<compile_context>
chip_gen: v7x
topology: tpu7x:2x2x1
jax: 0.10.0
libtpu: 0.0.40
codegen_flags: <defaults>
</compile_context>

<pallas_src>
import jax
import jax.numpy as jnp
import numpy as np
from jax.experimental import pallas as pl
from jax.experimental.pallas import tpu as pltpu


def _round_up(x: int, m: int) -> int:
    return (x + m - 1) // m * m


# ------------- fused conv1+pool -> conv2+pool kernel (one image per grid step) -------------


def _conv_stack_kernel(x_ref, w1_ref, b1_ref, w2_ref, b2_ref, o_ref):
    """x_ref:(1,2,16,128) bf16 row-parity-packed image; w1_ref:(5,128,1792) bf16;
    b1_ref:(1,896) f32; w2_ref:(5,896,256) bf16; b2_ref:(1,128) f32; o_ref:(1,9,128) bf16."""
    # ---- conv1 (5x5, 3->64) + bias + ReLU + 2x2 max-pool, output layout (p, oxp*64+co) ----
    pooled1 = None
    for r in range(2):                                     # parity of conv1 output row
        acc = jnp.zeros((14, 1792), jnp.float32)
        for ki in range(5):
            q, s = (r + ki) % 2, (r + ki) // 2             # image row 2p+r+ki lives at [q, s+p]
            acc = acc + jnp.dot(x_ref[0, q, s:s + 14, :], w1_ref[ki],
                                preferred_element_type=jnp.float32)
        accw = jnp.maximum(acc[:, :896], acc[:, 896:])     # pool over W (even/odd ox columns)
        pooled1 = accw if pooled1 is None else jnp.maximum(pooled1, accw)   # pool over H
    h1 = jnp.maximum(pooled1 + b1_ref[...], 0.0).astype(jnp.bfloat16)       # (14, 896)

    # ---- conv2 (5x5, 64->16) + bias + ReLU + 2x2 max-pool ----
    acc2 = jnp.zeros((10, 256), jnp.float32)
    for ki in range(5):
        acc2 = acc2 + jnp.dot(h1[ki:ki + 10, :], w2_ref[ki],
                              preferred_element_type=jnp.float32)
    m = jnp.maximum(acc2[:, :128], acc2[:, 128:])          # pool over W -> (10, 128)
    m = jnp.maximum(m[0:9, :], m[1:10, :])                 # pool over H (valid at even rows)
    o_ref[0] = jnp.maximum(m + b2_ref[...], 0.0).astype(o_ref.dtype)        # (9, 128)


def conv_stack(xp, w1t, b1row, w2t, b2row):
    n = xp.shape[0]
    flops = n * (10 * 2 * 14 * 128 * 1792 + 5 * 2 * 10 * 896 * 256)
    bytes_accessed = (int(xp.size) * 2 + int(w1t.size) * 2 + int(w2t.size) * 2
                      + int(b1row.size) * 4 + int(b2row.size) * 4 + n * 9 * 128 * 2)
    return pl.pallas_call(
        _conv_stack_kernel,
        out_shape=jax.ShapeDtypeStruct((n, 9, 128), jnp.bfloat16),
        grid=(n,),
        in_specs=[
            pl.BlockSpec((1, 2, 16, 128), lambda i: (i, 0, 0, 0)),
            pl.BlockSpec((5, 128, 1792), lambda i: (0, 0, 0)),
            pl.BlockSpec((1, 896), lambda i: (0, 0)),
            pl.BlockSpec((5, 896, 256), lambda i: (0, 0, 0)),
            pl.BlockSpec((1, 128), lambda i: (0, 0)),
        ],
        out_specs=pl.BlockSpec((1, 9, 128), lambda i: (i, 0, 0)),
        compiler_params=pltpu.CompilerParams(dimension_semantics=("parallel",)),
        cost_estimate=pl.CostEstimate(flops=int(flops), transcendentals=0,
                                      bytes_accessed=int(bytes_accessed)),
    )(xp, w1t, b1row, w2t, b2row)


# --------------------------- fused fc1 -> fc2 -> fc3 kernel -------------------------------


def _fc_stack_kernel(x_ref, w1_ref, b1_ref, w2_ref, b2_ref, w3_ref, b3_ref, o_ref):
    h = jnp.dot(x_ref[...], w1_ref[...], preferred_element_type=jnp.float32) + b1_ref[...]
    h = jnp.maximum(h, 0.0).astype(jnp.bfloat16)
    h = jnp.dot(h, w2_ref[...], preferred_element_type=jnp.float32) + b2_ref[...]
    h = jnp.maximum(h, 0.0).astype(jnp.bfloat16)
    h = jnp.dot(h, w3_ref[...], preferred_element_type=jnp.float32) + b3_ref[...]
    o_ref[...] = h.astype(o_ref.dtype)


def fc_stack(x, w1, b1, w2, b2, w3, b3):
    """x:(M,1152) bf16; all fc widths padded to 128; returns (M,128) f32 logits slab."""
    m, k = x.shape
    mpad = _round_up(m, 8)
    if mpad != m:
        x = jnp.pad(x, ((0, mpad - m), (0, 0)))
    # Row tile: <=512 rows/step and >=2 grid steps whenever possible (v7x two TensorCores).
    tm = mpad
    while tm % 16 == 0 and (tm > 512 or tm == mpad):
        tm //= 2

    flops = 2 * mpad * (k * 128 + 128 * 128 + 128 * 128)
    bytes_accessed = (mpad * k * 2 + int(w1.size) * 2 + int(w2.size) * 2
                      + int(w3.size) * 2 + 3 * 128 * 4 + mpad * 128 * 4)

    out = pl.pallas_call(
        _fc_stack_kernel,
        out_shape=jax.ShapeDtypeStruct((mpad, 128), jnp.float32),
        grid=(mpad // tm,),
        in_specs=[
            pl.BlockSpec((tm, k), lambda i: (i, 0)),
            pl.BlockSpec(w1.shape, lambda i: (0, 0)),
            pl.BlockSpec(b1.shape, lambda i: (0, 0)),
            pl.BlockSpec(w2.shape, lambda i: (0, 0)),
            pl.BlockSpec(b2.shape, lambda i: (0, 0)),
            pl.BlockSpec(w3.shape, lambda i: (0, 0)),
            pl.BlockSpec(b3.shape, lambda i: (0, 0)),
        ],
        out_specs=pl.BlockSpec((tm, 128), lambda i: (i, 0)),
        compiler_params=pltpu.CompilerParams(dimension_semantics=("parallel",)),
        cost_estimate=pl.CostEstimate(flops=int(flops), transcendentals=0,
                                      bytes_accessed=int(bytes_accessed)),
    )(x, w1, b1, w2, b2, w3, b3)
    return out[:m]


# ------------------------------------ TestNet ----------------------------------------------


def init_torch_params(seed=0):
    """Parameters in PyTorch layout (Conv2d: (Cout,Cin,kh,kw); Linear: (out,in))."""
    key = jax.random.PRNGKey(seed)
    ks = jax.random.split(key, 10)

    def w(k, shape, fan_in):
        return jax.random.normal(k, shape, jnp.float32) / jnp.sqrt(float(fan_in))

    return {
        "conv1_w": w(ks[0], (64, 3, 5, 5), 75), "conv1_b": w(ks[1], (64,), 75),
        "conv2_w": w(ks[2], (16, 64, 5, 5), 1600), "conv2_b": w(ks[3], (16,), 1600),
        "fc1_w": w(ks[4], (120, 400), 400), "fc1_b": w(ks[5], (120,), 400),
        "fc2_w": w(ks[6], (84, 120), 120), "fc2_b": w(ks[7], (84,), 120),
        "fc3_w": w(ks[8], (10, 84), 84), "fc3_b": w(ks[9], (10,), 84),
    }


def prepare_params(tp):
    """One-time conversion to kernel layout: Toeplitz-expanded conv weights with even/odd
    output columns split for pooling, biases tiled to the packed layouts, fc widths padded
    to 128, and the NCHW flatten permutation folded into fc1's weight."""
    w1 = np.asarray(tp["conv1_w"], np.float32)            # (64, 3, 5, 5)  (co, c, ki, kj)
    b1 = np.asarray(tp["conv1_b"], np.float32)
    w2 = np.asarray(tp["conv2_w"], np.float32)            # (16, 64, 5, 5)
    b2 = np.asarray(tp["conv2_b"], np.float32)

    # conv1 Toeplitz weight: rows = wx*3 + c (padded 96->128); cols [0:896]=even ox, [896:]=odd.
    w1t = np.zeros((5, 128, 1792), np.float32)
    for ki in range(5):
        for ox in range(28):
            col0 = (ox % 2) * 896 + (ox // 2) * 64
            for kj in range(5):
                wx = ox + kj
                w1t[ki, wx * 3:(wx + 1) * 3, col0:col0 + 64] = w1[:, :, ki, kj].T
    b1row = np.tile(b1, 14)[None, :]                       # (1, 896): col oxp*64+co -> b1[co]

    # conv2 Toeplitz weight: rows = oxp*64 + c2; cols [0:80]=even ox2, [128:208]=odd ox2.
    w2t = np.zeros((5, 896, 256), np.float32)
    for ki in range(5):
        for ox in range(10):
            col0 = (ox % 2) * 128 + (ox // 2) * 16
            for kj in range(5):
                xp_ = ox + kj
                w2t[ki, xp_ * 64:(xp_ + 1) * 64, col0:col0 + 16] = w2[:, :, ki, kj].T
    b2row = np.zeros((1, 128), np.float32)
    b2row[0, :80] = np.tile(b2, 5)

    # fc1: consumes the flattened (9,128) conv-kernel output: g = (2*y)*128 + x*16 + c.
    fw1 = np.asarray(tp["fc1_w"], np.float32)              # (120, 400), torch f = c*25 + y*5 + x
    w1p = np.zeros((9 * 128, 128), np.float32)
    for c in range(16):
        for y in range(5):
            for x in range(5):
                w1p[(2 * y) * 128 + x * 16 + c, :120] = fw1[:, c * 25 + y * 5 + x]
    b1p = np.zeros((1, 128), np.float32); b1p[0, :120] = np.asarray(tp["fc1_b"])
    w2p = np.zeros((128, 128), np.float32); w2p[:120, :84] = np.asarray(tp["fc2_w"]).T
    b2p = np.zeros((1, 128), np.float32); b2p[0, :84] = np.asarray(tp["fc2_b"])
    w3p = np.zeros((128, 128), np.float32); w3p[:84, :10] = np.asarray(tp["fc3_w"]).T
    b3p = np.zeros((1, 128), np.float32); b3p[0, :10] = np.asarray(tp["fc3_b"])

    return {
        "w1t": jnp.asarray(w1t, jnp.bfloat16), "b1row": jnp.asarray(b1row, jnp.float32),
        "w2t": jnp.asarray(w2t, jnp.bfloat16), "b2row": jnp.asarray(b2row, jnp.float32),
        "fc1_w": jnp.asarray(w1p, jnp.bfloat16), "fc1_b": jnp.asarray(b1p, jnp.float32),
        "fc2_w": jnp.asarray(w2p, jnp.bfloat16), "fc2_b": jnp.asarray(b2p, jnp.float32),
        "fc3_w": jnp.asarray(w3p, jnp.bfloat16), "fc3_b": jnp.asarray(b3p, jnp.float32),
    }


@jax.jit
def testnet_forward(params, x_nchw):
    n = x_nchw.shape[0]
    # Host-side packing: NCHW -> NHWC -> (N, 2, 16, 128): [n, row%2, row//2, wx*3+c] (pad 96->128).
    x = jnp.transpose(x_nchw, (0, 2, 3, 1)).reshape(n, 16, 2, 96)
    x = jnp.pad(x, ((0, 0), (0, 0), (0, 0), (0, 32)))
    xp = jnp.transpose(x, (0, 2, 1, 3)).astype(jnp.bfloat16)              # (N, 2, 16, 128)

    h = conv_stack(xp, params["w1t"], params["b1row"],
                   params["w2t"], params["b2row"])                        # (N, 9, 128) bf16
    h = h.reshape(n, 9 * 128)                                             # free HBM reshape
    out = fc_stack(h, params["fc1_w"], params["fc1_b"],
                   params["fc2_w"], params["fc2_b"],
                   params["fc3_w"], params["fc3_b"])                      # (N, 128) f32
    return out[:, :10]


def testnet_reference(tp, x_nchw):
    """Pure-JAX f32 reference mirroring the PyTorch module exactly."""
    x = x_nchw.astype(jnp.float32)

    def conv(z, w, b):
        y = jax.lax.conv_general_dilated(
            z, w, window_strides=(1, 1), padding="VALID",
            dimension_numbers=("NCHW", "OIHW", "NCHW"))
        return jax.nn.relu(y + b[None, :, None, None])

    def pool(z):
        return jax.lax.reduce_window(z, -jnp.inf, jax.lax.max,
                                     (1, 1, 2, 2), (1, 1, 2, 2), "VALID")

    h = pool(conv(x, tp["conv1_w"], tp["conv1_b"]))
    h = pool(conv(h, tp["conv2_w"], tp["conv2_b"]))
    h = h.reshape(h.shape[0], -1)                          # NCHW flatten == torch .view
    h = jax.nn.relu(h @ tp["fc1_w"].T + tp["fc1_b"])
    h = jax.nn.relu(h @ tp["fc2_w"].T + tp["fc2_b"])
    return h @ tp["fc3_w"].T + tp["fc3_b"]


if __name__ == "__main__":
    torch_params = init_torch_params(seed=0)
    params = prepare_params(torch_params)
    # Input must be 32x32 spatial so the flatten yields 16*5*5 = 400 features.
    x = jax.random.normal(jax.random.PRNGKey(0), (2, 3, 32, 32), jnp.float32)

    out = testnet_forward(params, x)
    jax.block_until_ready(out)
    assert out.shape == (2, 10) and out.dtype == jnp.float32

    ref = testnet_reference(torch_params, x)
    # bf16 MXU operands with f32 accumulation -> small deviation from the f32 reference.
    np.testing.assert_allclose(np.asarray(out), np.asarray(ref), rtol=0.2, atol=0.2)
    print("KERNEL_OK")
</pallas_src>

<mosaic_0001>
module attributes {stable_mosaic.version = 11 : i64} {
  func.func @_conv_stack_kernel(%arg0: i32, %arg1: memref<1x2x16x128xbf16, #tpu.memory_space<vmem>>, %arg2: memref<5x128x1792xbf16, #tpu.memory_space<vmem>>, %arg3: memref<1x896xf32, #tpu.memory_space<vmem>>, %arg4: memref<5x896x256xbf16, #tpu.memory_space<vmem>>, %arg5: memref<1x128xf32, #tpu.memory_space<vmem>>, %arg6: memref<1x9x128xbf16, #tpu.memory_space<vmem>>) attributes {dimension_semantics = [#tpu.dimension_semantics<parallel>], iteration_bounds = array<i64: 2>, scalar_prefetch = 0 : i64, scratch_operands = 0 : i64, tpu.core_type = #tpu.core_type<tc>, window_params = [{transform_indices = @transform_0, window_bounds = array<i64: 1, 2, 16, 128>}, {pipeline_mode = #tpu.pipeline_mode<synchronous>, transform_indices = @transform_1, window_bounds = array<i64: 5, 128, 1792>}, {pipeline_mode = #tpu.pipeline_mode<synchronous>, transform_indices = @transform_2, window_bounds = array<i64: 1, 896>}, {pipeline_mode = #tpu.pipeline_mode<synchronous>, transform_indices = @transform_3, window_bounds = array<i64: 5, 896, 256>}, {pipeline_mode = #tpu.pipeline_mode<synchronous>, transform_indices = @transform_4, window_bounds = array<i64: 1, 128>}, {transform_indices = @transform_5, window_bounds = array<i64: 1, 9, 128>}]} {
    %cst = arith.constant 0.000000e+00 : f32
    %0 = vector.broadcast %cst : f32 to vector<14x1792xf32>
    %c0 = arith.constant 0 : index
    %c0_0 = arith.constant 0 : index
    %c0_1 = arith.constant 0 : index
    %c0_2 = arith.constant 0 : index
    %1 = vector.load %arg1[%c0, %c0_0, %c0_1, %c0_2] : memref<1x2x16x128xbf16, #tpu.memory_space<vmem>>, vector<1x1x14x128xbf16>
    %2 = vector.shape_cast %1 : vector<1x1x14x128xbf16> to vector<14x128xbf16>
    %c0_3 = arith.constant 0 : index
    %c0_4 = arith.constant 0 : index
    %c0_5 = arith.constant 0 : index
    %3 = vector.load %arg2[%c0_3, %c0_4, %c0_5] : memref<5x128x1792xbf16, #tpu.memory_space<vmem>>, vector<1x128x1792xbf16>
    %4 = vector.shape_cast %3 : vector<1x128x1792xbf16> to vector<128x1792xbf16>
    %cst_6 = arith.constant dense<0.000000e+00> : vector<14x1792xf32>
    %5 = tpu.matmul %2, %4, %cst_6 {dimension_numbers = #tpu.dot_dimension_numbers<[1], [0], [0], [1], [0, 0, 1, 1], [], []>} : vector<14x128xbf16>, vector<128x1792xbf16>, vector<14x1792xf32> -> vector<14x1792xf32>
    %6 = arith.addf %0, %5 : vector<14x1792xf32>
    %c0_7 = arith.constant 0 : index
    %c1 = arith.constant 1 : index
    %c0_8 = arith.constant 0 : index
    %c0_9 = arith.constant 0 : index
    %7 = vector.load %arg1[%c0_7, %c1, %c0_8, %c0_9] : memref<1x2x16x128xbf16, #tpu.memory_space<vmem>>, vector<1x1x14x128xbf16>
    %8 = vector.shape_cast %7 : vector<1x1x14x128xbf16> to vector<14x128xbf16>
    %c1_10 = arith.constant 1 : index
    %c0_11 = arith.constant 0 : index
    %c0_12 = arith.constant 0 : index
    %9 = vector.load %arg2[%c1_10, %c0_11, %c0_12] : memref<5x128x1792xbf16, #tpu.memory_space<vmem>>, vector<1x128x1792xbf16>
    %10 = vector.shape_cast %9 : vector<1x128x1792xbf16> to vector<128x1792xbf16>
    %cst_13 = arith.constant dense<0.000000e+00> : vector<14x1792xf32>
    %11 = tpu.matmul %8, %10, %cst_13 {dimension_numbers = #tpu.dot_dimension_numbers<[1], [0], [0], [1], [0, 0, 1, 1], [], []>} : vector<14x128xbf16>, vector<128x1792xbf16>, vector<14x1792xf32> -> vector<14x1792xf32>
    %12 = arith.addf %6, %11 : vector<14x1792xf32>
    %c0_14 = arith.constant 0 : index
    %c0_15 = arith.constant 0 : index
    %c1_16 = arith.constant 1 : index
    %c0_17 = arith.constant 0 : index
    %13 = vector.load %arg1[%c0_14, %c0_15, %c1_16, %c0_17] : memref<1x2x16x128xbf16, #tpu.memory_space<vmem>>, vector<1x1x14x128xbf16>
    %14 = vector.shape_cast %13 : vector<1x1x14x128xbf16> to vector<14x128xbf16>
    %c2 = arith.constant 2 : index
    %c0_18 = arith.constant 0 : index
    %c0_19 = arith.constant 0 : index
    %15 = vector.load %arg2[%c2, %c0_18, %c0_19] : memref<5x128x1792xbf16, #tpu.memory_space<vmem>>, vector<1x128x1792xbf16>
    %16 = vector.shape_cast %15 : vector<1x128x1792xbf16> to vector<128x1792xbf16>
    %cst_20 = arith.constant dense<0.000000e+00> : vector<14x1792xf32>
    %17 = tpu.matmul %14, %16, %cst_20 {dimension_numbers = #tpu.dot_dimension_numbers<[1], [0], [0], [1], [0, 0, 1, 1], [], []>} : vector<14x128xbf16>, vector<128x1792xbf16>, vector<14x1792xf32> -> vector<14x1792xf32>
    %18 = arith.addf %12, %17 : vector<14x1792xf32>
    %c0_21 = arith.constant 0 : index
    %c1_22 = arith.constant 1 : index
    %c1_23 = arith.constant 1 : index
    %c0_24 = arith.constant 0 : index
    %19 = vector.load %arg1[%c0_21, %c1_22, %c1_23, %c0_24] : memref<1x2x16x128xbf16, #tpu.memory_space<vmem>>, vector<1x1x14x128xbf16>
    %20 = vector.shape_cast %19 : vector<1x1x14x128xbf16> to vector<14x128xbf16>
    %c3 = arith.constant 3 : index
    %c0_25 = arith.constant 0 : index
    %c0_26 = arith.constant 0 : index
    %21 = vector.load %arg2[%c3, %c0_25, %c0_26] : memref<5x128x1792xbf16, #tpu.memory_space<vmem>>, vector<1x128x1792xbf16>
    %22 = vector.shape_cast %21 : vector<1x128x1792xbf16> to vector<128x1792xbf16>
    %cst_27 = arith.constant dense<0.000000e+00> : vector<14x1792xf32>
    %23 = tpu.matmul %20, %22, %cst_27 {dimension_numbers = #tpu.dot_dimension_numbers<[1], [0], [0], [1], [0, 0, 1, 1], [], []>} : vector<14x128xbf16>, vector<128x1792xbf16>, vector<14x1792xf32> -> vector<14x1792xf32>
    %24 = arith.addf %18, %23 : vector<14x1792xf32>
    %c0_28 = arith.constant 0 : index
    %c0_29 = arith.constant 0 : index
    %c2_30 = arith.constant 2 : index
    %c0_31 = arith.constant 0 : index
    %25 = vector.load %arg1[%c0_28, %c0_29, %c2_30, %c0_31] : memref<1x2x16x128xbf16, #tpu.memory_space<vmem>>, vector<1x1x14x128xbf16>
    %26 = vector.shape_cast %25 : vector<1x1x14x128xbf16> to vector<14x128xbf16>
    %c4 = arith.constant 4 : index
    %c0_32 = arith.constant 0 : index
    %c0_33 = arith.constant 0 : index
    %27 = vector.load %arg2[%c4, %c0_32, %c0_33] : memref<5x128x1792xbf16, #tpu.memory_space<vmem>>, vector<1x128x1792xbf16>
    %28 = vector.shape_cast %27 : vector<1x128x1792xbf16> to vector<128x1792xbf16>
    %cst_34 = arith.constant dense<0.000000e+00> : vector<14x1792xf32>
    %29 = tpu.matmul %26, %28, %cst_34 {dimension_numbers = #tpu.dot_dimension_numbers<[1], [0], [0], [1], [0, 0, 1, 1], [], []>} : vector<14x128xbf16>, vector<128x1792xbf16>, vector<14x1792xf32> -> vector<14x1792xf32>
    %30 = arith.addf %24, %29 : vector<14x1792xf32>
    %31 = vector.extract_strided_slice %30 {offsets = [0, 0], sizes = [14, 896], strides = [1, 1]} : vector<14x1792xf32> to vector<14x896xf32>
    %32 = vector.extract_strided_slice %30 {offsets = [0, 896], sizes = [14, 896], strides = [1, 1]} : vector<14x1792xf32> to vector<14x896xf32>
    %33 = arith.maximumf %31, %32 : vector<14x896xf32>
    %cst_35 = arith.constant 0.000000e+00 : f32
    %34 = vector.broadcast %cst_35 : f32 to vector<14x1792xf32>
    %c0_36 = arith.constant 0 : index
    %c1_37 = arith.constant 1 : index
    %c0_38 = arith.constant 0 : index
    %c0_39 = arith.constant 0 : index
    %35 = vector.load %arg1[%c0_36, %c1_37, %c0_38, %c0_39] : memref<1x2x16x128xbf16, #tpu.memory_space<vmem>>, vector<1x1x14x128xbf16>
    %36 = vector.shape_cast %35 : vector<1x1x14x128xbf16> to vector<14x128xbf16>
    %c0_40 = arith.constant 0 : index
    %c0_41 = arith.constant 0 : index
    %c0_42 = arith.constant 0 : index
    %37 = vector.load %arg2[%c0_40, %c0_41, %c0_42] : memref<5x128x1792xbf16, #tpu.memory_space<vmem>>, vector<1x128x1792xbf16>
    %38 = vector.shape_cast %37 : vector<1x128x1792xbf16> to vector<128x1792xbf16>
    %cst_43 = arith.constant dense<0.000000e+00> : vector<14x1792xf32>
    %39 = tpu.matmul %36, %38, %cst_43 {dimension_numbers = #tpu.dot_dimension_numbers<[1], [0], [0], [1], [0, 0, 1, 1], [], []>} : vector<14x128xbf16>, vector<128x1792xbf16>, vector<14x1792xf32> -> vector<14x1792xf32>
    %40 = arith.addf %34, %39 : vector<14x1792xf32>
    %c0_44 = arith.constant 0 : index
    %c0_45 = arith.constant 0 : index
    %c1_46 = arith.constant 1 : index
    %c0_47 = arith.constant 0 : index
    %41 = vector.load %arg1[%c0_44, %c0_45, %c1_46, %c0_47] : memref<1x2x16x128xbf16, #tpu.memory_space<vmem>>, vector<1x1x14x128xbf16>
    %42 = vector.shape_cast %41 : vector<1x1x14x128xbf16> to vector<14x128xbf16>
    %c1_48 = arith.constant 1 : index
    %c0_49 = arith.constant 0 : index
    %c0_50 = arith.constant 0 : index
    %43 = vector.load %arg2[%c1_48, %c0_49, %c0_50] : memref<5x128x1792xbf16, #tpu.memory_space<vmem>>, vector<1x128x1792xbf16>
    %44 = vector.shape_cast %43 : vector<1x128x1792xbf16> to vector<128x1792xbf16>
    %cst_51 = arith.constant dense<0.000000e+00> : vector<14x1792xf32>
    %45 = tpu.matmul %42, %44, %cst_51 {dimension_numbers = #tpu.dot_dimension_numbers<[1], [0], [0], [1], [0, 0, 1, 1], [], []>} : vector<14x128xbf16>, vector<128x1792xbf16>, vector<14x1792xf32> -> vector<14x1792xf32>
    %46 = arith.addf %40, %45 : vector<14x1792xf32>
    %c0_52 = arith.constant 0 : index
    %c1_53 = arith.constant 1 : index
    %c1_54 = arith.constant 1 : index
    %c0_55 = arith.constant 0 : index
    %47 = vector.load %arg1[%c0_52, %c1_53, %c1_54, %c0_55] : memref<1x2x16x128xbf16, #tpu.memory_space<vmem>>, vector<1x1x14x128xbf16>
    %48 = vector.shape_cast %47 : vector<1x1x14x128xbf16> to vector<14x128xbf16>
    %c2_56 = arith.constant 2 : index
    %c0_57 = arith.constant 0 : index
    %c0_58 = arith.constant 0 : index
    %49 = vector.load %arg2[%c2_56, %c0_57, %c0_58] : memref<5x128x1792xbf16, #tpu.memory_space<vmem>>, vector<1x128x1792xbf16>
    %50 = vector.shape_cast %49 : vector<1x128x1792xbf16> to vector<128x1792xbf16>
    %cst_59 = arith.constant dense<0.000000e+00> : vector<14x1792xf32>
    %51 = tpu.matmul %48, %50, %cst_59 {dimension_numbers = #tpu.dot_dimension_numbers<[1], [0], [0], [1], [0, 0, 1, 1], [], []>} : vector<14x128xbf16>, vector<128x1792xbf16>, vector<14x1792xf32> -> vector<14x1792xf32>
    %52 = arith.addf %46, %51 : vector<14x1792xf32>
    %c0_60 = arith.constant 0 : index
    %c0_61 = arith.constant 0 : index
    %c2_62 = arith.constant 2 : index
    %c0_63 = arith.constant 0 : index
    %53 = vector.load %arg1[%c0_60, %c0_61, %c2_62, %c0_63] : memref<1x2x16x128xbf16, #tpu.memory_space<vmem>>, vector<1x1x14x128xbf16>
    %54 = vector.shape_cast %53 : vector<1x1x14x128xbf16> to vector<14x128xbf16>
    %c3_64 = arith.constant 3 : index
    %c0_65 = arith.constant 0 : index
    %c0_66 = arith.constant 0 : index
    %55 = vector.load %arg2[%c3_64, %c0_65, %c0_66] : memref<5x128x1792xbf16, #tpu.memory_space<vmem>>, vector<1x128x1792xbf16>
    %56 = vector.shape_cast %55 : vector<1x128x1792xbf16> to vector<128x1792xbf16>
    %cst_67 = arith.constant dense<0.000000e+00> : vector<14x1792xf32>
    %57 = tpu.matmul %54, %56, %cst_67 {dimension_numbers = #tpu.dot_dimension_numbers<[1], [0], [0], [1], [0, 0, 1, 1], [], []>} : vector<14x128xbf16>, vector<128x1792xbf16>, vector<14x1792xf32> -> vector<14x1792xf32>
    %58 = arith.addf %52, %57 : vector<14x1792xf32>
    %c0_68 = arith.constant 0 : index
    %c1_69 = arith.constant 1 : index
    %c2_70 = arith.constant 2 : index
    %c0_71 = arith.constant 0 : index
    %59 = vector.load %arg1[%c0_68, %c1_69, %c2_70, %c0_71] : memref<1x2x16x128xbf16, #tpu.memory_space<vmem>>, vector<1x1x14x128xbf16>
    %60 = vector.shape_cast %59 : vector<1x1x14x128xbf16> to vector<14x128xbf16>
    %c4_72 = arith.constant 4 : index
    %c0_73 = arith.constant 0 : index
    %c0_74 = arith.constant 0 : index
    %61 = vector.load %arg2[%c4_72, %c0_73, %c0_74] : memref<5x128x1792xbf16, #tpu.memory_space<vmem>>, vector<1x128x1792xbf16>
    %62 = vector.shape_cast %61 : vector<1x128x1792xbf16> to vector<128x1792xbf16>
    %cst_75 = arith.constant dense<0.000000e+00> : vector<14x1792xf32>
    %63 = tpu.matmul %60, %62, %cst_75 {dimension_numbers = #tpu.dot_dimension_numbers<[1], [0], [0], [1], [0, 0, 1, 1], [], []>} : vector<14x128xbf16>, vector<128x1792xbf16>, vector<14x1792xf32> -> vector<14x1792xf32>
    %64 = arith.addf %58, %63 : vector<14x1792xf32>
    %65 = vector.extract_strided_slice %64 {offsets = [0, 0], sizes = [14, 896], strides = [1, 1]} : vector<14x1792xf32> to vector<14x896xf32>
    %66 = vector.extract_strided_slice %64 {offsets = [0, 896], sizes = [14, 896], strides = [1, 1]} : vector<14x1792xf32> to vector<14x896xf32>
    %67 = arith.maximumf %65, %66 : vector<14x896xf32>
    %68 = arith.maximumf %33, %67 : vector<14x896xf32>
    %c0_76 = arith.constant 0 : index
    %c0_77 = arith.constant 0 : index
    %69 = vector.load %arg3[%c0_76, %c0_77] : memref<1x896xf32, #tpu.memory_space<vmem>>, vector<1x896xf32>
    %70 = vector.broadcast %69 : vector<1x896xf32> to vector<14x896xf32>
    %71 = arith.addf %68, %70 : vector<14x896xf32>
    %cst_78 = arith.constant 0.000000e+00 : f32
    %72 = vector.broadcast %cst_78 : f32 to vector<14x896xf32>
    %73 = arith.maximumf %71, %72 : vector<14x896xf32>
    %74 = arith.truncf %73 : vector<14x896xf32> to vector<14x896xbf16>
    %cst_79 = arith.constant 0.000000e+00 : f32
    %75 = vector.broadcast %cst_79 : f32 to vector<10x256xf32>
    %76 = vector.extract_strided_slice %74 {offsets = [0, 0], sizes = [10, 896], strides = [1, 1]} : vector<14x896xbf16> to vector<10x896xbf16>
    %c0_80 = arith.constant 0 : index
    %c0_81 = arith.constant 0 : index
    %c0_82 = arith.constant 0 : index
    %77 = vector.load %arg4[%c0_80, %c0_81, %c0_82] : memref<5x896x256xbf16, #tpu.memory_space<vmem>>, vector<1x896x256xbf16>
    %78 = vector.shape_cast %77 : vector<1x896x256xbf16> to vector<896x256xbf16>
    %cst_83 = arith.constant dense<0.000000e+00> : vector<10x256xf32>
    %79 = tpu.matmul %76, %78, %cst_83 {dimension_numbers = #tpu.dot_dimension_numbers<[1], [0], [0], [1], [0, 0, 1, 1], [], []>} : vector<10x896xbf16>, vector<896x256xbf16>, vector<10x256xf32> -> vector<10x256xf32>
    %80 = arith.addf %75, %79 : vector<10x256xf32>
    %81 = vector.extract_strided_slice %74 {offsets = [1, 0], sizes = [10, 896], strides = [1, 1]} : vector<14x896xbf16> to vector<10x896xbf16>
    %c1_84 = arith.constant 1 : index
    %c0_85 = arith.constant 0 : index
    %c0_86 = arith.constant 0 : index
    %82 = vector.load %arg4[%c1_84, %c0_85, %c0_86] : memref<5x896x256xbf16, #tpu.memory_space<vmem>>, vector<1x896x256xbf16>
    %83 = vector.shape_cast %82 : vector<1x896x256xbf16> to vector<896x256xbf16>
    %cst_87 = arith.constant dense<0.000000e+00> : vector<10x256xf32>
    %84 = tpu.matmul %81, %83, %cst_87 {dimension_numbers = #tpu.dot_dimension_numbers<[1], [0], [0], [1], [0, 0, 1, 1], [], []>} : vector<10x896xbf16>, vector<896x256xbf16>, vector<10x256xf32> -> vector<10x256xf32>
    %85 = arith.addf %80, %84 : vector<10x256xf32>
    %86 = vector.extract_strided_slice %74 {offsets = [2, 0], sizes = [10, 896], strides = [1, 1]} : vector<14x896xbf16> to vector<10x896xbf16>
    %c2_88 = arith.constant 2 : index
    %c0_89 = arith.constant 0 : index
    %c0_90 = arith.constant 0 : index
    %87 = vector.load %arg4[%c2_88, %c0_89, %c0_90] : memref<5x896x256xbf16, #tpu.memory_space<vmem>>, vector<1x896x256xbf16>
    %88 = vector.shape_cast %87 : vector<1x896x256xbf16> to vector<896x256xbf16>
    %cst_91 = arith.constant dense<0.000000e+00> : vector<10x256xf32>
    %89 = tpu.matmul %86, %88, %cst_91 {dimension_numbers = #tpu.dot_dimension_numbers<[1], [0], [0], [1], [0, 0, 1, 1], [], []>} : vector<10x896xbf16>, vector<896x256xbf16>, vector<10x256xf32> -> vector<10x256xf32>
    %90 = arith.addf %85, %89 : vector<10x256xf32>
    %91 = vector.extract_strided_slice %74 {offsets = [3, 0], sizes = [10, 896], strides = [1, 1]} : vector<14x896xbf16> to vector<10x896xbf16>
    %c3_92 = arith.constant 3 : index
    %c0_93 = arith.constant 0 : index
    %c0_94 = arith.constant 0 : index
    %92 = vector.load %arg4[%c3_92, %c0_93, %c0_94] : memref<5x896x256xbf16, #tpu.memory_space<vmem>>, vector<1x896x256xbf16>
    %93 = vector.shape_cast %92 : vector<1x896x256xbf16> to vector<896x256xbf16>
    %cst_95 = arith.constant dense<0.000000e+00> : vector<10x256xf32>
    %94 = tpu.matmul %91, %93, %cst_95 {dimension_numbers = #tpu.dot_dimension_numbers<[1], [0], [0], [1], [0, 0, 1, 1], [], []>} : vector<10x896xbf16>, vector<896x256xbf16>, vector<10x256xf32> -> vector<10x256xf32>
    %95 = arith.addf %90, %94 : vector<10x256xf32>
    %96 = vector.extract_strided_slice %74 {offsets = [4, 0], sizes = [10, 896], strides = [1, 1]} : vector<14x896xbf16> to vector<10x896xbf16>
    %c4_96 = arith.constant 4 : index
    %c0_97 = arith.constant 0 : index
    %c0_98 = arith.constant 0 : index
    %97 = vector.load %arg4[%c4_96, %c0_97, %c0_98] : memref<5x896x256xbf16, #tpu.memory_space<vmem>>, vector<1x896x256xbf16>
    %98 = vector.shape_cast %97 : vector<1x896x256xbf16> to vector<896x256xbf16>
    %cst_99 = arith.constant dense<0.000000e+00> : vector<10x256xf32>
    %99 = tpu.matmul %96, %98, %cst_99 {dimension_numbers = #tpu.dot_dimension_numbers<[1], [0], [0], [1], [0, 0, 1, 1], [], []>} : vector<10x896xbf16>, vector<896x256xbf16>, vector<10x256xf32> -> vector<10x256xf32>
    %100 = arith.addf %95, %99 : vector<10x256xf32>
    %101 = vector.extract_strided_slice %100 {offsets = [0, 0], sizes = [10, 128], strides = [1, 1]} : vector<10x256xf32> to vector<10x128xf32>
    %102 = vector.extract_strided_slice %100 {offsets = [0, 128], sizes = [10, 128], strides = [1, 1]} : vector<10x256xf32> to vector<10x128xf32>
    %103 = arith.maximumf %101, %102 : vector<10x128xf32>
    %104 = vector.extract_strided_slice %103 {offsets = [0, 0], sizes = [9, 128], strides = [1, 1]} : vector<10x128xf32> to vector<9x128xf32>
    %105 = vector.extract_strided_slice %103 {offsets = [1, 0], sizes = [9, 128], strides = [1, 1]} : vector<10x128xf32> to vector<9x128xf32>
    %106 = arith.maximumf %104, %105 : vector<9x128xf32>
    %c0_100 = arith.constant 0 : index
    %c0_101 = arith.constant 0 : index
    %107 = vector.load %arg5[%c0_100, %c0_101] : memref<1x128xf32, #tpu.memory_space<vmem>>, vector<1x128xf32>
    %108 = vector.broadcast %107 : vector<1x128xf32> to vector<9x128xf32>
    %109 = arith.addf %106, %108 : vector<9x128xf32>
    %cst_102 = arith.constant 0.000000e+00 : f32
    %110 = vector.broadcast %cst_102 : f32 to vector<9x128xf32>
    %111 = arith.maximumf %109, %110 : vector<9x128xf32>
    %112 = arith.truncf %111 : vector<9x128xf32> to vector<9x128xbf16>
    %c0_103 = arith.constant 0 : index
    %c0_104 = arith.constant 0 : index
    %c0_105 = arith.constant 0 : index
    %113 = vector.load %arg6[%c0_103, %c0_104, %c0_105] : memref<1x9x128xbf16, #tpu.memory_space<vmem>>, vector<1x9x128xbf16>
    %114 = vector.shape_cast %113 : vector<1x9x128xbf16> to vector<9x128xbf16>
    %115 = vector.shape_cast %112 : vector<9x128xbf16> to vector<1x9x128xbf16>
    tpu.vector_store %arg6[%c0_103, %c0_104, %c0_105], %115 {strides = array<i32>} : memref<1x9x128xbf16, #tpu.memory_space<vmem>>, vector<1x9x128xbf16>,
    return
  }
  func.func @transform_0(%arg0: i32) -> (i32, i32, i32, i32) {
    %c0_i32 = arith.constant 0 : i32
    %c0_i32_0 = arith.constant 0 : i32
    %c0_i32_1 = arith.constant 0 : i32
    %c0_i32_2 = arith.constant 0 : i32
    return %arg0, %c0_i32, %c0_i32_0, %c0_i32_1 : i32, i32, i32, i32
  }
  func.func @transform_1(%arg0: i32) -> (i32, i32, i32) {
    %c0_i32 = arith.constant 0 : i32
    %c0_i32_0 = arith.constant 0 : i32
    %c0_i32_1 = arith.constant 0 : i32
    %c0_i32_2 = arith.constant 0 : i32
    return %c0_i32, %c0_i32_0, %c0_i32_1 : i32, i32, i32
  }
  func.func @transform_2(%arg0: i32) -> (i32, i32) {
    %c0_i32 = arith.constant 0 : i32
    %c0_i32_0 = arith.constant 0 : i32
    %c0_i32_1 = arith.constant 0 : i32
    return %c0_i32, %c0_i32_0 : i32, i32
  }
  func.func @transform_3(%arg0: i32) -> (i32, i32, i32) {
    %c0_i32 = arith.constant 0 : i32
    %c0_i32_0 = arith.constant 0 : i32
    %c0_i32_1 = arith.constant 0 : i32
    %c0_i32_2 = arith.constant 0 : i32
    return %c0_i32, %c0_i32_0, %c0_i32_1 : i32, i32, i32
  }
  func.func @transform_4(%arg0: i32) -> (i32, i32) {
    %c0_i32 = arith.constant 0 : i32
    %c0_i32_0 = arith.constant 0 : i32
    %c0_i32_1 = arith.constant 0 : i32
    return %c0_i32, %c0_i32_0 : i32, i32
  }
  func.func @transform_5(%arg0: i32) -> (i32, i32, i32) {
    %c0_i32 = arith.constant 0 : i32
    %c0_i32_0 = arith.constant 0 : i32
    %c0_i32_1 = arith.constant 0 : i32
    return %arg0, %c0_i32, %c0_i32_0 : i32, i32, i32
  }
}

module attributes {stable_mosaic.version = 11 : i64} {
  func.func @_fc_stack_kernel(%arg0: i32, %arg1: memref<8x1152xbf16, #tpu.memory_space<vmem>>, %arg2: memref<1152x128xbf16, #tpu.memory_space<vmem>>, %arg3: memref<1x128xf32, #tpu.memory_space<vmem>>, %arg4: memref<128x128xbf16, #tpu.memory_space<vmem>>, %arg5: memref<1x128xf32, #tpu.memory_space<vmem>>, %arg6: memref<128x128xbf16, #tpu.memory_space<vmem>>, %arg7: memref<1x128xf32, #tpu.memory_space<vmem>>, %arg8: memref<8x128xf32, #tpu.memory_space<vmem>>) attributes {dimension_semantics = [#tpu.dimension_semantics<parallel>], iteration_bounds = array<i64: 1>, scalar_prefetch = 0 : i64, scratch_operands = 0 : i64, tpu.core_type = #tpu.core_type<tc>, window_params = [{transform_indices = @transform_0, window_bounds = array<i64: 8, 1152>}, {pipeline_mode = #tpu.pipeline_mode<synchronous>, transform_indices = @transform_1, window_bounds = array<i64: 1152, 128>}, {pipeline_mode = #tpu.pipeline_mode<synchronous>, transform_indices = @transform_2, window_bounds = array<i64: 1, 128>}, {pipeline_mode = #tpu.pipeline_mode<synchronous>, transform_indices = @transform_3, window_bounds = array<i64: 128, 128>}, {pipeline_mode = #tpu.pipeline_mode<synchronous>, transform_indices = @transform_4, window_bounds = array<i64: 1, 128>}, {pipeline_mode = #tpu.pipeline_mode<synchronous>, transform_indices = @transform_5, window_bounds = array<i64: 128, 128>}, {pipeline_mode = #tpu.pipeline_mode<synchronous>, transform_indices = @transform_6, window_bounds = array<i64: 1, 128>}, {transform_indices = @transform_7, window_bounds = array<i64: 8, 128>}]} {
    %c0 = arith.constant 0 : index
    %c0_0 = arith.constant 0 : index
    %0 = vector.load %arg1[%c0, %c0_0] : memref<8x1152xbf16, #tpu.memory_space<vmem>>, vector<8x1152xbf16>
    %c0_1 = arith.constant 0 : index
    %c0_2 = arith.constant 0 : index
    %1 = vector.load %arg2[%c0_1, %c0_2] : memref<1152x128xbf16, #tpu.memory_space<vmem>>, vector<1152x128xbf16>
    %cst = arith.constant dense<0.000000e+00> : vector<8x128xf32>
    %2 = tpu.matmul %0, %1, %cst {dimension_numbers = #tpu.dot_dimension_numbers<[1], [0], [0], [1], [0, 0, 1, 1], [], []>} : vector<8x1152xbf16>, vector<1152x128xbf16>, vector<8x128xf32> -> vector<8x128xf32>
    %c0_3 = arith.constant 0 : index
    %c0_4 = arith.constant 0 : index
    %3 = vector.load %arg3[%c0_3, %c0_4] : memref<1x128xf32, #tpu.memory_space<vmem>>, vector<1x128xf32>
    %4 = vector.broadcast %3 : vector<1x128xf32> to vector<8x128xf32>
    %5 = arith.addf %2, %4 : vector<8x128xf32>
    %cst_5 = arith.constant 0.000000e+00 : f32
    %6 = vector.broadcast %cst_5 : f32 to vector<8x128xf32>
    %7 = arith.maximumf %5, %6 : vector<8x128xf32>
    %8 = arith.truncf %7 : vector<8x128xf32> to vector<8x128xbf16>
    %c0_6 = arith.constant 0 : index
    %c0_7 = arith.constant 0 : index
    %9 = vector.load %arg4[%c0_6, %c0_7] : memref<128x128xbf16, #tpu.memory_space<vmem>>, vector<128x128xbf16>
    %cst_8 = arith.constant dense<0.000000e+00> : vector<8x128xf32>
    %10 = tpu.matmul %8, %9, %cst_8 {dimension_numbers = #tpu.dot_dimension_numbers<[1], [0], [0], [1], [0, 0, 1, 1], [], []>} : vector<8x128xbf16>, vector<128x128xbf16>, vector<8x128xf32> -> vector<8x128xf32>
    %c0_9 = arith.constant 0 : index
    %c0_10 = arith.constant 0 : index
    %11 = vector.load %arg5[%c0_9, %c0_10] : memref<1x128xf32, #tpu.memory_space<vmem>>, vector<1x128xf32>
    %12 = vector.broadcast %11 : vector<1x128xf32> to vector<8x128xf32>
    %13 = arith.addf %10, %12 : vector<8x128xf32>
    %cst_11 = arith.constant 0.000000e+00 : f32
    %14 = vector.broadcast %cst_11 : f32 to vector<8x128xf32>
    %15 = arith.maximumf %13, %14 : vector<8x128xf32>
    %16 = arith.truncf %15 : vector<8x128xf32> to vector<8x128xbf16>
    %c0_12 = arith.constant 0 : index
    %c0_13 = arith.constant 0 : index
    %17 = vector.load %arg6[%c0_12, %c0_13] : memref<128x128xbf16, #tpu.memory_space<vmem>>, vector<128x128xbf16>
    %cst_14 = arith.constant dense<0.000000e+00> : vector<8x128xf32>
    %18 = tpu.matmul %16, %17, %cst_14 {dimension_numbers = #tpu.dot_dimension_numbers<[1], [0], [0], [1], [0, 0, 1, 1], [], []>} : vector<8x128xbf16>, vector<128x128xbf16>, vector<8x128xf32> -> vector<8x128xf32>
    %c0_15 = arith.constant 0 : index
    %c0_16 = arith.constant 0 : index
    %19 = vector.load %arg7[%c0_15, %c0_16] : memref<1x128xf32, #tpu.memory_space<vmem>>, vector<1x128xf32>
    %20 = vector.broadcast %19 : vector<1x128xf32> to vector<8x128xf32>
    %21 = arith.addf %18, %20 : vector<8x128xf32>
    %c0_17 = arith.constant 0 : index
    %c0_18 = arith.constant 0 : index
    %22 = vector.load %arg8[%c0_17, %c0_18] : memref<8x128xf32, #tpu.memory_space<vmem>>, vector<8x128xf32>
    tpu.vector_store %arg8[%c0_17, %c0_18], %21 {strides = array<i32>} : memref<8x128xf32, #tpu.memory_space<vmem>>, vector<8x128xf32>,
    return
  }
  func.func @transform_0(%arg0: i32) -> (i32, i32) {
    %c0_i32 = arith.constant 0 : i32
    %c0_i32_0 = arith.constant 0 : i32
    return %arg0, %c0_i32 : i32, i32
  }
  func.func @transform_1(%arg0: i32) -> (i32, i32) {
    %c0_i32 = arith.constant 0 : i32
    %c0_i32_0 = arith.constant 0 : i32
    %c0_i32_1 = arith.constant 0 : i32
    return %c0_i32, %c0_i32_0 : i32, i32
  }
  func.func @transform_2(%arg0: i32) -> (i32, i32) {
    %c0_i32 = arith.constant 0 : i32
    %c0_i32_0 = arith.constant 0 : i32
    %c0_i32_1 = arith.constant 0 : i32
    return %c0_i32, %c0_i32_0 : i32, i32
  }
  func.func @transform_3(%arg0: i32) -> (i32, i32) {
    %c0_i32 = arith.constant 0 : i32
    %c0_i32_0 = arith.constant 0 : i32
    %c0_i32_1 = arith.constant 0 : i32
    return %c0_i32, %c0_i32_0 : i32, i32
  }
  func.func @transform_4(%arg0: i32) -> (i32, i32) {
    %c0_i32 = arith.constant 0 : i32
    %c0_i32_0 = arith.constant 0 : i32
    %c0_i32_1 = arith.constant 0 : i32
    return %c0_i32, %c0_i32_0 : i32, i32
  }
  func.func @transform_5(%arg0: i32) -> (i32, i32) {
    %c0_i32 = arith.constant 0 : i32
    %c0_i32_0 = arith.constant 0 : i32
    %c0_i32_1 = arith.constant 0 : i32
    return %c0_i32, %c0_i32_0 : i32, i32
  }
  func.func @transform_6(%arg0: i32) -> (i32, i32) {
    %c0_i32 = arith.constant 0 : i32
    %c0_i32_0 = arith.constant 0 : i32
    %c0_i32_1 = arith.constant 0 : i32
    return %c0_i32, %c0_i32_0 : i32, i32
  }
  func.func @transform_7(%arg0: i32) -> (i32, i32) {
    %c0_i32 = arith.constant 0 : i32
    %c0_i32_0 = arith.constant 0 : i32
    return %arg0, %c0_i32 : i32, i32
  }
}

</mosaic_0001>

<bundles_post_ra>
// kernel: testnet_forward.3
= control target key start
LH: loop header
LB: loop body
LE: loop exit
PB: predicated region body
PF: predicated region fallthrough
CT: control target
= control target key end

     0   :  { %vm1453_vm0 = vmmov 0   ;;  %s1815_s1 = inlined_call_operand.vmem [shape: bf16[1152,128], index: 1, kind: input, shape index: {}]   ;;  %s1816_s0 = inlined_call_operand.vmem [shape: bf16[8,1152], index: 0, kind: input, shape index: {}]   ;;  %s1817_s3 = inlined_call_operand.vmem [shape: bf16[128,128], index: 3, kind: input, shape index: {}]   ;;  %s1818_s5 = inlined_call_operand.vmem [shape: bf16[128,128], index: 5, kind: input, shape index: {}]   ;;  %s1819_s2 = inlined_call_operand.vmem [shape: f32[1,128], index: 2, kind: input, shape index: {}]   ;;  %s1820_s4 = inlined_call_operand.vmem [shape: f32[1,128], index: 4, kind: input, shape index: {}]   ;;  %s1821_s6 = inlined_call_operand.vmem [shape: f32[1,128], index: 6, kind: input, shape index: {}]   ;;  %s1822_s7 = inlined_call_operand.vmem [shape: f32[8,128], index: 7, kind: output, shape index: {}]  }
   0x1   :  { %v1355_v0 = vld [vmem:[%s1815_s1 + $0x40] sm:$0xff]   ;;  %v1359_v4 = vld [vmem:[%s1815_s1 + $0x48] sm:$0xff]   ;;  %v1363_v8 = vld [vmem:[%s1815_s1 + $0x50] sm:$0xff]  }
   0x2   :  { %v1356_v1 = vld [vmem:[%s1815_s1] sm:$0xff]   ;;  %1178 = vmatprep.subr.bf16.mxu0 %v1355_v0  ;;  %v1360_v5 = vld [vmem:[%s1815_s1 + $0x8] sm:$0xff]   ;;  %v1364_v9 = vld [vmem:[%s1815_s1 + $0x10] sm:$0xff]  }
   0x3   :  { %v1357_v2 = vld [vmem:[%s1815_s1 + $0xc0] sm:$0xff]   ;;  %1179 = vmatpush3.bf16.msra.mxu0 %v1356_v1  ;;  %v1361_v6 = vld [vmem:[%s1815_s1 + $0xc8] sm:$0xff]   ;;  %v1365_v10 = vld [vmem:[%s1815_s1 + $0xd0] sm:$0xff]  }
   0x4   :  { %v1358_v3 = vld [vmem:[%s1815_s1 + $0x80] sm:$0xff]   ;;  %1200 = vmatprep.subr.bf16.mxu1 %v1357_v2  ;;  %1180 = vmatprep.subr.bf16.mxu0 %v1359_v4  ;;  %v1362_v7 = vld [vmem:[%s1815_s1 + $0x88] sm:$0xff]   ;;  %v1366_v11 = vld [vmem:[%s1815_s1 + $0x90] sm:$0xff]  }
   0x5   :  { %1201 = vmatpush3.bf16.msra.mxu1 %v1358_v3  ;;  %v1367_v12 = vld [vmem:[%s1815_s1 + $0x58] sm:$0xff]   ;;  %v1371_v16 = vld [vmem:[%s1815_s1 + $0x60] sm:$0xff]   ;;  %v1375_v20 = vld [vmem:[%s1815_s1 + $0x68] sm:$0xff]  }
   0x6   :  { %1202 = vmatprep.subr.bf16.mxu1 %v1361_v6  ;;  %v1368_v13 = vld [vmem:[%s1815_s1 + $0x18] sm:$0xff]   ;;  %v1372_v17 = vld [vmem:[%s1815_s1 + $0x20] sm:$0xff]   ;;  %v1376_v21 = vld [vmem:[%s1815_s1 + $0x28] sm:$0xff]  }
   0x7   :  { %1181 = vmatpush3.bf16.msra.mxu0 %v1360_v5  ;;  %v1369_v14 = vld [vmem:[%s1815_s1 + $0xd8] sm:$0xff]   ;;  %v1373_v18 = vld [vmem:[%s1815_s1 + $0xe0] sm:$0xff]   ;;  %v1377_v22 = vld [vmem:[%s1815_s1 + $0xe8] sm:$0xff]  }
   0x8   :  { %1182 = vmatprep.subr.bf16.mxu0 %v1363_v8  ;;  %v1370_v15 = vld [vmem:[%s1815_s1 + $0x98] sm:$0xff]   ;;  %v1374_v19 = vld [vmem:[%s1815_s1 + $0xa0] sm:$0xff]   ;;  %v1378_v23 = vld [vmem:[%s1815_s1 + $0xa8] sm:$0xff]  }
   0x9   :  { %1203 = vmatpush3.bf16.msra.mxu1 %v1362_v7  ;;  %v1379_v24 = vld [vmem:[%s1815_s1 + $0x70] sm:$0xff]   ;;  %v1383_v28 = vld [vmem:[%s1815_s1 + $0x78] sm:$0xff]   ;;  %v27_v31 = vld [vmem:[%s1816_s0] sm:$0xff] }
   0xa   :  { %1204 = vmatprep.subr.bf16.mxu1 %v1365_v10  ;;  %v1380_v25 = vld [vmem:[%s1815_s1 + $0x30] sm:$0xff]   ;;  %v1384_v29 = vld [vmem:[%s1815_s1 + $0x38] sm:$0xff]   ;;  %v1079_v32 = vcombine.low %v27_v31, %v27_v31  ;;  %v1080_v33 = vcombine.high %v27_v31, %v27_v31  ;;  %v1389_v35 = vld [vmem:[%s1815_s1 + $0x140] sm:$0xff]  }
   0xb   :  { %1183 = vmatpush3.bf16.msra.mxu0 %v1364_v9  ;;  %v1381_v26 = vld [vmem:[%s1815_s1 + $0xf0] sm:$0xff]   ;;  %v1385_v30 = vld [vmem:[%s1815_s1 + $0xf8] sm:$0xff]   ;;  %v28_v36 = vld [vmem:[%s1816_s0 + $0x8] sm:$0xff]  ;;  %v1452_v9 = vmov 0.0  }
   0xc   :  { %1184 = vmatprep.subr.bf16.mxu0 %v1367_v12  ;;  %v1382_v27 = vld [vmem:[%s1815_s1 + $0xb0] sm:$0xff]   ;;  %v1388_v34 = vld [vmem:[%s1815_s1 + $0xb8] sm:$0xff]   ;;  %679 = vmatprep.mubr.bf16.mxu0 %v1080_v33  ;;  %v1081_v37 = vcombine.low %v28_v36, %v28_v36  ;;  %v1082_v38 = vcombine.high %v28_v36, %v28_v36  ;;  %v1392_v39 = vld [vmem:[%s1815_s1 + $0x100] sm:$0xff]  }
   0xd   :  { %1205 = vmatpush3.bf16.msra.mxu1 %v1366_v11  ;;  %v1393_v40 = vld [vmem:[%s1815_s1 + $0x1c0] sm:$0xff]   ;;  %v1395_v42 = vld [vmem:[%s1815_s1 + $0x148] sm:$0xff]   ;;  %v1399_v46 = vld [vmem:[%s1815_s1 + $0x150] sm:$0xff]  }
   0xe   :  { %1206 = vmatprep.subr.bf16.mxu1 %v1369_v14  ;;  %719 = vmatprep.mubr.bf16.mxu1 %v1082_v38  ;;  %v1394_v41 = vld [vmem:[%s1815_s1 + $0x180] sm:$0xff]   ;;  %v1396_v43 = vld [vmem:[%s1815_s1 + $0x108] sm:$0xff]   ;;  %v1400_v47 = vld [vmem:[%s1815_s1 + $0x110] sm:$0xff]  }
   0xf   :  { %1185 = vmatpush3.bf16.msra.mxu0 %v1368_v13  ;;  %v1397_v44 = vld [vmem:[%s1815_s1 + $0x1c8] sm:$0xff]   ;;  %v1401_v48 = vld [vmem:[%s1815_s1 + $0x1d0] sm:$0xff]   ;;  %v1403_v50 = vld [vmem:[%s1815_s1 + $0x158] sm:$0xff]  }
  0x10   :  { %1186 = vmatprep.subr.bf16.mxu0 %v1371_v16  ;;  %v1398_v45 = vld [vmem:[%s1815_s1 + $0x188] sm:$0xff]   ;;  %v1402_v49 = vld [vmem:[%s1815_s1 + $0x190] sm:$0xff]   ;;  %v1404_v51 = vld [vmem:[%s1815_s1 + $0x118] sm:$0xff]  }
  0x11   :  { %1207 = vmatpush3.bf16.msra.mxu1 %v1370_v15  ;;  %v1405_v52 = vld [vmem:[%s1815_s1 + $0x1d8] sm:$0xff]   ;;  %v1407_v54 = vld [vmem:[%s1815_s1 + $0x160] sm:$0xff]   ;;  %v1411_v58 = vld [vmem:[%s1815_s1 + $0x168] sm:$0xff]  }
  0x12   :  { %1208 = vmatprep.subr.bf16.mxu1 %v1373_v18  ;;  %v1406_v53 = vld [vmem:[%s1815_s1 + $0x198] sm:$0xff]   ;;  %v1408_v55 = vld [vmem:[%s1815_s1 + $0x120] sm:$0xff]   ;;  %v1412_v59 = vld [vmem:[%s1815_s1 + $0x128] sm:$0xff]  }
  0x13   :  { %1187 = vmatpush3.bf16.msra.mxu0 %v1372_v17  ;;  %v1409_v56 = vld [vmem:[%s1815_s1 + $0x1e0] sm:$0xff]   ;;  %v1413_v60 = vld [vmem:[%s1815_s1 + $0x1e8] sm:$0xff]   ;;  %v1415_v62 = vld [vmem:[%s1815_s1 + $0x170] sm:$0xff]  }
  0x14   :  { %1188 = vmatprep.subr.bf16.mxu0 %v1375_v20  ;;  %v1410_v57 = vld [vmem:[%s1815_s1 + $0x1a0] sm:$0xff]   ;;  %v1414_v61 = vld [vmem:[%s1815_s1 + $0x1a8] sm:$0xff]   ;;  %v1416_v63 = vld [vmem:[%s1815_s1 + $0x130] sm:$0xff]  }
  0x15   :  { %1209 = vmatpush3.bf16.msra.mxu1 %v1374_v19  ;;  %v1417_v0 = vld [vmem:[%s1815_s1 + $0x1f0] sm:$0xff]   ;;  %v1419_v2 = vld [vmem:[%s1815_s1 + $0x178] sm:$0xff]   ;;  %v1427_v13 = vld [vmem:[%s1815_s1 + $0x200] sm:$0xff]  }
  0x16   :  { %1210 = vmatprep.subr.bf16.mxu1 %v1377_v22  ;;  %v1418_v1 = vld [vmem:[%s1815_s1 + $0x1b0] sm:$0xff]   ;;  %v1420_v3 = vld [vmem:[%s1815_s1 + $0x138] sm:$0xff]   ;;  %v1428_v14 = vld [vmem:[%s1815_s1 + $0x208] sm:$0xff]  }
  0x17   :  { %1189 = vmatpush3.bf16.msra.mxu0 %v1376_v21  ;;  %v1421_v4 = vld [vmem:[%s1815_s1 + $0x1f8] sm:$0xff]   ;;  %v29_v5 = vld [vmem:[%s1816_s0 + $0x10] sm:$0xff]  ;;  %v1431_v17 = vld [vmem:[%s1815_s1 + $0x220] sm:$0xff]  }
  0x18   :  { %1190 = vmatprep.subr.bf16.mxu0 %v1379_v24  ;;  %v1083_v6 = vcombine.low %v29_v5, %v29_v5  ;;  %v1084_v7 = vcombine.high %v29_v5, %v29_v5  ;;  %v1424_v8 = vld [vmem:[%s1815_s1 + $0x1b8] sm:$0xff]   ;;  %v1429_v15 = vld [vmem:[%s1815_s1 + $0x210] sm:$0xff]   ;;  %v1432_v18 = vld [vmem:[%s1815_s1 + $0x228] sm:$0xff]  }
  0x19   :  { %1211 = vmatpush3.bf16.msra.mxu1 %v1378_v23  ;;  %v30_v10 = vld [vmem:[%s1816_s0 + $0x18] sm:$0xff]  ;;  %v1433_v19 = vld [vmem:[%s1815_s1 + $0x230] sm:$0xff]   ;;  %v1435_v21 = vld [vmem:[%s1816_s0 + $0x20] ss:$0 sps:$4 sm:$0xff]  }
  0x1a   :  { %1212 = vmatprep.subr.bf16.mxu1 %v1381_v26  ;;  %v1085_v11 = vcombine.low %v30_v10, %v30_v10  ;;  %v1086_v12 = vcombine.high %v30_v10, %v30_v10  ;;  %v1430_v16 = vld [vmem:[%s1815_s1 + $0x218] sm:$0xff]   ;;  %v1436_v22 = vld [vmem:[%s1817_s3] sm:$0xff]   ;;  %v1437_v23 = vld [vmem:[%s1817_s3 + $0x8] sm:$0xff]  }
  0x1b   :  { %1191 = vmatpush3.bf16.msra.mxu0 %v1380_v25  ;;  %v1434_v20 = vld [vmem:[%s1815_s1 + $0x238] sm:$0xff]   ;;  %v1438_v24 = vld [vmem:[%s1817_s3 + $0x10] sm:$0xff]   ;;  %v1440_v26 = vld [vmem:[%s1817_s3 + $0x20] sm:$0xff]  }
  0x1c   :  { %1192 = vmatprep.subr.bf16.mxu0 %v1383_v28  ;;  %v1439_v25 = vld [vmem:[%s1817_s3 + $0x18] sm:$0xff]   ;;  %v1442_v28 = vld [vmem:[%s1817_s3 + $0x30] sm:$0xff]   ;;  %v1445_v31 = vld [vmem:[%s1818_s5 + $0x8] sm:$0xff]  }
  0x1d   :  { %1213 = vmatpush3.bf16.msra.mxu1 %v1382_v27  ;;  %v1441_v27 = vld [vmem:[%s1817_s3 + $0x28] sm:$0xff]   ;;  %v1447_v33 = vld [vmem:[%s1818_s5 + $0x18] sm:$0xff]  }
  0x1e   :  { %1214 = vmatprep.subr.bf16.mxu1 %v1385_v30  ;;  %v1444_v30 = vld [vmem:[%s1818_s5] sm:$0xff]   ;;  %v1451_v5 = vld [vmem:[%s1818_s5 + $0x38] sm:$0xff]  }
  0x1f   :  { %1193 = vmatpush3.bf16.msra.mxu0 %v1384_v29  ;;  %v1443_v29 = vld [vmem:[%s1817_s3 + $0x38] sm:$0xff]  }
  0x20   :  { %1222 = vmatprep.subr.bf16.mxu0 %v1389_v35  ;;  %v1449_v35 = vld [vmem:[%s1818_s5 + $0x28] sm:$0xff]  }
  0x21   :  { %1215 = vmatpush3.bf16.msra.mxu1 %v1388_v34  ;;  %v1448_v34 = vld [vmem:[%s1818_s5 + $0x20] sm:$0xff]  }
  0x22   :  { %680 = vmatmul.mubr.bf16.vlgmr.msra.gmra.mrb[0].mxu0 %v1079_v32  ;;  %1244 = vmatprep.subr.bf16.mxu1 %v1393_v40  ;;  %v1446_v32 = vld [vmem:[%s1818_s5 + $0x10] sm:$0xff]  }
  0x23   :  { %1223 = vmatpush3.bf16.msra.mxu0 %v1392_v39  ;;  %759 = vmatprep.mubr.bf16.mxu0 %v1084_v7 }
  0x24   :  { %720 = vmatmul.mubr.bf16.vlgmr.msra.gmra.mrb[0].mxu1 %v1081_v37  ;;  %1224 = vmatprep.subr.bf16.mxu0 %v1395_v42  ;;  %v1078_v37 = vld [vmem:[%s1819_s2] ss:$0 sm:$0xff] }
  0x25   :  { %1245 = vmatpush3.bf16.msra.mxu1 %v1394_v41  ;;  %799 = vmatprep.mubr.bf16.mxu1 %v1086_v12 }
  0x26   :  { %1246 = vmatprep.subr.bf16.mxu1 %v1397_v44 }
  0x27   :  { %1225 = vmatpush3.bf16.msra.mxu0 %v1396_v43 }
  0x28   :  { %1226 = vmatprep.subr.bf16.mxu0 %v1399_v46 }
  0x29   :  { %1247 = vmatpush3.bf16.msra.mxu1 %v1398_v45 }
  0x2a   :  { %1248 = vmatprep.subr.bf16.mxu1 %v1401_v48 }
  0x2b   :  { %1227 = vmatpush3.bf16.msra.mxu0 %v1400_v47 }
  0x2c   :  { %1228 = vmatprep.subr.bf16.mxu0 %v1403_v50 }
  0x2d   :  { %1249 = vmatpush3.bf16.msra.mxu1 %v1402_v49 }
  0x2e   :  { %1250 = vmatprep.subr.bf16.mxu1 %v1405_v52 }
  0x2f   :  { %1229 = vmatpush3.bf16.msra.mxu0 %v1404_v51 }
  0x30   :  { %1230 = vmatprep.subr.bf16.mxu0 %v1407_v54 }
  0x31   :  { %1251 = vmatpush3.bf16.msra.mxu1 %v1406_v53 }
  0x32   :  { %1252 = vmatprep.subr.bf16.mxu1 %v1409_v56 }
  0x33   :  { %1231 = vmatpush3.bf16.msra.mxu0 %v1408_v55 }
  0x34   :  { %1232 = vmatprep.subr.bf16.mxu0 %v1411_v58 }
  0x35   :  { %1253 = vmatpush3.bf16.msra.mxu1 %v1410_v57 }
  0x36   :  { %1254 = vmatprep.subr.bf16.mxu1 %v1413_v60 }
  0x37   :  { %1233 = vmatpush3.bf16.msra.mxu0 %v1412_v59 }
  0x38   :  { %1234 = vmatprep.subr.bf16.mxu0 %v1415_v62 }
  0x39   :  { %1255 = vmatpush3.bf16.msra.mxu1 %v1414_v61 }
  0x3a   :  { %1256 = vmatprep.subr.bf16.mxu1 %v1417_v0 }
  0x3b   :  { %1235 = vmatpush3.bf16.msra.mxu0 %v1416_v63 }
  0x3c   :  { %1236 = vmatprep.subr.bf16.mxu0 %v1419_v2 }
  0x3d   :  { %1257 = vmatpush3.bf16.msra.mxu1 %v1418_v1 }
  0x3e   :  { %1258 = vmatprep.subr.bf16.mxu1 %v1421_v4  ;;  %v1450_v4 = vld [vmem:[%s1818_s5 + $0x30] sm:$0xff]  }
  0x3f   :  { %1237 = vmatpush3.bf16.msra.mxu0 %v1420_v3 }
  0x40   :  { %1293 = vmatprep.subr.bf16.mxu0 %v1452_v9 }
  0x41   :  { %1259 = vmatpush3.bf16.msra.mxu1 %v1424_v8 }
  0x42   :  { %760 = vmatmul.mubr.bf16.vlgmr.msra.gmra.mrb[4].mxu0 %v1083_v6  ;;  %1313 = vmatprep.subr.bf16.mxu1 %v1452_v9  ;;  %v1160_v6 = vld [vmem:[%s1820_s4] ss:$0 sm:$0xff] }
  0x43   :  { %1294 = vmatpush3.bf16.msra.mxu0 %v1427_v13  ;;  %1309 = vmatprep.mubr.msk.bf16.mxu0 %vm1453_vm0, %v1452_v9 }
  0x44   :  { %800 = vmatmul.mubr.bf16.vlgmr.msra.gmra.mrb[4].mxu1 %v1085_v11  ;;  %1295 = vmatprep.subr.bf16.mxu0 %v1452_v9 }
  0x45   :  { %1329 = vmatprep.mubr.msk.bf16.mxu1 %vm1453_vm0, %v1452_v9  ;;  %1314 = vmatpush3.bf16.msra.mxu1 %v1436_v22 }
  0x46   :  { %1315 = vmatprep.subr.bf16.mxu1 %v1452_v9 }
  0x47   :  { %1296 = vmatpush3.bf16.msra.mxu0 %v1428_v14 }
  0x48   :  { %1297 = vmatprep.subr.bf16.mxu0 %v1452_v9 }
  0x49   :  { %1316 = vmatpush3.bf16.msra.mxu1 %v1437_v23 }
  0x4a   :  { %1317 = vmatprep.subr.bf16.mxu1 %v1452_v9 }
  0x4b   :  { %1298 = vmatpush3.bf16.msra.mxu0 %v1429_v15 }
  0x4c   :  { %1299 = vmatprep.subr.bf16.mxu0 %v1452_v9 }
  0x4d   :  { %1318 = vmatpush3.bf16.msra.mxu1 %v1438_v24 }
  0x4e   :  { %1319 = vmatprep.subr.bf16.mxu1 %v1452_v9 }
  0x4f   :  { %1300 = vmatpush3.bf16.msra.mxu0 %v1430_v16 }
  0x50   :  { %1301 = vmatprep.subr.bf16.mxu0 %v1452_v9 }
  0x51   :  { %1320 = vmatpush3.bf16.msra.mxu1 %v1439_v25 }
  0x52   :  { %1321 = vmatprep.subr.bf16.mxu1 %v1452_v9 }
  0x53   :  { %1302 = vmatpush3.bf16.msra.mxu0 %v1431_v17 }
  0x54   :  { %1303 = vmatprep.subr.bf16.mxu0 %v1452_v9 }
  0x55   :  { %1322 = vmatpush3.bf16.msra.mxu1 %v1440_v26 }
  0x56   :  { %1323 = vmatprep.subr.bf16.mxu1 %v1452_v9 }
  0x57   :  { %1304 = vmatpush3.bf16.msra.mxu0 %v1432_v18 }
  0x58   :  { %1305 = vmatprep.subr.bf16.mxu0 %v1452_v9 }
  0x59   :  { %1324 = vmatpush3.bf16.msra.mxu1 %v1441_v27 }
  0x5a   :  { %1325 = vmatprep.subr.bf16.mxu1 %v1452_v9 }
  0x5b   :  { %1306 = vmatpush3.bf16.msra.mxu0 %v1433_v19 }
  0x5c   :  { %1307 = vmatprep.subr.bf16.mxu0 %v1452_v9 }
  0x5d   :  { %1326 = vmatpush3.bf16.msra.mxu1 %v1442_v28 }
  0x5e   :  { %1327 = vmatprep.subr.bf16.mxu1 %v1452_v9 }
  0x5f   :  { %1308 = vmatpush3.bf16.msra.mxu0 %v1434_v20 }
  0x60   :  { %1333 = vmatprep.subr.bf16.mxu0 %v1452_v9 }
  0x61   :  { %1328 = vmatpush3.bf16.msra.mxu1 %v1443_v29 }
  0x62   :  { %1310 = vmatmul.mubr.bf16.vlgmr.msra.gmra.mrb[8].mxu0 %v1435_v21 }
  0x63   :  { %1349 = vmatprep.mubr.msk.bf16.mxu0 %vm1453_vm0, %v1452_v9  ;;  %1334 = vmatpush3.bf16.msra.mxu0 %v1444_v30 }
  0x64   :  { %1335 = vmatprep.subr.bf16.mxu0 %v1452_v9 }
  0x67   :  { %1336 = vmatpush3.bf16.msra.mxu0 %v1445_v31 }
  0x68   :  { %1337 = vmatprep.subr.bf16.mxu0 %v1452_v9 }
  0x6b   :  { %1338 = vmatpush3.bf16.msra.mxu0 %v1446_v32 }
  0x6c   :  { %1339 = vmatprep.subr.bf16.mxu0 %v1452_v9 }
  0x6f   :  { %1340 = vmatpush3.bf16.msra.mxu0 %v1447_v33 }
  0x70   :  { %1341 = vmatprep.subr.bf16.mxu0 %v1452_v9 }
  0x73   :  { %1342 = vmatpush3.bf16.msra.mxu0 %v1448_v34 }
  0x74   :  { %1343 = vmatprep.subr.bf16.mxu0 %v1452_v9 }
  0x77   :  { %1344 = vmatpush3.bf16.msra.mxu0 %v1449_v35 }
  0x78   :  { %1345 = vmatprep.subr.bf16.mxu0 %v1452_v9 }
  0x7b   :  { %1346 = vmatpush3.bf16.msra.mxu0 %v1450_v4 }
  0x7c   :  { %1347 = vmatprep.subr.bf16.mxu0 %v1452_v9  ;;  %v1169_v9 = vld [vmem:[%s1821_s6] ss:$0 sm:$0xff] }
  0x7f   :  { %1348 = vmatpush3.bf16.msra.mxu0 %v1451_v5 }
  0xf5   :  { %v1194_v36 = vpop.f32.mrb[0].mxu0 }
  0xf6   :  { %v1195_v38 = vpop.f32.mrb[1].mxu0 }
  0xf7   :  { %v1196_v39 = vadd.f32 %v1195_v38, %v1194_v36  ;;  %v1197_v40 = vpop.f32.mrb[2].mxu0  ;;  %v1216_v41 = vpop.f32.mrb[0].mxu1 }
  0xf8   :  { %v1198_v42 = vpop.f32.mrb[3].mxu0  ;;  %v1217_v43 = vpop.f32.mrb[1].mxu1 }
  0xf9   :  { %v682_v44 = vadd.f32 %v1196_v39, %v1078_v37  ;;  %v1218_v45 = vadd.f32 %v1217_v43, %v1216_v41  ;;  %v1219_v46 = vpop.f32.mrb[2].mxu1 }
  0xfa   :  { %v1220_v47 = vpop.f32.mrb[3].mxu1 }
  0xfb   :  { %v722_v48 = vadd.f32 %v1218_v45, %v682_v44 }
 0x115   :  { %v1238_v49 = vpop.f32.mrb[4].mxu0 }
 0x116   :  { %v1239_v50 = vpop.f32.mrb[5].mxu0 }
 0x117   :  { %v1240_v51 = vadd.f32 %v1239_v50, %v1238_v49  ;;  %v1241_v52 = vpop.f32.mrb[6].mxu0  ;;  %v1260_v53 = vpop.f32.mrb[4].mxu1 }
 0x118   :  { %v1242_v54 = vpop.f32.mrb[7].mxu0  ;;  %v1261_v55 = vpop.f32.mrb[5].mxu1 }
 0x119   :  { %v762_v56 = vadd.f32 %v1240_v51, %v722_v48  ;;  %v1262_v57 = vadd.f32 %v1261_v55, %v1260_v53  ;;  %v1263_v58 = vpop.f32.mrb[6].mxu1 }
 0x11a   :  { %v1264_v59 = vpop.f32.mrb[7].mxu1 }
 0x11b   :  { %v802_v60 = vadd.f32 %v1262_v57, %v762_v56 }
 0x135   :  { %v841_v61 = vpop.f32.mrb[8].mxu0 }
 0x136   :  { %v842_v62 = vadd.f32 %v841_v61, %v802_v60  ;;  %v1311_v63 = vpop.f32.mrb[9].mxu0 }
 0x137   :  { %v844_v0 = vpop.f32.mrb[10].mxu0 }
 0x138   :  { %v847_v1 = vmax.f32 %v842_v62, 0.0  ;;  %v1312_v2 = vpop.f32.mrb[11].mxu0 }
 0x13a   :  { %v848_v3 = vpack.c.bf16 %v847_v1, %v847_v1 }
 0x13c   :  { %1330 = vmatmul.mubr.bf16.vlgmr.msra.gmra.mrb[8].mxu1 %v848_v3 }
 0x20f   :  { %v954_v7 = vpop.f32.mrb[8].mxu1 }
 0x210   :  { %v955_v8 = vadd.f32 %v1160_v6, %v954_v7  ;;  %v1331_v10 = vpop.f32.mrb[9].mxu1 }
 0x211   :  { %v957_v11 = vpop.f32.mrb[10].mxu1 }
 0x212   :  { %v960_v12 = vmax.f32 %v955_v8, 0.0  ;;  %v1332_v13 = vpop.f32.mrb[11].mxu1 }
 0x214   :  { %v961_v14 = vpack.c.bf16 %v960_v12, %v960_v12 }
 0x216   :  { %1350 = vmatmul.mubr.bf16.vlgmr.msra.gmra.mrb[12].mxu0 %v961_v14 }
 0x2e9   :  { %v1067_v15 = vpop.f32.mrb[12].mxu0 }
 0x2ea   :  { %v1068_v16 = vadd.f32 %v1169_v9, %v1067_v15  ;;  %v1351_v17 = vpop.f32.mrb[13].mxu0 }
 0x2eb   :  { %v1070_v18 = vpop.f32.mrb[14].mxu0 }
 0x2ec   :  { %1073 = vst [vmem:[%s1822_s7] sm:$0xff] %v1068_v16  ;;  %v1352_v19 = vpop.f32.mrb[15].mxu0 }

// kernel: testnet_forward.2
= control target key start
LH: loop header
LB: loop body
LE: loop exit
PB: predicated region body
PF: predicated region fallthrough
CT: control target
= control target key end

     0   :  { %10 = vsyncpa [#allocation3], 0  ;;  %s16081_s0 = inlined_call_operand.vmem [shape: bf16[2,2,16,128], index: 0, kind: input, shape index: {}]   ;;  %s16082_s1 = inlined_call_operand.hbm [shape: bf16[5,128,1792], index: 1, kind: input, shape index: {}]   ;;  %s16083_s2 = inlined_call_operand.hbm [shape: f32[1,896], index: 2, kind: input, shape index: {}]   ;;  %s16084_s3 = inlined_call_operand.hbm [shape: bf16[5,896,256], index: 3, kind: input, shape index: {}]   ;;  %s16085_s4 = inlined_call_operand.hbm [shape: f32[1,128], index: 4, kind: input, shape index: {}]   ;;  %s16086_s5 = inlined_call_operand.vmem [shape: bf16[2,9,128], index: 5, kind: output, shape index: {}]  }
   0x1   :  { %11 = vsyncpa [#allocation5], 0 }
   0x2   :  { %12 = vsyncpa [#allocation8], 0  ;;  %s15409_s18 = smov 0  }
   0x3 LB: > { %s15370_s19 = smov [#allocation4]   ;;  %s15415_s21 = sadd.s32 4294967295, %s15368_s18   ;;  %s15368_s18 = sphi %s15409_s18, %s18_s18  }
   0x4   : > { %s185_s20 = sshll.u32 %s15370_s19, 4  ;;  %p11481_p0 = scmp.ge.s32.totalorder %s15368_s18, 1  ;;  %s186_s20 = int_to_ptr.vmem [resolvable:$true] %s185_s20 }
   0x5   : > { %p159_p1 = scmp.lt.s32.totalorder %s15368_s18, 3  ;;  %p16087_p2 = scmp.eq.s32.totalorder %s15415_s21, 0 }
   0x6   : > { %s15371_s23 = smov [#allocation2]   ;;  %s15372_s26 = smov [#allocation6]  }
   0x7   : > { %p15420_p3 = pnand %p11481_p0, %p159_p1  ;;  %s171_s24 = sshll.u32 %s15371_s23, 4  ;;  %s15426_s24 = int_to_ptr.vmem [resolvable:$true] %s171_s24 }
   0x8   : > { %s195_s27 = sshll.u32 %s15372_s26, 4  ;;  %s15238_s30 = scalar_lea.hbm %s16083_s2, 112  ;;  %s15434_s27 = int_to_ptr.vmem [resolvable:$true] %s195_s27 }
   0x9   : > { %s16091_s22 = scalar_select %p15420_p3, 1, 0 }
   0xa   : > { %p12951_p4 = pneg %p15420_p3  ;;  %p15239_p6 = scmp.ne.s32.totalorder %s16083_s2, %s15238_s30 }
   0xb   : > { %p15245_p10 = scmp.lt.u32.totalorder %s15238_s30, %s16083_s2 }
   0xc   : > { %p15430_p5 = pnand %p16087_p2, %p12951_p4 }
   0xe   : > { %p15444_p7 = pneg %p15430_p5 }
  0x10   : > { %p15241_p8 = pnand %p15444_p7, %p15239_p6 }
  0x12   : > { %p15242_p9 = pneg %p15241_p8 }
  0x14   : > { %p15247_p11 = pnand %p15245_p10, %p15242_p9 }
  0x16   : > { %15250 = shalt.err (!%p15247_p11)
}
  0x17   : > { %s15251_s11 = scalar_lea.vmem %s186_s20, 112  ;;  %s15258_s12 = scalar_lea.vmem %s186_s20, 128 }
  0x18   : > { %p15252_p12 = scmp.ne.s32.totalorder %s186_s20, %s15251_s11  ;;  %p15259_p1 = scmp.lt.s32.totalorder %s186_s20, %s186_s20 }
  0x19   : > { %p15260_p4 = scmp.lt.s32.totalorder %s15258_s12, %s15251_s11 }
  0x1a   : > { %p15254_p13 = pnand %p15252_p12, %p15444_p7 }
  0x1b   : > { %p15261_p2 = por %p15260_p4, %p15259_p1 }
  0x1c   : > { %p15255_p0 = pneg %p15254_p13 }
  0x1e   : > { %p15262_p3 = pnand %p15261_p2, %p15255_p0 }
  0x20   : > { %15265 = shalt.err (!%p15262_p3)
}
  0x21   : > { %12957 = dma.hbm_to_vmem [thread:$0]  (!%p15430_p5), %s16083_s2, 112, %s186_s20, [#allocation5]  }
  0x22   : > { %s15266_s17 = scalar_lea.hbm %s16082_s1, 71680 }
  0x23   : > { %p15267_p6 = scmp.ne.s32.totalorder %s16082_s1, %s15266_s17  ;;  %p15273_p2 = scmp.lt.u32.totalorder %s15266_s17, %s16082_s1 }
  0x25   : > { %p15269_p8 = pnand %p15267_p6, %p15444_p7 }
  0x27   : > { %p15270_p9 = pneg %p15269_p8 }
  0x29   : > { %p15275_p3 = pnand %p15273_p2, %p15270_p9 }
  0x2b   : > { %15278 = shalt.err (!%p15275_p3)
}
  0x2c   : > { %s15279_s20 = scalar_lea.vmem %s15426_s24, 71680  ;;  %p15287_p13 = scmp.lt.s32.totalorder %s15426_s24, %s15426_s24 }
  0x2d   : > { %p15280_p10 = scmp.ne.s32.totalorder %s15426_s24, %s15279_s20  ;;  %p15288_p0 = scmp.lt.s32.totalorder %s15279_s20, %s15279_s20 }
  0x2f   : > { %p15282_p11 = pnand %p15280_p10, %p15444_p7  ;;  %p15289_p1 = por %p15288_p0, %p15287_p13 }
  0x31   : > { %p15283_p12 = pneg %p15282_p11 }
  0x33   : > { %p15290_p4 = pnand %p15289_p1, %p15283_p12 }
  0x35   : > { %15293 = shalt.err (!%p15290_p4)
}
  0x36   : > { %s15373_s29 = smov 896   ;;  %s15374_s30 = smov 56  }
  0x37   : > { %12954 = dma.hbm_to_vmem [thread:$0]  (!%p15430_p5), %s16082_s1, 71680, %s15426_s24, [#allocation3], %s15373_s29, %s15373_s29, %s15374_s30  }
  0x38   : > { %s15294_s11 = scalar_lea.hbm %s16084_s3, 71680 }
  0x39   : > { %p15295_p6 = scmp.ne.s32.totalorder %s16084_s3, %s15294_s11  ;;  %p15301_p2 = scmp.lt.u32.totalorder %s15294_s11, %s16084_s3 }
  0x3b   : > { %p15297_p8 = pnand %p15295_p6, %p15444_p7 }
  0x3d   : > { %p15298_p9 = pneg %p15297_p8 }
  0x3f   : > { %p15303_p3 = pnand %p15301_p2, %p15298_p9 }
  0x41   : > { %15306 = shalt.err (!%p15303_p3)
}
  0x42   : > { %s15307_s24 = scalar_lea.vmem %s15434_s27, 71680  ;;  %p15315_p13 = scmp.lt.s32.totalorder %s15434_s27, %s15434_s27 }
  0x43   : > { %p15308_p10 = scmp.ne.s32.totalorder %s15434_s27, %s15307_s24  ;;  %p15316_p0 = scmp.lt.s32.totalorder %s15307_s24, %s15307_s24 }
  0x45   : > { %p15310_p11 = pnand %p15308_p10, %p15444_p7  ;;  %p15317_p1 = por %p15316_p0, %p15315_p13 }
  0x47   : > { %p15311_p12 = pneg %p15310_p11 }
  0x49   : > { %p15318_p4 = pnand %p15317_p1, %p15311_p12 }
  0x4b   : > { %15321 = shalt.err (!%p15318_p4)
}
  0x4c   : > { %s15375_s16 = smov 128   ;;  %s15376_s17 = smov 8  }
  0x4d   : > { %12960 = dma.hbm_to_vmem [thread:$0]  (!%p15430_p5), %s16084_s3, 71680, %s15434_s27, [#allocation5], %s15375_s16, %s15375_s16, %s15376_s17  }
  0x4e   : > { %s15377_s26 = smov [#allocation7]   ;;  %s15322_s30 = scalar_lea.hbm %s16085_s4, 16 }
  0x4f   : > { %s209_s28 = sshll.u32 %s15377_s26, 4  ;;  %p15323_p6 = scmp.ne.s32.totalorder %s16085_s4, %s15322_s30  ;;  %s210_s28 = int_to_ptr.vmem [resolvable:$true] %s209_s28 }
  0x50   : > { %p15329_p2 = scmp.lt.u32.totalorder %s15322_s30, %s16085_s4 }
  0x51   : > { %p15325_p8 = pnand %p15323_p6, %p15444_p7 }
  0x53   : > { %p15326_p9 = pneg %p15325_p8 }
  0x55   : > { %p15331_p3 = pnand %p15329_p2, %p15326_p9 }
  0x57   : > { %15334 = shalt.err (!%p15331_p3)
}
  0x58   : > { %s15335_s27 = scalar_lea.vmem %s210_s28, 16  ;;  %s15342_s11 = scalar_lea.vmem %s210_s28, 32 }
  0x59   : > { %p15336_p10 = scmp.ne.s32.totalorder %s210_s28, %s15335_s27  ;;  %p15343_p13 = scmp.lt.s32.totalorder %s210_s28, %s210_s28 }
  0x5a   : > { %p15344_p0 = scmp.lt.s32.totalorder %s15342_s11, %s15335_s27 }
  0x5b   : > { %p15338_p11 = pnand %p15336_p10, %p15444_p7 }
  0x5c   : > { %p15345_p1 = por %p15344_p0, %p15343_p13 }
  0x5d   : > { %p15339_p12 = pneg %p15338_p11 }
  0x5f   : > { %p15346_p4 = pnand %p15345_p1, %p15339_p12 }
  0x61   : > { %15349 = shalt.err (!%p15346_p4)
}
  0x62   : > { %12963 = dma.hbm_to_vmem [thread:$0]  (!%p15430_p5), %s16085_s4, 16, %s210_s28, [#allocation8]  }
  0x63   : > { %p16094_p6 = scmp.ne.s32.totalorder %s16091_s22, 0 }
  0x64   : > { %p16095_p8 = scmp.eq.s32.totalorder (!%p16094_p6), %s15415_s21, 0 }
  0x65   : > { %230 = sbr.rel (%p16094_p6) target bundleno = 2949 (0xb85), region = 40 }
  0x6c   : > { %15355 = dma.done.wait (%p16095_p8), [#allocation3], 71680   ;;  %p16096_p7 = pmov %p16095_p8 }
  0x6e   : > { %15357 = vsyncadd (%p16096_p7), [#allocation3], 4294895616  ;;  %p16097_p9 = pmov %p16096_p7 }
  0x6f   : > { %p16098_p2 = pmov %p16096_p7 }
  0x70   : > { %15359 = dma.done.wait (%p16097_p9), [#allocation5], 71792  }
  0x71   : > { %15361 = vsyncadd (%p16098_p2), [#allocation5], 4294895504  ;;  %p16099_p3 = pmov %p16098_p2 }
  0x72   : > { %p16100_p5 = pmov %p16098_p2 }
  0x73   : > { %15363 = dma.done.wait (%p16099_p3), [#allocation8], 16  }
  0x74   : > { %15365 = vsyncadd (%p16100_p5), [#allocation8], 4294967280  ;;  %v16089_v0 = vmov 0   ;;  %v12989_v1 = vld [vmem:[#allocation2 + $0x384] ss:$56 sps:$4 sm:$0xff]   ;;  %p270_p10 = scmp.lt.s32.totalorder %s15415_s21, 1 }
  0x75   : > { %1109 = vmatprep.mubr.bf16.mxu1 %v16089_v0  ;;  %1195 = vmatprep.mubr.bf16.mxu0 %v16089_v0  ;;  %v12991_v2 = vld [vmem:[#allocation2 + $0x394] ss:$56 sps:$4 sm:$0xff]   ;;  %v12993_v3 = vld [vmem:[#allocation2 + $0x380] ss:$56 sps:$4 sm:$0xff]   ;;  %v12994_v4 = vld [vmem:[#allocation2 + $0x390] ss:$56 sps:$4 sm:$0xff]  }
  0x76   : > { %1077 = vmatprep.subr.bf16.mxu1 %v12989_v1  ;;  %1163 = vmatprep.subr.bf16.mxu0 %v12991_v2  ;;  %v12995_v5 = vld [vmem:[#allocation2 + $0x3f4] ss:$56 sps:$4 sm:$0xff]   ;;  %v12997_v6 = vld [vmem:[#allocation2 + $0x404] ss:$56 sps:$4 sm:$0xff]   ;;  %v12999_v7 = vld [vmem:[#allocation2 + $0x3f0] ss:$56 sps:$4 sm:$0xff]  }
  0x77   : > { %1078 = vmatpush1.bf16.msra.mxu1 %v12993_v3  ;;  %1164 = vmatpush1.bf16.msra.mxu0 %v12994_v4  ;;  %v13000_v8 = vld [vmem:[#allocation2 + $0x400] ss:$56 sps:$4 sm:$0xff]   ;;  %v13001_v9 = vld [vmem:[#allocation2 + $0x464] ss:$56 sps:$4 sm:$0xff]   ;;  %v13003_v10 = vld [vmem:[#allocation2 + $0x474] ss:$56 sps:$4 sm:$0xff]  }
  0x78   : > { %1079 = vmatprep.subr.bf16.mxu1 %v12995_v5  ;;  %1165 = vmatprep.subr.bf16.mxu0 %v12997_v6  ;;  %v13005_v11 = vld [vmem:[#allocation2 + $0x460] ss:$56 sps:$4 sm:$0xff]   ;;  %v13006_v12 = vld [vmem:[#allocation2 + $0x470] ss:$56 sps:$4 sm:$0xff]   ;;  %v13007_v13 = vld [vmem:[#allocation2 + $0x4d4] ss:$56 sps:$4 sm:$0xff]  }
  0x79   : > { %v13009_v14 = vld [vmem:[#allocation2 + $0x4e4] ss:$56 sps:$4 sm:$0xff]   ;;  %v13011_v15 = vld [vmem:[#allocation2 + $0x4d0] ss:$56 sps:$4 sm:$0xff]   ;;  %v13012_v16 = vld [vmem:[#allocation2 + $0x4e0] ss:$56 sps:$4 sm:$0xff]  }
  0x7a   : > { %v13013_v17 = vld [vmem:[#allocation2 + $0x544] ss:$56 sps:$4 sm:$0xff]   ;;  %v13015_v18 = vld [vmem:[#allocation2 + $0x554] ss:$56 sps:$4 sm:$0xff]   ;;  %v13017_v19 = vld [vmem:[#allocation2 + $0x540] ss:$56 sps:$4 sm:$0xff]  }
  0x7b   : > { %1080 = vmatpush1.bf16.msra.mxu1 %v12999_v7  ;;  %1166 = vmatpush1.bf16.msra.mxu0 %v13000_v8  ;;  %v13018_v20 = vld [vmem:[#allocation2 + $0x550] ss:$56 sps:$4 sm:$0xff]   ;;  %v13019_v21 = vld [vmem:[#allocation2 + $0x5b4] ss:$56 sps:$4 sm:$0xff]   ;;  %v13021_v22 = vld [vmem:[#allocation2 + $0x5c4] ss:$56 sps:$4 sm:$0xff]  }
  0x7c   : > { %1081 = vmatprep.subr.bf16.mxu1 %v13001_v9  ;;  %1167 = vmatprep.subr.bf16.mxu0 %v13003_v10  ;;  %s16108_s21 = smov (!%p270_p10, %s15415_s21), 1  ;;  %v13023_v23 = vld [vmem:[#allocation2 + $0x5b0] ss:$56 sps:$4 sm:$0xff]   ;;  %v13024_v24 = vld [vmem:[#allocation2 + $0x5c0] ss:$56 sps:$4 sm:$0xff]   ;;  %vm11349_vm0 = vcmask 1046528  }
  0x7d   : > { %v13025_v25 = vld [vmem:[#allocation2 + $0x624] ss:$56 sps:$4 sm:$0xff]   ;;  %v13027_v26 = vld [vmem:[#allocation2 + $0x634] ss:$56 sps:$4 sm:$0xff]   ;;  %s12631_s22 = sshll.u32 %s16108_s21, 4  ;;  %s12632_s15 = sshll.u32 %s16108_s21, 3 }
  0x7e   : > { %v13029_v27 = vld [vmem:[#allocation2 + $0x620] ss:$56 sps:$4 sm:$0xff]   ;;  %v13030_v28 = vld [vmem:[#allocation2 + $0x630] ss:$56 sps:$4 sm:$0xff]   ;;  %v13031_v29 = vld [vmem:[#allocation2 + $0x694] ss:$56 sps:$4 sm:$0xff]   ;;  %s15548_s14 = scalar_lea.vmem %s16081_s0, %s12631_s22  ;;  %s279_s17 = scalar_lea.vmem %s16086_s5, %s12632_s15 }
  0x7f   : > { %1082 = vmatpush1.bf16.msra.mxu1 %v13005_v11  ;;  %1168 = vmatpush1.bf16.msra.mxu0 %v13006_v12  ;;  %v13033_v30 = vld [vmem:[#allocation2 + $0x6a4] ss:$56 sps:$4 sm:$0xff]   ;;  %v13035_v31 = vld [vmem:[#allocation2 + $0x690] ss:$56 sps:$4 sm:$0xff]   ;;  %v13036_v32 = vld [vmem:[#allocation2 + $0x6a0] ss:$56 sps:$4 sm:$0xff]  }
  0x80   : > { %1083 = vmatprep.subr.bf16.mxu1 %v13007_v13  ;;  %1169 = vmatprep.subr.bf16.mxu0 %v13009_v14  ;;  %v11496_v33 = vld [vmem:[%s15548_s14 + $0x8] sm:$0xf]  ;;  %v11497_v34 = vld [vmem:[%s15548_s14 + $0xc] sm:$0x7]  ;;  %v13044_v36 = vld [vmem:[#allocation2 + $0x3a4] ss:$56 sps:$4 sm:$0xff]  }
  0x81   : > { %v13041_v35 = vld [vmem:[#allocation2 + $0x38c] ss:$56 sps:$4 sm:$0xff]   ;;  %v15552_v37 = vcombine.low %v11496_v33, %v11497_v34  ;;  %v13039_v38 = vld [vmem:[#allocation2 + $0x388] ss:$56 sps:$4 sm:$0xff]   ;;  %v13047_v40 = vld [vmem:[#allocation2 + $0x3fc] ss:$56 sps:$4 sm:$0xff]  }
  0x82   : > { %v13042_v39 = vld [vmem:[#allocation2 + $0x3a0] ss:$56 sps:$4 sm:$0xff]   ;;  %v13050_v41 = vld [vmem:[#allocation2 + $0x414] ss:$56 sps:$4 sm:$0xff]   ;;  %v13048_v43 = vld [vmem:[#allocation2 + $0x410] ss:$56 sps:$4 sm:$0xff]  }
  0x83   : > { %1084 = vmatpush1.bf16.msra.mxu1 %v13011_v15  ;;  %1170 = vmatpush1.bf16.msra.mxu0 %v13012_v16  ;;  %v13045_v42 = vld [vmem:[#allocation2 + $0x3f8] ss:$56 sps:$4 sm:$0xff]   ;;  %v13053_v44 = vld [vmem:[#allocation2 + $0x46c] ss:$56 sps:$4 sm:$0xff]   ;;  %v13051_v46 = vld [vmem:[#allocation2 + $0x468] ss:$56 sps:$4 sm:$0xff]  }
  0x84   : > { %1085 = vmatprep.subr.bf16.mxu1 %v13013_v17  ;;  %1171 = vmatprep.subr.bf16.mxu0 %v13015_v18  ;;  %v13056_v45 = vld [vmem:[#allocation2 + $0x484] ss:$56 sps:$4 sm:$0xff]   ;;  %v13054_v47 = vld [vmem:[#allocation2 + $0x480] ss:$56 sps:$4 sm:$0xff]   ;;  %v13062_v49 = vld [vmem:[#allocation2 + $0x4f4] ss:$56 sps:$4 sm:$0xff]  }
  0x85   : > { %v13059_v48 = vld [vmem:[#allocation2 + $0x4dc] ss:$56 sps:$4 sm:$0xff]   ;;  %v13057_v50 = vld [vmem:[#allocation2 + $0x4d8] ss:$56 sps:$4 sm:$0xff]   ;;  %v13065_v52 = vld [vmem:[#allocation2 + $0x54c] ss:$56 sps:$4 sm:$0xff]  }
  0x86   : > { %v13060_v51 = vld [vmem:[#allocation2 + $0x4f0] ss:$56 sps:$4 sm:$0xff]   ;;  %v13068_v53 = vld [vmem:[#allocation2 + $0x564] ss:$56 sps:$4 sm:$0xff]   ;;  %v13066_v55 = vld [vmem:[#allocation2 + $0x560] ss:$56 sps:$4 sm:$0xff]  }
  0x87   : > { %1086 = vmatpush1.bf16.msra.mxu1 %v13017_v19  ;;  %1172 = vmatpush1.bf16.msra.mxu0 %v13018_v20  ;;  %v13063_v54 = vld [vmem:[#allocation2 + $0x548] ss:$56 sps:$4 sm:$0xff]   ;;  %v13071_v56 = vld [vmem:[#allocation2 + $0x5bc] ss:$56 sps:$4 sm:$0xff]   ;;  %v13069_v58 = vld [vmem:[#allocation2 + $0x5b8] ss:$56 sps:$4 sm:$0xff]  }
  0x88   : > { %1087 = vmatprep.subr.bf16.mxu1 %v13019_v21  ;;  %1173 = vmatprep.subr.bf16.mxu0 %v13021_v22  ;;  %v13074_v57 = vld [vmem:[#allocation2 + $0x5d4] ss:$56 sps:$4 sm:$0xff]   ;;  %v13072_v59 = vld [vmem:[#allocation2 + $0x5d0] ss:$56 sps:$4 sm:$0xff]   ;;  %v13080_v61 = vld [vmem:[#allocation2 + $0x644] ss:$56 sps:$4 sm:$0xff]  }
  0x89   : > { %v13077_v60 = vld [vmem:[#allocation2 + $0x62c] ss:$56 sps:$4 sm:$0xff]   ;;  %v13075_v62 = vld [vmem:[#allocation2 + $0x628] ss:$56 sps:$4 sm:$0xff]   ;;  %v13083_v1 = vld [vmem:[#allocation2 + $0x69c] ss:$56 sps:$4 sm:$0xff]  }
  0x8a   : > { %v13078_v63 = vld [vmem:[#allocation2 + $0x640] ss:$56 sps:$4 sm:$0xff]   ;;  %v13086_v2 = vld [vmem:[#allocation2 + $0x6b4] ss:$56 sps:$4 sm:$0xff]   ;;  %v13084_v4 = vld [vmem:[#allocation2 + $0x6b0] ss:$56 sps:$4 sm:$0xff]  }
  0x8b   : > { %1088 = vmatpush1.bf16.msra.mxu1 %v13023_v23  ;;  %1174 = vmatpush1.bf16.msra.mxu0 %v13024_v24  ;;  %v13081_v3 = vld [vmem:[#allocation2 + $0x698] ss:$56 sps:$4 sm:$0xff]   ;;  %v13089_v5 = vld [vmem:[#allocation2 + $0x39c] ss:$56 sps:$4 sm:$0xff]   ;;  %v13095_v9 = vld [vmem:[#allocation2 + $0x40c] ss:$56 sps:$4 sm:$0xff]  }
  0x8c   : > { %1089 = vmatprep.subr.bf16.mxu1 %v13025_v25  ;;  %1175 = vmatprep.subr.bf16.mxu0 %v13027_v26  ;;  %v13092_v6 = vld [vmem:[#allocation2 + $0x3b4] ss:$56 sps:$4 sm:$0xff]   ;;  %v13087_v7 = vld [vmem:[#allocation2 + $0x398] ss:$56 sps:$4 sm:$0xff]   ;;  %v13098_v10 = vld [vmem:[#allocation2 + $0x424] ss:$56 sps:$4 sm:$0xff]  }
  0x8d   : > { %v13090_v8 = vld [vmem:[#allocation2 + $0x3b0] ss:$56 sps:$4 sm:$0xff]   ;;  %v13096_v12 = vld [vmem:[#allocation2 + $0x420] ss:$56 sps:$4 sm:$0xff]   ;;  %v13101_v13 = vld [vmem:[#allocation2 + $0x47c] ss:$56 sps:$4 sm:$0xff]  }
  0x8e   : > { %v13093_v11 = vld [vmem:[#allocation2 + $0x408] ss:$56 sps:$4 sm:$0xff]   ;;  %v13104_v14 = vld [vmem:[#allocation2 + $0x494] ss:$56 sps:$4 sm:$0xff]   ;;  %v13099_v15 = vld [vmem:[#allocation2 + $0x478] ss:$56 sps:$4 sm:$0xff]  }
  0x8f   : > { %1090 = vmatpush1.bf16.msra.mxu1 %v13029_v27  ;;  %1176 = vmatpush1.bf16.msra.mxu0 %v13030_v28  ;;  %v13102_v16 = vld [vmem:[#allocation2 + $0x490] ss:$56 sps:$4 sm:$0xff]   ;;  %v13107_v17 = vld [vmem:[#allocation2 + $0x4ec] ss:$56 sps:$4 sm:$0xff]   ;;  %v13108_v20 = vld [vmem:[#allocation2 + $0x500] ss:$56 sps:$4 sm:$0xff]  }
  0x90   : > { %1091 = vmatprep.subr.bf16.mxu1 %v13031_v29  ;;  %1177 = vmatprep.subr.bf16.mxu0 %v13033_v30  ;;  %v13110_v18 = vld [vmem:[#allocation2 + $0x504] ss:$56 sps:$4 sm:$0xff]   ;;  %v13105_v19 = vld [vmem:[#allocation2 + $0x4e8] ss:$56 sps:$4 sm:$0xff]   ;;  %v13116_v22 = vld [vmem:[#allocation2 + $0x574] ss:$56 sps:$4 sm:$0xff]  }
  0x91   : > { %v13113_v21 = vld [vmem:[#allocation2 + $0x55c] ss:$56 sps:$4 sm:$0xff]   ;;  %v13111_v23 = vld [vmem:[#allocation2 + $0x558] ss:$56 sps:$4 sm:$0xff]   ;;  %v13119_v25 = vld [vmem:[#allocation2 + $0x5cc] ss:$56 sps:$4 sm:$0xff]  }
  0x92   : > { %v13114_v24 = vld [vmem:[#allocation2 + $0x570] ss:$56 sps:$4 sm:$0xff]   ;;  %v13122_v26 = vld [vmem:[#allocation2 + $0x5e4] ss:$56 sps:$4 sm:$0xff]   ;;  %v13120_v28 = vld [vmem:[#allocation2 + $0x5e0] ss:$56 sps:$4 sm:$0xff]  }
  0x93   : > { %1092 = vmatpush1.bf16.msra.mxu1 %v13035_v31  ;;  %1178 = vmatpush1.bf16.msra.mxu0 %v13036_v32  ;;  %v13117_v27 = vld [vmem:[#allocation2 + $0x5c8] ss:$56 sps:$4 sm:$0xff]   ;;  %v13125_v29 = vld [vmem:[#allocation2 + $0x63c] ss:$56 sps:$4 sm:$0xff]   ;;  %v13123_v31 = vld [vmem:[#allocation2 + $0x638] ss:$56 sps:$4 sm:$0xff]  }
  0x94   : > { %1120 = vmatprep.subr.bf16.mxu1 %v13041_v35  ;;  %1249 = vmatprep.subr.bf16.mxu0 %v13044_v36  ;;  %v13128_v30 = vld [vmem:[#allocation2 + $0x654] ss:$56 sps:$4 sm:$0xff]   ;;  %v13126_v32 = vld [vmem:[#allocation2 + $0x650] ss:$56 sps:$4 sm:$0xff]   ;;  %v13134_v34 = vld [vmem:[#allocation2 + $0x6c4] ss:$56 sps:$4 sm:$0xff]  }
  0x95   : > { %v13131_v33 = vld [vmem:[#allocation2 + $0x6ac] ss:$56 sps:$4 sm:$0xff]   ;;  %v13129_v35 = vld [vmem:[#allocation2 + $0x6a8] ss:$56 sps:$4 sm:$0xff]   ;;  %vm11377_vm1 = vcmask 1040384  }
  0x96   : > { %1110 = vmatmul.mubr.bf16.vlgmr.msra.gmra.mrb[0].mxu1 %v15552_v37  ;;  %1196 = vmatmul.mubr.bf16.vlgmr.msra.gmra.mrb[0].mxu0 %v15552_v37  ;;  %v13132_v36 = vld [vmem:[#allocation2 + $0x6c0] ss:$56 sps:$4 sm:$0xff]   ;;  %vm11378_vm2 = vsmask.f32 256 }
  0x97   : > { %1121 = vmatpush1.bf16.msra.mxu1 %v13039_v38  ;;  %1250 = vmatpush1.bf16.msra.mxu0 %v13042_v39  ;;  %v13137_v38 = vld [vmem:[#allocation2 + $0x3ac] ss:$56 sps:$4 sm:$0xff]   ;;  %vm11379_vm3 = vmand %vm11377_vm1, %vm11378_vm2 }
  0x98   : > { %1122 = vmatprep.subr.bf16.mxu1 %v13047_v40  ;;  %1251 = vmatprep.subr.bf16.mxu0 %v13050_v41  ;;  %v13140_v39 = vld [vmem:[#allocation2 + $0x4] ss:$56 sps:$4 sm:$0xff]   ;;  %v13135_v40 = vld [vmem:[#allocation2 + $0x3a8] ss:$56 sps:$4 sm:$0xff]  }
  0x99   : > { %1152 = vmatprep.mubr.bf16.mxu1 %v16089_v0  ;;  %1281 = vmatprep.mubr.bf16.mxu0 %v16089_v0  ;;  %v13138_v41 = vld [vmem:[#allocation2] ss:$56 sps:$4 sm:$0xff]  }
  0x9b   : > { %1123 = vmatpush1.bf16.msra.mxu1 %v13045_v42  ;;  %1252 = vmatpush1.bf16.msra.mxu0 %v13048_v43  ;;  %v13143_v42 = vld [vmem:[#allocation2 + $0x41c] ss:$56 sps:$4 sm:$0xff]  }
  0x9c   : > { %1124 = vmatprep.subr.bf16.mxu1 %v13053_v44  ;;  %1253 = vmatprep.subr.bf16.mxu0 %v13056_v45  ;;  %v13146_v43 = vld [vmem:[#allocation2 + $0x74] ss:$56 sps:$4 sm:$0xff]   ;;  %v13141_v44 = vld [vmem:[#allocation2 + $0x418] ss:$56 sps:$4 sm:$0xff]  }
  0x9d   : > { %v13144_v45 = vld [vmem:[#allocation2 + $0x70] ss:$56 sps:$4 sm:$0xff]  }
  0x9f   : > { %1125 = vmatpush1.bf16.msra.mxu1 %v13051_v46  ;;  %1254 = vmatpush1.bf16.msra.mxu0 %v13054_v47  ;;  %v13149_v46 = vld [vmem:[#allocation2 + $0x48c] ss:$56 sps:$4 sm:$0xff]  }
  0xa0   : > { %1126 = vmatprep.subr.bf16.mxu1 %v13059_v48  ;;  %1255 = vmatprep.subr.bf16.mxu0 %v13062_v49  ;;  %v13152_v47 = vld [vmem:[#allocation2 + $0xe4] ss:$56 sps:$4 sm:$0xff]   ;;  %v13147_v48 = vld [vmem:[#allocation2 + $0x488] ss:$56 sps:$4 sm:$0xff]  }
  0xa1   : > { %v13150_v49 = vld [vmem:[#allocation2 + $0xe0] ss:$56 sps:$4 sm:$0xff]  }
  0xa3   : > { %1127 = vmatpush1.bf16.msra.mxu1 %v13057_v50  ;;  %1256 = vmatpush1.bf16.msra.mxu0 %v13060_v51  ;;  %v13155_v50 = vld [vmem:[#allocation2 + $0x4fc] ss:$56 sps:$4 sm:$0xff]  }
  0xa4   : > { %1128 = vmatprep.subr.bf16.mxu1 %v13065_v52  ;;  %1257 = vmatprep.subr.bf16.mxu0 %v13068_v53  ;;  %v13158_v51 = vld [vmem:[#allocation2 + $0x154] ss:$56 sps:$4 sm:$0xff]   ;;  %v13153_v52 = vld [vmem:[#allocation2 + $0x4f8] ss:$56 sps:$4 sm:$0xff]  }
  0xa5   : > { %v13156_v53 = vld [vmem:[#allocation2 + $0x150] ss:$56 sps:$4 sm:$0xff]  }
  0xa7   : > { %1129 = vmatpush1.bf16.msra.mxu1 %v13063_v54  ;;  %1258 = vmatpush1.bf16.msra.mxu0 %v13066_v55  ;;  %v13161_v54 = vld [vmem:[#allocation2 + $0x56c] ss:$56 sps:$4 sm:$0xff]  }
  0xa8   : > { %1130 = vmatprep.subr.bf16.mxu1 %v13071_v56  ;;  %1259 = vmatprep.subr.bf16.mxu0 %v13074_v57  ;;  %v13164_v55 = vld [vmem:[#allocation2 + $0x1c4] ss:$56 sps:$4 sm:$0xff]   ;;  %v13159_v56 = vld [vmem:[#allocation2 + $0x568] ss:$56 sps:$4 sm:$0xff]  }
  0xa9   : > { %v13162_v57 = vld [vmem:[#allocation2 + $0x1c0] ss:$56 sps:$4 sm:$0xff]  }
  0xab   : > { %1131 = vmatpush1.bf16.msra.mxu1 %v13069_v58  ;;  %1260 = vmatpush1.bf16.msra.mxu0 %v13072_v59  ;;  %v13167_v58 = vld [vmem:[#allocation2 + $0x5dc] ss:$56 sps:$4 sm:$0xff]  }
  0xac   : > { %1132 = vmatprep.subr.bf16.mxu1 %v13077_v60  ;;  %1261 = vmatprep.subr.bf16.mxu0 %v13080_v61  ;;  %v13170_v59 = vld [vmem:[#allocation2 + $0x234] ss:$56 sps:$4 sm:$0xff]   ;;  %v13165_v60 = vld [vmem:[#allocation2 + $0x5d8] ss:$56 sps:$4 sm:$0xff]  }
  0xad   : > { %v13168_v61 = vld [vmem:[#allocation2 + $0x230] ss:$56 sps:$4 sm:$0xff]  }
  0xaf   : > { %1133 = vmatpush1.bf16.msra.mxu1 %v13075_v62  ;;  %1262 = vmatpush1.bf16.msra.mxu0 %v13078_v63  ;;  %v13173_v62 = vld [vmem:[#allocation2 + $0x64c] ss:$56 sps:$4 sm:$0xff]  }
  0xb0   : > { %1134 = vmatprep.subr.bf16.mxu1 %v13083_v1  ;;  %1263 = vmatprep.subr.bf16.mxu0 %v13086_v2  ;;  %v13176_v63 = vld [vmem:[#allocation2 + $0x2a4] ss:$56 sps:$4 sm:$0xff]   ;;  %v13171_v1 = vld [vmem:[#allocation2 + $0x648] ss:$56 sps:$4 sm:$0xff]  }
  0xb1   : > { %v13174_v2 = vld [vmem:[#allocation2 + $0x2a0] ss:$56 sps:$4 sm:$0xff]  }
  0xb3   : > { %1135 = vmatpush1.bf16.msra.mxu1 %v13081_v3  ;;  %1264 = vmatpush1.bf16.msra.mxu0 %v13084_v4  ;;  %v13179_v3 = vld [vmem:[#allocation2 + $0x6bc] ss:$56 sps:$4 sm:$0xff]  }
  0xb4   : > { %1206 = vmatprep.subr.bf16.mxu1 %v13089_v5  ;;  %1335 = vmatprep.subr.bf16.mxu0 %v13092_v6  ;;  %v13182_v4 = vld [vmem:[#allocation2 + $0x314] ss:$56 sps:$4 sm:$0xff]   ;;  %v13177_v5 = vld [vmem:[#allocation2 + $0x6b8] ss:$56 sps:$4 sm:$0xff]  }
  0xb5   : > { %v13180_v6 = vld [vmem:[#allocation2 + $0x310] ss:$56 sps:$4 sm:$0xff]  }
  0xb6   : > { %1153 = vmatmul.mubr.bf16.vlgmr.msra.gmra.mrb[4].mxu1 %v15552_v37  ;;  %1282 = vmatmul.mubr.bf16.vlgmr.msra.gmra.mrb[4].mxu0 %v15552_v37 }
  0xb7   : > { %1207 = vmatpush1.bf16.msra.mxu1 %v13087_v7  ;;  %1336 = vmatpush1.bf16.msra.mxu0 %v13090_v8  ;;  %v13185_v7 = vld [vmem:[#allocation2 + $0xc] ss:$56 sps:$4 sm:$0xff]   ;;  %v15567_v8 = vld [vmem:[%s15548_s14] sm:$0xf] }
  0xb8   : > { %1208 = vmatprep.subr.bf16.mxu1 %v13095_v9  ;;  %1337 = vmatprep.subr.bf16.mxu0 %v13098_v10  ;;  %v282_v9 = vld [vmem:[%s15548_s14 + $0x4] sm:$0x7]  ;;  %v13188_v10 = vld [vmem:[#allocation2 + $0x14] ss:$56 sps:$4 sm:$0xff]  }
  0xb9   : > { %1238 = vmatprep.mubr.bf16.mxu1 %v16089_v0  ;;  %1367 = vmatprep.mubr.bf16.mxu0 %v16089_v0 }
  0xbb   : > { %1209 = vmatpush1.bf16.msra.mxu1 %v13093_v11  ;;  %1338 = vmatpush1.bf16.msra.mxu0 %v13096_v12  ;;  %v13183_v11 = vld [vmem:[#allocation2 + $0x8] ss:$56 sps:$4 sm:$0xff]   ;;  %v15571_v12 = vcombine.low %v15567_v8, %v282_v9  ;;  %v13278_v9 = vld [vmem:[#allocation2 + $0x32c] ss:$56 sps:$4 sm:$0xff]  }
  0xbc   : > { %1210 = vmatprep.subr.bf16.mxu1 %v13101_v13  ;;  %1339 = vmatprep.subr.bf16.mxu0 %v13104_v14  ;;  %v13186_v13 = vld [vmem:[#allocation2 + $0x10] ss:$56 sps:$4 sm:$0xff]   ;;  %v13194_v14 = vld [vmem:[#allocation2 + $0x7c] ss:$56 sps:$4 sm:$0xff]  }
  0xbf   : > { %1211 = vmatpush1.bf16.msra.mxu1 %v13099_v15  ;;  %1340 = vmatpush1.bf16.msra.mxu0 %v13102_v16  ;;  %v13197_v15 = vld [vmem:[#allocation2 + $0x84] ss:$56 sps:$4 sm:$0xff]   ;;  %v13192_v16 = vld [vmem:[#allocation2 + $0x78] ss:$56 sps:$4 sm:$0xff]  }
  0xc0   : > { %1212 = vmatprep.subr.bf16.mxu1 %v13107_v17  ;;  %1341 = vmatprep.subr.bf16.mxu0 %v13110_v18  ;;  %v13195_v17 = vld [vmem:[#allocation2 + $0x80] ss:$56 sps:$4 sm:$0xff]   ;;  %v13200_v18 = vld [vmem:[#allocation2 + $0xec] ss:$56 sps:$4 sm:$0xff]  }
  0xc3   : > { %1213 = vmatpush1.bf16.msra.mxu1 %v13105_v19  ;;  %1342 = vmatpush1.bf16.msra.mxu0 %v13108_v20  ;;  %v13203_v19 = vld [vmem:[#allocation2 + $0xf4] ss:$56 sps:$4 sm:$0xff]   ;;  %v13198_v20 = vld [vmem:[#allocation2 + $0xe8] ss:$56 sps:$4 sm:$0xff]  }
  0xc4   : > { %1214 = vmatprep.subr.bf16.mxu1 %v13113_v21  ;;  %1343 = vmatprep.subr.bf16.mxu0 %v13116_v22  ;;  %v13201_v21 = vld [vmem:[#allocation2 + $0xf0] ss:$56 sps:$4 sm:$0xff]   ;;  %v13206_v22 = vld [vmem:[#allocation2 + $0x15c] ss:$56 sps:$4 sm:$0xff]  }
  0xc7   : > { %1215 = vmatpush1.bf16.msra.mxu1 %v13111_v23  ;;  %1344 = vmatpush1.bf16.msra.mxu0 %v13114_v24  ;;  %v13209_v23 = vld [vmem:[#allocation2 + $0x164] ss:$56 sps:$4 sm:$0xff]   ;;  %v13204_v24 = vld [vmem:[#allocation2 + $0x158] ss:$56 sps:$4 sm:$0xff]  }
  0xc8   : > { %1216 = vmatprep.subr.bf16.mxu1 %v13119_v25  ;;  %1345 = vmatprep.subr.bf16.mxu0 %v13122_v26  ;;  %v13207_v25 = vld [vmem:[#allocation2 + $0x160] ss:$56 sps:$4 sm:$0xff]   ;;  %v13212_v26 = vld [vmem:[#allocation2 + $0x1cc] ss:$56 sps:$4 sm:$0xff]  }
  0xcb   : > { %1217 = vmatpush1.bf16.msra.mxu1 %v13117_v27  ;;  %1346 = vmatpush1.bf16.msra.mxu0 %v13120_v28  ;;  %v13215_v27 = vld [vmem:[#allocation2 + $0x1d4] ss:$56 sps:$4 sm:$0xff]   ;;  %v13210_v28 = vld [vmem:[#allocation2 + $0x1c8] ss:$56 sps:$4 sm:$0xff]  }
  0xcc   : > { %1218 = vmatprep.subr.bf16.mxu1 %v13125_v29  ;;  %1347 = vmatprep.subr.bf16.mxu0 %v13128_v30  ;;  %v13213_v29 = vld [vmem:[#allocation2 + $0x1d0] ss:$56 sps:$4 sm:$0xff]   ;;  %v13218_v30 = vld [vmem:[#allocation2 + $0x23c] ss:$56 sps:$4 sm:$0xff]  }
  0xcf   : > { %1219 = vmatpush1.bf16.msra.mxu1 %v13123_v31  ;;  %1348 = vmatpush1.bf16.msra.mxu0 %v13126_v32  ;;  %v13221_v31 = vld [vmem:[#allocation2 + $0x244] ss:$56 sps:$4 sm:$0xff]   ;;  %v13216_v32 = vld [vmem:[#allocation2 + $0x238] ss:$56 sps:$4 sm:$0xff]  }
  0xd0   : > { %1220 = vmatprep.subr.bf16.mxu1 %v13131_v33  ;;  %1349 = vmatprep.subr.bf16.mxu0 %v13134_v34  ;;  %v13219_v33 = vld [vmem:[#allocation2 + $0x240] ss:$56 sps:$4 sm:$0xff]   ;;  %v13224_v34 = vld [vmem:[#allocation2 + $0x2ac] ss:$56 sps:$4 sm:$0xff]  }
  0xd3   : > { %1221 = vmatpush1.bf16.msra.mxu1 %v13129_v35  ;;  %1350 = vmatpush1.bf16.msra.mxu0 %v13132_v36  ;;  %v13227_v35 = vld [vmem:[#allocation2 + $0x2b4] ss:$56 sps:$4 sm:$0xff]   ;;  %v13222_v36 = vld [vmem:[#allocation2 + $0x2a8] ss:$56 sps:$4 sm:$0xff]  }
  0xd4   : > { %1292 = vmatprep.subr.bf16.mxu1 %v13137_v38  ;;  %1944 = vmatprep.subr.bf16.mxu0 %v13140_v39  ;;  %v13225_v38 = vld [vmem:[#allocation2 + $0x2b0] ss:$56 sps:$4 sm:$0xff]   ;;  %v13230_v39 = vld [vmem:[#allocation2 + $0x31c] ss:$56 sps:$4 sm:$0xff]  }
  0xd6   : > { %1239 = vmatmul.mubr.bf16.vlgmr.msra.gmra.mrb[8].mxu1 %v15552_v37  ;;  %1368 = vmatmul.mubr.bf16.vlgmr.msra.gmra.mrb[8].mxu0 %v15552_v37 }
  0xd7   : > { %1293 = vmatpush1.bf16.msra.mxu1 %v13135_v40  ;;  %1945 = vmatpush1.bf16.msra.mxu0 %v13138_v41  ;;  %v13233_v40 = vld [vmem:[#allocation2 + $0x324] ss:$56 sps:$4 sm:$0xff]   ;;  %v13228_v41 = vld [vmem:[#allocation2 + $0x318] ss:$56 sps:$4 sm:$0xff]  }
  0xd8   : > { %1294 = vmatprep.subr.bf16.mxu1 %v13143_v42  ;;  %1946 = vmatprep.subr.bf16.mxu0 %v13146_v43  ;;  %v13231_v42 = vld [vmem:[#allocation2 + $0x320] ss:$56 sps:$4 sm:$0xff]   ;;  %v13236_v43 = vld [vmem:[#allocation2 + $0x1c] ss:$56 sps:$4 sm:$0xff]  }
  0xd9   : > { %1324 = vmatprep.mubr.bf16.mxu1 %v16089_v0  ;;  %1976 = vmatprep.mubr.bf16.mxu0 %v16089_v0 }
  0xdb   : > { %1295 = vmatpush1.bf16.msra.mxu1 %v13141_v44  ;;  %1947 = vmatpush1.bf16.msra.mxu0 %v13144_v45  ;;  %v13239_v44 = vld [vmem:[#allocation2 + $0x24] ss:$56 sps:$4 sm:$0xff]   ;;  %v13234_v45 = vld [vmem:[#allocation2 + $0x18] ss:$56 sps:$4 sm:$0xff]  }
  0xdc   : > { %1296 = vmatprep.subr.bf16.mxu1 %v13149_v46  ;;  %1948 = vmatprep.subr.bf16.mxu0 %v13152_v47  ;;  %v13237_v46 = vld [vmem:[#allocation2 + $0x20] ss:$56 sps:$4 sm:$0xff]   ;;  %v13242_v47 = vld [vmem:[#allocation2 + $0x8c] ss:$56 sps:$4 sm:$0xff]  }
  0xdf   : > { %1297 = vmatpush1.bf16.msra.mxu1 %v13147_v48  ;;  %1949 = vmatpush1.bf16.msra.mxu0 %v13150_v49  ;;  %v13245_v48 = vld [vmem:[#allocation2 + $0x94] ss:$56 sps:$4 sm:$0xff]   ;;  %v13240_v49 = vld [vmem:[#allocation2 + $0x88] ss:$56 sps:$4 sm:$0xff]  }
  0xe0   : > { %1298 = vmatprep.subr.bf16.mxu1 %v13155_v50  ;;  %1950 = vmatprep.subr.bf16.mxu0 %v13158_v51  ;;  %v13243_v50 = vld [vmem:[#allocation2 + $0x90] ss:$56 sps:$4 sm:$0xff]   ;;  %v13248_v51 = vld [vmem:[#allocation2 + $0xfc] ss:$56 sps:$4 sm:$0xff]  }
  0xe3   : > { %1299 = vmatpush1.bf16.msra.mxu1 %v13153_v52  ;;  %1951 = vmatpush1.bf16.msra.mxu0 %v13156_v53  ;;  %v13251_v52 = vld [vmem:[#allocation2 + $0x104] ss:$56 sps:$4 sm:$0xff]   ;;  %v13246_v53 = vld [vmem:[#allocation2 + $0xf8] ss:$56 sps:$4 sm:$0xff]  }
  0xe4   : > { %1300 = vmatprep.subr.bf16.mxu1 %v13161_v54  ;;  %1952 = vmatprep.subr.bf16.mxu0 %v13164_v55  ;;  %v13249_v54 = vld [vmem:[#allocation2 + $0x100] ss:$56 sps:$4 sm:$0xff]   ;;  %v13254_v55 = vld [vmem:[#allocation2 + $0x16c] ss:$56 sps:$4 sm:$0xff]  }
  0xe7   : > { %1301 = vmatpush1.bf16.msra.mxu1 %v13159_v56  ;;  %1953 = vmatpush1.bf16.msra.mxu0 %v13162_v57  ;;  %v13257_v56 = vld [vmem:[#allocation2 + $0x174] ss:$56 sps:$4 sm:$0xff]   ;;  %v13252_v57 = vld [vmem:[#allocation2 + $0x168] ss:$56 sps:$4 sm:$0xff]  }
  0xe8   : > { %1302 = vmatprep.subr.bf16.mxu1 %v13167_v58  ;;  %1954 = vmatprep.subr.bf16.mxu0 %v13170_v59  ;;  %v13255_v58 = vld [vmem:[#allocation2 + $0x170] ss:$56 sps:$4 sm:$0xff]   ;;  %v13260_v59 = vld [vmem:[#allocation2 + $0x1dc] ss:$56 sps:$4 sm:$0xff]  }
  0xeb   : > { %1303 = vmatpush1.bf16.msra.mxu1 %v13165_v60  ;;  %1955 = vmatpush1.bf16.msra.mxu0 %v13168_v61  ;;  %v13263_v60 = vld [vmem:[#allocation2 + $0x1e4] ss:$56 sps:$4 sm:$0xff]   ;;  %v13258_v61 = vld [vmem:[#allocation2 + $0x1d8] ss:$56 sps:$4 sm:$0xff]  }
  0xec   : > { %1304 = vmatprep.subr.bf16.mxu1 %v13173_v62  ;;  %1956 = vmatprep.subr.bf16.mxu0 %v13176_v63  ;;  %v13261_v62 = vld [vmem:[#allocation2 + $0x1e0] ss:$56 sps:$4 sm:$0xff]   ;;  %v13266_v63 = vld [vmem:[#allocation2 + $0x24c] ss:$56 sps:$4 sm:$0xff]  }
  0xef   : > { %1305 = vmatpush1.bf16.msra.mxu1 %v13171_v1  ;;  %1957 = vmatpush1.bf16.msra.mxu0 %v13174_v2  ;;  %v13269_v1 = vld [vmem:[#allocation2 + $0x254] ss:$56 sps:$4 sm:$0xff]   ;;  %v13264_v2 = vld [vmem:[#allocation2 + $0x248] ss:$56 sps:$4 sm:$0xff]  }
  0xf0   : > { %1306 = vmatprep.subr.bf16.mxu1 %v13179_v3  ;;  %1958 = vmatprep.subr.bf16.mxu0 %v13182_v4  ;;  %v13267_v3 = vld [vmem:[#allocation2 + $0x250] ss:$56 sps:$4 sm:$0xff]   ;;  %v13272_v4 = vld [vmem:[#allocation2 + $0x2bc] ss:$56 sps:$4 sm:$0xff]  }
  0xf3   : > { %1307 = vmatpush1.bf16.msra.mxu1 %v13177_v5  ;;  %1959 = vmatpush1.bf16.msra.mxu0 %v13180_v6  ;;  %v13275_v5 = vld [vmem:[#allocation2 + $0x2c4] ss:$56 sps:$4 sm:$0xff]   ;;  %v13270_v6 = vld [vmem:[#allocation2 + $0x2b8] ss:$56 sps:$4 sm:$0xff]  }
  0xf4   : > { %1987 = vmatprep.subr.bf16.mxu1 %v13185_v7  ;;  %2030 = vmatprep.subr.bf16.mxu0 %v13188_v10  ;;  %v13273_v7 = vld [vmem:[#allocation2 + $0x2c0] ss:$56 sps:$4 sm:$0xff]   ;;  %v13281_v10 = vld [vmem:[#allocation2 + $0x334] ss:$56 sps:$4 sm:$0xff]  }
  0xf6   : > { %1325 = vmatmul.mubr.bf16.vlgmr.msra.gmra.mrb[12].mxu1 %v15552_v37  ;;  %1977 = vmatmul.mubr.bf16.vlgmr.msra.gmra.mrb[12].mxu0 %v15571_v12 }
  0xf7   : > { %1988 = vmatpush1.bf16.msra.mxu1 %v13183_v11  ;;  %2031 = vmatpush1.bf16.msra.mxu0 %v13186_v13  ;;  %v13276_v11 = vld [vmem:[#allocation2 + $0x328] ss:$56 sps:$4 sm:$0xff]  }
  0xf8   : > { %1989 = vmatprep.subr.bf16.mxu1 %v13194_v14  ;;  %2032 = vmatprep.subr.bf16.mxu0 %v13197_v15  ;;  %v13279_v13 = vld [vmem:[#allocation2 + $0x330] ss:$56 sps:$4 sm:$0xff]   ;;  %v13284_v14 = vld [vmem:[#allocation2 + $0x2c] ss:$56 sps:$4 sm:$0xff]  }
  0xf9   : > { %2019 = vmatprep.mubr.bf16.mxu1 %v16089_v0  ;;  %2062 = vmatprep.mubr.bf16.mxu0 %v16089_v0  ;;  %v13287_v15 = vld [vmem:[#allocation2 + $0x34] ss:$56 sps:$4 sm:$0xff]  }
  0xfb   : > { %1990 = vmatpush1.bf16.msra.mxu1 %v13192_v16  ;;  %2033 = vmatpush1.bf16.msra.mxu0 %v13195_v17  ;;  %v13282_v16 = vld [vmem:[#allocation2 + $0x28] ss:$56 sps:$4 sm:$0xff]  }
  0xfc   : > { %1991 = vmatprep.subr.bf16.mxu1 %v13200_v18  ;;  %2034 = vmatprep.subr.bf16.mxu0 %v13203_v19  ;;  %v13285_v17 = vld [vmem:[#allocation2 + $0x30] ss:$56 sps:$4 sm:$0xff]   ;;  %v13290_v18 = vld [vmem:[#allocation2 + $0x9c] ss:$56 sps:$4 sm:$0xff]  }
  0xfd   : > { %v13293_v19 = vld [vmem:[#allocation2 + $0xa4] ss:$56 sps:$4 sm:$0xff]  }
  0xff   : > { %1992 = vmatpush1.bf16.msra.mxu1 %v13198_v20  ;;  %2035 = vmatpush1.bf16.msra.mxu0 %v13201_v21  ;;  %v13288_v20 = vld [vmem:[#allocation2 + $0x98] ss:$56 sps:$4 sm:$0xff]  }
 0x100   : > { %1993 = vmatprep.subr.bf16.mxu1 %v13206_v22  ;;  %2036 = vmatprep.subr.bf16.mxu0 %v13209_v23  ;;  %v13291_v21 = vld [vmem:[#allocation2 + $0xa0] ss:$56 sps:$4 sm:$0xff]   ;;  %v13296_v22 = vld [vmem:[#allocation2 + $0x10c] ss:$56 sps:$4 sm:$0xff]  }
 0x101   : > { %v13299_v23 = vld [vmem:[#allocation2 + $0x114] ss:$56 sps:$4 sm:$0xff]  }
 0x103   : > { %1994 = vmatpush1.bf16.msra.mxu1 %v13204_v24  ;;  %2037 = vmatpush1.bf16.msra.mxu0 %v13207_v25  ;;  %v13294_v24 = vld [vmem:[#allocation2 + $0x108] ss:$56 sps:$4 sm:$0xff]  }
 0x104   : > { %1995 = vmatprep.subr.bf16.mxu1 %v13212_v26  ;;  %2038 = vmatprep.subr.bf16.mxu0 %v13215_v27  ;;  %v13297_v25 = vld [vmem:[#allocation2 + $0x110] ss:$56 sps:$4 sm:$0xff]   ;;  %v13302_v26 = vld [vmem:[#allocation2 + $0x17c] ss:$56 sps:$4 sm:$0xff]  }
 0x105   : > { %v13305_v27 = vld [vmem:[#allocation2 + $0x184] ss:$56 sps:$4 sm:$0xff]  }
 0x107   : > { %1996 = vmatpush1.bf16.msra.mxu1 %v13210_v28  ;;  %2039 = vmatpush1.bf16.msra.mxu0 %v13213_v29  ;;  %v13300_v28 = vld [vmem:[#allocation2 + $0x178] ss:$56 sps:$4 sm:$0xff]  }
 0x108   : > { %1997 = vmatprep.subr.bf16.mxu1 %v13218_v30  ;;  %2040 = vmatprep.subr.bf16.mxu0 %v13221_v31  ;;  %v13303_v29 = vld [vmem:[#allocation2 + $0x180] ss:$56 sps:$4 sm:$0xff]   ;;  %v13308_v30 = vld [vmem:[#allocation2 + $0x1ec] ss:$56 sps:$4 sm:$0xff]  }
 0x109   : > { %v13311_v31 = vld [vmem:[#allocation2 + $0x1f4] ss:$56 sps:$4 sm:$0xff]  }
 0x10b   : > { %1998 = vmatpush1.bf16.msra.mxu1 %v13216_v32  ;;  %2041 = vmatpush1.bf16.msra.mxu0 %v13219_v33  ;;  %v13306_v32 = vld [vmem:[#allocation2 + $0x1e8] ss:$56 sps:$4 sm:$0xff]  }
 0x10c   : > { %1999 = vmatprep.subr.bf16.mxu1 %v13224_v34  ;;  %2042 = vmatprep.subr.bf16.mxu0 %v13227_v35  ;;  %v13309_v33 = vld [vmem:[#allocation2 + $0x1f0] ss:$56 sps:$4 sm:$0xff]   ;;  %v13314_v34 = vld [vmem:[#allocation2 + $0x25c] ss:$56 sps:$4 sm:$0xff]  }
 0x10d   : > { %v13317_v35 = vld [vmem:[#allocation2 + $0x264] ss:$56 sps:$4 sm:$0xff]  }
 0x10f   : > { %2000 = vmatpush1.bf16.msra.mxu1 %v13222_v36  ;;  %2043 = vmatpush1.bf16.msra.mxu0 %v13225_v38  ;;  %v13312_v36 = vld [vmem:[#allocation2 + $0x258] ss:$56 sps:$4 sm:$0xff]  }
 0x110   : > { %2001 = vmatprep.subr.bf16.mxu1 %v13230_v39  ;;  %2044 = vmatprep.subr.bf16.mxu0 %v13233_v40  ;;  %v13315_v38 = vld [vmem:[#allocation2 + $0x260] ss:$56 sps:$4 sm:$0xff]   ;;  %v13320_v39 = vld [vmem:[#allocation2 + $0x2cc] ss:$56 sps:$4 sm:$0xff]  }
 0x111   : > { %v13323_v40 = vld [vmem:[#allocation2 + $0x2d4] ss:$56 sps:$4 sm:$0xff]  }
 0x113   : > { %2002 = vmatpush1.bf16.msra.mxu1 %v13228_v41  ;;  %2045 = vmatpush1.bf16.msra.mxu0 %v13231_v42  ;;  %v13318_v41 = vld [vmem:[#allocation2 + $0x2c8] ss:$56 sps:$4 sm:$0xff]  }
 0x114   : > { %2073 = vmatprep.subr.bf16.mxu1 %v13236_v43  ;;  %2116 = vmatprep.subr.bf16.mxu0 %v13239_v44  ;;  %v13321_v42 = vld [vmem:[#allocation2 + $0x2d0] ss:$56 sps:$4 sm:$0xff]   ;;  %v13326_v43 = vld [vmem:[#allocation2 + $0x33c] ss:$56 sps:$4 sm:$0xff]  }
 0x115   : > { %v13329_v44 = vld [vmem:[#allocation2 + $0x344] ss:$56 sps:$4 sm:$0xff]  }
 0x116   : > { %2020 = vmatmul.mubr.bf16.vlgmr.msra.gmra.mrb[4].mxu1 %v15571_v12  ;;  %2063 = vmatmul.mubr.bf16.vlgmr.msra.gmra.mrb[0].mxu0 %v15571_v12 }
 0x117   : > { %2074 = vmatpush1.bf16.msra.mxu1 %v13234_v45  ;;  %2117 = vmatpush1.bf16.msra.mxu0 %v13237_v46  ;;  %v13324_v45 = vld [vmem:[#allocation2 + $0x338] ss:$56 sps:$4 sm:$0xff]  }
 0x118   : > { %2075 = vmatprep.subr.bf16.mxu1 %v13242_v47  ;;  %2118 = vmatprep.subr.bf16.mxu0 %v13245_v48  ;;  %v13327_v46 = vld [vmem:[#allocation2 + $0x340] ss:$56 sps:$4 sm:$0xff]   ;;  %v13332_v47 = vld [vmem:[#allocation2 + $0x704] ss:$56 sps:$4 sm:$0xff]  }
 0x119   : > { %2105 = vmatprep.mubr.bf16.mxu1 %v16089_v0  ;;  %2148 = vmatprep.mubr.bf16.mxu0 %v16089_v0  ;;  %v13335_v48 = vld [vmem:[#allocation2 + $0x70c] ss:$56 sps:$4 sm:$0xff]  }
 0x11b   : > { %2076 = vmatpush1.bf16.msra.mxu1 %v13240_v49  ;;  %2119 = vmatpush1.bf16.msra.mxu0 %v13243_v50  ;;  %v13330_v49 = vld [vmem:[#allocation2 + $0x700] ss:$56 sps:$4 sm:$0xff]  }
 0x11c   : > { %2077 = vmatprep.subr.bf16.mxu1 %v13248_v51  ;;  %2120 = vmatprep.subr.bf16.mxu0 %v13251_v52  ;;  %v13333_v50 = vld [vmem:[#allocation2 + $0x708] ss:$56 sps:$4 sm:$0xff]   ;;  %v13338_v51 = vld [vmem:[#allocation2 + $0x774] ss:$56 sps:$4 sm:$0xff]  }
 0x11d   : > { %v13341_v52 = vld [vmem:[#allocation2 + $0x77c] ss:$56 sps:$4 sm:$0xff]  }
 0x11f   : > { %2078 = vmatpush1.bf16.msra.mxu1 %v13246_v53  ;;  %2121 = vmatpush1.bf16.msra.mxu0 %v13249_v54  ;;  %v13336_v53 = vld [vmem:[#allocation2 + $0x770] ss:$56 sps:$4 sm:$0xff]  }
 0x120   : > { %2079 = vmatprep.subr.bf16.mxu1 %v13254_v55  ;;  %2122 = vmatprep.subr.bf16.mxu0 %v13257_v56  ;;  %v13339_v54 = vld [vmem:[#allocation2 + $0x778] ss:$56 sps:$4 sm:$0xff]   ;;  %v13344_v55 = vld [vmem:[#allocation2 + $0x7e4] ss:$56 sps:$4 sm:$0xff]  }
 0x121   : > { %v13347_v56 = vld [vmem:[#allocation2 + $0x7ec] ss:$56 sps:$4 sm:$0xff]  }
 0x123   : > { %2080 = vmatpush1.bf16.msra.mxu1 %v13252_v57  ;;  %2123 = vmatpush1.bf16.msra.mxu0 %v13255_v58  ;;  %v13342_v57 = vld [vmem:[#allocation2 + $0x7e0] ss:$56 sps:$4 sm:$0xff]  }
 0x124   : > { %2081 = vmatprep.subr.bf16.mxu1 %v13260_v59  ;;  %2124 = vmatprep.subr.bf16.mxu0 %v13263_v60  ;;  %v13345_v58 = vld [vmem:[#allocation2 + $0x7e8] ss:$56 sps:$4 sm:$0xff]   ;;  %v13350_v59 = vld [vmem:[#allocation2 + $0x854] ss:$56 sps:$4 sm:$0xff]  }
 0x125   : > { %v13348_v60 = vld [vmem:[#allocation2 + $0x850] ss:$56 sps:$4 sm:$0xff]  }
 0x127   : > { %2082 = vmatpush1.bf16.msra.mxu1 %v13258_v61  ;;  %2125 = vmatpush1.bf16.msra.mxu0 %v13261_v62  ;;  %v13351_v61 = vld [vmem:[#allocation2 + $0x858] ss:$56 sps:$4 sm:$0xff]   ;;  %v13356_v62 = vld [vmem:[#allocation2 + $0x8c4] ss:$56 sps:$4 sm:$0xff]  }
 0x128   : > { %2083 = vmatprep.subr.bf16.mxu1 %v13266_v63  ;;  %2126 = vmatprep.subr.bf16.mxu0 %v13269_v1  ;;  %v13359_v63 = vld [vmem:[#allocation2 + $0x8cc] ss:$56 sps:$4 sm:$0xff]  }
 0x129   : > { %v2245_v1 = vld [vmem:[%s15548_s14 + $0x4] sm:$0xf] }
 0x12b   : > { %2084 = vmatpush1.bf16.msra.mxu1 %v13264_v2  ;;  %2127 = vmatpush1.bf16.msra.mxu0 %v13267_v3  ;;  %v13354_v2 = vld [vmem:[#allocation2 + $0x8c0] ss:$56 sps:$4 sm:$0xff]  }
 0x12c   : > { %2085 = vmatprep.subr.bf16.mxu1 %v13272_v4  ;;  %2128 = vmatprep.subr.bf16.mxu0 %v13275_v5  ;;  %v13357_v3 = vld [vmem:[#allocation2 + $0x8c8] ss:$56 sps:$4 sm:$0xff]   ;;  %v13362_v4 = vld [vmem:[#allocation2 + $0x934] ss:$56 sps:$4 sm:$0xff]  }
 0x12d   : > { %v13365_v5 = vld [vmem:[#allocation2 + $0x93c] ss:$56 sps:$4 sm:$0xff]  }
 0x12f   : > { %2086 = vmatpush1.bf16.msra.mxu1 %v13270_v6  ;;  %2129 = vmatpush1.bf16.msra.mxu0 %v13273_v7  ;;  %v11724_v6 = vcombine.low %v15567_v8, %v2245_v1  ;;  %v13360_v7 = vld [vmem:[#allocation2 + $0x930] ss:$56 sps:$4 sm:$0xff]   ;;  %v13374_v8 = vld [vmem:[#allocation2 + $0xa14] ss:$56 sps:$4 sm:$0xff]  }
 0x130   : > { %2087 = vmatprep.subr.bf16.mxu1 %v13278_v9  ;;  %2130 = vmatprep.subr.bf16.mxu0 %v13281_v10  ;;  %v13363_v9 = vld [vmem:[#allocation2 + $0x938] ss:$56 sps:$4 sm:$0xff]   ;;  %v13368_v10 = vld [vmem:[#allocation2 + $0x9a4] ss:$56 sps:$4 sm:$0xff]  }
 0x131   : > { %v13432_v1 = vld [vmem:[#allocation2 + $0x790] ss:$56 sps:$4 sm:$0xff]  }
 0x133   : > { %2088 = vmatpush1.bf16.msra.mxu1 %v13276_v11  ;;  %2131 = vmatpush1.bf16.msra.mxu0 %v13279_v13  ;;  %v13371_v11 = vld [vmem:[#allocation2 + $0x9ac] ss:$56 sps:$4 sm:$0xff]  }
 0x134   : > { %2159 = vmatprep.subr.bf16.mxu1 %v13284_v14  ;;  %2202 = vmatprep.subr.bf16.mxu0 %v13287_v15  ;;  %v2365_v14 = vshll.u32 %v11724_v6, 16 }
 0x136   : > { %2106 = vmatmul.mubr.bf16.vlgmr.msra.gmra.mrb[8].mxu1 %v15571_v12  ;;  %2149 = vmatmul.mubr.bf16.vlgmr.msra.gmra.mrb[4].mxu0 %v15571_v12 }
 0x137   : > { %2160 = vmatpush1.bf16.msra.mxu1 %v13282_v16  ;;  %2203 = vmatpush1.bf16.msra.mxu0 %v13285_v17  ;;  %v13366_v16 = vld [vmem:[#allocation2 + $0x9a0] ss:$56 sps:$4 sm:$0xff]  }
 0x138   : > { %2161 = vmatprep.subr.bf16.mxu1 %v13290_v18  ;;  %2204 = vmatprep.subr.bf16.mxu0 %v13293_v19  ;;  %v13369_v18 = vld [vmem:[#allocation2 + $0x9a8] ss:$56 sps:$4 sm:$0xff]  }
 0x139   : > { %2191 = vmatprep.mubr.bf16.mxu1 %v16089_v0  ;;  %2234 = vmatprep.mubr.bf16.mxu0 %v16089_v0 }
 0x13b   : > { %2162 = vmatpush1.bf16.msra.mxu1 %v13288_v20  ;;  %2205 = vmatpush1.bf16.msra.mxu0 %v13291_v21  ;;  %v13377_v20 = vld [vmem:[#allocation2 + $0xa1c] ss:$56 sps:$4 sm:$0xff]   ;;  %v2363_v21 = vshrl.u32 %v11724_v6, 16  ;;  %v13441_v6 = vld [vmem:[#allocation2 + $0x808] ss:$56 sps:$4 sm:$0xff]  }
 0x13c   : > { %2163 = vmatprep.subr.bf16.mxu1 %v13296_v22  ;;  %2206 = vmatprep.subr.bf16.mxu0 %v13299_v23  ;;  %v2367_v22 = vrot.slane %v2365_v14, 1  ;;  %v13372_v23 = vld [vmem:[#allocation2 + $0xa10] ss:$56 sps:$4 sm:$0xff]   ;;  %v13452_v14 = vld [vmem:[#allocation2 + $0x8e4] ss:$56 sps:$4 sm:$0xff]  }
 0x13f   : > { %2164 = vmatpush1.bf16.msra.mxu1 %v13294_v24  ;;  %2207 = vmatpush1.bf16.msra.mxu0 %v13297_v25  ;;  %v13375_v24 = vld [vmem:[#allocation2 + $0xa18] ss:$56 sps:$4 sm:$0xff]   ;;  %v13380_v25 = vld [vmem:[#allocation2 + $0x714] ss:$56 sps:$4 sm:$0xff]  }
 0x140   : > { %2165 = vmatprep.subr.bf16.mxu1 %v13302_v26  ;;  %2208 = vmatprep.subr.bf16.mxu0 %v13305_v27  ;;  %v13383_v26 = vld [vmem:[#allocation2 + $0x71c] ss:$56 sps:$4 sm:$0xff]   ;;  %v15599_v27 = vor.u32 %v2367_v22, %v2363_v21  ;;  %v13456_v22 = vld [vmem:[#allocation2 + $0x950] ss:$56 sps:$4 sm:$0xff]  }
 0x141   : > { %v13461_v21 = vld [vmem:[#allocation2 + $0x95c] ss:$56 sps:$4 sm:$0xff]  }
 0x143   : > { %2166 = vmatpush1.bf16.msra.mxu1 %v13300_v28  ;;  %2209 = vmatpush1.bf16.msra.mxu0 %v13303_v29  ;;  %v13378_v28 = vld [vmem:[#allocation2 + $0x710] ss:$56 sps:$4 sm:$0xff]  }
 0x144   : > { %2167 = vmatprep.subr.bf16.mxu1 %v13308_v30  ;;  %2210 = vmatprep.subr.bf16.mxu0 %v13311_v31  ;;  %v13381_v29 = vld [vmem:[#allocation2 + $0x718] ss:$56 sps:$4 sm:$0xff]   ;;  %v13386_v30 = vld [vmem:[#allocation2 + $0x784] ss:$56 sps:$4 sm:$0xff]  }
 0x145   : > { %v13389_v31 = vld [vmem:[#allocation2 + $0x78c] ss:$56 sps:$4 sm:$0xff]  }
 0x147   : > { %2168 = vmatpush1.bf16.msra.mxu1 %v13306_v32  ;;  %2211 = vmatpush1.bf16.msra.mxu0 %v13309_v33  ;;  %v13384_v32 = vld [vmem:[#allocation2 + $0x780] ss:$56 sps:$4 sm:$0xff]  }
 0x148   : > { %2169 = vmatprep.subr.bf16.mxu1 %v13314_v34  ;;  %2212 = vmatprep.subr.bf16.mxu0 %v13317_v35  ;;  %v13387_v33 = vld [vmem:[#allocation2 + $0x788] ss:$56 sps:$4 sm:$0xff]   ;;  %v13392_v34 = vld [vmem:[#allocation2 + $0x7f4] ss:$56 sps:$4 sm:$0xff]  }
 0x149   : > { %v13395_v35 = vld [vmem:[#allocation2 + $0x7fc] ss:$56 sps:$4 sm:$0xff]  }
 0x14b   : > { %2170 = vmatpush1.bf16.msra.mxu1 %v13312_v36  ;;  %2213 = vmatpush1.bf16.msra.mxu0 %v13315_v38  ;;  %v13390_v36 = vld [vmem:[#allocation2 + $0x7f0] ss:$56 sps:$4 sm:$0xff]  }
 0x14c   : > { %2171 = vmatprep.subr.bf16.mxu1 %v13320_v39  ;;  %2214 = vmatprep.subr.bf16.mxu0 %v13323_v40  ;;  %v13393_v38 = vld [vmem:[#allocation2 + $0x7f8] ss:$56 sps:$4 sm:$0xff]   ;;  %v13398_v39 = vld [vmem:[#allocation2 + $0x864] ss:$56 sps:$4 sm:$0xff]  }
 0x14d   : > { %v13401_v40 = vld [vmem:[#allocation2 + $0x86c] ss:$56 sps:$4 sm:$0xff]  }
 0x14f   : > { %2172 = vmatpush1.bf16.msra.mxu1 %v13318_v41  ;;  %2215 = vmatpush1.bf16.msra.mxu0 %v13321_v42  ;;  %v13396_v41 = vld [vmem:[#allocation2 + $0x860] ss:$56 sps:$4 sm:$0xff]  }
 0x150   : > { %2173 = vmatprep.subr.bf16.mxu1 %v13326_v43  ;;  %2216 = vmatprep.subr.bf16.mxu0 %v13329_v44  ;;  %v13399_v42 = vld [vmem:[#allocation2 + $0x868] ss:$56 sps:$4 sm:$0xff]   ;;  %v13404_v43 = vld [vmem:[#allocation2 + $0x8d4] ss:$56 sps:$4 sm:$0xff]  }
 0x151   : > { %v13407_v44 = vld [vmem:[#allocation2 + $0x8dc] ss:$56 sps:$4 sm:$0xff]  }
 0x153   : > { %2174 = vmatpush1.bf16.msra.mxu1 %v13324_v45  ;;  %2217 = vmatpush1.bf16.msra.mxu0 %v13327_v46  ;;  %v13402_v45 = vld [vmem:[#allocation2 + $0x8d0] ss:$56 sps:$4 sm:$0xff]  }
 0x154   : > { %2930 = vmatprep.subr.bf16.mxu0 %v13332_v47  ;;  %2973 = vmatprep.subr.bf16.mxu1 %v13335_v48  ;;  %v13405_v46 = vld [vmem:[#allocation2 + $0x8d8] ss:$56 sps:$4 sm:$0xff]   ;;  %v13410_v47 = vld [vmem:[#allocation2 + $0x944] ss:$56 sps:$4 sm:$0xff]  }
 0x155   : > { %v13413_v48 = vld [vmem:[#allocation2 + $0x94c] ss:$56 sps:$4 sm:$0xff]  }
 0x156   : > { %2192 = vmatmul.mubr.bf16.vlgmr.msra.gmra.mrb[12].mxu1 %v15571_v12  ;;  %2235 = vmatmul.mubr.bf16.vlgmr.msra.gmra.mrb[8].mxu0 %v15571_v12  ;;  %v13353_v12 = vld [vmem:[#allocation2 + $0x85c] ss:$56 sps:$4 sm:$0xff]  }
 0x157   : > { %2931 = vmatpush1.bf16.msra.mxu0 %v13330_v49  ;;  %2974 = vmatpush1.bf16.msra.mxu1 %v13333_v50  ;;  %v13408_v49 = vld [vmem:[#allocation2 + $0x940] ss:$56 sps:$4 sm:$0xff]  }
 0x158   : > { %2932 = vmatprep.subr.bf16.mxu0 %v13338_v51  ;;  %2975 = vmatprep.subr.bf16.mxu1 %v13341_v52  ;;  %v13411_v50 = vld [vmem:[#allocation2 + $0x948] ss:$56 sps:$4 sm:$0xff]   ;;  %v13416_v51 = vld [vmem:[#allocation2 + $0x9b4] ss:$56 sps:$4 sm:$0xff]  }
 0x159   : > { %2962 = vmatprep.mubr.bf16.mxu0 %v16089_v0  ;;  %3005 = vmatprep.mubr.bf16.mxu1 %v16089_v0  ;;  %v13419_v52 = vld [vmem:[#allocation2 + $0x9bc] ss:$56 sps:$4 sm:$0xff]  }
 0x15b   : > { %2933 = vmatpush1.bf16.msra.mxu0 %v13336_v53  ;;  %2976 = vmatpush1.bf16.msra.mxu1 %v13339_v54  ;;  %v13414_v53 = vld [vmem:[#allocation2 + $0x9b0] ss:$56 sps:$4 sm:$0xff]  }
 0x15c   : > { %2934 = vmatprep.subr.bf16.mxu0 %v13344_v55  ;;  %2977 = vmatprep.subr.bf16.mxu1 %v13347_v56  ;;  %v13417_v54 = vld [vmem:[#allocation2 + $0x9b8] ss:$56 sps:$4 sm:$0xff]   ;;  %v13422_v55 = vld [vmem:[#allocation2 + $0xa24] ss:$56 sps:$4 sm:$0xff]  }
 0x15d   : > { %v13425_v56 = vld [vmem:[#allocation2 + $0xa2c] ss:$56 sps:$4 sm:$0xff]  }
 0x15f   : > { %2935 = vmatpush1.bf16.msra.mxu0 %v13342_v57  ;;  %2978 = vmatpush1.bf16.msra.mxu1 %v13345_v58  ;;  %v13420_v57 = vld [vmem:[#allocation2 + $0xa20] ss:$56 sps:$4 sm:$0xff]  }
 0x160   : > { %2936 = vmatprep.subr.bf16.mxu0 %v13350_v59  ;;  %2979 = vmatprep.subr.bf16.mxu1 %v13353_v12  ;;  %v13423_v58 = vld [vmem:[#allocation2 + $0xa28] ss:$56 sps:$4 sm:$0xff]   ;;  %v13428_v59 = vld [vmem:[#allocation2 + $0x724] ss:$56 sps:$4 sm:$0xff]  }
 0x161   : > { %v13431_v12 = vld [vmem:[#allocation2 + $0x72c] ss:$56 sps:$4 sm:$0xff]  }
 0x163   : > { %2937 = vmatpush1.bf16.msra.mxu0 %v13348_v60  ;;  %2980 = vmatpush1.bf16.msra.mxu1 %v13351_v61  ;;  %v13426_v60 = vld [vmem:[#allocation2 + $0x720] ss:$56 sps:$4 sm:$0xff]  }
 0x164   : > { %2938 = vmatprep.subr.bf16.mxu0 %v13356_v62  ;;  %2981 = vmatprep.subr.bf16.mxu1 %v13359_v63  ;;  %v13429_v61 = vld [vmem:[#allocation2 + $0x728] ss:$56 sps:$4 sm:$0xff]   ;;  %v13434_v62 = vld [vmem:[#allocation2 + $0x794] ss:$56 sps:$4 sm:$0xff]  }
 0x165   : > { %v13437_v63 = vld [vmem:[#allocation2 + $0x79c] ss:$56 sps:$4 sm:$0xff]  }
 0x167   : > { %2939 = vmatpush1.bf16.msra.mxu0 %v13354_v2  ;;  %2982 = vmatpush1.bf16.msra.mxu1 %v13357_v3  ;;  %v13435_v2 = vld [vmem:[#allocation2 + $0x798] ss:$56 sps:$4 sm:$0xff]   ;;  %v13440_v3 = vld [vmem:[#allocation2 + $0x804] ss:$56 sps:$4 sm:$0xff]  }
 0x168   : > { %2940 = vmatprep.subr.bf16.mxu0 %v13362_v4  ;;  %2983 = vmatprep.subr.bf16.mxu1 %v13365_v5  ;;  %v13443_v4 = vld [vmem:[#allocation2 + $0x80c] ss:$56 sps:$4 sm:$0xff]   ;;  %v13438_v5 = vld [vmem:[#allocation2 + $0x800] ss:$56 sps:$4 sm:$0xff]  }
 0x169   : > { %v15591_v13 = vpop.f32.mrb[0].mxu1 }
 0x16a   : > { %v15593_v15 = vpop.f32.mrb[1].mxu1 }
 0x16b   : > { %v15595_v17 = vpop.f32.mrb[2].mxu1  ;;  %2941 = vmatpush1.bf16.msra.mxu0 %v13360_v7  ;;  %2984 = vmatpush1.bf16.msra.mxu1 %v13363_v9  ;;  %v13446_v7 = vld [vmem:[#allocation2 + $0x874] ss:$56 sps:$4 sm:$0xff]  }
 0x16c   : > { %v15597_v19 = vpop.f32.mrb[3].mxu1  ;;  %2942 = vmatprep.subr.bf16.mxu0 %v13368_v10  ;;  %2985 = vmatprep.subr.bf16.mxu1 %v13371_v11  ;;  %v13449_v9 = vld [vmem:[#allocation2 + $0x87c] ss:$56 sps:$4 sm:$0xff]   ;;  %v13444_v10 = vld [vmem:[#allocation2 + $0x870] ss:$56 sps:$4 sm:$0xff]  }
 0x16d   : > { %v13447_v11 = vld [vmem:[#allocation2 + $0x878] ss:$56 sps:$4 sm:$0xff]  }
 0x16f   : > { %2943 = vmatpush1.bf16.msra.mxu0 %v13366_v16  ;;  %2986 = vmatpush1.bf16.msra.mxu1 %v13369_v18  ;;  %v13455_v16 = vld [vmem:[#allocation2 + $0x8ec] ss:$56 sps:$4 sm:$0xff]   ;;  %v13450_v18 = vld [vmem:[#allocation2 + $0x8e0] ss:$56 sps:$4 sm:$0xff]  }
 0x170   : > { %2944 = vmatprep.subr.bf16.mxu0 %v13374_v8  ;;  %2987 = vmatprep.subr.bf16.mxu1 %v13377_v20  ;;  %v13453_v8 = vld [vmem:[#allocation2 + $0x8e8] ss:$56 sps:$4 sm:$0xff]   ;;  %v13458_v20 = vld [vmem:[#allocation2 + $0x954] ss:$56 sps:$4 sm:$0xff]  }
 0x173   : > { %2945 = vmatpush1.bf16.msra.mxu0 %v13372_v23  ;;  %2988 = vmatpush1.bf16.msra.mxu1 %v13375_v24  ;;  %v13459_v23 = vld [vmem:[#allocation2 + $0x958] ss:$56 sps:$4 sm:$0xff]   ;;  %v13464_v24 = vld [vmem:[#allocation2 + $0x9c4] ss:$56 sps:$4 sm:$0xff]  }
 0x174   : > { %3016 = vmatprep.subr.bf16.mxu0 %v13380_v25  ;;  %3059 = vmatprep.subr.bf16.mxu1 %v13383_v26  ;;  %v13467_v25 = vld [vmem:[#allocation2 + $0x9cc] ss:$56 sps:$4 sm:$0xff]   ;;  %v13462_v26 = vld [vmem:[#allocation2 + $0x9c0] ss:$56 sps:$4 sm:$0xff]  }
 0x176   : > { %2963 = vmatmul.mubr.bf16.vlgmr.msra.gmra.mrb[12].mxu0 %v15599_v27  ;;  %3006 = vmatmul.mubr.bf16.vlgmr.msra.gmra.mrb[4].mxu1 %v15599_v27 }
 0x177   : > { %3017 = vmatpush1.bf16.msra.mxu0 %v13378_v28  ;;  %3060 = vmatpush1.bf16.msra.mxu1 %v13381_v29  ;;  %v13465_v28 = vld [vmem:[#allocation2 + $0x9c8] ss:$56 sps:$4 sm:$0xff]   ;;  %v13470_v29 = vld [vmem:[#allocation2 + $0xa34] ss:$56 sps:$4 sm:$0xff]  }
 0x178   : > { %3018 = vmatprep.subr.bf16.mxu0 %v13386_v30  ;;  %3061 = vmatprep.subr.bf16.mxu1 %v13389_v31  ;;  %v13473_v30 = vld [vmem:[#allocation2 + $0xa3c] ss:$56 sps:$4 sm:$0xff]   ;;  %v13468_v31 = vld [vmem:[#allocation2 + $0xa30] ss:$56 sps:$4 sm:$0xff]  }
 0x179   : > { %3048 = vmatprep.mubr.bf16.mxu0 %v16089_v0  ;;  %3091 = vmatprep.mubr.bf16.mxu1 %v16089_v0 }
 0x17b   : > { %3019 = vmatpush1.bf16.msra.mxu0 %v13384_v32  ;;  %3062 = vmatpush1.bf16.msra.mxu1 %v13387_v33  ;;  %v13471_v32 = vld [vmem:[#allocation2 + $0xa38] ss:$56 sps:$4 sm:$0xff]   ;;  %v13476_v33 = vld [vmem:[#allocation2 + $0x734] ss:$56 sps:$4 sm:$0xff]  }
 0x17c   : > { %3020 = vmatprep.subr.bf16.mxu0 %v13392_v34  ;;  %3063 = vmatprep.subr.bf16.mxu1 %v13395_v35  ;;  %v13479_v34 = vld [vmem:[#allocation2 + $0xa8c] ss:$56 sps:$4 sm:$0xff]   ;;  %v13474_v35 = vld [vmem:[#allocation2 + $0x730] ss:$56 sps:$4 sm:$0xff]  }
 0x17f   : > { %3021 = vmatpush1.bf16.msra.mxu0 %v13390_v36  ;;  %3064 = vmatpush1.bf16.msra.mxu1 %v13393_v38  ;;  %v13477_v36 = vld [vmem:[#allocation2 + $0xa88] ss:$56 sps:$4 sm:$0xff]   ;;  %v13482_v38 = vld [vmem:[#allocation2 + $0x7a4] ss:$56 sps:$4 sm:$0xff]  }
 0x180   : > { %3022 = vmatprep.subr.bf16.mxu0 %v13398_v39  ;;  %3065 = vmatprep.subr.bf16.mxu1 %v13401_v40  ;;  %v13485_v39 = vld [vmem:[#allocation2 + $0xafc] ss:$56 sps:$4 sm:$0xff]   ;;  %v13480_v40 = vld [vmem:[#allocation2 + $0x7a0] ss:$56 sps:$4 sm:$0xff]  }
 0x183   : > { %3023 = vmatpush1.bf16.msra.mxu0 %v13396_v41  ;;  %3066 = vmatpush1.bf16.msra.mxu1 %v13399_v42  ;;  %v13483_v41 = vld [vmem:[#allocation2 + $0xaf8] ss:$56 sps:$4 sm:$0xff]   ;;  %v13488_v42 = vld [vmem:[#allocation2 + $0x814] ss:$56 sps:$4 sm:$0xff]  }
 0x184   : > { %3024 = vmatprep.subr.bf16.mxu0 %v13404_v43  ;;  %3067 = vmatprep.subr.bf16.mxu1 %v13407_v44  ;;  %v13491_v43 = vld [vmem:[#allocation2 + $0xb6c] ss:$56 sps:$4 sm:$0xff]   ;;  %v13486_v44 = vld [vmem:[#allocation2 + $0x810] ss:$56 sps:$4 sm:$0xff]  }
 0x187   : > { %3025 = vmatpush1.bf16.msra.mxu0 %v13402_v45  ;;  %3068 = vmatpush1.bf16.msra.mxu1 %v13405_v46  ;;  %v13489_v45 = vld [vmem:[#allocation2 + $0xb68] ss:$56 sps:$4 sm:$0xff]   ;;  %v13494_v46 = vld [vmem:[#allocation2 + $0x884] ss:$56 sps:$4 sm:$0xff]  }
 0x188   : > { %3026 = vmatprep.subr.bf16.mxu0 %v13410_v47  ;;  %3069 = vmatprep.subr.bf16.mxu1 %v13413_v48  ;;  %v13497_v47 = vld [vmem:[#allocation2 + $0xbdc] ss:$56 sps:$4 sm:$0xff]   ;;  %v13492_v48 = vld [vmem:[#allocation2 + $0x880] ss:$56 sps:$4 sm:$0xff]  }
 0x18b   : > { %3027 = vmatpush1.bf16.msra.mxu0 %v13408_v49  ;;  %3070 = vmatpush1.bf16.msra.mxu1 %v13411_v50  ;;  %v13495_v49 = vld [vmem:[#allocation2 + $0xbd8] ss:$56 sps:$4 sm:$0xff]   ;;  %v13500_v50 = vld [vmem:[#allocation2 + $0x8f4] ss:$56 sps:$4 sm:$0xff]  }
 0x18c   : > { %3028 = vmatprep.subr.bf16.mxu0 %v13416_v51  ;;  %3071 = vmatprep.subr.bf16.mxu1 %v13419_v52  ;;  %v13503_v51 = vld [vmem:[#allocation2 + $0xc4c] ss:$56 sps:$4 sm:$0xff]  }
 0x18d   : > { %v11837_v52 = vld [vmem:[%s15548_s14 + $0xc] sm:$0xf] }
 0x18f   : > { %3029 = vmatpush1.bf16.msra.mxu0 %v13414_v53  ;;  %3072 = vmatpush1.bf16.msra.mxu1 %v13417_v54  ;;  %v13498_v53 = vld [vmem:[#allocation2 + $0x8f0] ss:$56 sps:$4 sm:$0xff]  }
 0x190   : > { %3030 = vmatprep.subr.bf16.mxu0 %v13422_v55  ;;  %3073 = vmatprep.subr.bf16.mxu1 %v13425_v56  ;;  %v13501_v54 = vld [vmem:[#allocation2 + $0xc48] ss:$56 sps:$4 sm:$0xff]   ;;  %v13506_v55 = vld [vmem:[#allocation2 + $0x964] ss:$56 sps:$4 sm:$0xff]  }
 0x191   : > { %v13509_v56 = vld [vmem:[#allocation2 + $0xcbc] ss:$56 sps:$4 sm:$0xff]  }
 0x193   : > { %3031 = vmatpush1.bf16.msra.mxu0 %v13420_v57  ;;  %3074 = vmatpush1.bf16.msra.mxu1 %v13423_v58  ;;  %v14675_v57 = vld [vmem:[%s15548_s14 + $0x8] sm:$0xf] }
 0x194   : > { %3102 = vmatprep.subr.bf16.mxu0 %v13428_v59  ;;  %3145 = vmatprep.subr.bf16.mxu1 %v13431_v12  ;;  %v11838_v58 = vcombine.low %v14675_v57, %v11837_v52  ;;  %v13504_v59 = vld [vmem:[#allocation2 + $0x960] ss:$56 sps:$4 sm:$0xff]   ;;  %v13578_v52 = vld [vmem:[#allocation2 + $0xb04] ss:$56 sps:$4 sm:$0xff]  }
 0x195   : > { %v13507_v12 = vld [vmem:[#allocation2 + $0xcb8] ss:$56 sps:$4 sm:$0xff]   ;;  %v13587_v57 = vld [vmem:[#allocation2 + $0xb8c] ss:$56 sps:$4 sm:$0xff]  }
 0x196   : > { %3049 = vmatmul.mubr.bf16.vlgmr.msra.gmra.mrb[0].mxu0 %v15599_v27  ;;  %3092 = vmatmul.mubr.bf16.vlgmr.msra.gmra.mrb[8].mxu1 %v15599_v27 }
 0x197   : > { %3103 = vmatpush1.bf16.msra.mxu0 %v13426_v60  ;;  %3146 = vmatpush1.bf16.msra.mxu1 %v13429_v61  ;;  %v13512_v60 = vld [vmem:[#allocation2 + $0x9d4] ss:$56 sps:$4 sm:$0xff]  }
 0x198   : > { %3104 = vmatprep.subr.bf16.mxu0 %v13434_v62  ;;  %3147 = vmatprep.subr.bf16.mxu1 %v13437_v63  ;;  %v13515_v61 = vld [vmem:[#allocation2 + $0xd2c] ss:$56 sps:$4 sm:$0xff]   ;;  %v3379_v62 = vshll.u32 %v11838_v58, 16  ;;  %v13510_v63 = vld [vmem:[#allocation2 + $0x9d0] ss:$56 sps:$4 sm:$0xff]  }
 0x199   : > { %3134 = vmatprep.mubr.bf16.mxu0 %v16089_v0  ;;  %3177 = vmatprep.mubr.bf16.mxu1 %v16089_v0 }
 0x19b   : > { %3105 = vmatpush1.bf16.msra.mxu0 %v13432_v1  ;;  %3148 = vmatpush1.bf16.msra.mxu1 %v13435_v2  ;;  %v13513_v1 = vld [vmem:[#allocation2 + $0xd28] ss:$56 sps:$4 sm:$0xff]   ;;  %v13518_v2 = vld [vmem:[#allocation2 + $0xa44] ss:$56 sps:$4 sm:$0xff]  }
 0x19c   : > { %3106 = vmatprep.subr.bf16.mxu0 %v13440_v3  ;;  %3149 = vmatprep.subr.bf16.mxu1 %v13443_v4  ;;  %v13521_v3 = vld [vmem:[#allocation2 + $0xd9c] ss:$56 sps:$4 sm:$0xff]   ;;  %v3377_v4 = vshrl.u32 %v11838_v58, 16  ;;  %v13582_v58 = vld [vmem:[#allocation2 + $0xb70] ss:$56 sps:$4 sm:$0xff]  }
 0x19f   : > { %3107 = vmatpush1.bf16.msra.mxu0 %v13438_v5  ;;  %3150 = vmatpush1.bf16.msra.mxu1 %v13441_v6  ;;  %v3381_v5 = vrot.slane %v3379_v62, 1  ;;  %v13516_v6 = vld [vmem:[#allocation2 + $0xa40] ss:$56 sps:$4 sm:$0xff]  }
 0x1a0   : > { %3108 = vmatprep.subr.bf16.mxu0 %v13446_v7  ;;  %3151 = vmatprep.subr.bf16.mxu1 %v13449_v9  ;;  %v13519_v7 = vld [vmem:[#allocation2 + $0xd98] ss:$56 sps:$4 sm:$0xff]   ;;  %v13524_v9 = vld [vmem:[#allocation2 + $0xa84] ss:$56 sps:$4 sm:$0xff]  }
 0x1a1   : > { %v13591_v62 = vld [vmem:[#allocation2 + $0xbf8] ss:$56 sps:$4 sm:$0xff]  }
 0x1a3   : > { %3109 = vmatpush1.bf16.msra.mxu0 %v13444_v10  ;;  %3152 = vmatpush1.bf16.msra.mxu1 %v13447_v11  ;;  %v13527_v10 = vld [vmem:[#allocation2 + $0xa9c] ss:$56 sps:$4 sm:$0xff]   ;;  %v13522_v11 = vld [vmem:[#allocation2 + $0xa80] ss:$56 sps:$4 sm:$0xff]  }
 0x1a4   : > { %3110 = vmatprep.subr.bf16.mxu0 %v13452_v14  ;;  %3153 = vmatprep.subr.bf16.mxu1 %v13455_v16  ;;  %v15615_v14 = vor.u32 %v3381_v5, %v3377_v4  ;;  %v13525_v16 = vld [vmem:[#allocation2 + $0xa98] ss:$56 sps:$4 sm:$0xff]   ;;  %v13602_v4 = vld [vmem:[#allocation2 + $0xcc4] ss:$56 sps:$4 sm:$0xff]  }
 0x1a5   : > { %v13605_v5 = vld [vmem:[#allocation2 + $0xcdc] ss:$56 sps:$4 sm:$0xff]  }
 0x1a7   : > { %3111 = vmatpush1.bf16.msra.mxu0 %v13450_v18  ;;  %3154 = vmatpush1.bf16.msra.mxu1 %v13453_v8  ;;  %v13530_v18 = vld [vmem:[#allocation2 + $0xaf4] ss:$56 sps:$4 sm:$0xff]  }
 0x1a8   : > { %3112 = vmatprep.subr.bf16.mxu0 %v13458_v20  ;;  %3155 = vmatprep.subr.bf16.mxu1 %v13461_v21  ;;  %v13533_v8 = vld [vmem:[#allocation2 + $0xb0c] ss:$56 sps:$4 sm:$0xff]   ;;  %v13528_v20 = vld [vmem:[#allocation2 + $0xaf0] ss:$56 sps:$4 sm:$0xff]  }
 0x1a9   : > { %v13531_v21 = vld [vmem:[#allocation2 + $0xb08] ss:$56 sps:$4 sm:$0xff]  }
 0x1ab   : > { %3113 = vmatpush1.bf16.msra.mxu0 %v13456_v22  ;;  %3156 = vmatpush1.bf16.msra.mxu1 %v13459_v23  ;;  %v13536_v22 = vld [vmem:[#allocation2 + $0xb64] ss:$56 sps:$4 sm:$0xff]  }
 0x1ac   : > { %3114 = vmatprep.subr.bf16.mxu0 %v13464_v24  ;;  %3157 = vmatprep.subr.bf16.mxu1 %v13467_v25  ;;  %v13539_v23 = vld [vmem:[#allocation2 + $0xb7c] ss:$56 sps:$4 sm:$0xff]   ;;  %v13534_v24 = vld [vmem:[#allocation2 + $0xb60] ss:$56 sps:$4 sm:$0xff]  }
 0x1ad   : > { %v13537_v25 = vld [vmem:[#allocation2 + $0xb78] ss:$56 sps:$4 sm:$0xff]  }
 0x1af   : > { %3115 = vmatpush1.bf16.msra.mxu0 %v13462_v26  ;;  %3158 = vmatpush1.bf16.msra.mxu1 %v13465_v28  ;;  %v13542_v26 = vld [vmem:[#allocation2 + $0xbd4] ss:$56 sps:$4 sm:$0xff]  }
 0x1b0   : > { %3116 = vmatprep.subr.bf16.mxu0 %v13470_v29  ;;  %3159 = vmatprep.subr.bf16.mxu1 %v13473_v30  ;;  %v13545_v28 = vld [vmem:[#allocation2 + $0xbec] ss:$56 sps:$4 sm:$0xff]   ;;  %v13540_v29 = vld [vmem:[#allocation2 + $0xbd0] ss:$56 sps:$4 sm:$0xff]  }
 0x1b1   : > { %v13543_v30 = vld [vmem:[#allocation2 + $0xbe8] ss:$56 sps:$4 sm:$0xff]  }
 0x1b3   : > { %3117 = vmatpush1.bf16.msra.mxu0 %v13468_v31  ;;  %3160 = vmatpush1.bf16.msra.mxu1 %v13471_v32  ;;  %v13548_v31 = vld [vmem:[#allocation2 + $0xc44] ss:$56 sps:$4 sm:$0xff]  }
 0x1b4   : > { %3188 = vmatprep.subr.bf16.mxu0 %v13476_v33  ;;  %3987 = vmatprep.subr.bf16.mxu1 %v13479_v34  ;;  %v13551_v32 = vld [vmem:[#allocation2 + $0xc5c] ss:$56 sps:$4 sm:$0xff]   ;;  %v13546_v33 = vld [vmem:[#allocation2 + $0xc40] ss:$56 sps:$4 sm:$0xff]  }
 0x1b5   : > { %v13549_v34 = vld [vmem:[#allocation2 + $0xc58] ss:$56 sps:$4 sm:$0xff]  }
 0x1b6   : > { %3135 = vmatmul.mubr.bf16.vlgmr.msra.gmra.mrb[4].mxu0 %v15599_v27  ;;  %3178 = vmatmul.mubr.bf16.vlgmr.msra.gmra.mrb[12].mxu1 %v15599_v27 }
 0x1b7   : > { %3189 = vmatpush1.bf16.msra.mxu0 %v13474_v35  ;;  %3988 = vmatpush1.bf16.msra.mxu1 %v13477_v36  ;;  %v13554_v35 = vld [vmem:[#allocation2 + $0xcb4] ss:$56 sps:$4 sm:$0xff]  }
 0x1b8   : > { %3190 = vmatprep.subr.bf16.mxu0 %v13482_v38  ;;  %3989 = vmatprep.subr.bf16.mxu1 %v13485_v39  ;;  %v13557_v36 = vld [vmem:[#allocation2 + $0xccc] ss:$56 sps:$4 sm:$0xff]   ;;  %v13552_v38 = vld [vmem:[#allocation2 + $0xcb0] ss:$56 sps:$4 sm:$0xff]  }
 0x1b9   : > { %3220 = vmatprep.mubr.bf16.mxu0 %v16089_v0  ;;  %4019 = vmatprep.mubr.bf16.mxu1 %v16089_v0  ;;  %v13555_v39 = vld [vmem:[#allocation2 + $0xcc8] ss:$56 sps:$4 sm:$0xff]  }
 0x1bb   : > { %3191 = vmatpush1.bf16.msra.mxu0 %v13480_v40  ;;  %3990 = vmatpush1.bf16.msra.mxu1 %v13483_v41  ;;  %v13560_v40 = vld [vmem:[#allocation2 + $0xd24] ss:$56 sps:$4 sm:$0xff]  }
 0x1bc   : > { %3192 = vmatprep.subr.bf16.mxu0 %v13488_v42  ;;  %3991 = vmatprep.subr.bf16.mxu1 %v13491_v43  ;;  %v13563_v41 = vld [vmem:[#allocation2 + $0xd3c] ss:$56 sps:$4 sm:$0xff]   ;;  %v13558_v42 = vld [vmem:[#allocation2 + $0xd20] ss:$56 sps:$4 sm:$0xff]  }
 0x1bd   : > { %v13561_v43 = vld [vmem:[#allocation2 + $0xd38] ss:$56 sps:$4 sm:$0xff]  }
 0x1bf   : > { %3193 = vmatpush1.bf16.msra.mxu0 %v13486_v44  ;;  %3992 = vmatpush1.bf16.msra.mxu1 %v13489_v45  ;;  %v13566_v44 = vld [vmem:[#allocation2 + $0xd94] ss:$56 sps:$4 sm:$0xff]  }
 0x1c0   : > { %3194 = vmatprep.subr.bf16.mxu0 %v13494_v46  ;;  %3993 = vmatprep.subr.bf16.mxu1 %v13497_v47  ;;  %v13569_v45 = vld [vmem:[#allocation2 + $0xdac] ss:$56 sps:$4 sm:$0xff]   ;;  %v13564_v46 = vld [vmem:[#allocation2 + $0xd90] ss:$56 sps:$4 sm:$0xff]  }
 0x1c1   : > { %v13567_v47 = vld [vmem:[#allocation2 + $0xda8] ss:$56 sps:$4 sm:$0xff]  }
 0x1c3   : > { %3195 = vmatpush1.bf16.msra.mxu0 %v13492_v48  ;;  %3994 = vmatpush1.bf16.msra.mxu1 %v13495_v49  ;;  %v13572_v48 = vld [vmem:[#allocation2 + $0xa94] ss:$56 sps:$4 sm:$0xff]  }
 0x1c4   : > { %3196 = vmatprep.subr.bf16.mxu0 %v13500_v50  ;;  %3995 = vmatprep.subr.bf16.mxu1 %v13503_v51  ;;  %v13575_v49 = vld [vmem:[#allocation2 + $0xaac] ss:$56 sps:$4 sm:$0xff]   ;;  %v13570_v50 = vld [vmem:[#allocation2 + $0xa90] ss:$56 sps:$4 sm:$0xff]  }
 0x1c5   : > { %v13573_v51 = vld [vmem:[#allocation2 + $0xaa8] ss:$56 sps:$4 sm:$0xff]  }
 0x1c7   : > { %3197 = vmatpush1.bf16.msra.mxu0 %v13498_v53  ;;  %3996 = vmatpush1.bf16.msra.mxu1 %v13501_v54  ;;  %v13581_v53 = vld [vmem:[#allocation2 + $0xb1c] ss:$56 sps:$4 sm:$0xff]   ;;  %v13576_v54 = vld [vmem:[#allocation2 + $0xb00] ss:$56 sps:$4 sm:$0xff]  }
 0x1c8   : > { %3198 = vmatprep.subr.bf16.mxu0 %v13506_v55  ;;  %3997 = vmatprep.subr.bf16.mxu1 %v13509_v56  ;;  %v13579_v55 = vld [vmem:[#allocation2 + $0xb18] ss:$56 sps:$4 sm:$0xff]   ;;  %v13584_v56 = vld [vmem:[#allocation2 + $0xb74] ss:$56 sps:$4 sm:$0xff]  }
 0x1cb   : > { %3199 = vmatpush1.bf16.msra.mxu0 %v13504_v59  ;;  %3998 = vmatpush1.bf16.msra.mxu1 %v13507_v12  ;;  %v13585_v59 = vld [vmem:[#allocation2 + $0xb88] ss:$56 sps:$4 sm:$0xff]   ;;  %v13590_v12 = vld [vmem:[#allocation2 + $0xbe4] ss:$56 sps:$4 sm:$0xff]  }
 0x1cc   : > { %3200 = vmatprep.subr.bf16.mxu0 %v13512_v60  ;;  %3999 = vmatprep.subr.bf16.mxu1 %v13515_v61  ;;  %v13593_v60 = vld [vmem:[#allocation2 + $0xbfc] ss:$56 sps:$4 sm:$0xff]   ;;  %v13588_v61 = vld [vmem:[#allocation2 + $0xbe0] ss:$56 sps:$4 sm:$0xff]  }
 0x1cf   : > { %3201 = vmatpush1.bf16.msra.mxu0 %v13510_v63  ;;  %4000 = vmatpush1.bf16.msra.mxu1 %v13513_v1  ;;  %v13596_v63 = vld [vmem:[#allocation2 + $0xc54] ss:$56 sps:$4 sm:$0xff]  }
 0x1d0   : > { %3202 = vmatprep.subr.bf16.mxu0 %v13518_v2  ;;  %4001 = vmatprep.subr.bf16.mxu1 %v13521_v3  ;;  %v13599_v1 = vld [vmem:[#allocation2 + $0xc6c] ss:$56 sps:$4 sm:$0xff]   ;;  %v13594_v2 = vld [vmem:[#allocation2 + $0xc50] ss:$56 sps:$4 sm:$0xff]  }
 0x1d1   : > { %v13597_v3 = vld [vmem:[#allocation2 + $0xc68] ss:$56 sps:$4 sm:$0xff]  }
 0x1d3   : > { %3203 = vmatpush1.bf16.msra.mxu0 %v13516_v6  ;;  %4002 = vmatpush1.bf16.msra.mxu1 %v13519_v7  ;;  %v13600_v6 = vld [vmem:[#allocation2 + $0xcc0] ss:$56 sps:$4 sm:$0xff]  }
 0x1d4   : > { %3944 = vmatprep.subr.bf16.mxu0 %v13524_v9  ;;  %4073 = vmatprep.subr.bf16.mxu1 %v13527_v10  ;;  %v13603_v7 = vld [vmem:[#allocation2 + $0xcd8] ss:$56 sps:$4 sm:$0xff]   ;;  %v13608_v9 = vld [vmem:[#allocation2 + $0xd34] ss:$56 sps:$4 sm:$0xff]  }
 0x1d5   : > { %v13611_v10 = vld [vmem:[#allocation2 + $0xd4c] ss:$56 sps:$4 sm:$0xff]  }
 0x1d6   : > { %3221 = vmatmul.mubr.bf16.vlgmr.msra.gmra.mrb[8].mxu0 %v15599_v27  ;;  %4020 = vmatmul.mubr.bf16.vlgmr.msra.gmra.mrb[4].mxu1 %v15615_v14 }
 0x1d7   : > { %3945 = vmatpush1.bf16.msra.mxu0 %v13522_v11  ;;  %4074 = vmatpush1.bf16.msra.mxu1 %v13525_v16  ;;  %v13606_v11 = vld [vmem:[#allocation2 + $0xd30] ss:$56 sps:$4 sm:$0xff]  }
 0x1d8   : > { %3946 = vmatprep.subr.bf16.mxu0 %v13530_v18  ;;  %4075 = vmatprep.subr.bf16.mxu1 %v13533_v8  ;;  %v13609_v16 = vld [vmem:[#allocation2 + $0xd48] ss:$56 sps:$4 sm:$0xff]   ;;  %v13614_v18 = vld [vmem:[#allocation2 + $0xda4] ss:$56 sps:$4 sm:$0xff]  }
 0x1d9   : > { %3976 = vmatprep.mubr.bf16.mxu0 %v16089_v0  ;;  %4105 = vmatprep.mubr.bf16.mxu1 %v16089_v0  ;;  %v13617_v8 = vld [vmem:[#allocation2 + $0xdbc] ss:$56 sps:$4 sm:$0xff]  }
 0x1db   : > { %3947 = vmatpush1.bf16.msra.mxu0 %v13528_v20  ;;  %4076 = vmatpush1.bf16.msra.mxu1 %v13531_v21  ;;  %v13612_v20 = vld [vmem:[#allocation2 + $0xda0] ss:$56 sps:$4 sm:$0xff]  }
 0x1dc   : > { %3948 = vmatprep.subr.bf16.mxu0 %v13536_v22  ;;  %4077 = vmatprep.subr.bf16.mxu1 %v13539_v23  ;;  %v13615_v21 = vld [vmem:[#allocation2 + $0xdb8] ss:$56 sps:$4 sm:$0xff]   ;;  %v13620_v22 = vld [vmem:[#allocation2 + $0xaa4] ss:$56 sps:$4 sm:$0xff]  }
 0x1dd   : > { %v13623_v23 = vld [vmem:[#allocation2 + $0xe0c] ss:$56 sps:$4 sm:$0xff]  }
 0x1df   : > { %3949 = vmatpush1.bf16.msra.mxu0 %v13534_v24  ;;  %4078 = vmatpush1.bf16.msra.mxu1 %v13537_v25  ;;  %v13618_v24 = vld [vmem:[#allocation2 + $0xaa0] ss:$56 sps:$4 sm:$0xff]  }
 0x1e0   : > { %3950 = vmatprep.subr.bf16.mxu0 %v13542_v26  ;;  %4079 = vmatprep.subr.bf16.mxu1 %v13545_v28  ;;  %v13621_v25 = vld [vmem:[#allocation2 + $0xe08] ss:$56 sps:$4 sm:$0xff]   ;;  %v13626_v26 = vld [vmem:[#allocation2 + $0xb14] ss:$56 sps:$4 sm:$0xff]  }
 0x1e1   : > { %v13629_v28 = vld [vmem:[#allocation2 + $0xe7c] ss:$56 sps:$4 sm:$0xff]  }
 0x1e3   : > { %3951 = vmatpush1.bf16.msra.mxu0 %v13540_v29  ;;  %4080 = vmatpush1.bf16.msra.mxu1 %v13543_v30  ;;  %v13624_v29 = vld [vmem:[#allocation2 + $0xb10] ss:$56 sps:$4 sm:$0xff]  }
 0x1e4   : > { %3952 = vmatprep.subr.bf16.mxu0 %v13548_v31  ;;  %4081 = vmatprep.subr.bf16.mxu1 %v13551_v32  ;;  %v13627_v30 = vld [vmem:[#allocation2 + $0xe78] ss:$56 sps:$4 sm:$0xff]   ;;  %v13632_v31 = vld [vmem:[#allocation2 + $0xb84] ss:$56 sps:$4 sm:$0xff]  }
 0x1e5   : > { %v13635_v32 = vld [vmem:[#allocation2 + $0xeec] ss:$56 sps:$4 sm:$0xff]  }
 0x1e7   : > { %3953 = vmatpush1.bf16.msra.mxu0 %v13546_v33  ;;  %4082 = vmatpush1.bf16.msra.mxu1 %v13549_v34  ;;  %v13630_v33 = vld [vmem:[#allocation2 + $0xb80] ss:$56 sps:$4 sm:$0xff]  }
 0x1e8   : > { %3954 = vmatprep.subr.bf16.mxu0 %v13554_v35  ;;  %4083 = vmatprep.subr.bf16.mxu1 %v13557_v36  ;;  %v13633_v34 = vld [vmem:[#allocation2 + $0xee8] ss:$56 sps:$4 sm:$0xff]   ;;  %v13638_v35 = vld [vmem:[#allocation2 + $0xbf4] ss:$56 sps:$4 sm:$0xff]  }
 0x1e9   : > { %v13641_v36 = vld [vmem:[#allocation2 + $0xf5c] ss:$56 sps:$4 sm:$0xff]  }
 0x1eb   : > { %3955 = vmatpush1.bf16.msra.mxu0 %v13552_v38  ;;  %4084 = vmatpush1.bf16.msra.mxu1 %v13555_v39  ;;  %v13636_v38 = vld [vmem:[#allocation2 + $0xbf0] ss:$56 sps:$4 sm:$0xff]  }
 0x1ec   : > { %3956 = vmatprep.subr.bf16.mxu0 %v13560_v40  ;;  %4085 = vmatprep.subr.bf16.mxu1 %v13563_v41  ;;  %v13639_v39 = vld [vmem:[#allocation2 + $0xf58] ss:$56 sps:$4 sm:$0xff]   ;;  %v13644_v40 = vld [vmem:[#allocation2 + $0xc64] ss:$56 sps:$4 sm:$0xff]  }
 0x1ed   : > { %v13647_v41 = vld [vmem:[#allocation2 + $0xfcc] ss:$56 sps:$4 sm:$0xff]  }
 0x1ef   : > { %3957 = vmatpush1.bf16.msra.mxu0 %v13558_v42  ;;  %4086 = vmatpush1.bf16.msra.mxu1 %v13561_v43  ;;  %v13642_v42 = vld [vmem:[#allocation2 + $0xc60] ss:$56 sps:$4 sm:$0xff]  }
 0x1f0   : > { %3958 = vmatprep.subr.bf16.mxu0 %v13566_v44  ;;  %4087 = vmatprep.subr.bf16.mxu1 %v13569_v45  ;;  %v13645_v43 = vld [vmem:[#allocation2 + $0xfc8] ss:$56 sps:$4 sm:$0xff]   ;;  %v13650_v44 = vld [vmem:[#allocation2 + $0xcd4] ss:$56 sps:$4 sm:$0xff]  }
 0x1f1   : > { %v13653_v45 = vld [vmem:[#allocation2 + $0x103c] ss:$56 sps:$4 sm:$0xff]  }
 0x1f3   : > { %3959 = vmatpush1.bf16.msra.mxu0 %v13564_v46  ;;  %4088 = vmatpush1.bf16.msra.mxu1 %v13567_v47  ;;  %v13648_v46 = vld [vmem:[#allocation2 + $0xcd0] ss:$56 sps:$4 sm:$0xff]  }
 0x1f4   : > { %4030 = vmatprep.subr.bf16.mxu0 %v13572_v48  ;;  %4159 = vmatprep.subr.bf16.mxu1 %v13575_v49  ;;  %v13651_v47 = vld [vmem:[#allocation2 + $0x1038] ss:$56 sps:$4 sm:$0xff]   ;;  %v13656_v48 = vld [vmem:[#allocation2 + $0xd44] ss:$56 sps:$4 sm:$0xff]  }
 0x1f5   : > { %v13659_v49 = vld [vmem:[#allocation2 + $0x10ac] ss:$56 sps:$4 sm:$0xff]  }
 0x1f6   : > { %3977 = vmatmul.mubr.bf16.vlgmr.msra.gmra.mrb[12].mxu0 %v15615_v14  ;;  %4106 = vmatmul.mubr.bf16.vlgmr.msra.gmra.mrb[8].mxu1 %v15615_v14 }
 0x1f7   : > { %4031 = vmatpush1.bf16.msra.mxu0 %v13570_v50  ;;  %4160 = vmatpush1.bf16.msra.mxu1 %v13573_v51  ;;  %v4273_v50 = vld [vmem:[%s15548_s14] sm:$0xe] }
 0x1f8   : > { %4032 = vmatprep.subr.bf16.mxu0 %v13578_v52  ;;  %4161 = vmatprep.subr.bf16.mxu1 %v13581_v53  ;;  %v13654_v51 = vld [vmem:[#allocation2 + $0xd40] ss:$56 sps:$4 sm:$0xff]   ;;  %v13662_v53 = vld [vmem:[#allocation2 + $0xdb4] ss:$56 sps:$4 sm:$0xff]  }
 0x1f9   : > { %4062 = vmatprep.mubr.bf16.mxu0 %v16089_v0  ;;  %4191 = vmatprep.mubr.bf16.mxu1 %v16089_v0  ;;  %v13657_v52 = vld [vmem:[#allocation2 + $0x10a8] ss:$56 sps:$4 sm:$0xff]  }
 0x1fb   : > { %4033 = vmatpush1.bf16.msra.mxu0 %v13576_v54  ;;  %4162 = vmatpush1.bf16.msra.mxu1 %v13579_v55  ;;  %v13665_v54 = vld [vmem:[#allocation2 + $0x111c] ss:$56 sps:$4 sm:$0xff]   ;;  %v13660_v55 = vld [vmem:[#allocation2 + $0xdb0] ss:$56 sps:$4 sm:$0xff]  }
 0x1fc   : > { %4034 = vmatprep.subr.bf16.mxu0 %v13584_v56  ;;  %4163 = vmatprep.subr.bf16.mxu1 %v13587_v57  ;;  %v13663_v56 = vld [vmem:[#allocation2 + $0x1118] ss:$56 sps:$4 sm:$0xff]   ;;  %v14676_v57 = vld [vmem:[%s15548_s14 + $0x4] sm:$0xf] }
 0x1ff   : > { %4035 = vmatpush1.bf16.msra.mxu0 %v13582_v58  ;;  %4164 = vmatpush1.bf16.msra.mxu1 %v13585_v59  ;;  %v11951_v58 = vcombine.low %v4273_v50, %v14676_v57  ;;  %v13668_v59 = vld [vmem:[#allocation2 + $0xab4] ss:$56 sps:$4 sm:$0xff]   ;;  %v13732_v50 = vld [vmem:[#allocation2 + $0xf50] ss:$56 sps:$4 sm:$0xff]  }
 0x200   : > { %4036 = vmatprep.subr.bf16.mxu0 %v13590_v12  ;;  %4165 = vmatprep.subr.bf16.mxu1 %v13593_v60  ;;  %v13671_v12 = vld [vmem:[#allocation2 + $0xe1c] ss:$56 sps:$4 sm:$0xff]   ;;  %v13666_v60 = vld [vmem:[#allocation2 + $0xab0] ss:$56 sps:$4 sm:$0xff]  }
 0x201   : > { %v13749_v57 = vld [vmem:[#allocation2 + $0x105c] ss:$56 sps:$4 sm:$0xff]  }
 0x203   : > { %4037 = vmatpush1.bf16.msra.mxu0 %v13588_v61  ;;  %4166 = vmatpush1.bf16.msra.mxu1 %v13591_v62  ;;  %v13669_v61 = vld [vmem:[#allocation2 + $0xe18] ss:$56 sps:$4 sm:$0xff]   ;;  %v15631_v62 = vrot.slane %v11951_v58, 1 }
 0x204   : > { %4038 = vmatprep.subr.bf16.mxu0 %v13596_v63  ;;  %4167 = vmatprep.subr.bf16.mxu1 %v13599_v1  ;;  %v13674_v63 = vld [vmem:[#allocation2 + $0xb24] ss:$56 sps:$4 sm:$0xff]   ;;  %v13744_v58 = vld [vmem:[#allocation2 + $0x1030] ss:$56 sps:$4 sm:$0xff]  }
 0x205   : > { %v13677_v1 = vld [vmem:[#allocation2 + $0xe8c] ss:$56 sps:$4 sm:$0xff]  }
 0x207   : > { %4039 = vmatpush1.bf16.msra.mxu0 %v13594_v2  ;;  %4168 = vmatpush1.bf16.msra.mxu1 %v13597_v3  ;;  %v13672_v2 = vld [vmem:[#allocation2 + $0xb20] ss:$56 sps:$4 sm:$0xff]  }
 0x208   : > { %4040 = vmatprep.subr.bf16.mxu0 %v13602_v4  ;;  %4169 = vmatprep.subr.bf16.mxu1 %v13605_v5  ;;  %v13675_v3 = vld [vmem:[#allocation2 + $0xe88] ss:$56 sps:$4 sm:$0xff]   ;;  %v13680_v4 = vld [vmem:[#allocation2 + $0xb94] ss:$56 sps:$4 sm:$0xff]  }
 0x209   : > { %v13683_v5 = vld [vmem:[#allocation2 + $0xefc] ss:$56 sps:$4 sm:$0xff]  }
 0x20b   : > { %4041 = vmatpush1.bf16.msra.mxu0 %v13600_v6  ;;  %4170 = vmatpush1.bf16.msra.mxu1 %v13603_v7  ;;  %v13678_v6 = vld [vmem:[#allocation2 + $0xb90] ss:$56 sps:$4 sm:$0xff]  }
 0x20c   : > { %4042 = vmatprep.subr.bf16.mxu0 %v13608_v9  ;;  %4171 = vmatprep.subr.bf16.mxu1 %v13611_v10  ;;  %v13681_v7 = vld [vmem:[#allocation2 + $0xef8] ss:$56 sps:$4 sm:$0xff]   ;;  %v13686_v9 = vld [vmem:[#allocation2 + $0xc04] ss:$56 sps:$4 sm:$0xff]  }
 0x20d   : > { %v13689_v10 = vld [vmem:[#allocation2 + $0xf6c] ss:$56 sps:$4 sm:$0xff]  }
 0x20f   : > { %4043 = vmatpush1.bf16.msra.mxu0 %v13606_v11  ;;  %4172 = vmatpush1.bf16.msra.mxu1 %v13609_v16  ;;  %v13684_v11 = vld [vmem:[#allocation2 + $0xc00] ss:$56 sps:$4 sm:$0xff]  }
 0x210   : > { %4044 = vmatprep.subr.bf16.mxu0 %v13614_v18  ;;  %4173 = vmatprep.subr.bf16.mxu1 %v13617_v8  ;;  %v13687_v16 = vld [vmem:[#allocation2 + $0xf68] ss:$56 sps:$4 sm:$0xff]   ;;  %v13692_v18 = vld [vmem:[#allocation2 + $0xc74] ss:$56 sps:$4 sm:$0xff]  }
 0x211   : > { %v13695_v8 = vld [vmem:[#allocation2 + $0xfdc] ss:$56 sps:$4 sm:$0xff]  }
 0x213   : > { %4045 = vmatpush1.bf16.msra.mxu0 %v13612_v20  ;;  %4174 = vmatpush1.bf16.msra.mxu1 %v13615_v21  ;;  %v13690_v20 = vld [vmem:[#allocation2 + $0xc70] ss:$56 sps:$4 sm:$0xff]  }
 0x214   : > { %4116 = vmatprep.subr.bf16.mxu0 %v13620_v22  ;;  %4995 = vmatprep.subr.bf16.mxu1 %v13623_v23  ;;  %v13693_v21 = vld [vmem:[#allocation2 + $0xfd8] ss:$56 sps:$4 sm:$0xff]   ;;  %v13698_v22 = vld [vmem:[#allocation2 + $0xce4] ss:$56 sps:$4 sm:$0xff]  }
 0x215   : > { %v13701_v23 = vld [vmem:[#allocation2 + $0x104c] ss:$56 sps:$4 sm:$0xff]  }
 0x216   : > { %4063 = vmatmul.mubr.bf16.vlgmr.msra.gmra.mrb[0].mxu0 %v15615_v14  ;;  %4192 = vmatmul.mubr.bf16.vlgmr.msra.gmra.mrb[12].mxu1 %v15615_v14 }
 0x217   : > { %4117 = vmatpush1.bf16.msra.mxu0 %v13618_v24  ;;  %4996 = vmatpush1.bf16.msra.mxu1 %v13621_v25  ;;  %v13696_v24 = vld [vmem:[#allocation2 + $0xce0] ss:$56 sps:$4 sm:$0xff]  }
 0x218   : > { %4118 = vmatprep.subr.bf16.mxu0 %v13626_v26  ;;  %4997 = vmatprep.subr.bf16.mxu1 %v13629_v28  ;;  %v13699_v25 = vld [vmem:[#allocation2 + $0x1048] ss:$56 sps:$4 sm:$0xff]   ;;  %v13704_v26 = vld [vmem:[#allocation2 + $0xd54] ss:$56 sps:$4 sm:$0xff]  }
 0x219   : > { %5027 = vmatprep.mubr.bf16.mxu1 %v16089_v0  ;;  %4148 = vmatprep.mubr.bf16.mxu0 %v16089_v0  ;;  %v13707_v28 = vld [vmem:[#allocation2 + $0x10bc] ss:$56 sps:$4 sm:$0xff]  }
 0x21b   : > { %4119 = vmatpush1.bf16.msra.mxu0 %v13624_v29  ;;  %4998 = vmatpush1.bf16.msra.mxu1 %v13627_v30  ;;  %v13702_v29 = vld [vmem:[#allocation2 + $0xd50] ss:$56 sps:$4 sm:$0xff]  }
 0x21c   : > { %4120 = vmatprep.subr.bf16.mxu0 %v13632_v31  ;;  %4999 = vmatprep.subr.bf16.mxu1 %v13635_v32  ;;  %v13705_v30 = vld [vmem:[#allocation2 + $0x10b8] ss:$56 sps:$4 sm:$0xff]   ;;  %v13710_v31 = vld [vmem:[#allocation2 + $0xdc4] ss:$56 sps:$4 sm:$0xff]  }
 0x21d   : > { %v13713_v32 = vld [vmem:[#allocation2 + $0x112c] ss:$56 sps:$4 sm:$0xff]  }
 0x21f   : > { %4121 = vmatpush1.bf16.msra.mxu0 %v13630_v33  ;;  %5000 = vmatpush1.bf16.msra.mxu1 %v13633_v34  ;;  %v13708_v33 = vld [vmem:[#allocation2 + $0xdc0] ss:$56 sps:$4 sm:$0xff]  }
 0x220   : > { %4122 = vmatprep.subr.bf16.mxu0 %v13638_v35  ;;  %5001 = vmatprep.subr.bf16.mxu1 %v13641_v36  ;;  %v13711_v34 = vld [vmem:[#allocation2 + $0x1128] ss:$56 sps:$4 sm:$0xff]   ;;  %v13716_v35 = vld [vmem:[#allocation2 + $0xe04] ss:$56 sps:$4 sm:$0xff]  }
 0x221   : > { %v13719_v36 = vld [vmem:[#allocation2 + $0xe2c] ss:$56 sps:$4 sm:$0xff]  }
 0x223   : > { %4123 = vmatpush1.bf16.msra.mxu0 %v13636_v38  ;;  %5002 = vmatpush1.bf16.msra.mxu1 %v13639_v39  ;;  %v13714_v38 = vld [vmem:[#allocation2 + $0xe00] ss:$56 sps:$4 sm:$0xff]  }
 0x224   : > { %4124 = vmatprep.subr.bf16.mxu0 %v13644_v40  ;;  %5003 = vmatprep.subr.bf16.mxu1 %v13647_v41  ;;  %v13717_v39 = vld [vmem:[#allocation2 + $0xe28] ss:$56 sps:$4 sm:$0xff]   ;;  %v13722_v40 = vld [vmem:[#allocation2 + $0xe74] ss:$56 sps:$4 sm:$0xff]  }
 0x225   : > { %v13725_v41 = vld [vmem:[#allocation2 + $0xe9c] ss:$56 sps:$4 sm:$0xff]  }
 0x227   : > { %4125 = vmatpush1.bf16.msra.mxu0 %v13642_v42  ;;  %5004 = vmatpush1.bf16.msra.mxu1 %v13645_v43  ;;  %v13720_v42 = vld [vmem:[#allocation2 + $0xe70] ss:$56 sps:$4 sm:$0xff]  }
 0x228   : > { %4126 = vmatprep.subr.bf16.mxu0 %v13650_v44  ;;  %5005 = vmatprep.subr.bf16.mxu1 %v13653_v45  ;;  %v13723_v43 = vld [vmem:[#allocation2 + $0xe98] ss:$56 sps:$4 sm:$0xff]   ;;  %v13728_v44 = vld [vmem:[#allocation2 + $0xee4] ss:$56 sps:$4 sm:$0xff]  }
 0x229   : > { %v13731_v45 = vld [vmem:[#allocation2 + $0xf0c] ss:$56 sps:$4 sm:$0xff]  }
 0x22b   : > { %4127 = vmatpush1.bf16.msra.mxu0 %v13648_v46  ;;  %5006 = vmatpush1.bf16.msra.mxu1 %v13651_v47  ;;  %v13726_v46 = vld [vmem:[#allocation2 + $0xee0] ss:$56 sps:$4 sm:$0xff]  }
 0x22c   : > { %4128 = vmatprep.subr.bf16.mxu0 %v13656_v48  ;;  %5007 = vmatprep.subr.bf16.mxu1 %v13659_v49  ;;  %v13729_v47 = vld [vmem:[#allocation2 + $0xf08] ss:$56 sps:$4 sm:$0xff]   ;;  %v13734_v48 = vld [vmem:[#allocation2 + $0xf54] ss:$56 sps:$4 sm:$0xff]  }
 0x22d   : > { %v13737_v49 = vld [vmem:[#allocation2 + $0xf7c] ss:$56 sps:$4 sm:$0xff]  }
 0x22f   : > { %4129 = vmatpush1.bf16.msra.mxu0 %v13654_v51  ;;  %5008 = vmatpush1.bf16.msra.mxu1 %v13657_v52  ;;  %v13735_v51 = vld [vmem:[#allocation2 + $0xf78] ss:$56 sps:$4 sm:$0xff]   ;;  %v13740_v52 = vld [vmem:[#allocation2 + $0xfc4] ss:$56 sps:$4 sm:$0xff]  }
 0x230   : > { %4130 = vmatprep.subr.bf16.mxu0 %v13662_v53  ;;  %5009 = vmatprep.subr.bf16.mxu1 %v13665_v54  ;;  %v13743_v53 = vld [vmem:[#allocation2 + $0xfec] ss:$56 sps:$4 sm:$0xff]   ;;  %v13738_v54 = vld [vmem:[#allocation2 + $0xfc0] ss:$56 sps:$4 sm:$0xff]  }
 0x233   : > { %4131 = vmatpush1.bf16.msra.mxu0 %v13660_v55  ;;  %5010 = vmatpush1.bf16.msra.mxu1 %v13663_v56  ;;  %v13741_v55 = vld [vmem:[#allocation2 + $0xfe8] ss:$56 sps:$4 sm:$0xff]   ;;  %v13746_v56 = vld [vmem:[#allocation2 + $0x1034] ss:$56 sps:$4 sm:$0xff]  }
 0x234   : > { %4202 = vmatprep.subr.bf16.mxu0 %v13668_v59  ;;  %5081 = vmatprep.subr.bf16.mxu1 %v13671_v12  ;;  %v13747_v59 = vld [vmem:[#allocation2 + $0x1058] ss:$56 sps:$4 sm:$0xff]   ;;  %v13752_v12 = vld [vmem:[#allocation2 + $0x10a4] ss:$56 sps:$4 sm:$0xff]  }
 0x236   : > { %5028 = vmatmul.mubr.bf16.vlgmr.msra.gmra.mrb[4].mxu1 %v15631_v62  ;;  %4149 = vmatmul.mubr.bf16.vlgmr.msra.gmra.mrb[4].mxu0 %v15615_v14 }
 0x237   : > { %4203 = vmatpush1.bf16.msra.mxu0 %v13666_v60  ;;  %5082 = vmatpush1.bf16.msra.mxu1 %v13669_v61  ;;  %v13755_v60 = vld [vmem:[#allocation2 + $0x10cc] ss:$56 sps:$4 sm:$0xff]   ;;  %v13750_v61 = vld [vmem:[#allocation2 + $0x10a0] ss:$56 sps:$4 sm:$0xff]  }
 0x238   : > { %4204 = vmatprep.subr.bf16.mxu0 %v13674_v63  ;;  %5083 = vmatprep.subr.bf16.mxu1 %v13677_v1  ;;  %v13753_v63 = vld [vmem:[#allocation2 + $0x10c8] ss:$56 sps:$4 sm:$0xff]   ;;  %v13758_v1 = vld [vmem:[#allocation2 + $0x1114] ss:$56 sps:$4 sm:$0xff]  }
 0x239   : > { %5113 = vmatprep.mubr.bf16.mxu1 %v16089_v0  ;;  %4234 = vmatprep.mubr.bf16.mxu0 %v16089_v0 }
 0x23b   : > { %4205 = vmatpush1.bf16.msra.mxu0 %v13672_v2  ;;  %5084 = vmatpush1.bf16.msra.mxu1 %v13675_v3  ;;  %v13761_v2 = vld [vmem:[#allocation2 + $0x113c] ss:$56 sps:$4 sm:$0xff]   ;;  %v13756_v3 = vld [vmem:[#allocation2 + $0x1110] ss:$56 sps:$4 sm:$0xff]  }
 0x23c   : > { %4206 = vmatprep.subr.bf16.mxu0 %v13680_v4  ;;  %5085 = vmatprep.subr.bf16.mxu1 %v13683_v5  ;;  %v13759_v4 = vld [vmem:[#allocation2 + $0x1138] ss:$56 sps:$4 sm:$0xff]   ;;  %v13764_v5 = vld [vmem:[#allocation2 + $0xe14] ss:$56 sps:$4 sm:$0xff]  }
 0x23f   : > { %4207 = vmatpush1.bf16.msra.mxu0 %v13678_v6  ;;  %5086 = vmatpush1.bf16.msra.mxu1 %v13681_v7  ;;  %v13762_v6 = vld [vmem:[#allocation2 + $0xe10] ss:$56 sps:$4 sm:$0xff]   ;;  %v13767_v7 = vld [vmem:[#allocation2 + $0xe84] ss:$56 sps:$4 sm:$0xff]  }
 0x240   : > { %4208 = vmatprep.subr.bf16.mxu0 %v13686_v9  ;;  %5087 = vmatprep.subr.bf16.mxu1 %v13689_v10  ;;  %v14677_v9 = vld [vmem:[#allocation2 + $0x384] ss:$56 sps:$4 sm:$0xff]   ;;  %v13765_v10 = vld [vmem:[#allocation2 + $0xe80] ss:$56 sps:$4 sm:$0xff]  }
 0x243   : > { %4209 = vmatpush1.bf16.msra.mxu0 %v13684_v11  ;;  %5088 = vmatpush1.bf16.msra.mxu1 %v13687_v16  ;;  %v13770_v11 = vld [vmem:[#allocation2 + $0xef4] ss:$56 sps:$4 sm:$0xff]   ;;  %v14678_v16 = vld [vmem:[#allocation2 + $0x380] ss:$56 sps:$4 sm:$0xff]  }
 0x244   : > { %4210 = vmatprep.subr.bf16.mxu0 %v13692_v18  ;;  %5089 = vmatprep.subr.bf16.mxu1 %v13695_v8  ;;  %v14679_v18 = vld [vmem:[#allocation2 + $0x3f4] ss:$56 sps:$4 sm:$0xff]   ;;  %v13768_v8 = vld [vmem:[#allocation2 + $0xef0] ss:$56 sps:$4 sm:$0xff]  }
 0x247   : > { %4211 = vmatpush1.bf16.msra.mxu0 %v13690_v20  ;;  %5090 = vmatpush1.bf16.msra.mxu1 %v13693_v21  ;;  %v13773_v20 = vld [vmem:[#allocation2 + $0xf64] ss:$56 sps:$4 sm:$0xff]   ;;  %v14680_v21 = vld [vmem:[#allocation2 + $0x3f0] ss:$56 sps:$4 sm:$0xff]  }
 0x248   : > { %4212 = vmatprep.subr.bf16.mxu0 %v13698_v22  ;;  %5091 = vmatprep.subr.bf16.mxu1 %v13701_v23  ;;  %v14681_v22 = vld [vmem:[#allocation2 + $0x464] ss:$56 sps:$4 sm:$0xff]   ;;  %v13771_v23 = vld [vmem:[#allocation2 + $0xf60] ss:$56 sps:$4 sm:$0xff]  }
 0x24b   : > { %4213 = vmatpush1.bf16.msra.mxu0 %v13696_v24  ;;  %5092 = vmatpush1.bf16.msra.mxu1 %v13699_v25  ;;  %v13776_v24 = vld [vmem:[#allocation2 + $0xfd4] ss:$56 sps:$4 sm:$0xff]   ;;  %v14682_v25 = vld [vmem:[#allocation2 + $0x460] ss:$56 sps:$4 sm:$0xff]  }
 0x24c   : > { %4214 = vmatprep.subr.bf16.mxu0 %v13704_v26  ;;  %5093 = vmatprep.subr.bf16.mxu1 %v13707_v28  ;;  %v14683_v26 = vld [vmem:[#allocation2 + $0x4d4] ss:$56 sps:$4 sm:$0xff]   ;;  %v13774_v28 = vld [vmem:[#allocation2 + $0xfd0] ss:$56 sps:$4 sm:$0xff]  }
 0x24f   : > { %4215 = vmatpush1.bf16.msra.mxu0 %v13702_v29  ;;  %5094 = vmatpush1.bf16.msra.mxu1 %v13705_v30  ;;  %v13779_v29 = vld [vmem:[#allocation2 + $0x1044] ss:$56 sps:$4 sm:$0xff]   ;;  %v14684_v30 = vld [vmem:[#allocation2 + $0x4d0] ss:$56 sps:$4 sm:$0xff]  }
 0x250   : > { %4216 = vmatprep.subr.bf16.mxu0 %v13710_v31  ;;  %5095 = vmatprep.subr.bf16.mxu1 %v13713_v32  ;;  %v14685_v31 = vld [vmem:[#allocation2 + $0x544] ss:$56 sps:$4 sm:$0xff]   ;;  %v13777_v32 = vld [vmem:[#allocation2 + $0x1040] ss:$56 sps:$4 sm:$0xff]  }
 0x253   : > { %4217 = vmatpush1.bf16.msra.mxu0 %v13708_v33  ;;  %5096 = vmatpush1.bf16.msra.mxu1 %v13711_v34  ;;  %v13782_v33 = vld [vmem:[#allocation2 + $0x10b4] ss:$56 sps:$4 sm:$0xff]   ;;  %v14686_v34 = vld [vmem:[#allocation2 + $0x540] ss:$56 sps:$4 sm:$0xff]  }
 0x254   : > { %4952 = vmatprep.subr.bf16.mxu0 %v13716_v35  ;;  %5167 = vmatprep.subr.bf16.mxu1 %v13719_v36  ;;  %v14687_v35 = vld [vmem:[#allocation2 + $0x5b4] ss:$56 sps:$4 sm:$0xff]   ;;  %v13780_v36 = vld [vmem:[#allocation2 + $0x10b0] ss:$56 sps:$4 sm:$0xff]  }
 0x256   : > { %5114 = vmatmul.mubr.bf16.vlgmr.msra.gmra.mrb[8].mxu1 %v15631_v62  ;;  %4235 = vmatmul.mubr.bf16.vlgmr.msra.gmra.mrb[8].mxu0 %v15615_v14 }
 0x257   : > { %4953 = vmatpush1.bf16.msra.mxu0 %v13714_v38  ;;  %5168 = vmatpush1.bf16.msra.mxu1 %v13717_v39  ;;  %v13785_v38 = vld [vmem:[#allocation2 + $0x1124] ss:$56 sps:$4 sm:$0xff]   ;;  %v14688_v39 = vld [vmem:[#allocation2 + $0x5b0] ss:$56 sps:$4 sm:$0xff]  }
 0x258   : > { %4954 = vmatprep.subr.bf16.mxu0 %v13722_v40  ;;  %5169 = vmatprep.subr.bf16.mxu1 %v13725_v41  ;;  %v14689_v40 = vld [vmem:[#allocation2 + $0x624] ss:$56 sps:$4 sm:$0xff]   ;;  %v13783_v41 = vld [vmem:[#allocation2 + $0x1120] ss:$56 sps:$4 sm:$0xff]  }
 0x259   : > { %4984 = vmatprep.mubr.bf16.mxu0 %v16089_v0  ;;  %5199 = vmatprep.mubr.bf16.mxu1 %v16089_v0 }
 0x25b   : > { %4955 = vmatpush1.bf16.msra.mxu0 %v13720_v42  ;;  %5170 = vmatpush1.bf16.msra.mxu1 %v13723_v43  ;;  %v13788_v42 = vld [vmem:[#allocation2 + $0xe24] ss:$56 sps:$4 sm:$0xff]   ;;  %v14690_v43 = vld [vmem:[#allocation2 + $0x620] ss:$56 sps:$4 sm:$0xff]  }
 0x25c   : > { %4956 = vmatprep.subr.bf16.mxu0 %v13728_v44  ;;  %5171 = vmatprep.subr.bf16.mxu1 %v13731_v45  ;;  %v14691_v44 = vld [vmem:[#allocation2 + $0x694] ss:$56 sps:$4 sm:$0xff]   ;;  %v13786_v45 = vld [vmem:[#allocation2 + $0xe20] ss:$56 sps:$4 sm:$0xff]  }
 0x25f   : > { %4957 = vmatpush1.bf16.msra.mxu0 %v13726_v46  ;;  %5172 = vmatpush1.bf16.msra.mxu1 %v13729_v47  ;;  %v13791_v46 = vld [vmem:[#allocation2 + $0xe94] ss:$56 sps:$4 sm:$0xff]   ;;  %v14692_v47 = vld [vmem:[#allocation2 + $0x690] ss:$56 sps:$4 sm:$0xff]  }
 0x260   : > { %4958 = vmatprep.subr.bf16.mxu0 %v13734_v48  ;;  %5173 = vmatprep.subr.bf16.mxu1 %v13737_v49  ;;  %v14693_v48 = vld [vmem:[#allocation2 + $0x38c] ss:$56 sps:$4 sm:$0xff]   ;;  %v13789_v49 = vld [vmem:[#allocation2 + $0xe90] ss:$56 sps:$4 sm:$0xff]  }
 0x263   : > { %4959 = vmatpush1.bf16.msra.mxu0 %v13732_v50  ;;  %5174 = vmatpush1.bf16.msra.mxu1 %v13735_v51  ;;  %v13794_v50 = vld [vmem:[#allocation2 + $0xf04] ss:$56 sps:$4 sm:$0xff]   ;;  %v14694_v51 = vld [vmem:[#allocation2 + $0x388] ss:$56 sps:$4 sm:$0xff]  }
 0x264   : > { %4960 = vmatprep.subr.bf16.mxu0 %v13740_v52  ;;  %5175 = vmatprep.subr.bf16.mxu1 %v13743_v53  ;;  %v14695_v52 = vld [vmem:[#allocation2 + $0x3fc] ss:$56 sps:$4 sm:$0xff]   ;;  %v13792_v53 = vld [vmem:[#allocation2 + $0xf00] ss:$56 sps:$4 sm:$0xff]  }
 0x267   : > { %4961 = vmatpush1.bf16.msra.mxu0 %v13738_v54  ;;  %5176 = vmatpush1.bf16.msra.mxu1 %v13741_v55  ;;  %v13797_v54 = vld [vmem:[#allocation2 + $0xf74] ss:$56 sps:$4 sm:$0xff]   ;;  %v14696_v55 = vld [vmem:[#allocation2 + $0x3f8] ss:$56 sps:$4 sm:$0xff]  }
 0x268   : > { %4962 = vmatprep.subr.bf16.mxu0 %v13746_v56  ;;  %5177 = vmatprep.subr.bf16.mxu1 %v13749_v57  ;;  %v14697_v56 = vld [vmem:[#allocation2 + $0x46c] ss:$56 sps:$4 sm:$0xff]   ;;  %v13795_v57 = vld [vmem:[#allocation2 + $0xf70] ss:$56 sps:$4 sm:$0xff]  }
 0x26b   : > { %4963 = vmatpush1.bf16.msra.mxu0 %v13744_v58  ;;  %5178 = vmatpush1.bf16.msra.mxu1 %v13747_v59  ;;  %v13800_v58 = vld [vmem:[#allocation2 + $0xfe4] ss:$56 sps:$4 sm:$0xff]   ;;  %v14698_v59 = vld [vmem:[#allocation2 + $0x468] ss:$56 sps:$4 sm:$0xff]  }
 0x26c   : > { %4964 = vmatprep.subr.bf16.mxu0 %v13752_v12  ;;  %5179 = vmatprep.subr.bf16.mxu1 %v13755_v60  ;;  %v14699_v12 = vld [vmem:[#allocation2 + $0x4dc] ss:$56 sps:$4 sm:$0xff]   ;;  %v13798_v60 = vld [vmem:[#allocation2 + $0xfe0] ss:$56 sps:$4 sm:$0xff]  }
 0x26f   : > { %4965 = vmatpush1.bf16.msra.mxu0 %v13750_v61  ;;  %5180 = vmatpush1.bf16.msra.mxu1 %v13753_v63  ;;  %v13803_v61 = vld [vmem:[#allocation2 + $0x1054] ss:$56 sps:$4 sm:$0xff]   ;;  %v14700_v63 = vld [vmem:[#allocation2 + $0x4d8] ss:$56 sps:$4 sm:$0xff]  }
 0x270   : > { %4966 = vmatprep.subr.bf16.mxu0 %v13758_v1  ;;  %5181 = vmatprep.subr.bf16.mxu1 %v13761_v2  ;;  %v14701_v1 = vld [vmem:[#allocation2 + $0x54c] ss:$56 sps:$4 sm:$0xff]   ;;  %v14702_v2 = vld [vmem:[#allocation2 + $0x548] ss:$56 sps:$4 sm:$0xff]  }
 0x273   : > { %4967 = vmatpush1.bf16.msra.mxu0 %v13756_v3  ;;  %5182 = vmatpush1.bf16.msra.mxu1 %v13759_v4  ;;  %v13801_v3 = vld [vmem:[#allocation2 + $0x1050] ss:$56 sps:$4 sm:$0xff]   ;;  %v14703_v4 = vld [vmem:[#allocation2 + $0x5bc] ss:$56 sps:$4 sm:$0xff]  }
 0x274   : > { %5038 = vmatprep.subr.bf16.mxu0 %v13764_v5  ;;  %5295 = vmatprep.subr.bf16.mxu1 %v14677_v9  ;;  %v13806_v5 = vld [vmem:[#allocation2 + $0x10c4] ss:$56 sps:$4 sm:$0xff]  }
 0x275   : > { %v14705_v9 = vld [vmem:[#allocation2 + $0x62c] ss:$56 sps:$4 sm:$0xff]  }
 0x276   : > { %4985 = vmatmul.mubr.bf16.vlgmr.msra.gmra.mrb[12].mxu0 %v15631_v62  ;;  %5200 = vmatmul.mubr.bf16.vlgmr.msra.gmra.mrb[12].mxu1 %v15631_v62 }
 0x277   : > { %5039 = vmatpush1.bf16.msra.mxu0 %v13762_v6  ;;  %5296 = vmatpush1.bf16.msra.mxu1 %v14678_v16  ;;  %v14704_v6 = vld [vmem:[#allocation2 + $0x5b8] ss:$56 sps:$4 sm:$0xff]  }
 0x278   : > { %5040 = vmatprep.subr.bf16.mxu0 %v13767_v7  ;;  %5297 = vmatprep.subr.bf16.mxu1 %v14679_v18  ;;  %v13804_v7 = vld [vmem:[#allocation2 + $0x10c0] ss:$56 sps:$4 sm:$0xff]   ;;  %v13807_v16 = vld [vmem:[#allocation2 + $0x1130] ss:$56 sps:$4 sm:$0xff]   ;;  %v14707_v18 = vld [vmem:[#allocation2 + $0x69c] ss:$56 sps:$4 sm:$0xff]  }
 0x279   : > { %5070 = vmatprep.mubr.bf16.mxu0 %v16089_v0  ;;  %5327 = vmatprep.mubr.bf16.mxu1 %v16089_v0 }
 0x27b   : > { %5041 = vmatpush1.bf16.msra.mxu0 %v13765_v10  ;;  %5298 = vmatpush1.bf16.msra.mxu1 %v14680_v21  ;;  %v13809_v10 = vld [vmem:[#allocation2 + $0x1134] ss:$56 sps:$4 sm:$0xff]   ;;  %v13810_v21 = vld [vmem:[#allocation2 + $0xe30] ss:$56 sps:$4 sm:$0xff]  }
 0x27c   : > { %5042 = vmatprep.subr.bf16.mxu0 %v13770_v11  ;;  %5299 = vmatprep.subr.bf16.mxu1 %v14681_v22  ;;  %v14706_v11 = vld [vmem:[#allocation2 + $0x628] ss:$56 sps:$4 sm:$0xff]   ;;  %v14709_v22 = vld [vmem:[#allocation2 + $0x394] ss:$56 sps:$4 sm:$0xff]  }
 0x27f   : > { %5043 = vmatpush1.bf16.msra.mxu0 %v13768_v8  ;;  %5300 = vmatpush1.bf16.msra.mxu1 %v14682_v25  ;;  %v13812_v8 = vld [vmem:[#allocation2 + $0xe34] ss:$56 sps:$4 sm:$0xff]   ;;  %v13813_v25 = vld [vmem:[#allocation2 + $0xea0] ss:$56 sps:$4 sm:$0xff]  }
 0x280   : > { %5044 = vmatprep.subr.bf16.mxu0 %v13773_v20  ;;  %5301 = vmatprep.subr.bf16.mxu1 %v14683_v26  ;;  %v14708_v20 = vld [vmem:[#allocation2 + $0x698] ss:$56 sps:$4 sm:$0xff]   ;;  %v14711_v26 = vld [vmem:[#allocation2 + $0x404] ss:$56 sps:$4 sm:$0xff]  }
 0x283   : > { %5045 = vmatpush1.bf16.msra.mxu0 %v13771_v23  ;;  %5302 = vmatpush1.bf16.msra.mxu1 %v14684_v30  ;;  %v13815_v23 = vld [vmem:[#allocation2 + $0xea4] ss:$56 sps:$4 sm:$0xff]   ;;  %v13816_v30 = vld [vmem:[#allocation2 + $0xf10] ss:$56 sps:$4 sm:$0xff]  }
 0x284   : > { %5046 = vmatprep.subr.bf16.mxu0 %v13776_v24  ;;  %5303 = vmatprep.subr.bf16.mxu1 %v14685_v31  ;;  %v14710_v24 = vld [vmem:[#allocation2 + $0x390] ss:$56 sps:$4 sm:$0xff]   ;;  %v14713_v31 = vld [vmem:[#allocation2 + $0x474] ss:$56 sps:$4 sm:$0xff]  }
 0x287   : > { %5047 = vmatpush1.bf16.msra.mxu0 %v13774_v28  ;;  %5304 = vmatpush1.bf16.msra.mxu1 %v14686_v34  ;;  %v13818_v28 = vld [vmem:[#allocation2 + $0xf14] ss:$56 sps:$4 sm:$0xff]   ;;  %v13819_v34 = vld [vmem:[#allocation2 + $0xf80] ss:$56 sps:$4 sm:$0xff]  }
 0x288   : > { %5048 = vmatprep.subr.bf16.mxu0 %v13779_v29  ;;  %5305 = vmatprep.subr.bf16.mxu1 %v14687_v35  ;;  %v14712_v29 = vld [vmem:[#allocation2 + $0x400] ss:$56 sps:$4 sm:$0xff]   ;;  %v14715_v35 = vld [vmem:[#allocation2 + $0x4e4] ss:$56 sps:$4 sm:$0xff]  }
 0x28b   : > { %5049 = vmatpush1.bf16.msra.mxu0 %v13777_v32  ;;  %5306 = vmatpush1.bf16.msra.mxu1 %v14688_v39  ;;  %v13821_v32 = vld [vmem:[#allocation2 + $0xf84] ss:$56 sps:$4 sm:$0xff]   ;;  %v13822_v39 = vld [vmem:[#allocation2 + $0xff0] ss:$56 sps:$4 sm:$0xff]  }
 0x28c   : > { %5050 = vmatprep.subr.bf16.mxu0 %v13782_v33  ;;  %5307 = vmatprep.subr.bf16.mxu1 %v14689_v40  ;;  %v14714_v33 = vld [vmem:[#allocation2 + $0x470] ss:$56 sps:$4 sm:$0xff]   ;;  %v14717_v40 = vld [vmem:[#allocation2 + $0x554] ss:$56 sps:$4 sm:$0xff]  }
 0x28f   : > { %5051 = vmatpush1.bf16.msra.mxu0 %v13780_v36  ;;  %5308 = vmatpush1.bf16.msra.mxu1 %v14690_v43  ;;  %v13824_v36 = vld [vmem:[#allocation2 + $0xff4] ss:$56 sps:$4 sm:$0xff]   ;;  %v13825_v43 = vld [vmem:[#allocation2 + $0x1060] ss:$56 sps:$4 sm:$0xff]  }
 0x290   : > { %5052 = vmatprep.subr.bf16.mxu0 %v13785_v38  ;;  %5309 = vmatprep.subr.bf16.mxu1 %v14691_v44  ;;  %v14716_v38 = vld [vmem:[#allocation2 + $0x4e0] ss:$56 sps:$4 sm:$0xff]   ;;  %v14719_v44 = vld [vmem:[#allocation2 + $0x5c4] ss:$56 sps:$4 sm:$0xff]  }
 0x293   : > { %5053 = vmatpush1.bf16.msra.mxu0 %v13783_v41  ;;  %5310 = vmatpush1.bf16.msra.mxu1 %v14692_v47  ;;  %v13827_v41 = vld [vmem:[#allocation2 + $0x1064] ss:$56 sps:$4 sm:$0xff]   ;;  %v13828_v47 = vld [vmem:[#allocation2 + $0x10d0] ss:$56 sps:$4 sm:$0xff]  }
 0x294   : > { %5124 = vmatprep.subr.bf16.mxu0 %v13788_v42  ;;  %5338 = vmatprep.subr.bf16.mxu1 %v14693_v48  ;;  %v14718_v42 = vld [vmem:[#allocation2 + $0x550] ss:$56 sps:$4 sm:$0xff]   ;;  %v14721_v48 = vld [vmem:[#allocation2 + $0x634] ss:$56 sps:$4 sm:$0xff]  }
 0x296   : > { %5071 = vmatmul.mubr.bf16.vlgmr.msra.gmra.mrb[0].mxu0 %v15631_v62  ;;  %5328 = vmatmul.mubr.bf16.vlgmr.msra.gmra.mrb[16].mxu1 %v15599_v27 }
 0x297   : > { %5125 = vmatpush1.bf16.msra.mxu0 %v13786_v45  ;;  %5339 = vmatpush1.bf16.msra.mxu1 %v14694_v51  ;;  %v13830_v45 = vld [vmem:[#allocation2 + $0x10d4] ss:$56 sps:$4 sm:$0xff]   ;;  %v13831_v51 = vld [vmem:[#allocation2 + $0x1140] ss:$56 sps:$4 sm:$0xff]  }
 0x298   : > { %5126 = vmatprep.subr.bf16.mxu0 %v13791_v46  ;;  %5340 = vmatprep.subr.bf16.mxu1 %v14695_v52  ;;  %v14720_v46 = vld [vmem:[#allocation2 + $0x5c0] ss:$56 sps:$4 sm:$0xff]   ;;  %v14723_v52 = vld [vmem:[#allocation2 + $0x6a4] ss:$56 sps:$4 sm:$0xff]  }
 0x299   : > { %5156 = vmatprep.mubr.bf16.mxu0 %v16089_v0  ;;  %5370 = vmatprep.mubr.bf16.mxu1 %v16089_v0 }
 0x29b   : > { %5127 = vmatpush1.bf16.msra.mxu0 %v13789_v49  ;;  %5341 = vmatpush1.bf16.msra.mxu1 %v14696_v55  ;;  %v13833_v49 = vld [vmem:[#allocation2 + $0x1144] ss:$56 sps:$4 sm:$0xff]  }
 0x29c   : > { %5128 = vmatprep.subr.bf16.mxu0 %v13794_v50  ;;  %5342 = vmatprep.subr.bf16.mxu1 %v14697_v56  ;;  %v14722_v50 = vld [vmem:[#allocation2 + $0x630] ss:$56 sps:$4 sm:$0xff]   ;;  %v14726_v55 = vld [vmem:[#allocation2 + $0x3ac] ss:$56 sps:$4 sm:$0xff]  }
 0x29d   : > { %v14727_v56 = vld [vmem:[#allocation2 + $0x398] ss:$56 sps:$4 sm:$0xff]  }
 0x29f   : > { %5129 = vmatpush1.bf16.msra.mxu0 %v13792_v53  ;;  %5343 = vmatpush1.bf16.msra.mxu1 %v14698_v59  ;;  %v14724_v53 = vld [vmem:[#allocation2 + $0x6a0] ss:$56 sps:$4 sm:$0xff]   ;;  %v14730_v59 = vld [vmem:[#allocation2 + $0x41c] ss:$56 sps:$4 sm:$0xff]  }
 0x2a0   : > { %5130 = vmatprep.subr.bf16.mxu0 %v13797_v54  ;;  %5344 = vmatprep.subr.bf16.mxu1 %v14699_v12  ;;  %v14725_v54 = vld [vmem:[#allocation2 + $0x39c] ss:$56 sps:$4 sm:$0xff]   ;;  %v14731_v12 = vld [vmem:[#allocation2 + $0x408] ss:$56 sps:$4 sm:$0xff]  }
 0x2a3   : > { %5131 = vmatpush1.bf16.msra.mxu0 %v13795_v57  ;;  %5345 = vmatpush1.bf16.msra.mxu1 %v14700_v63  ;;  %v14728_v57 = vld [vmem:[#allocation2 + $0x40c] ss:$56 sps:$4 sm:$0xff]  }
 0x2a4   : > { %5132 = vmatprep.subr.bf16.mxu0 %v13800_v58  ;;  %5346 = vmatprep.subr.bf16.mxu1 %v14701_v1  ;;  %v14729_v58 = vld [vmem:[#allocation2 + $0x3a8] ss:$56 sps:$4 sm:$0xff]   ;;  %v14734_v63 = vld [vmem:[#allocation2 + $0x48c] ss:$56 sps:$4 sm:$0xff]   ;;  %v14735_v1 = vld [vmem:[#allocation2 + $0x478] ss:$56 sps:$4 sm:$0xff]  }
 0x2a7   : > { %5133 = vmatpush1.bf16.msra.mxu0 %v13798_v60  ;;  %5347 = vmatpush1.bf16.msra.mxu1 %v14702_v2  ;;  %v14732_v60 = vld [vmem:[#allocation2 + $0x47c] ss:$56 sps:$4 sm:$0xff]   ;;  %v14736_v2 = vld [vmem:[#allocation2 + $0x4ec] ss:$56 sps:$4 sm:$0xff]  }
 0x2a8   : > { %5134 = vmatprep.subr.bf16.mxu0 %v13803_v61  ;;  %5348 = vmatprep.subr.bf16.mxu1 %v14703_v4  ;;  %v14733_v61 = vld [vmem:[#allocation2 + $0x418] ss:$56 sps:$4 sm:$0xff]   ;;  %v14738_v4 = vld [vmem:[#allocation2 + $0x4fc] ss:$56 sps:$4 sm:$0xff]  }
 0x2ab   : > { %5135 = vmatpush1.bf16.msra.mxu0 %v13801_v3  ;;  %5349 = vmatpush1.bf16.msra.mxu1 %v14704_v6  ;;  %v14737_v3 = vld [vmem:[#allocation2 + $0x488] ss:$56 sps:$4 sm:$0xff]   ;;  %v14740_v6 = vld [vmem:[#allocation2 + $0x55c] ss:$56 sps:$4 sm:$0xff]  }
 0x2ac   : > { %5136 = vmatprep.subr.bf16.mxu0 %v13806_v5  ;;  %5350 = vmatprep.subr.bf16.mxu1 %v14705_v9  ;;  %v14739_v5 = vld [vmem:[#allocation2 + $0x4e8] ss:$56 sps:$4 sm:$0xff]   ;;  %v14742_v9 = vld [vmem:[#allocation2 + $0x56c] ss:$56 sps:$4 sm:$0xff]  }
 0x2af   : > { %5137 = vmatpush1.bf16.msra.mxu0 %v13804_v7  ;;  %5351 = vmatpush1.bf16.msra.mxu1 %v14706_v11  ;;  %v14741_v7 = vld [vmem:[#allocation2 + $0x4f8] ss:$56 sps:$4 sm:$0xff]   ;;  %v14744_v11 = vld [vmem:[#allocation2 + $0x5cc] ss:$56 sps:$4 sm:$0xff]  }
 0x2b0   : > { %5138 = vmatprep.subr.bf16.mxu0 %v13809_v10  ;;  %5352 = vmatprep.subr.bf16.mxu1 %v14707_v18  ;;  %v14743_v10 = vld [vmem:[#allocation2 + $0x558] ss:$56 sps:$4 sm:$0xff]   ;;  %v14746_v18 = vld [vmem:[#allocation2 + $0x5dc] ss:$56 sps:$4 sm:$0xff]  }
 0x2b3   : > { %5139 = vmatpush1.bf16.msra.mxu0 %v13807_v16  ;;  %5353 = vmatpush1.bf16.msra.mxu1 %v14708_v20  ;;  %v14745_v16 = vld [vmem:[#allocation2 + $0x568] ss:$56 sps:$4 sm:$0xff]   ;;  %v14748_v20 = vld [vmem:[#allocation2 + $0x63c] ss:$56 sps:$4 sm:$0xff]  }
 0x2b4   : > { %5210 = vmatprep.subr.bf16.mxu0 %v13812_v8  ;;  %5381 = vmatprep.subr.bf16.mxu1 %v14709_v22  ;;  %v14747_v8 = vld [vmem:[#allocation2 + $0x5c8] ss:$56 sps:$4 sm:$0xff]   ;;  %v14750_v22 = vld [vmem:[#allocation2 + $0x64c] ss:$56 sps:$4 sm:$0xff]  }
 0x2b6   : > { %5157 = vmatmul.mubr.bf16.vlgmr.msra.gmra.mrb[4].mxu0 %v15631_v62  ;;  %5371 = vmatmul.mubr.bf16.vlgmr.msra.gmra.mrb[20].mxu1 %v15599_v27 }
 0x2b7   : > { %5211 = vmatpush1.bf16.msra.mxu0 %v13810_v21  ;;  %5382 = vmatpush1.bf16.msra.mxu1 %v14710_v24  ;;  %v14749_v21 = vld [vmem:[#allocation2 + $0x5d8] ss:$56 sps:$4 sm:$0xff]   ;;  %v14752_v24 = vld [vmem:[#allocation2 + $0x6ac] ss:$56 sps:$4 sm:$0xff]  }
 0x2b8   : > { %5212 = vmatprep.subr.bf16.mxu0 %v13815_v23  ;;  %5383 = vmatprep.subr.bf16.mxu1 %v14711_v26  ;;  %v14751_v23 = vld [vmem:[#allocation2 + $0x638] ss:$56 sps:$4 sm:$0xff]   ;;  %v14754_v26 = vld [vmem:[#allocation2 + $0x6bc] ss:$56 sps:$4 sm:$0xff]  }
 0x2b9   : > { %5242 = vmatprep.mubr.bf16.mxu0 %v16089_v0  ;;  %5413 = vmatprep.mubr.bf16.mxu1 %v16089_v0 }
 0x2bb   : > { %5213 = vmatpush1.bf16.msra.mxu0 %v13813_v25  ;;  %5384 = vmatpush1.bf16.msra.mxu1 %v14712_v29  ;;  %v14753_v25 = vld [vmem:[#allocation2 + $0x648] ss:$56 sps:$4 sm:$0xff]   ;;  %v14756_v29 = vld [vmem:[#allocation2 + $0x3a4] ss:$56 sps:$4 sm:$0xff]  }
 0x2bc   : > { %5214 = vmatprep.subr.bf16.mxu0 %v13818_v28  ;;  %5385 = vmatprep.subr.bf16.mxu1 %v14713_v31  ;;  %v14755_v28 = vld [vmem:[#allocation2 + $0x6a8] ss:$56 sps:$4 sm:$0xff]   ;;  %v14758_v31 = vld [vmem:[#allocation2 + $0x2c] ss:$56 sps:$4 sm:$0xff]  }
 0x2bf   : > { %5215 = vmatpush1.bf16.msra.mxu0 %v13816_v30  ;;  %5386 = vmatpush1.bf16.msra.mxu1 %v14714_v33  ;;  %v14757_v30 = vld [vmem:[#allocation2 + $0x6b8] ss:$56 sps:$4 sm:$0xff]   ;;  %v14760_v33 = vld [vmem:[#allocation2 + $0x414] ss:$56 sps:$4 sm:$0xff]  }
 0x2c0   : > { %5216 = vmatprep.subr.bf16.mxu0 %v13821_v32  ;;  %5387 = vmatprep.subr.bf16.mxu1 %v14715_v35  ;;  %v14759_v32 = vld [vmem:[#allocation2 + $0x3a0] ss:$56 sps:$4 sm:$0xff]   ;;  %v14762_v35 = vld [vmem:[#allocation2 + $0x9c] ss:$56 sps:$4 sm:$0xff]  }
 0x2c3   : > { %5217 = vmatpush1.bf16.msra.mxu0 %v13819_v34  ;;  %5388 = vmatpush1.bf16.msra.mxu1 %v14716_v38  ;;  %v14761_v34 = vld [vmem:[#allocation2 + $0x28] ss:$56 sps:$4 sm:$0xff]   ;;  %v14764_v38 = vld [vmem:[#allocation2 + $0x484] ss:$56 sps:$4 sm:$0xff]  }
 0x2c4   : > { %5218 = vmatprep.subr.bf16.mxu0 %v13824_v36  ;;  %5389 = vmatprep.subr.bf16.mxu1 %v14717_v40  ;;  %v14763_v36 = vld [vmem:[#allocation2 + $0x410] ss:$56 sps:$4 sm:$0xff]   ;;  %v14766_v40 = vld [vmem:[#allocation2 + $0x10c] ss:$56 sps:$4 sm:$0xff]  }
 0x2c7   : > { %5219 = vmatpush1.bf16.msra.mxu0 %v13822_v39  ;;  %5390 = vmatpush1.bf16.msra.mxu1 %v14718_v42  ;;  %v14765_v39 = vld [vmem:[#allocation2 + $0x98] ss:$56 sps:$4 sm:$0xff]   ;;  %v14768_v42 = vld [vmem:[#allocation2 + $0x4f4] ss:$56 sps:$4 sm:$0xff]  }
 0x2c8   : > { %5220 = vmatprep.subr.bf16.mxu0 %v13827_v41  ;;  %5391 = vmatprep.subr.bf16.mxu1 %v14719_v44  ;;  %v14767_v41 = vld [vmem:[#allocation2 + $0x480] ss:$56 sps:$4 sm:$0xff]   ;;  %v14770_v44 = vld [vmem:[#allocation2 + $0x17c] ss:$56 sps:$4 sm:$0xff]  }
 0x2cb   : > { %5221 = vmatpush1.bf16.msra.mxu0 %v13825_v43  ;;  %5392 = vmatpush1.bf16.msra.mxu1 %v14720_v46  ;;  %v14769_v43 = vld [vmem:[#allocation2 + $0x108] ss:$56 sps:$4 sm:$0xff]   ;;  %v14772_v46 = vld [vmem:[#allocation2 + $0x564] ss:$56 sps:$4 sm:$0xff]  }
 0x2cc   : > { %5222 = vmatprep.subr.bf16.mxu0 %v13830_v45  ;;  %5393 = vmatprep.subr.bf16.mxu1 %v14721_v48  ;;  %v14771_v45 = vld [vmem:[#allocation2 + $0x4f0] ss:$56 sps:$4 sm:$0xff]   ;;  %v14774_v48 = vld [vmem:[#allocation2 + $0x1ec] ss:$56 sps:$4 sm:$0xff]  }
 0x2cf   : > { %5223 = vmatpush1.bf16.msra.mxu0 %v13828_v47  ;;  %5394 = vmatpush1.bf16.msra.mxu1 %v14722_v50  ;;  %v14773_v47 = vld [vmem:[#allocation2 + $0x178] ss:$56 sps:$4 sm:$0xff]   ;;  %v14776_v50 = vld [vmem:[#allocation2 + $0x5d4] ss:$56 sps:$4 sm:$0xff]  }
 0x2d0   : > { %5224 = vmatprep.subr.bf16.mxu0 %v13833_v49  ;;  %5395 = vmatprep.subr.bf16.mxu1 %v14723_v52  ;;  %v14775_v49 = vld [vmem:[#allocation2 + $0x560] ss:$56 sps:$4 sm:$0xff]  }
 0x2d1   : > { %v14777_v52 = vld [vmem:[#allocation2 + $0x1e8] ss:$56 sps:$4 sm:$0xff]  }
 0x2d3   : > { %5225 = vmatpush1.bf16.msra.mxu0 %v13831_v51  ;;  %5396 = vmatpush1.bf16.msra.mxu1 %v14724_v53 }
 0x2d4   : > { %5424 = vmatprep.subr.bf16.mxu1 %v14725_v54  ;;  %5510 = vmatprep.subr.bf16.mxu0 %v14726_v55  ;;  %v14778_v54 = vld [vmem:[#allocation2 + $0x25c] ss:$56 sps:$4 sm:$0xff]  }
 0x2d6   : > { %5243 = vmatmul.mubr.bf16.vlgmr.msra.gmra.mrb[8].mxu0 %v15631_v62  ;;  %5414 = vmatmul.mubr.bf16.vlgmr.msra.gmra.mrb[24].mxu1 %v15599_v27 }
 0x2d7   : > { %5425 = vmatpush1.bf16.msra.mxu1 %v14727_v56  ;;  %5456 = vmatprep.mubr.bf16.mxu1 %v16089_v0  ;;  %v14779_v56 = vld [vmem:[#allocation2 + $0x5d0] ss:$56 sps:$4 sm:$0xff]  }
 0x2d8   : > { %5426 = vmatprep.subr.bf16.mxu1 %v14728_v57  ;;  %5511 = vmatpush1.bf16.msra.mxu0 %v14729_v58  ;;  %v14780_v58 = vld [vmem:[#allocation2 + $0x644] ss:$56 sps:$4 sm:$0xff]  }
 0x2d9   : > { %5512 = vmatprep.subr.bf16.mxu0 %v14730_v59  ;;  %5542 = vmatprep.mubr.bf16.mxu0 %v16089_v0  ;;  %v14781_v59 = vld [vmem:[#allocation2 + $0x258] ss:$56 sps:$4 sm:$0xff]  }
 0x2db   : > { %5427 = vmatpush1.bf16.msra.mxu1 %v14731_v12  ;;  %v14782_v12 = vld [vmem:[#allocation2 + $0x2cc] ss:$56 sps:$4 sm:$0xff]  }
 0x2dc   : > { %5428 = vmatprep.subr.bf16.mxu1 %v14732_v60  ;;  %5513 = vmatpush1.bf16.msra.mxu0 %v14733_v61  ;;  %v14783_v60 = vld [vmem:[#allocation2 + $0x640] ss:$56 sps:$4 sm:$0xff]   ;;  %v14784_v61 = vld [vmem:[#allocation2 + $0x6b4] ss:$56 sps:$4 sm:$0xff]  }
 0x2dd   : > { %5514 = vmatprep.subr.bf16.mxu0 %v14734_v63  ;;  %v14785_v63 = vld [vmem:[#allocation2 + $0x2c8] ss:$56 sps:$4 sm:$0xff]  }
 0x2df   : > { %5429 = vmatpush1.bf16.msra.mxu1 %v14735_v1  ;;  %v14786_v1 = vld [vmem:[#allocation2 + $0x33c] ss:$56 sps:$4 sm:$0xff]  }
 0x2e0   : > { %5430 = vmatprep.subr.bf16.mxu1 %v14736_v2  ;;  %5515 = vmatpush1.bf16.msra.mxu0 %v14737_v3  ;;  %v14787_v2 = vld [vmem:[#allocation2 + $0x6b0] ss:$56 sps:$4 sm:$0xff]   ;;  %v14788_v3 = vld [vmem:[#allocation2 + $0x3b4] ss:$56 sps:$4 sm:$0xff]  }
 0x2e1   : > { %5516 = vmatprep.subr.bf16.mxu0 %v14738_v4  ;;  %v14789_v4 = vld [vmem:[#allocation2 + $0x338] ss:$56 sps:$4 sm:$0xff]  }
 0x2e3   : > { %5431 = vmatpush1.bf16.msra.mxu1 %v14739_v5  ;;  %v14790_v5 = vld [vmem:[#allocation2 + $0x72c] ss:$56 sps:$4 sm:$0xff]  }
 0x2e4   : > { %5432 = vmatprep.subr.bf16.mxu1 %v14740_v6  ;;  %5517 = vmatpush1.bf16.msra.mxu0 %v14741_v7  ;;  %v14791_v6 = vld [vmem:[#allocation2 + $0x3b0] ss:$56 sps:$4 sm:$0xff]   ;;  %v14792_v7 = vld [vmem:[#allocation2 + $0x424] ss:$56 sps:$4 sm:$0xff]  }
 0x2e5   : > { %5518 = vmatprep.subr.bf16.mxu0 %v14742_v9  ;;  %v14793_v9 = vld [vmem:[#allocation2 + $0x728] ss:$56 sps:$4 sm:$0xff]  }
 0x2e7   : > { %5433 = vmatpush1.bf16.msra.mxu1 %v14743_v10  ;;  %v14794_v10 = vld [vmem:[#allocation2 + $0x79c] ss:$56 sps:$4 sm:$0xff]  }
 0x2e8   : > { %5434 = vmatprep.subr.bf16.mxu1 %v14744_v11  ;;  %5519 = vmatpush1.bf16.msra.mxu0 %v14745_v16  ;;  %v14795_v11 = vld [vmem:[#allocation2 + $0x420] ss:$56 sps:$4 sm:$0xff]   ;;  %v14796_v16 = vld [vmem:[#allocation2 + $0x494] ss:$56 sps:$4 sm:$0xff]  }
 0x2e9   : > { %5520 = vmatprep.subr.bf16.mxu0 %v14746_v18  ;;  %v14797_v18 = vld [vmem:[#allocation2 + $0x798] ss:$56 sps:$4 sm:$0xff]  }
 0x2eb   : > { %5435 = vmatpush1.bf16.msra.mxu1 %v14747_v8  ;;  %v14798_v8 = vld [vmem:[#allocation2 + $0x80c] ss:$56 sps:$4 sm:$0xff]  }
 0x2ec   : > { %5436 = vmatprep.subr.bf16.mxu1 %v14748_v20  ;;  %5521 = vmatpush1.bf16.msra.mxu0 %v14749_v21  ;;  %v14799_v20 = vld [vmem:[#allocation2 + $0x490] ss:$56 sps:$4 sm:$0xff]   ;;  %v14800_v21 = vld [vmem:[#allocation2 + $0x504] ss:$56 sps:$4 sm:$0xff]  }
 0x2ed   : > { %5522 = vmatprep.subr.bf16.mxu0 %v14750_v22  ;;  %v14801_v22 = vld [vmem:[#allocation2 + $0x808] ss:$56 sps:$4 sm:$0xff]  }
 0x2ef   : > { %5437 = vmatpush1.bf16.msra.mxu1 %v14751_v23  ;;  %v14802_v23 = vld [vmem:[#allocation2 + $0x87c] ss:$56 sps:$4 sm:$0xff]  }
 0x2f0   : > { %5438 = vmatprep.subr.bf16.mxu1 %v14752_v24  ;;  %5523 = vmatpush1.bf16.msra.mxu0 %v14753_v25  ;;  %v14803_v24 = vld [vmem:[#allocation2 + $0x500] ss:$56 sps:$4 sm:$0xff]   ;;  %v14804_v25 = vld [vmem:[#allocation2 + $0x574] ss:$56 sps:$4 sm:$0xff]  }
 0x2f1   : > { %5524 = vmatprep.subr.bf16.mxu0 %v14754_v26  ;;  %v14805_v26 = vld [vmem:[#allocation2 + $0x878] ss:$56 sps:$4 sm:$0xff]  }
 0x2f3   : > { %5439 = vmatpush1.bf16.msra.mxu1 %v14755_v28  ;;  %v14806_v28 = vld [vmem:[#allocation2 + $0x8ec] ss:$56 sps:$4 sm:$0xff]  }
 0x2f4   : > { %5467 = vmatprep.subr.bf16.mxu1 %v14756_v29  ;;  %5525 = vmatpush1.bf16.msra.mxu0 %v14757_v30  ;;  %v14807_v29 = vld [vmem:[#allocation2 + $0x570] ss:$56 sps:$4 sm:$0xff]   ;;  %v14808_v30 = vld [vmem:[#allocation2 + $0x5e4] ss:$56 sps:$4 sm:$0xff]  }
 0x2f5   : > { %5811 = vmatprep.subr.bf16.mxu0 %v14758_v31 }
 0x2f6   : > { %5457 = vmatmul.mubr.bf16.vlgmr.msra.gmra.mrb[28].mxu1 %v15599_v27 }
 0x2f7   : > { %5468 = vmatpush1.bf16.msra.mxu1 %v14759_v32  ;;  %5499 = vmatprep.mubr.bf16.mxu1 %v16089_v0  ;;  %v14809_v32 = vld [vmem:[#allocation2 + $0x8e8] ss:$56 sps:$4 sm:$0xff]  }
 0x2f8   : > { %5469 = vmatprep.subr.bf16.mxu1 %v14760_v33  ;;  %5543 = vmatmul.mubr.bf16.vlgmr.msra.gmra.mrb[16].mxu0 %v15599_v27 }
 0x2f9   : > { %5812 = vmatpush1.bf16.msra.mxu0 %v14761_v34  ;;  %5843 = vmatprep.mubr.bf16.mxu0 %v16089_v0  ;;  %v14810_v34 = vld [vmem:[#allocation2 + $0x95c] ss:$56 sps:$4 sm:$0xff]  }
 0x2fa   : > { %5813 = vmatprep.subr.bf16.mxu0 %v14762_v35 }
 0x2fb   : > { %5470 = vmatpush1.bf16.msra.mxu1 %v14763_v36  ;;  %v14811_v36 = vld [vmem:[#allocation2 + $0x5e0] ss:$56 sps:$4 sm:$0xff]  }
 0x2fc   : > { %5471 = vmatprep.subr.bf16.mxu1 %v14764_v38 }
 0x2fd   : > { %5814 = vmatpush1.bf16.msra.mxu0 %v14765_v39  ;;  %v14812_v39 = vld [vmem:[#allocation2 + $0x654] ss:$56 sps:$4 sm:$0xff]  }
 0x2fe   : > { %5815 = vmatprep.subr.bf16.mxu0 %v14766_v40  ;;  %v14813_v40 = vld [vmem:[#allocation2 + $0x958] ss:$56 sps:$4 sm:$0xff]  }
 0x2ff   : > { %5472 = vmatpush1.bf16.msra.mxu1 %v14767_v41  ;;  %v14814_v41 = vld [vmem:[#allocation2 + $0x9cc] ss:$56 sps:$4 sm:$0xff]  }
 0x300   : > { %5473 = vmatprep.subr.bf16.mxu1 %v14768_v42  ;;  %v14815_v42 = vld [vmem:[#allocation2 + $0x650] ss:$56 sps:$4 sm:$0xff]  }
 0x301   : > { %5816 = vmatpush1.bf16.msra.mxu0 %v14769_v43  ;;  %v14816_v43 = vld [vmem:[#allocation2 + $0x6c4] ss:$56 sps:$4 sm:$0xff]  }
 0x302   : > { %5817 = vmatprep.subr.bf16.mxu0 %v14770_v44  ;;  %v14817_v44 = vld [vmem:[#allocation2 + $0x9c8] ss:$56 sps:$4 sm:$0xff]  }
 0x303   : > { %5474 = vmatpush1.bf16.msra.mxu1 %v14771_v45  ;;  %v14818_v45 = vld [vmem:[#allocation2 + $0xa3c] ss:$56 sps:$4 sm:$0xff]  }
 0x304   : > { %5475 = vmatprep.subr.bf16.mxu1 %v14772_v46  ;;  %v14819_v46 = vld [vmem:[#allocation2 + $0x6c0] ss:$56 sps:$4 sm:$0xff]  }
 0x305   : > { %5818 = vmatpush1.bf16.msra.mxu0 %v14773_v47  ;;  %v14820_v47 = vld [vmem:[#allocation2 + $0x4] ss:$56 sps:$4 sm:$0xff]  }
 0x306   : > { %5819 = vmatprep.subr.bf16.mxu0 %v14774_v48  ;;  %v14821_v48 = vld [vmem:[#allocation2 + $0xa38] ss:$56 sps:$4 sm:$0xff]  }
 0x307   : > { %5476 = vmatpush1.bf16.msra.mxu1 %v14775_v49  ;;  %v14822_v49 = vld [vmem:[#allocation2 + $0xaac] ss:$56 sps:$4 sm:$0xff]  }
 0x308   : > { %5477 = vmatprep.subr.bf16.mxu1 %v14776_v50  ;;  %v14823_v50 = vld [vmem:[#allocation2] ss:$56 sps:$4 sm:$0xff]  }
 0x309   : > { %v15661_v51 = vpop.f32.mrb[4].mxu1  ;;  %5820 = vmatpush1.bf16.msra.mxu0 %v14777_v52  ;;  %v14824_v52 = vld [vmem:[#allocation2 + $0x74] ss:$56 sps:$4 sm:$0xff]  }
 0x30a   : > { %v15663_v53 = vpop.f32.mrb[5].mxu1  ;;  %5821 = vmatprep.subr.bf16.mxu0 %v14778_v54  ;;  %v14825_v54 = vld [vmem:[#allocation2 + $0xaa8] ss:$56 sps:$4 sm:$0xff]  }
 0x30b   : > { %v15665_v55 = vpop.f32.mrb[6].mxu1  ;;  %5478 = vmatpush1.bf16.msra.mxu1 %v14779_v56  ;;  %v14826_v56 = vld [vmem:[#allocation2 + $0xb1c] ss:$56 sps:$4 sm:$0xff]  }
 0x30c   : > { %v15667_v57 = vpop.f32.mrb[7].mxu1  ;;  %5479 = vmatprep.subr.bf16.mxu1 %v14780_v58  ;;  %v14827_v58 = vld [vmem:[#allocation2 + $0x70] ss:$56 sps:$4 sm:$0xff]  }
 0x30d   : > { %5822 = vmatpush1.bf16.msra.mxu0 %v14781_v59  ;;  %v14828_v59 = vld [vmem:[#allocation2 + $0xe4] ss:$56 sps:$4 sm:$0xff]  }
 0x30e   : > { %5823 = vmatprep.subr.bf16.mxu0 %v14782_v12  ;;  %v14830_v12 = vld [vmem:[#allocation2 + $0xb8c] ss:$56 sps:$4 sm:$0xff]  }
 0x30f   : > { %5480 = vmatpush1.bf16.msra.mxu1 %v14783_v60  ;;  %v14831_v60 = vld [vmem:[#allocation2 + $0xe0] ss:$56 sps:$4 sm:$0xff]  }
 0x310   : > { %5481 = vmatprep.subr.bf16.mxu1 %v14784_v61  ;;  %v14832_v61 = vld [vmem:[#allocation2 + $0x154] ss:$56 sps:$4 sm:$0xff]  }
 0x311   : > { %5824 = vmatpush1.bf16.msra.mxu0 %v14785_v63  ;;  %v14833_v63 = vld [vmem:[#allocation2 + $0xb88] ss:$56 sps:$4 sm:$0xff]  }
 0x312   : > { %5825 = vmatprep.subr.bf16.mxu0 %v14786_v1  ;;  %v14834_v1 = vld [vmem:[#allocation2 + $0xbfc] ss:$56 sps:$4 sm:$0xff]  }
 0x313   : > { %5482 = vmatpush1.bf16.msra.mxu1 %v14787_v2  ;;  %v14835_v2 = vld [vmem:[#allocation2 + $0x150] ss:$56 sps:$4 sm:$0xff]  }
 0x314   : > { %5553 = vmatprep.subr.bf16.mxu1 %v14788_v3  ;;  %v14836_v3 = vld [vmem:[#allocation2 + $0x1c4] ss:$56 sps:$4 sm:$0xff]  }
 0x315   : > { %5826 = vmatpush1.bf16.msra.mxu0 %v14789_v4  ;;  %v14837_v4 = vld [vmem:[#allocation2 + $0xbf8] ss:$56 sps:$4 sm:$0xff]  }
 0x316   : > { %5500 = vmatmul.mubr.bf16.vlgmr.msra.gmra.mrb[32].mxu1 %v15599_v27  ;;  %6112 = vmatprep.subr.bf16.mxu0 %v14790_v5  ;;  %v14838_v5 = vld [vmem:[#allocation2 + $0xc6c] ss:$56 sps:$4 sm:$0xff]  }
 0x317   : > { %5554 = vmatpush1.bf16.msra.mxu1 %v14791_v6  ;;  %5585 = vmatprep.mubr.bf16.mxu1 %v16089_v0  ;;  %v14839_v6 = vld [vmem:[#allocation2 + $0x1c0] ss:$56 sps:$4 sm:$0xff]  }
 0x318   : > { %5555 = vmatprep.subr.bf16.mxu1 %v14792_v7  ;;  %5844 = vmatmul.mubr.bf16.vlgmr.msra.gmra.mrb[16].mxu0 %v15552_v37  ;;  %v14840_v7 = vld [vmem:[#allocation2 + $0x234] ss:$56 sps:$4 sm:$0xff]  }
 0x319   : > { %6113 = vmatpush1.bf16.msra.mxu0 %v14793_v9  ;;  %6144 = vmatprep.mubr.bf16.mxu0 %v16089_v0 }
 0x31a   : > { %6114 = vmatprep.subr.bf16.mxu0 %v14794_v10 }
 0x31b   : > { %5556 = vmatpush1.bf16.msra.mxu1 %v14795_v11  ;;  %v14841_v11 = vld [vmem:[#allocation2 + $0xc68] ss:$56 sps:$4 sm:$0xff]  }
 0x31c   : > { %5557 = vmatprep.subr.bf16.mxu1 %v14796_v16 }
 0x31d   : > { %6115 = vmatpush1.bf16.msra.mxu0 %v14797_v18 }
 0x31e   : > { %6116 = vmatprep.subr.bf16.mxu0 %v14798_v8 }
 0x31f   : > { %5558 = vmatpush1.bf16.msra.mxu1 %v14799_v20 }
 0x320   : > { %5559 = vmatprep.subr.bf16.mxu1 %v14800_v21  ;;  %v14842_v21 = vld [vmem:[#allocation2 + $0xcdc] ss:$56 sps:$4 sm:$0xff]  }
 0x321   : > { %6117 = vmatpush1.bf16.msra.mxu0 %v14801_v22 }
 0x322   : > { %6118 = vmatprep.subr.bf16.mxu0 %v14802_v23 }
 0x323   : > { %5560 = vmatpush1.bf16.msra.mxu1 %v14803_v24 }
 0x324   : > { %5561 = vmatprep.subr.bf16.mxu1 %v14804_v25  ;;  %v14843_v25 = vld [vmem:[#allocation2 + $0x230] ss:$56 sps:$4 sm:$0xff]  }
 0x325   : > { %6119 = vmatpush1.bf16.msra.mxu0 %v14805_v26 }
 0x326   : > { %6120 = vmatprep.subr.bf16.mxu0 %v14806_v28 }
 0x327   : > { %5562 = vmatpush1.bf16.msra.mxu1 %v14807_v29 }
 0x328   : > { %5563 = vmatprep.subr.bf16.mxu1 %v14808_v30 }
 0x329   : > { %v15673_v31 = vpop.f32.mrb[8].mxu1  ;;  %6121 = vmatpush1.bf16.msra.mxu0 %v14809_v32  ;;  %v14844_v32 = vld [vmem:[#allocation2 + $0x2a4] ss:$56 sps:$4 sm:$0xff]  }
 0x32a   : > { %v15675_v33 = vpop.f32.mrb[9].mxu1  ;;  %6122 = vmatprep.subr.bf16.mxu0 %v14810_v34  ;;  %v14845_v34 = vld [vmem:[#allocation2 + $0xcd8] ss:$56 sps:$4 sm:$0xff]  }
 0x32b   : > { %v15677_v35 = vpop.f32.mrb[10].mxu1  ;;  %5564 = vmatpush1.bf16.msra.mxu1 %v14811_v36 }
 0x32c   : > { %v15679_v38 = vpop.f32.mrb[11].mxu1  ;;  %5565 = vmatprep.subr.bf16.mxu1 %v14812_v39  ;;  %v14846_v39 = vld [vmem:[#allocation2 + $0xd4c] ss:$56 sps:$4 sm:$0xff]  }
 0x32d   : > { %6123 = vmatpush1.bf16.msra.mxu0 %v14813_v40  ;;  %v14848_v40 = vld [vmem:[#allocation2 + $0x314] ss:$56 sps:$4 sm:$0xff]  }
 0x32e   : > { %6124 = vmatprep.subr.bf16.mxu0 %v14814_v41  ;;  %v14849_v41 = vld [vmem:[#allocation2 + $0xd48] ss:$56 sps:$4 sm:$0xff]  }
 0x32f   : > { %5566 = vmatpush1.bf16.msra.mxu1 %v14815_v42  ;;  %v14850_v42 = vld [vmem:[#allocation2 + $0xdbc] ss:$56 sps:$4 sm:$0xff]  }
 0x330   : > { %5567 = vmatprep.subr.bf16.mxu1 %v14816_v43  ;;  %v14851_v43 = vld [vmem:[#allocation2 + $0x310] ss:$56 sps:$4 sm:$0xff]  }
 0x331   : > { %6125 = vmatpush1.bf16.msra.mxu0 %v14817_v44  ;;  %v14852_v44 = vld [vmem:[#allocation2 + $0xc] ss:$56 sps:$4 sm:$0xff]  }
 0x332   : > { %6126 = vmatprep.subr.bf16.mxu0 %v14818_v45  ;;  %v14854_v45 = vld [vmem:[#allocation2 + $0xe2c] ss:$56 sps:$4 sm:$0xff]  }
 0x333   : > { %5568 = vmatpush1.bf16.msra.mxu1 %v14819_v46  ;;  %v14855_v46 = vld [vmem:[#allocation2 + $0x8] ss:$56 sps:$4 sm:$0xff]  }
 0x334   : > { %5596 = vmatprep.subr.bf16.mxu1 %v14820_v47  ;;  %v14856_v47 = vld [vmem:[#allocation2 + $0x7c] ss:$56 sps:$4 sm:$0xff]  }
 0x335   : > { %6127 = vmatpush1.bf16.msra.mxu0 %v14821_v48  ;;  %v14857_v48 = vld [vmem:[#allocation2 + $0xe28] ss:$56 sps:$4 sm:$0xff]  }
 0x336   : > { %5586 = vmatmul.mubr.bf16.vlgmr.msra.gmra.mrb[36].mxu1 %v15599_v27  ;;  %6441 = vmatprep.subr.bf16.mxu0 %v14822_v49  ;;  %v14829_v27 = vld [vmem:[#allocation2 + $0xb18] ss:$56 sps:$4 sm:$0xff]   ;;  %v14858_v49 = vld [vmem:[#allocation2 + $0xe9c] ss:$56 sps:$4 sm:$0xff]  }
 0x337   : > { %5597 = vmatpush1.bf16.msra.mxu1 %v14823_v50  ;;  %5628 = vmatprep.mubr.bf16.mxu1 %v16089_v0  ;;  %v14859_v50 = vld [vmem:[#allocation2 + $0x78] ss:$56 sps:$4 sm:$0xff]  }
 0x338   : > { %5598 = vmatprep.subr.bf16.mxu1 %v14824_v52  ;;  %6145 = vmatmul.mubr.bf16.vlgmr.msra.gmra.mrb[16].mxu0 %v15615_v14  ;;  %v14860_v52 = vld [vmem:[#allocation2 + $0xec] ss:$56 sps:$4 sm:$0xff]  }
 0x339   : > { %6442 = vmatpush1.bf16.msra.mxu0 %v14825_v54  ;;  %6473 = vmatprep.mubr.bf16.mxu0 %v16089_v0  ;;  %v14861_v54 = vld [vmem:[#allocation2 + $0xe98] ss:$56 sps:$4 sm:$0xff]  }
 0x33a   : > { %6443 = vmatprep.subr.bf16.mxu0 %v14826_v56  ;;  %v14862_v56 = vld [vmem:[#allocation2 + $0xf0c] ss:$56 sps:$4 sm:$0xff]  }
 0x33b   : > { %5599 = vmatpush1.bf16.msra.mxu1 %v14827_v58  ;;  %v14863_v58 = vld [vmem:[#allocation2 + $0xe8] ss:$56 sps:$4 sm:$0xff]  }
 0x33c   : > { %5600 = vmatprep.subr.bf16.mxu1 %v14828_v59  ;;  %v14864_v59 = vld [vmem:[#allocation2 + $0x15c] ss:$56 sps:$4 sm:$0xff]  }
 0x33d   : > { %6444 = vmatpush1.bf16.msra.mxu0 %v14829_v27  ;;  %v14865_v27 = vld [vmem:[#allocation2 + $0xf08] ss:$56 sps:$4 sm:$0xff]  }
 0x33e   : > { %6445 = vmatprep.subr.bf16.mxu0 %v14830_v12  ;;  %v14866_v12 = vld [vmem:[#allocation2 + $0xf7c] ss:$56 sps:$4 sm:$0xff]  }
 0x33f   : > { %5601 = vmatpush1.bf16.msra.mxu1 %v14831_v60  ;;  %v14867_v60 = vld [vmem:[#allocation2 + $0x158] ss:$56 sps:$4 sm:$0xff]  }
 0x340   : > { %5602 = vmatprep.subr.bf16.mxu1 %v14832_v61  ;;  %v14868_v61 = vld [vmem:[#allocation2 + $0x1cc] ss:$56 sps:$4 sm:$0xff]  }
 0x341   : > { %6446 = vmatpush1.bf16.msra.mxu0 %v14833_v63  ;;  %v14869_v63 = vld [vmem:[#allocation2 + $0xf78] ss:$56 sps:$4 sm:$0xff]  }
 0x342   : > { %6447 = vmatprep.subr.bf16.mxu0 %v14834_v1  ;;  %v14870_v1 = vld [vmem:[#allocation2 + $0xfec] ss:$56 sps:$4 sm:$0xff]  }
 0x343   : > { %5603 = vmatpush1.bf16.msra.mxu1 %v14835_v2  ;;  %v14871_v2 = vld [vmem:[#allocation2 + $0x1c8] ss:$56 sps:$4 sm:$0xff]  }
 0x344   : > { %5604 = vmatprep.subr.bf16.mxu1 %v14836_v3  ;;  %v14872_v3 = vld [vmem:[#allocation2 + $0x23c] ss:$56 sps:$4 sm:$0xff]  }
 0x345   : > { %6448 = vmatpush1.bf16.msra.mxu0 %v14837_v4 }
 0x346   : > { %6449 = vmatprep.subr.bf16.mxu0 %v14838_v5  ;;  %v14873_v5 = vld [vmem:[#allocation2 + $0xfe8] ss:$56 sps:$4 sm:$0xff]  }
 0x347   : > { %5605 = vmatpush1.bf16.msra.mxu1 %v14839_v6 }
 0x348   : > { %5606 = vmatprep.subr.bf16.mxu1 %v14840_v7 }
 0x349   : > { %v4986_v9 = vpop.f32.mrb[12].mxu0  ;;  %v15685_v10 = vpop.f32.mrb[12].mxu1  ;;  %6450 = vmatpush1.bf16.msra.mxu0 %v14841_v11 }
 0x34a   : > { %v15688_v16 = vadd.f32 %v4986_v9, %v15591_v13  ;;  %v5284_v18 = vmax.f32 %v15663_v53, %v15685_v10  ;;  %v4988_v8 = vpop.f32.mrb[13].mxu0  ;;  %v15692_v20 = vpop.f32.mrb[13].mxu1  ;;  %6451 = vmatprep.subr.bf16.mxu0 %v14842_v21  ;;  %v14874_v9 = vld [vmem:[#allocation2 + $0x105c] ss:$56 sps:$4 sm:$0xff]  }
 0x34b   : > { %v15695_v22 = vadd.f32 %v4988_v8, %v15593_v15  ;;  %v4990_v23 = vpop.f32.mrb[14].mxu0  ;;  %v15697_v24 = vpop.f32.mrb[14].mxu1  ;;  %5607 = vmatpush1.bf16.msra.mxu1 %v14843_v25  ;;  %v14875_v8 = vld [vmem:[#allocation2 + $0x238] ss:$56 sps:$4 sm:$0xff]  }
 0x34c   : > { %v5281_v13 = vmax.f32 %v15688_v16, %v15675_v33  ;;  %v15702_v26 = vadd.f32 %v4990_v23, %v15595_v17  ;;  %v5291_v28 = vmax.f32 %v15667_v57, %v15697_v24  ;;  %v4992_v29 = vpop.f32.mrb[15].mxu0  ;;  %v15706_v30 = vpop.f32.mrb[15].mxu1  ;;  %5608 = vmatprep.subr.bf16.mxu1 %v14844_v32  ;;  %v14847_v17 = vld [vmem:[#allocation2 + $0x2a0] ss:$56 sps:$4 sm:$0xff]   ;;  %v14876_v23 = vld [vmem:[#allocation2 + $0x2ac] ss:$56 sps:$4 sm:$0xff]  }
 0x34d   : > { %v15709_v15 = vadd.f32 %v4992_v29, %v15597_v19  ;;  %6452 = vmatpush1.bf16.msra.mxu0 %v14845_v34  ;;  %v14853_v19 = vld [vmem:[#allocation2 + $0xdb8] ss:$56 sps:$4 sm:$0xff]   ;;  %v14878_v32 = vld [vmem:[#allocation2 + $0x10cc] ss:$56 sps:$4 sm:$0xff]   ;;  %v14879_v34 = vld [vmem:[#allocation2 + $0x2a8] ss:$56 sps:$4 sm:$0xff]  }
 0x34e   : > { %v5288_v36 = vmax.f32 %v15702_v26, %v15679_v38  ;;  %6453 = vmatprep.subr.bf16.mxu0 %v14846_v39  ;;  %v14877_v29 = vld [vmem:[#allocation2 + $0x1058] ss:$56 sps:$4 sm:$0xff]   ;;  %v14880_v39 = vld [vmem:[#allocation2 + $0x31c] ss:$56 sps:$4 sm:$0xff]  }
 0x34f   : > { %5609 = vmatpush1.bf16.msra.mxu1 %v14847_v17  ;;  %v14881_v17 = vld [vmem:[#allocation2 + $0x10c8] ss:$56 sps:$4 sm:$0xff]   ;;  %v13930_v57 = vld [vmem:[#allocation6 + $0x6f4] ss:$8 sps:$4 sm:$0xff]  }
 0x350   : > { %5610 = vmatprep.subr.bf16.mxu1 %v14848_v40  ;;  %v14882_v40 = vld [vmem:[#allocation2 + $0x113c] ss:$56 sps:$4 sm:$0xff]  }
 0x351   : > { %6454 = vmatpush1.bf16.msra.mxu0 %v14849_v41  ;;  %v14883_v41 = vld [vmem:[#allocation2 + $0x318] ss:$56 sps:$4 sm:$0xff]  }
 0x352   : > { %6455 = vmatprep.subr.bf16.mxu0 %v14850_v42  ;;  %v14884_v42 = vld [vmem:[#allocation2 + $0x14] ss:$56 sps:$4 sm:$0xff]  }
 0x353   : > { %5611 = vmatpush1.bf16.msra.mxu1 %v14851_v43  ;;  %v14885_v43 = vld [vmem:[#allocation2 + $0x1138] ss:$56 sps:$4 sm:$0xff]  }
 0x354   : > { %5639 = vmatprep.subr.bf16.mxu1 %v14852_v44  ;;  %v14886_v44 = vld [vmem:[#allocation2 + $0x10] ss:$56 sps:$4 sm:$0xff]  }
 0x355   : > { %6456 = vmatpush1.bf16.msra.mxu0 %v14853_v19  ;;  %v14887_v19 = vld [vmem:[#allocation2 + $0x84] ss:$56 sps:$4 sm:$0xff]  }
 0x356   : > { %5629 = vmatmul.mubr.bf16.vlgmr.msra.gmra.mrb[16].mxu1 %v15552_v37  ;;  %6776 = vmatprep.subr.bf16.mxu0 %v14854_v45  ;;  %v14888_v45 = vld [vmem:[#allocation2 + $0x80] ss:$56 sps:$4 sm:$0xff]  }
 0x357   : > { %5640 = vmatpush1.bf16.msra.mxu1 %v14855_v46  ;;  %5671 = vmatprep.mubr.bf16.mxu1 %v16089_v0  ;;  %v14889_v46 = vld [vmem:[#allocation2 + $0xf4] ss:$56 sps:$4 sm:$0xff]  }
 0x358   : > { %5641 = vmatprep.subr.bf16.mxu1 %v14856_v47  ;;  %6474 = vmatmul.mubr.bf16.vlgmr.msra.gmra.mrb[16].mxu0 %v15631_v62  ;;  %v14890_v47 = vld [vmem:[#allocation2 + $0xf0] ss:$56 sps:$4 sm:$0xff]  }
 0x359   : > { %6777 = vmatpush1.bf16.msra.mxu0 %v14857_v48  ;;  %6808 = vmatprep.mubr.bf16.mxu0 %v16089_v0  ;;  %v14891_v48 = vld [vmem:[#allocation2 + $0x164] ss:$56 sps:$4 sm:$0xff]  }
 0x35a   : > { %6778 = vmatprep.subr.bf16.mxu0 %v14858_v49  ;;  %v14892_v49 = vld [vmem:[#allocation2 + $0x160] ss:$56 sps:$4 sm:$0xff]  }
 0x35b   : > { %5642 = vmatpush1.bf16.msra.mxu1 %v14859_v50  ;;  %v14893_v50 = vld [vmem:[#allocation2 + $0x1d4] ss:$56 sps:$4 sm:$0xff]  }
 0x35c   : > { %5643 = vmatprep.subr.bf16.mxu1 %v14860_v52  ;;  %v14894_v52 = vld [vmem:[#allocation2 + $0x1d0] ss:$56 sps:$4 sm:$0xff]  }
 0x35d   : > { %6779 = vmatpush1.bf16.msra.mxu0 %v14861_v54  ;;  %v14895_v54 = vld [vmem:[#allocation2 + $0x244] ss:$56 sps:$4 sm:$0xff]  }
 0x35e   : > { %6780 = vmatprep.subr.bf16.mxu0 %v14862_v56 }
 0x35f   : > { %5644 = vmatpush1.bf16.msra.mxu1 %v14863_v58 }
 0x360   : > { %5645 = vmatprep.subr.bf16.mxu1 %v14864_v59 }
 0x361   : > { %6781 = vmatpush1.bf16.msra.mxu0 %v14865_v27 }
 0x362   : > { %6782 = vmatprep.subr.bf16.mxu0 %v14866_v12 }
 0x363   : > { %5646 = vmatpush1.bf16.msra.mxu1 %v14867_v60  ;;  %v14896_v60 = vld [vmem:[#allocation2 + $0x240] ss:$56 sps:$4 sm:$0xff]  }
 0x364   : > { %5647 = vmatprep.subr.bf16.mxu1 %v14868_v61 }
 0x365   : > { %6783 = vmatpush1.bf16.msra.mxu0 %v14869_v63 }
 0x366   : > { %6784 = vmatprep.subr.bf16.mxu0 %v14870_v1  ;;  %v14897_v1 = vld [vmem:[#allocation2 + $0x2b4] ss:$56 sps:$4 sm:$0xff]  }
 0x367   : > { %5648 = vmatpush1.bf16.msra.mxu1 %v14871_v2  ;;  %v13922_v2 = vld [vmem:[#allocation6 + $0x6e0] ss:$8 sps:$4 sm:$0xff]  }
 0x368   : > { %5649 = vmatprep.subr.bf16.mxu1 %v14872_v3  ;;  %v14898_v3 = vld [vmem:[#allocation2 + $0x2b0] ss:$56 sps:$4 sm:$0xff]  }
 0x369   : > { %v15717_v4 = vpop.f32.mrb[0].mxu0  ;;  %6785 = vmatpush1.bf16.msra.mxu0 %v14873_v5  ;;  %v14899_v5 = vld [vmem:[#allocation2 + $0x324] ss:$56 sps:$4 sm:$0xff]  }
 0x36a   : > { %v5285_v6 = vmax.f32 %v15717_v4, %v15692_v20  ;;  %v15721_v7 = vpop.f32.mrb[1].mxu0  ;;  %6786 = vmatprep.subr.bf16.mxu0 %v14874_v9  ;;  %v14900_v9 = vld [vmem:[#allocation2 + $0x320] ss:$56 sps:$4 sm:$0xff]  }
 0x36b   : > { %v15723_v11 = vpop.f32.mrb[2].mxu0  ;;  %5650 = vmatpush1.bf16.msra.mxu1 %v14875_v8  ;;  %v14901_v8 = vld [vmem:[#allocation2 + $0x1c] ss:$56 sps:$4 sm:$0xff]  }
 0x36c   : > { %v5292_v21 = vmax.f32 %v15723_v11, %v15706_v30  ;;  %5651 = vmatprep.subr.bf16.mxu1 %v14876_v23  ;;  %v15727_v25 = vpop.f32.mrb[3].mxu0  ;;  %v14902_v23 = vld [vmem:[#allocation2 + $0x18] ss:$56 sps:$4 sm:$0xff]  }
 0x36d   : > { %6787 = vmatpush1.bf16.msra.mxu0 %v14877_v29  ;;  %v14903_v29 = vld [vmem:[#allocation2 + $0x8c] ss:$56 sps:$4 sm:$0xff]  }
 0x36e   : > { %6788 = vmatprep.subr.bf16.mxu0 %v14878_v32  ;;  %v14904_v32 = vld [vmem:[#allocation2 + $0x88] ss:$56 sps:$4 sm:$0xff]  }
 0x36f   : > { %5652 = vmatpush1.bf16.msra.mxu1 %v14879_v34  ;;  %v14905_v34 = vld [vmem:[#allocation2 + $0xfc] ss:$56 sps:$4 sm:$0xff]  }
 0x370   : > { %5653 = vmatprep.subr.bf16.mxu1 %v14880_v39  ;;  %v14906_v39 = vld [vmem:[#allocation2 + $0xf8] ss:$56 sps:$4 sm:$0xff]  }
 0x371   : > { %6789 = vmatpush1.bf16.msra.mxu0 %v14881_v17  ;;  %v14907_v17 = vld [vmem:[#allocation2 + $0x16c] ss:$56 sps:$4 sm:$0xff]  }
 0x372   : > { %6790 = vmatprep.subr.bf16.mxu0 %v14882_v40  ;;  %v14908_v40 = vld [vmem:[#allocation2 + $0x168] ss:$56 sps:$4 sm:$0xff]  }
 0x373   : > { %5654 = vmatpush1.bf16.msra.mxu1 %v14883_v41  ;;  %v14909_v41 = vld [vmem:[#allocation2 + $0x1dc] ss:$56 sps:$4 sm:$0xff]  }
 0x374   : > { %5682 = vmatprep.subr.bf16.mxu1 %v14884_v42  ;;  %v14910_v42 = vld [vmem:[#allocation2 + $0x1d8] ss:$56 sps:$4 sm:$0xff]  }
 0x375   : > { %6791 = vmatpush1.bf16.msra.mxu0 %v14885_v43  ;;  %v14911_v43 = vld [vmem:[#allocation2 + $0x24c] ss:$56 sps:$4 sm:$0xff]  }
 0x376   : > { %5672 = vmatmul.mubr.bf16.vlgmr.msra.gmra.mrb[20].mxu1 %v15552_v37 }
 0x377   : > { %5683 = vmatpush1.bf16.msra.mxu1 %v14886_v44  ;;  %5714 = vmatprep.mubr.bf16.mxu1 %v16089_v0 }
 0x378   : > { %5684 = vmatprep.subr.bf16.mxu1 %v14887_v19  ;;  %v13924_v19 = vld [vmem:[#allocation6 + $0x6e4] ss:$8 sps:$4 sm:$0xff]  }
 0x37b   : > { %5685 = vmatpush1.bf16.msra.mxu1 %v14888_v45 }
 0x37c   : > { %5686 = vmatprep.subr.bf16.mxu1 %v14889_v46 }
 0x37f   : > { %5687 = vmatpush1.bf16.msra.mxu1 %v14890_v47 }
 0x380   : > { %5688 = vmatprep.subr.bf16.mxu1 %v14891_v48  ;;  %v14912_v48 = vld [vmem:[#allocation2 + $0x248] ss:$56 sps:$4 sm:$0xff]  }
 0x383   : > { %5689 = vmatpush1.bf16.msra.mxu1 %v14892_v49 }
 0x384   : > { %5690 = vmatprep.subr.bf16.mxu1 %v14893_v50 }
 0x387   : > { %5691 = vmatpush1.bf16.msra.mxu1 %v14894_v52  ;;  %v14913_v52 = vld [vmem:[#allocation2 + $0x2bc] ss:$56 sps:$4 sm:$0xff]  }
 0x388   : > { %5692 = vmatprep.subr.bf16.mxu1 %v14895_v54 }
 0x389   : > { %v15731_v56 = vpop.f32.mrb[4].mxu0 }
 0x38a   : > { %v5282_v58 = vmax.f32 %v15695_v22, %v15731_v56  ;;  %v15735_v59 = vpop.f32.mrb[5].mxu0 }
 0x38b   : > { %v5283_v27 = vmax.f32 %v15661_v51, %v15735_v59  ;;  %v15739_v12 = vpop.f32.mrb[6].mxu0  ;;  %5693 = vmatpush1.bf16.msra.mxu1 %v14896_v60  ;;  %v14914_v60 = vld [vmem:[#allocation2 + $0x2b8] ss:$56 sps:$4 sm:$0xff]  }
 0x38c   : > { %v5289_v61 = vmax.f32 %v15709_v15, %v15739_v12  ;;  %v15743_v63 = vpop.f32.mrb[7].mxu0  ;;  %5694 = vmatprep.subr.bf16.mxu1 %v14897_v1  ;;  %v14915_v1 = vld [vmem:[#allocation2 + $0x32c] ss:$56 sps:$4 sm:$0xff]  }
 0x38f   : > { %5695 = vmatpush1.bf16.msra.mxu1 %v14898_v3  ;;  %v14916_v3 = vld [vmem:[#allocation2 + $0x328] ss:$56 sps:$4 sm:$0xff]  }
 0x390   : > { %5696 = vmatprep.subr.bf16.mxu1 %v14899_v5  ;;  %v14917_v5 = vld [vmem:[#allocation2 + $0x24] ss:$56 sps:$4 sm:$0xff]  }
 0x393   : > { %5697 = vmatpush1.bf16.msra.mxu1 %v14900_v9  ;;  %v14918_v9 = vld [vmem:[#allocation2 + $0x20] ss:$56 sps:$4 sm:$0xff]  }
 0x394   : > { %5725 = vmatprep.subr.bf16.mxu1 %v14901_v8  ;;  %v14919_v8 = vld [vmem:[#allocation2 + $0x94] ss:$56 sps:$4 sm:$0xff]  }
 0x396   : > { %5715 = vmatmul.mubr.bf16.vlgmr.msra.gmra.mrb[24].mxu1 %v15552_v37 }
 0x397   : > { %5726 = vmatpush1.bf16.msra.mxu1 %v14902_v23  ;;  %5757 = vmatprep.mubr.bf16.mxu1 %v16089_v0  ;;  %v14920_v23 = vld [vmem:[#allocation2 + $0x90] ss:$56 sps:$4 sm:$0xff]  }
 0x398   : > { %5727 = vmatprep.subr.bf16.mxu1 %v14903_v29  ;;  %v14921_v29 = vld [vmem:[#allocation2 + $0x104] ss:$56 sps:$4 sm:$0xff]  }
 0x39b   : > { %5728 = vmatpush1.bf16.msra.mxu1 %v14904_v32  ;;  %v14922_v32 = vld [vmem:[#allocation2 + $0x100] ss:$56 sps:$4 sm:$0xff]  }
 0x39c   : > { %5729 = vmatprep.subr.bf16.mxu1 %v14905_v34  ;;  %v14923_v34 = vld [vmem:[#allocation2 + $0x174] ss:$56 sps:$4 sm:$0xff]  }
 0x39f   : > { %5730 = vmatpush1.bf16.msra.mxu1 %v14906_v39  ;;  %v14924_v39 = vld [vmem:[#allocation2 + $0x170] ss:$56 sps:$4 sm:$0xff]  }
 0x3a0   : > { %5731 = vmatprep.subr.bf16.mxu1 %v14907_v17  ;;  %v14925_v17 = vld [vmem:[#allocation2 + $0x1e4] ss:$56 sps:$4 sm:$0xff]  }
 0x3a3   : > { %5732 = vmatpush1.bf16.msra.mxu1 %v14908_v40  ;;  %v14926_v40 = vld [vmem:[#allocation2 + $0x1e0] ss:$56 sps:$4 sm:$0xff]  }
 0x3a4   : > { %5733 = vmatprep.subr.bf16.mxu1 %v14909_v41  ;;  %v14927_v41 = vld [vmem:[#allocation2 + $0x254] ss:$56 sps:$4 sm:$0xff]  }
 0x3a7   : > { %5734 = vmatpush1.bf16.msra.mxu1 %v14910_v42  ;;  %v14928_v42 = vld [vmem:[#allocation2 + $0x250] ss:$56 sps:$4 sm:$0xff]  }
 0x3a8   : > { %5735 = vmatprep.subr.bf16.mxu1 %v14911_v43  ;;  %v14929_v43 = vld [vmem:[#allocation2 + $0x2c4] ss:$56 sps:$4 sm:$0xff]  }
 0x3a9   : > { %v15749_v44 = vpop.f32.mrb[8].mxu0 }
 0x3aa   : > { %v15753_v45 = vpop.f32.mrb[9].mxu0 }
 0x3ab   : > { %v15757_v47 = vpop.f32.mrb[10].mxu0  ;;  %5736 = vmatpush1.bf16.msra.mxu1 %v14912_v48  ;;  %v14930_v48 = vld [vmem:[#allocation2 + $0x2c0] ss:$56 sps:$4 sm:$0xff]  }
 0x3ac   : > { %v15761_v50 = vpop.f32.mrb[11].mxu0  ;;  %5737 = vmatprep.subr.bf16.mxu1 %v14913_v52  ;;  %v14931_v52 = vld [vmem:[#allocation2 + $0x334] ss:$56 sps:$4 sm:$0xff]  }
 0x3af   : > { %5738 = vmatpush1.bf16.msra.mxu1 %v14914_v60  ;;  %v14932_v60 = vld [vmem:[#allocation2 + $0x330] ss:$56 sps:$4 sm:$0xff]  }
 0x3b0   : > { %5739 = vmatprep.subr.bf16.mxu1 %v14915_v1  ;;  %v14933_v1 = vld [vmem:[#allocation2 + $0x34] ss:$56 sps:$4 sm:$0xff]  }
 0x3b3   : > { %5740 = vmatpush1.bf16.msra.mxu1 %v14916_v3  ;;  %v14934_v3 = vld [vmem:[#allocation2 + $0x30] ss:$56 sps:$4 sm:$0xff]  }
 0x3b4   : > { %5768 = vmatprep.subr.bf16.mxu1 %v14917_v5  ;;  %v14935_v5 = vld [vmem:[#allocation2 + $0xa4] ss:$56 sps:$4 sm:$0xff]  }
 0x3b6   : > { %5758 = vmatmul.mubr.bf16.vlgmr.msra.gmra.mrb[28].mxu1 %v15552_v37 }
 0x3b7   : > { %5769 = vmatpush1.bf16.msra.mxu1 %v14918_v9  ;;  %5800 = vmatprep.mubr.bf16.mxu1 %v16089_v0  ;;  %v14936_v9 = vld [vmem:[#allocation2 + $0xa0] ss:$56 sps:$4 sm:$0xff]  }
 0x3b8   : > { %5770 = vmatprep.subr.bf16.mxu1 %v14919_v8  ;;  %v14937_v8 = vld [vmem:[#allocation2 + $0x114] ss:$56 sps:$4 sm:$0xff]  }
 0x3bb   : > { %5771 = vmatpush1.bf16.msra.mxu1 %v14920_v23  ;;  %v14938_v23 = vld [vmem:[#allocation2 + $0x110] ss:$56 sps:$4 sm:$0xff]  }
 0x3bc   : > { %5772 = vmatprep.subr.bf16.mxu1 %v14921_v29  ;;  %v14939_v29 = vld [vmem:[#allocation2 + $0x184] ss:$56 sps:$4 sm:$0xff]  }
 0x3bf   : > { %5773 = vmatpush1.bf16.msra.mxu1 %v14922_v32  ;;  %v14940_v32 = vld [vmem:[#allocation2 + $0x180] ss:$56 sps:$4 sm:$0xff]  }
 0x3c0   : > { %5774 = vmatprep.subr.bf16.mxu1 %v14923_v34  ;;  %v14941_v34 = vld [vmem:[#allocation2 + $0x1f4] ss:$56 sps:$4 sm:$0xff]  }
 0x3c3   : > { %5775 = vmatpush1.bf16.msra.mxu1 %v14924_v39  ;;  %v14942_v39 = vld [vmem:[#allocation2 + $0x1f0] ss:$56 sps:$4 sm:$0xff]  }
 0x3c4   : > { %5776 = vmatprep.subr.bf16.mxu1 %v14925_v17  ;;  %v14943_v17 = vld [vmem:[#allocation2 + $0x264] ss:$56 sps:$4 sm:$0xff]  }
 0x3c7   : > { %5777 = vmatpush1.bf16.msra.mxu1 %v14926_v40  ;;  %v14944_v40 = vld [vmem:[#allocation2 + $0x260] ss:$56 sps:$4 sm:$0xff]  }
 0x3c8   : > { %5778 = vmatprep.subr.bf16.mxu1 %v14927_v41  ;;  %v14945_v41 = vld [vmem:[#allocation2 + $0x2d4] ss:$56 sps:$4 sm:$0xff]  }
 0x3cb   : > { %5779 = vmatpush1.bf16.msra.mxu1 %v14928_v42  ;;  %v14946_v42 = vld [vmem:[#allocation2 + $0x2d0] ss:$56 sps:$4 sm:$0xff]  }
 0x3cc   : > { %5780 = vmatprep.subr.bf16.mxu1 %v14929_v43  ;;  %v14947_v43 = vld [vmem:[#allocation2 + $0x344] ss:$56 sps:$4 sm:$0xff]  }
 0x3cf   : > { %5781 = vmatpush1.bf16.msra.mxu1 %v14930_v48  ;;  %v14948_v48 = vld [vmem:[#allocation2 + $0x340] ss:$56 sps:$4 sm:$0xff]  }
 0x3d0   : > { %5782 = vmatprep.subr.bf16.mxu1 %v14931_v52  ;;  %v14949_v52 = vld [vmem:[#allocation2 + $0x704] ss:$56 sps:$4 sm:$0xff]  }
 0x3d3   : > { %5783 = vmatpush1.bf16.msra.mxu1 %v14932_v60  ;;  %v14950_v60 = vld [vmem:[#allocation2 + $0x700] ss:$56 sps:$4 sm:$0xff]  }
 0x3d4   : > { %5854 = vmatprep.subr.bf16.mxu1 %v14933_v1  ;;  %v14951_v1 = vld [vmem:[#allocation2 + $0x774] ss:$56 sps:$4 sm:$0xff]  }
 0x3d6   : > { %5801 = vmatmul.mubr.bf16.vlgmr.msra.gmra.mrb[32].mxu1 %v15552_v37 }
 0x3d7   : > { %5855 = vmatpush1.bf16.msra.mxu1 %v14934_v3  ;;  %5886 = vmatprep.mubr.bf16.mxu1 %v16089_v0  ;;  %v14952_v3 = vld [vmem:[#allocation2 + $0x770] ss:$56 sps:$4 sm:$0xff]  }
 0x3d8   : > { %5856 = vmatprep.subr.bf16.mxu1 %v14935_v5  ;;  %v14953_v5 = vld [vmem:[#allocation2 + $0x7e4] ss:$56 sps:$4 sm:$0xff]  }
 0x3db   : > { %5857 = vmatpush1.bf16.msra.mxu1 %v14936_v9  ;;  %v14954_v9 = vld [vmem:[#allocation2 + $0x7e0] ss:$56 sps:$4 sm:$0xff]  }
 0x3dc   : > { %5858 = vmatprep.subr.bf16.mxu1 %v14937_v8  ;;  %v14955_v8 = vld [vmem:[#allocation2 + $0x854] ss:$56 sps:$4 sm:$0xff]  }
 0x3df   : > { %5859 = vmatpush1.bf16.msra.mxu1 %v14938_v23  ;;  %v14956_v23 = vld [vmem:[#allocation2 + $0x850] ss:$56 sps:$4 sm:$0xff]  }
 0x3e0   : > { %5860 = vmatprep.subr.bf16.mxu1 %v14939_v29  ;;  %v14957_v29 = vld [vmem:[#allocation2 + $0x8c4] ss:$56 sps:$4 sm:$0xff]  }
 0x3e3   : > { %5861 = vmatpush1.bf16.msra.mxu1 %v14940_v32  ;;  %v14958_v32 = vld [vmem:[#allocation2 + $0x8c0] ss:$56 sps:$4 sm:$0xff]  }
 0x3e4   : > { %5862 = vmatprep.subr.bf16.mxu1 %v14941_v34  ;;  %v14960_v34 = vld [vmem:[#allocation2 + $0x930] ss:$56 sps:$4 sm:$0xff]  }
 0x3e7   : > { %5863 = vmatpush1.bf16.msra.mxu1 %v14942_v39  ;;  %v14961_v39 = vld [vmem:[#allocation2 + $0x9a4] ss:$56 sps:$4 sm:$0xff]  }
 0x3e8   : > { %5864 = vmatprep.subr.bf16.mxu1 %v14943_v17  ;;  %v14962_v17 = vld [vmem:[#allocation2 + $0x9a0] ss:$56 sps:$4 sm:$0xff]  }
 0x3eb   : > { %5865 = vmatpush1.bf16.msra.mxu1 %v14944_v40  ;;  %v14963_v40 = vld [vmem:[#allocation2 + $0xa14] ss:$56 sps:$4 sm:$0xff]  }
 0x3ec   : > { %5866 = vmatprep.subr.bf16.mxu1 %v14945_v41  ;;  %v14964_v41 = vld [vmem:[#allocation2 + $0xa10] ss:$56 sps:$4 sm:$0xff]  }
 0x3ef   : > { %5867 = vmatpush1.bf16.msra.mxu1 %v14946_v42  ;;  %v14965_v42 = vld [vmem:[#allocation2 + $0x70c] ss:$56 sps:$4 sm:$0xff]  }
 0x3f0   : > { %5868 = vmatprep.subr.bf16.mxu1 %v14947_v43  ;;  %v14966_v43 = vld [vmem:[#allocation2 + $0x708] ss:$56 sps:$4 sm:$0xff]  }
 0x3f3   : > { %5869 = vmatpush1.bf16.msra.mxu1 %v14948_v48  ;;  %v14967_v48 = vld [vmem:[#allocation2 + $0x77c] ss:$56 sps:$4 sm:$0xff]  }
 0x3f4   : > { %5897 = vmatprep.subr.bf16.mxu1 %v14949_v52  ;;  %v14968_v52 = vld [vmem:[#allocation2 + $0x778] ss:$56 sps:$4 sm:$0xff]  }
 0x3f6   : > { %5887 = vmatmul.mubr.bf16.vlgmr.msra.gmra.mrb[36].mxu1 %v15552_v37  ;;  %v14959_v37 = vld [vmem:[#allocation2 + $0x934] ss:$56 sps:$4 sm:$0xff]  }
 0x3f7   : > { %5898 = vmatpush1.bf16.msra.mxu1 %v14950_v60  ;;  %5929 = vmatprep.mubr.bf16.mxu1 %v16089_v0  ;;  %v14969_v60 = vld [vmem:[#allocation2 + $0x7ec] ss:$56 sps:$4 sm:$0xff]  }
 0x3f8   : > { %5899 = vmatprep.subr.bf16.mxu1 %v14951_v1  ;;  %v14970_v1 = vld [vmem:[#allocation2 + $0x7e8] ss:$56 sps:$4 sm:$0xff]  }
 0x3fb   : > { %5900 = vmatpush1.bf16.msra.mxu1 %v14952_v3  ;;  %v14971_v3 = vld [vmem:[#allocation2 + $0x85c] ss:$56 sps:$4 sm:$0xff]  }
 0x3fc   : > { %5901 = vmatprep.subr.bf16.mxu1 %v14953_v5  ;;  %v14972_v5 = vld [vmem:[#allocation2 + $0x858] ss:$56 sps:$4 sm:$0xff]  }
 0x3ff   : > { %5902 = vmatpush1.bf16.msra.mxu1 %v14954_v9  ;;  %v14973_v9 = vld [vmem:[#allocation2 + $0x8cc] ss:$56 sps:$4 sm:$0xff]  }
 0x400   : > { %5903 = vmatprep.subr.bf16.mxu1 %v14955_v8  ;;  %v14974_v8 = vld [vmem:[#allocation2 + $0x8c8] ss:$56 sps:$4 sm:$0xff]  }
 0x403   : > { %5904 = vmatpush1.bf16.msra.mxu1 %v14956_v23  ;;  %v14975_v23 = vld [vmem:[#allocation2 + $0x93c] ss:$56 sps:$4 sm:$0xff]  }
 0x404   : > { %5905 = vmatprep.subr.bf16.mxu1 %v14957_v29  ;;  %v14976_v29 = vld [vmem:[#allocation2 + $0x938] ss:$56 sps:$4 sm:$0xff]  }
 0x407   : > { %5906 = vmatpush1.bf16.msra.mxu1 %v14958_v32  ;;  %v14977_v32 = vld [vmem:[#allocation2 + $0x9ac] ss:$56 sps:$4 sm:$0xff]  }
 0x408   : > { %5907 = vmatprep.subr.bf16.mxu1 %v14959_v37  ;;  %v14978_v37 = vld [vmem:[#allocation2 + $0x9a8] ss:$56 sps:$4 sm:$0xff]  }
 0x40b   : > { %5908 = vmatpush1.bf16.msra.mxu1 %v14960_v34  ;;  %v14979_v34 = vld [vmem:[#allocation2 + $0xa1c] ss:$56 sps:$4 sm:$0xff]  }
 0x40c   : > { %5909 = vmatprep.subr.bf16.mxu1 %v14961_v39  ;;  %v14980_v39 = vld [vmem:[#allocation2 + $0xa18] ss:$56 sps:$4 sm:$0xff]  }
 0x40f   : > { %5910 = vmatpush1.bf16.msra.mxu1 %v14962_v17  ;;  %v14981_v17 = vld [vmem:[#allocation2 + $0x714] ss:$56 sps:$4 sm:$0xff]  }
 0x410   : > { %5911 = vmatprep.subr.bf16.mxu1 %v14963_v40  ;;  %v14982_v40 = vld [vmem:[#allocation2 + $0x710] ss:$56 sps:$4 sm:$0xff]  }
 0x413   : > { %5912 = vmatpush1.bf16.msra.mxu1 %v14964_v41  ;;  %v14983_v41 = vld [vmem:[#allocation2 + $0x784] ss:$56 sps:$4 sm:$0xff]  }
 0x414   : > { %5940 = vmatprep.subr.bf16.mxu1 %v14965_v42  ;;  %v14984_v42 = vld [vmem:[#allocation2 + $0x780] ss:$56 sps:$4 sm:$0xff]  }
 0x416   : > { %5930 = vmatmul.mubr.bf16.vlgmr.msra.gmra.mrb[16].mxu1 %v15615_v14 }
 0x417   : > { %5941 = vmatpush1.bf16.msra.mxu1 %v14966_v43  ;;  %5972 = vmatprep.mubr.bf16.mxu1 %v16089_v0  ;;  %v14985_v43 = vld [vmem:[#allocation2 + $0x7f4] ss:$56 sps:$4 sm:$0xff]  }
 0x418   : > { %5942 = vmatprep.subr.bf16.mxu1 %v14967_v48  ;;  %v14986_v48 = vld [vmem:[#allocation2 + $0x7f0] ss:$56 sps:$4 sm:$0xff]  }
 0x41b   : > { %5943 = vmatpush1.bf16.msra.mxu1 %v14968_v52  ;;  %v14987_v52 = vld [vmem:[#allocation2 + $0x864] ss:$56 sps:$4 sm:$0xff]  }
 0x41c   : > { %5944 = vmatprep.subr.bf16.mxu1 %v14969_v60  ;;  %v14988_v60 = vld [vmem:[#allocation2 + $0x860] ss:$56 sps:$4 sm:$0xff]  }
 0x41f   : > { %5945 = vmatpush1.bf16.msra.mxu1 %v14970_v1  ;;  %v14989_v1 = vld [vmem:[#allocation2 + $0x8d4] ss:$56 sps:$4 sm:$0xff]  }
 0x420   : > { %5946 = vmatprep.subr.bf16.mxu1 %v14971_v3  ;;  %v14990_v3 = vld [vmem:[#allocation2 + $0x8d0] ss:$56 sps:$4 sm:$0xff]  }
 0x423   : > { %5947 = vmatpush1.bf16.msra.mxu1 %v14972_v5  ;;  %v14991_v5 = vld [vmem:[#allocation2 + $0x944] ss:$56 sps:$4 sm:$0xff]  }
 0x424   : > { %5948 = vmatprep.subr.bf16.mxu1 %v14973_v9  ;;  %v14992_v9 = vld [vmem:[#allocation2 + $0x940] ss:$56 sps:$4 sm:$0xff]  }
 0x427   : > { %5949 = vmatpush1.bf16.msra.mxu1 %v14974_v8  ;;  %v14993_v8 = vld [vmem:[#allocation2 + $0x9b4] ss:$56 sps:$4 sm:$0xff]  }
 0x428   : > { %5950 = vmatprep.subr.bf16.mxu1 %v14975_v23  ;;  %v14994_v23 = vld [vmem:[#allocation2 + $0x9b0] ss:$56 sps:$4 sm:$0xff]  }
 0x42b   : > { %5951 = vmatpush1.bf16.msra.mxu1 %v14976_v29  ;;  %v14995_v29 = vld [vmem:[#allocation2 + $0xa24] ss:$56 sps:$4 sm:$0xff]  }
 0x42c   : > { %5952 = vmatprep.subr.bf16.mxu1 %v14977_v32  ;;  %v14996_v32 = vld [vmem:[#allocation2 + $0xa20] ss:$56 sps:$4 sm:$0xff]  }
 0x42f   : > { %5953 = vmatpush1.bf16.msra.mxu1 %v14978_v37  ;;  %v14997_v37 = vld [vmem:[#allocation2 + $0x71c] ss:$56 sps:$4 sm:$0xff]  }
 0x430   : > { %5954 = vmatprep.subr.bf16.mxu1 %v14979_v34  ;;  %v14998_v34 = vld [vmem:[#allocation2 + $0x718] ss:$56 sps:$4 sm:$0xff]  }
 0x433   : > { %5955 = vmatpush1.bf16.msra.mxu1 %v14980_v39  ;;  %v14999_v39 = vld [vmem:[#allocation2 + $0x78c] ss:$56 sps:$4 sm:$0xff]  }
 0x434   : > { %5983 = vmatprep.subr.bf16.mxu1 %v14981_v17  ;;  %v15000_v17 = vld [vmem:[#allocation2 + $0x788] ss:$56 sps:$4 sm:$0xff]  }
 0x436   : > { %5973 = vmatmul.mubr.bf16.vlgmr.msra.gmra.mrb[20].mxu1 %v15615_v14 }
 0x437   : > { %5984 = vmatpush1.bf16.msra.mxu1 %v14982_v40  ;;  %6015 = vmatprep.mubr.bf16.mxu1 %v16089_v0  ;;  %v15001_v40 = vld [vmem:[#allocation2 + $0x7fc] ss:$56 sps:$4 sm:$0xff]  }
 0x438   : > { %5985 = vmatprep.subr.bf16.mxu1 %v14983_v41  ;;  %v15002_v41 = vld [vmem:[#allocation2 + $0x7f8] ss:$56 sps:$4 sm:$0xff]  }
 0x43b   : > { %5986 = vmatpush1.bf16.msra.mxu1 %v14984_v42  ;;  %v15003_v42 = vld [vmem:[#allocation2 + $0x86c] ss:$56 sps:$4 sm:$0xff]  }
 0x43c   : > { %5987 = vmatprep.subr.bf16.mxu1 %v14985_v43  ;;  %v15004_v43 = vld [vmem:[#allocation2 + $0x868] ss:$56 sps:$4 sm:$0xff]  }
 0x43f   : > { %5988 = vmatpush1.bf16.msra.mxu1 %v14986_v48  ;;  %v15005_v48 = vld [vmem:[#allocation2 + $0x8dc] ss:$56 sps:$4 sm:$0xff]  }
 0x440   : > { %5989 = vmatprep.subr.bf16.mxu1 %v14987_v52  ;;  %v15006_v52 = vld [vmem:[#allocation2 + $0x8d8] ss:$56 sps:$4 sm:$0xff]  }
 0x443   : > { %5990 = vmatpush1.bf16.msra.mxu1 %v14988_v60  ;;  %v15007_v60 = vld [vmem:[#allocation2 + $0x94c] ss:$56 sps:$4 sm:$0xff]  }
 0x444   : > { %5991 = vmatprep.subr.bf16.mxu1 %v14989_v1  ;;  %v15008_v1 = vld [vmem:[#allocation2 + $0x948] ss:$56 sps:$4 sm:$0xff]  }
 0x447   : > { %5992 = vmatpush1.bf16.msra.mxu1 %v14990_v3  ;;  %v15009_v3 = vld [vmem:[#allocation2 + $0x9bc] ss:$56 sps:$4 sm:$0xff]  }
 0x448   : > { %5993 = vmatprep.subr.bf16.mxu1 %v14991_v5  ;;  %v15010_v5 = vld [vmem:[#allocation2 + $0x9b8] ss:$56 sps:$4 sm:$0xff]  }
 0x44b   : > { %5994 = vmatpush1.bf16.msra.mxu1 %v14992_v9  ;;  %v15011_v9 = vld [vmem:[#allocation2 + $0xa2c] ss:$56 sps:$4 sm:$0xff]  }
 0x44c   : > { %5995 = vmatprep.subr.bf16.mxu1 %v14993_v8  ;;  %v15012_v8 = vld [vmem:[#allocation2 + $0xa28] ss:$56 sps:$4 sm:$0xff]  }
 0x44f   : > { %5996 = vmatpush1.bf16.msra.mxu1 %v14994_v23  ;;  %v15013_v23 = vld [vmem:[#allocation2 + $0x724] ss:$56 sps:$4 sm:$0xff]  }
 0x450   : > { %5997 = vmatprep.subr.bf16.mxu1 %v14995_v29  ;;  %v15014_v29 = vld [vmem:[#allocation2 + $0x720] ss:$56 sps:$4 sm:$0xff]  }
 0x453   : > { %5998 = vmatpush1.bf16.msra.mxu1 %v14996_v32  ;;  %v15015_v32 = vld [vmem:[#allocation2 + $0x794] ss:$56 sps:$4 sm:$0xff]  }
 0x454   : > { %6026 = vmatprep.subr.bf16.mxu1 %v14997_v37  ;;  %v15016_v37 = vld [vmem:[#allocation2 + $0x790] ss:$56 sps:$4 sm:$0xff]  }
 0x456   : > { %6016 = vmatmul.mubr.bf16.vlgmr.msra.gmra.mrb[24].mxu1 %v15615_v14 }
 0x457   : > { %6027 = vmatpush1.bf16.msra.mxu1 %v14998_v34  ;;  %6058 = vmatprep.mubr.bf16.mxu1 %v16089_v0  ;;  %v15017_v34 = vld [vmem:[#allocation2 + $0x804] ss:$56 sps:$4 sm:$0xff]  }
 0x458   : > { %6028 = vmatprep.subr.bf16.mxu1 %v14999_v39  ;;  %v15018_v39 = vld [vmem:[#allocation2 + $0x800] ss:$56 sps:$4 sm:$0xff]  }
 0x45b   : > { %6029 = vmatpush1.bf16.msra.mxu1 %v15000_v17  ;;  %v15019_v17 = vld [vmem:[#allocation2 + $0x874] ss:$56 sps:$4 sm:$0xff]  }
 0x45c   : > { %6030 = vmatprep.subr.bf16.mxu1 %v15001_v40  ;;  %v15020_v40 = vld [vmem:[#allocation2 + $0x870] ss:$56 sps:$4 sm:$0xff]  }
 0x45f   : > { %6031 = vmatpush1.bf16.msra.mxu1 %v15002_v41  ;;  %v15021_v41 = vld [vmem:[#allocation2 + $0x8e4] ss:$56 sps:$4 sm:$0xff]  }
 0x460   : > { %6032 = vmatprep.subr.bf16.mxu1 %v15003_v42  ;;  %v15022_v42 = vld [vmem:[#allocation2 + $0x8e0] ss:$56 sps:$4 sm:$0xff]  }
 0x463   : > { %6033 = vmatpush1.bf16.msra.mxu1 %v15004_v43  ;;  %v15023_v43 = vld [vmem:[#allocation2 + $0x954] ss:$56 sps:$4 sm:$0xff]  }
 0x464   : > { %6034 = vmatprep.subr.bf16.mxu1 %v15005_v48  ;;  %v15024_v48 = vld [vmem:[#allocation2 + $0x950] ss:$56 sps:$4 sm:$0xff]  }
 0x467   : > { %6035 = vmatpush1.bf16.msra.mxu1 %v15006_v52  ;;  %v15025_v52 = vld [vmem:[#allocation2 + $0x9c4] ss:$56 sps:$4 sm:$0xff]  }
 0x468   : > { %6036 = vmatprep.subr.bf16.mxu1 %v15007_v60  ;;  %v15026_v60 = vld [vmem:[#allocation2 + $0x9c0] ss:$56 sps:$4 sm:$0xff]  }
 0x46b   : > { %6037 = vmatpush1.bf16.msra.mxu1 %v15008_v1  ;;  %v15027_v1 = vld [vmem:[#allocation2 + $0xa34] ss:$56 sps:$4 sm:$0xff]  }
 0x46c   : > { %6038 = vmatprep.subr.bf16.mxu1 %v15009_v3  ;;  %v15028_v3 = vld [vmem:[#allocation2 + $0xa30] ss:$56 sps:$4 sm:$0xff]  }
 0x46f   : > { %6039 = vmatpush1.bf16.msra.mxu1 %v15010_v5  ;;  %v15029_v5 = vld [vmem:[#allocation2 + $0x734] ss:$56 sps:$4 sm:$0xff]  }
 0x470   : > { %6040 = vmatprep.subr.bf16.mxu1 %v15011_v9  ;;  %v15030_v9 = vld [vmem:[#allocation2 + $0x730] ss:$56 sps:$4 sm:$0xff]  }
 0x473   : > { %6041 = vmatpush1.bf16.msra.mxu1 %v15012_v8  ;;  %v15031_v8 = vld [vmem:[#allocation2 + $0x7a4] ss:$56 sps:$4 sm:$0xff]  }
 0x474   : > { %6069 = vmatprep.subr.bf16.mxu1 %v15013_v23  ;;  %v15032_v23 = vld [vmem:[#allocation2 + $0x7a0] ss:$56 sps:$4 sm:$0xff]  }
 0x476   : > { %6059 = vmatmul.mubr.bf16.vlgmr.msra.gmra.mrb[28].mxu1 %v15615_v14 }
 0x477   : > { %6070 = vmatpush1.bf16.msra.mxu1 %v15014_v29  ;;  %6101 = vmatprep.mubr.bf16.mxu1 %v16089_v0  ;;  %v15033_v29 = vld [vmem:[#allocation2 + $0x814] ss:$56 sps:$4 sm:$0xff]  }
 0x478   : > { %6071 = vmatprep.subr.bf16.mxu1 %v15015_v32  ;;  %v15034_v32 = vld [vmem:[#allocation2 + $0x810] ss:$56 sps:$4 sm:$0xff]  }
 0x47b   : > { %6072 = vmatpush1.bf16.msra.mxu1 %v15016_v37  ;;  %v15035_v37 = vld [vmem:[#allocation2 + $0x884] ss:$56 sps:$4 sm:$0xff]  }
 0x47c   : > { %6073 = vmatprep.subr.bf16.mxu1 %v15017_v34  ;;  %v15036_v34 = vld [vmem:[#allocation2 + $0x880] ss:$56 sps:$4 sm:$0xff]  }
 0x47f   : > { %6074 = vmatpush1.bf16.msra.mxu1 %v15018_v39  ;;  %v15037_v39 = vld [vmem:[#allocation2 + $0x8f4] ss:$56 sps:$4 sm:$0xff]  }
 0x480   : > { %6075 = vmatprep.subr.bf16.mxu1 %v15019_v17  ;;  %v15038_v17 = vld [vmem:[#allocation2 + $0x8f0] ss:$56 sps:$4 sm:$0xff]  }
 0x483   : > { %6076 = vmatpush1.bf16.msra.mxu1 %v15020_v40  ;;  %v15039_v40 = vld [vmem:[#allocation2 + $0x964] ss:$56 sps:$4 sm:$0xff]  }
 0x484   : > { %6077 = vmatprep.subr.bf16.mxu1 %v15021_v41  ;;  %v15040_v41 = vld [vmem:[#allocation2 + $0x960] ss:$56 sps:$4 sm:$0xff]  }
 0x487   : > { %6078 = vmatpush1.bf16.msra.mxu1 %v15022_v42  ;;  %v15041_v42 = vld [vmem:[#allocation2 + $0x9d4] ss:$56 sps:$4 sm:$0xff]  }
 0x488   : > { %6079 = vmatprep.subr.bf16.mxu1 %v15023_v43  ;;  %v15042_v43 = vld [vmem:[#allocation2 + $0x9d0] ss:$56 sps:$4 sm:$0xff]  }
 0x48b   : > { %6080 = vmatpush1.bf16.msra.mxu1 %v15024_v48  ;;  %v15043_v48 = vld [vmem:[#allocation2 + $0xa44] ss:$56 sps:$4 sm:$0xff]  }
 0x48c   : > { %6081 = vmatprep.subr.bf16.mxu1 %v15025_v52  ;;  %v15044_v52 = vld [vmem:[#allocation2 + $0xa40] ss:$56 sps:$4 sm:$0xff]  }
 0x48f   : > { %6082 = vmatpush1.bf16.msra.mxu1 %v15026_v60  ;;  %v15045_v60 = vld [vmem:[#allocation2 + $0xa84] ss:$56 sps:$4 sm:$0xff]  }
 0x490   : > { %6083 = vmatprep.subr.bf16.mxu1 %v15027_v1  ;;  %v15046_v1 = vld [vmem:[#allocation2 + $0xa80] ss:$56 sps:$4 sm:$0xff]  }
 0x493   : > { %6084 = vmatpush1.bf16.msra.mxu1 %v15028_v3  ;;  %v15047_v3 = vld [vmem:[#allocation2 + $0xaf4] ss:$56 sps:$4 sm:$0xff]  }
 0x494   : > { %6155 = vmatprep.subr.bf16.mxu1 %v15029_v5  ;;  %v15048_v5 = vld [vmem:[#allocation2 + $0xaf0] ss:$56 sps:$4 sm:$0xff]  }
 0x496   : > { %6102 = vmatmul.mubr.bf16.vlgmr.msra.gmra.mrb[32].mxu1 %v15615_v14 }
 0x497   : > { %6156 = vmatpush1.bf16.msra.mxu1 %v15030_v9  ;;  %6187 = vmatprep.mubr.bf16.mxu1 %v16089_v0  ;;  %v15049_v9 = vld [vmem:[#allocation2 + $0xb64] ss:$56 sps:$4 sm:$0xff]  }
 0x498   : > { %6157 = vmatprep.subr.bf16.mxu1 %v15031_v8  ;;  %v15050_v8 = vld [vmem:[#allocation2 + $0xb60] ss:$56 sps:$4 sm:$0xff]  }
 0x49b   : > { %6158 = vmatpush1.bf16.msra.mxu1 %v15032_v23  ;;  %v15051_v23 = vld [vmem:[#allocation2 + $0xbd4] ss:$56 sps:$4 sm:$0xff]  }
 0x49c   : > { %6159 = vmatprep.subr.bf16.mxu1 %v15033_v29  ;;  %v15052_v29 = vld [vmem:[#allocation2 + $0xbd0] ss:$56 sps:$4 sm:$0xff]  }
 0x49f   : > { %6160 = vmatpush1.bf16.msra.mxu1 %v15034_v32  ;;  %v15053_v32 = vld [vmem:[#allocation2 + $0xc44] ss:$56 sps:$4 sm:$0xff]  }
 0x4a0   : > { %6161 = vmatprep.subr.bf16.mxu1 %v15035_v37  ;;  %v15054_v37 = vld [vmem:[#allocation2 + $0xc40] ss:$56 sps:$4 sm:$0xff]  }
 0x4a3   : > { %6162 = vmatpush1.bf16.msra.mxu1 %v15036_v34  ;;  %v15056_v34 = vld [vmem:[#allocation2 + $0xcb0] ss:$56 sps:$4 sm:$0xff]  }
 0x4a4   : > { %6163 = vmatprep.subr.bf16.mxu1 %v15037_v39  ;;  %v15057_v39 = vld [vmem:[#allocation2 + $0xd24] ss:$56 sps:$4 sm:$0xff]  }
 0x4a7   : > { %6164 = vmatpush1.bf16.msra.mxu1 %v15038_v17  ;;  %v15058_v17 = vld [vmem:[#allocation2 + $0xd20] ss:$56 sps:$4 sm:$0xff]  }
 0x4a8   : > { %6165 = vmatprep.subr.bf16.mxu1 %v15039_v40  ;;  %v15059_v40 = vld [vmem:[#allocation2 + $0xd94] ss:$56 sps:$4 sm:$0xff]  }
 0x4ab   : > { %6166 = vmatpush1.bf16.msra.mxu1 %v15040_v41  ;;  %v15060_v41 = vld [vmem:[#allocation2 + $0xd90] ss:$56 sps:$4 sm:$0xff]  }
 0x4ac   : > { %6167 = vmatprep.subr.bf16.mxu1 %v15041_v42  ;;  %v15061_v42 = vld [vmem:[#allocation2 + $0xa8c] ss:$56 sps:$4 sm:$0xff]  }
 0x4af   : > { %6168 = vmatpush1.bf16.msra.mxu1 %v15042_v43  ;;  %v15062_v43 = vld [vmem:[#allocation2 + $0xa88] ss:$56 sps:$4 sm:$0xff]  }
 0x4b0   : > { %6169 = vmatprep.subr.bf16.mxu1 %v15043_v48  ;;  %v15063_v48 = vld [vmem:[#allocation2 + $0xafc] ss:$56 sps:$4 sm:$0xff]  }
 0x4b3   : > { %6170 = vmatpush1.bf16.msra.mxu1 %v15044_v52  ;;  %v15064_v52 = vld [vmem:[#allocation2 + $0xaf8] ss:$56 sps:$4 sm:$0xff]  }
 0x4b4   : > { %6226 = vmatprep.subr.bf16.mxu1 %v15045_v60  ;;  %v15065_v60 = vld [vmem:[#allocation2 + $0xb6c] ss:$56 sps:$4 sm:$0xff]  }
 0x4b6   : > { %6188 = vmatmul.mubr.bf16.vlgmr.msra.gmra.mrb[36].mxu1 %v15615_v14  ;;  %v15055_v14 = vld [vmem:[#allocation2 + $0xcb4] ss:$56 sps:$4 sm:$0xff]  }
 0x4b7   : > { %6227 = vmatpush1.bf16.msra.mxu1 %v15046_v1  ;;  %6258 = vmatprep.mubr.bf16.mxu1 %v16089_v0  ;;  %v15066_v1 = vld [vmem:[#allocation2 + $0xb68] ss:$56 sps:$4 sm:$0xff]  }
 0x4b8   : > { %6228 = vmatprep.subr.bf16.mxu1 %v15047_v3  ;;  %v15067_v3 = vld [vmem:[#allocation2 + $0xbdc] ss:$56 sps:$4 sm:$0xff]  }
 0x4bb   : > { %6229 = vmatpush1.bf16.msra.mxu1 %v15048_v5  ;;  %v15068_v5 = vld [vmem:[#allocation2 + $0xbd8] ss:$56 sps:$4 sm:$0xff]  }
 0x4bc   : > { %6230 = vmatprep.subr.bf16.mxu1 %v15049_v9  ;;  %v15069_v9 = vld [vmem:[#allocation2 + $0xc4c] ss:$56 sps:$4 sm:$0xff]  }
 0x4bf   : > { %6231 = vmatpush1.bf16.msra.mxu1 %v15050_v8  ;;  %v15070_v8 = vld [vmem:[#allocation2 + $0xc48] ss:$56 sps:$4 sm:$0xff]  }
 0x4c0   : > { %6232 = vmatprep.subr.bf16.mxu1 %v15051_v23  ;;  %v15071_v23 = vld [vmem:[#allocation2 + $0xcbc] ss:$56 sps:$4 sm:$0xff]  }
 0x4c3   : > { %6233 = vmatpush1.bf16.msra.mxu1 %v15052_v29  ;;  %v15072_v29 = vld [vmem:[#allocation2 + $0xcb8] ss:$56 sps:$4 sm:$0xff]  }
 0x4c4   : > { %6234 = vmatprep.subr.bf16.mxu1 %v15053_v32  ;;  %v15073_v32 = vld [vmem:[#allocation2 + $0xd2c] ss:$56 sps:$4 sm:$0xff]  }
 0x4c7   : > { %6235 = vmatpush1.bf16.msra.mxu1 %v15054_v37  ;;  %v15074_v37 = vld [vmem:[#allocation2 + $0xd28] ss:$56 sps:$4 sm:$0xff]  }
 0x4c8   : > { %6236 = vmatprep.subr.bf16.mxu1 %v15055_v14  ;;  %v15075_v14 = vld [vmem:[#allocation2 + $0xd9c] ss:$56 sps:$4 sm:$0xff]  }
 0x4cb   : > { %6237 = vmatpush1.bf16.msra.mxu1 %v15056_v34  ;;  %v15076_v34 = vld [vmem:[#allocation2 + $0xd98] ss:$56 sps:$4 sm:$0xff]  }
 0x4cc   : > { %6238 = vmatprep.subr.bf16.mxu1 %v15057_v39  ;;  %v15077_v39 = vld [vmem:[#allocation2 + $0xa94] ss:$56 sps:$4 sm:$0xff]  }
 0x4cf   : > { %6239 = vmatpush1.bf16.msra.mxu1 %v15058_v17  ;;  %v15078_v17 = vld [vmem:[#allocation2 + $0xa90] ss:$56 sps:$4 sm:$0xff]  }
 0x4d0   : > { %6240 = vmatprep.subr.bf16.mxu1 %v15059_v40  ;;  %v15079_v40 = vld [vmem:[#allocation2 + $0xb04] ss:$56 sps:$4 sm:$0xff]  }
 0x4d3   : > { %6241 = vmatpush1.bf16.msra.mxu1 %v15060_v41  ;;  %v15080_v41 = vld [vmem:[#allocation2 + $0xb00] ss:$56 sps:$4 sm:$0xff]  }
 0x4d4   : > { %6269 = vmatprep.subr.bf16.mxu1 %v15061_v42  ;;  %v15081_v42 = vld [vmem:[#allocation2 + $0xb74] ss:$56 sps:$4 sm:$0xff]  }
 0x4d6   : > { %6259 = vmatmul.mubr.bf16.vlgmr.msra.gmra.mrb[16].mxu1 %v15631_v62 }
 0x4d7   : > { %6270 = vmatpush1.bf16.msra.mxu1 %v15062_v43  ;;  %6301 = vmatprep.mubr.bf16.mxu1 %v16089_v0  ;;  %v15082_v43 = vld [vmem:[#allocation2 + $0xb70] ss:$56 sps:$4 sm:$0xff]  }
 0x4d8   : > { %6271 = vmatprep.subr.bf16.mxu1 %v15063_v48  ;;  %v15083_v48 = vld [vmem:[#allocation2 + $0xbe4] ss:$56 sps:$4 sm:$0xff]  }
 0x4db   : > { %6272 = vmatpush1.bf16.msra.mxu1 %v15064_v52  ;;  %v15084_v52 = vld [vmem:[#allocation2 + $0xbe0] ss:$56 sps:$4 sm:$0xff]  }
 0x4dc   : > { %6273 = vmatprep.subr.bf16.mxu1 %v15065_v60  ;;  %v15085_v60 = vld [vmem:[#allocation2 + $0xc54] ss:$56 sps:$4 sm:$0xff]  }
 0x4df   : > { %6274 = vmatpush1.bf16.msra.mxu1 %v15066_v1  ;;  %v15086_v1 = vld [vmem:[#allocation2 + $0xc50] ss:$56 sps:$4 sm:$0xff]  }
 0x4e0   : > { %6275 = vmatprep.subr.bf16.mxu1 %v15067_v3  ;;  %v15087_v3 = vld [vmem:[#allocation2 + $0xcc4] ss:$56 sps:$4 sm:$0xff]  }
 0x4e3   : > { %6276 = vmatpush1.bf16.msra.mxu1 %v15068_v5  ;;  %v15088_v5 = vld [vmem:[#allocation2 + $0xcc0] ss:$56 sps:$4 sm:$0xff]  }
 0x4e4   : > { %6277 = vmatprep.subr.bf16.mxu1 %v15069_v9  ;;  %v15089_v9 = vld [vmem:[#allocation2 + $0xd34] ss:$56 sps:$4 sm:$0xff]  }
 0x4e7   : > { %6278 = vmatpush1.bf16.msra.mxu1 %v15070_v8  ;;  %v15090_v8 = vld [vmem:[#allocation2 + $0xd30] ss:$56 sps:$4 sm:$0xff]  }
 0x4e8   : > { %6279 = vmatprep.subr.bf16.mxu1 %v15071_v23  ;;  %v15091_v23 = vld [vmem:[#allocation2 + $0xda4] ss:$56 sps:$4 sm:$0xff]  }
 0x4eb   : > { %6280 = vmatpush1.bf16.msra.mxu1 %v15072_v29  ;;  %v12064_v29 = vld [vmem:[%s15548_s14 + $0x8] sm:$0xe] }
 0x4ec   : > { %6281 = vmatprep.subr.bf16.mxu1 %v15073_v32  ;;  %v15092_v32 = vld [vmem:[%s15548_s14 + $0xc] sm:$0xf] }
 0x4ef   : > { %6282 = vmatpush1.bf16.msra.mxu1 %v15074_v37  ;;  %v12065_v37 = vcombine.low %v12064_v29, %v15092_v32  ;;  %v15109_v29 = vld [vmem:[#allocation2 + $0xda8] ss:$56 sps:$4 sm:$0xff]   ;;  %v15110_v32 = vld [vmem:[#allocation2 + $0xaa4] ss:$56 sps:$4 sm:$0xff]  }
 0x4f0   : > { %6283 = vmatprep.subr.bf16.mxu1 %v15075_v14  ;;  %v15093_v14 = vld [vmem:[#allocation2 + $0xda0] ss:$56 sps:$4 sm:$0xff]  }
 0x4f3   : > { %6284 = vmatpush1.bf16.msra.mxu1 %v15076_v34  ;;  %v15094_v34 = vld [vmem:[#allocation2 + $0xa9c] ss:$56 sps:$4 sm:$0xff]  }
 0x4f4   : > { %6312 = vmatprep.subr.bf16.mxu1 %v15077_v39  ;;  %v15789_v39 = vrot.slane %v12065_v37, 1  ;;  %v15111_v37 = vld [vmem:[#allocation2 + $0xaa0] ss:$56 sps:$4 sm:$0xff]  }
 0x4f6   : > { %6302 = vmatmul.mubr.bf16.vlgmr.msra.gmra.mrb[20].mxu1 %v15631_v62  ;;  %6809 = vmatmul.mubr.bf16.vlgmr.msra.gmra.mrb[16].mxu0 %v15789_v39 }
 0x4f7   : > { %6313 = vmatpush1.bf16.msra.mxu1 %v15078_v17  ;;  %6344 = vmatprep.mubr.bf16.mxu1 %v16089_v0  ;;  %v15095_v17 = vld [vmem:[#allocation2 + $0xa98] ss:$56 sps:$4 sm:$0xff]  }
 0x4f8   : > { %6314 = vmatprep.subr.bf16.mxu1 %v15079_v40  ;;  %v15096_v40 = vld [vmem:[#allocation2 + $0xb0c] ss:$56 sps:$4 sm:$0xff]   ;;  %7992 = vmatprep.mubr.bf16.mxu0 %v16089_v0 }
 0x4fb   : > { %6315 = vmatpush1.bf16.msra.mxu1 %v15080_v41  ;;  %v15097_v41 = vld [vmem:[#allocation2 + $0xb08] ss:$56 sps:$4 sm:$0xff]  }
 0x4fc   : > { %6316 = vmatprep.subr.bf16.mxu1 %v15081_v42  ;;  %v15098_v42 = vld [vmem:[#allocation2 + $0xb7c] ss:$56 sps:$4 sm:$0xff]  }
 0x4ff   : > { %6317 = vmatpush1.bf16.msra.mxu1 %v15082_v43  ;;  %v15099_v43 = vld [vmem:[#allocation2 + $0xb78] ss:$56 sps:$4 sm:$0xff]  }
 0x500   : > { %6318 = vmatprep.subr.bf16.mxu1 %v15083_v48  ;;  %v15100_v48 = vld [vmem:[#allocation2 + $0xbec] ss:$56 sps:$4 sm:$0xff]  }
 0x503   : > { %6319 = vmatpush1.bf16.msra.mxu1 %v15084_v52  ;;  %v15101_v52 = vld [vmem:[#allocation2 + $0xbe8] ss:$56 sps:$4 sm:$0xff]  }
 0x504   : > { %6320 = vmatprep.subr.bf16.mxu1 %v15085_v60  ;;  %v15102_v60 = vld [vmem:[#allocation2 + $0xc5c] ss:$56 sps:$4 sm:$0xff]  }
 0x507   : > { %6321 = vmatpush1.bf16.msra.mxu1 %v15086_v1  ;;  %v15103_v1 = vld [vmem:[#allocation2 + $0xc58] ss:$56 sps:$4 sm:$0xff]  }
 0x508   : > { %6322 = vmatprep.subr.bf16.mxu1 %v15087_v3  ;;  %v15104_v3 = vld [vmem:[#allocation2 + $0xccc] ss:$56 sps:$4 sm:$0xff]  }
 0x50b   : > { %6323 = vmatpush1.bf16.msra.mxu1 %v15088_v5  ;;  %v15105_v5 = vld [vmem:[#allocation2 + $0xcc8] ss:$56 sps:$4 sm:$0xff]  }
 0x50c   : > { %6324 = vmatprep.subr.bf16.mxu1 %v15089_v9  ;;  %v15106_v9 = vld [vmem:[#allocation2 + $0xd3c] ss:$56 sps:$4 sm:$0xff]  }
 0x50f   : > { %6325 = vmatpush1.bf16.msra.mxu1 %v15090_v8  ;;  %v15107_v8 = vld [vmem:[#allocation2 + $0xd38] ss:$56 sps:$4 sm:$0xff]  }
 0x510   : > { %6326 = vmatprep.subr.bf16.mxu1 %v15091_v23  ;;  %v15108_v23 = vld [vmem:[#allocation2 + $0xdac] ss:$56 sps:$4 sm:$0xff]  }
 0x513   : > { %6327 = vmatpush1.bf16.msra.mxu1 %v15093_v14  ;;  %v15112_v14 = vld [vmem:[#allocation2 + $0xb14] ss:$56 sps:$4 sm:$0xff]  }
 0x514   : > { %6355 = vmatprep.subr.bf16.mxu1 %v15094_v34  ;;  %v15113_v34 = vld [vmem:[#allocation2 + $0xb10] ss:$56 sps:$4 sm:$0xff]  }
 0x516   : > { %6345 = vmatmul.mubr.bf16.vlgmr.msra.gmra.mrb[24].mxu1 %v15631_v62 }
 0x517   : > { %6356 = vmatpush1.bf16.msra.mxu1 %v15095_v17  ;;  %6387 = vmatprep.mubr.bf16.mxu1 %v16089_v0  ;;  %v15114_v17 = vld [vmem:[#allocation2 + $0xb84] ss:$56 sps:$4 sm:$0xff]  }
 0x518   : > { %6357 = vmatprep.subr.bf16.mxu1 %v15096_v40  ;;  %v15115_v40 = vld [vmem:[#allocation2 + $0xb80] ss:$56 sps:$4 sm:$0xff]  }
 0x51b   : > { %6358 = vmatpush1.bf16.msra.mxu1 %v15097_v41  ;;  %v15116_v41 = vld [vmem:[#allocation2 + $0xbf4] ss:$56 sps:$4 sm:$0xff]  }
 0x51c   : > { %6359 = vmatprep.subr.bf16.mxu1 %v15098_v42  ;;  %v15117_v42 = vld [vmem:[#allocation2 + $0xbf0] ss:$56 sps:$4 sm:$0xff]  }
 0x51f   : > { %6360 = vmatpush1.bf16.msra.mxu1 %v15099_v43  ;;  %v15118_v43 = vld [vmem:[#allocation2 + $0xc64] ss:$56 sps:$4 sm:$0xff]  }
 0x520   : > { %6361 = vmatprep.subr.bf16.mxu1 %v15100_v48  ;;  %v15119_v48 = vld [vmem:[#allocation2 + $0xc60] ss:$56 sps:$4 sm:$0xff]  }
 0x523   : > { %6362 = vmatpush1.bf16.msra.mxu1 %v15101_v52  ;;  %v15120_v52 = vld [vmem:[#allocation2 + $0xcd4] ss:$56 sps:$4 sm:$0xff]  }
 0x524   : > { %6363 = vmatprep.subr.bf16.mxu1 %v15102_v60  ;;  %v15121_v60 = vld [vmem:[#allocation2 + $0xcd0] ss:$56 sps:$4 sm:$0xff]  }
 0x527   : > { %6364 = vmatpush1.bf16.msra.mxu1 %v15103_v1  ;;  %v15122_v1 = vld [vmem:[#allocation2 + $0xd44] ss:$56 sps:$4 sm:$0xff]  }
 0x528   : > { %6365 = vmatprep.subr.bf16.mxu1 %v15104_v3  ;;  %v15123_v3 = vld [vmem:[#allocation2 + $0xd40] ss:$56 sps:$4 sm:$0xff]  }
 0x52b   : > { %6366 = vmatpush1.bf16.msra.mxu1 %v15105_v5  ;;  %v15124_v5 = vld [vmem:[#allocation2 + $0xdb4] ss:$56 sps:$4 sm:$0xff]  }
 0x52c   : > { %6367 = vmatprep.subr.bf16.mxu1 %v15106_v9  ;;  %v15125_v9 = vld [vmem:[#allocation2 + $0xdb0] ss:$56 sps:$4 sm:$0xff]  }
 0x52f   : > { %6368 = vmatpush1.bf16.msra.mxu1 %v15107_v8  ;;  %v15126_v8 = vld [vmem:[#allocation2 + $0xab4] ss:$56 sps:$4 sm:$0xff]  }
 0x530   : > { %6369 = vmatprep.subr.bf16.mxu1 %v15108_v23  ;;  %v15127_v23 = vld [vmem:[#allocation2 + $0xab0] ss:$56 sps:$4 sm:$0xff]  }
 0x533   : > { %6370 = vmatpush1.bf16.msra.mxu1 %v15109_v29  ;;  %v15128_v29 = vld [vmem:[#allocation2 + $0xb24] ss:$56 sps:$4 sm:$0xff]  }
 0x534   : > { %6398 = vmatprep.subr.bf16.mxu1 %v15110_v32  ;;  %v15129_v32 = vld [vmem:[#allocation2 + $0xb20] ss:$56 sps:$4 sm:$0xff]  }
 0x536   : > { %6388 = vmatmul.mubr.bf16.vlgmr.msra.gmra.mrb[28].mxu1 %v15631_v62 }
 0x537   : > { %6399 = vmatpush1.bf16.msra.mxu1 %v15111_v37  ;;  %6430 = vmatprep.mubr.bf16.mxu1 %v16089_v0  ;;  %v15130_v37 = vld [vmem:[#allocation2 + $0xb94] ss:$56 sps:$4 sm:$0xff]  }
 0x538   : > { %6400 = vmatprep.subr.bf16.mxu1 %v15112_v14  ;;  %v15131_v14 = vld [vmem:[#allocation2 + $0xb90] ss:$56 sps:$4 sm:$0xff]  }
 0x53b   : > { %6401 = vmatpush1.bf16.msra.mxu1 %v15113_v34  ;;  %v15132_v34 = vld [vmem:[#allocation2 + $0xc04] ss:$56 sps:$4 sm:$0xff]  }
 0x53c   : > { %6402 = vmatprep.subr.bf16.mxu1 %v15114_v17  ;;  %v15133_v17 = vld [vmem:[#allocation2 + $0xc00] ss:$56 sps:$4 sm:$0xff]  }
 0x53f   : > { %6403 = vmatpush1.bf16.msra.mxu1 %v15115_v40  ;;  %v15134_v40 = vld [vmem:[#allocation2 + $0xc74] ss:$56 sps:$4 sm:$0xff]  }
 0x540   : > { %6404 = vmatprep.subr.bf16.mxu1 %v15116_v41  ;;  %v15135_v41 = vld [vmem:[#allocation2 + $0xc70] ss:$56 sps:$4 sm:$0xff]  }
 0x543   : > { %6405 = vmatpush1.bf16.msra.mxu1 %v15117_v42  ;;  %v15136_v42 = vld [vmem:[#allocation2 + $0xce4] ss:$56 sps:$4 sm:$0xff]  }
 0x544   : > { %6406 = vmatprep.subr.bf16.mxu1 %v15118_v43  ;;  %v15137_v43 = vld [vmem:[#allocation2 + $0xce0] ss:$56 sps:$4 sm:$0xff]  }
 0x547   : > { %6407 = vmatpush1.bf16.msra.mxu1 %v15119_v48  ;;  %v15138_v48 = vld [vmem:[#allocation2 + $0xd54] ss:$56 sps:$4 sm:$0xff]  }
 0x548   : > { %6408 = vmatprep.subr.bf16.mxu1 %v15120_v52  ;;  %v15139_v52 = vld [vmem:[#allocation2 + $0xd50] ss:$56 sps:$4 sm:$0xff]  }
 0x54b   : > { %6409 = vmatpush1.bf16.msra.mxu1 %v15121_v60  ;;  %v15140_v60 = vld [vmem:[#allocation2 + $0xdc4] ss:$56 sps:$4 sm:$0xff]  }
 0x54c   : > { %6410 = vmatprep.subr.bf16.mxu1 %v15122_v1  ;;  %v15141_v1 = vld [vmem:[#allocation2 + $0xdc0] ss:$56 sps:$4 sm:$0xff]  }
 0x54f   : > { %6411 = vmatpush1.bf16.msra.mxu1 %v15123_v3  ;;  %v15142_v3 = vld [vmem:[#allocation2 + $0xe04] ss:$56 sps:$4 sm:$0xff]  }
 0x550   : > { %6412 = vmatprep.subr.bf16.mxu1 %v15124_v5  ;;  %v15143_v5 = vld [vmem:[#allocation2 + $0xe00] ss:$56 sps:$4 sm:$0xff]  }
 0x553   : > { %6413 = vmatpush1.bf16.msra.mxu1 %v15125_v9  ;;  %v15144_v9 = vld [vmem:[#allocation2 + $0xe74] ss:$56 sps:$4 sm:$0xff]  }
 0x554   : > { %6484 = vmatprep.subr.bf16.mxu1 %v15126_v8  ;;  %v15145_v8 = vld [vmem:[#allocation2 + $0xe70] ss:$56 sps:$4 sm:$0xff]  }
 0x556   : > { %6431 = vmatmul.mubr.bf16.vlgmr.msra.gmra.mrb[32].mxu1 %v15631_v62 }
 0x557   : > { %6485 = vmatpush1.bf16.msra.mxu1 %v15127_v23  ;;  %6516 = vmatprep.mubr.bf16.mxu1 %v16089_v0  ;;  %v15146_v23 = vld [vmem:[#allocation2 + $0xee4] ss:$56 sps:$4 sm:$0xff]  }
 0x558   : > { %6486 = vmatprep.subr.bf16.mxu1 %v15128_v29  ;;  %v15147_v29 = vld [vmem:[#allocation2 + $0xee0] ss:$56 sps:$4 sm:$0xff]  }
 0x55b   : > { %6487 = vmatpush1.bf16.msra.mxu1 %v15129_v32  ;;  %v15148_v32 = vld [vmem:[#allocation2 + $0xf54] ss:$56 sps:$4 sm:$0xff]  }
 0x55c   : > { %6488 = vmatprep.subr.bf16.mxu1 %v15130_v37  ;;  %v15149_v37 = vld [vmem:[#allocation2 + $0xf50] ss:$56 sps:$4 sm:$0xff]  }
 0x55f   : > { %6489 = vmatpush1.bf16.msra.mxu1 %v15131_v14  ;;  %v15150_v14 = vld [vmem:[#allocation2 + $0xfc4] ss:$56 sps:$4 sm:$0xff]  }
 0x560   : > { %6490 = vmatprep.subr.bf16.mxu1 %v15132_v34  ;;  %v15151_v34 = vld [vmem:[#allocation2 + $0xfc0] ss:$56 sps:$4 sm:$0xff]  }
 0x563   : > { %6491 = vmatpush1.bf16.msra.mxu1 %v15133_v17  ;;  %v15153_v17 = vld [vmem:[#allocation2 + $0x1030] ss:$56 sps:$4 sm:$0xff]  }
 0x564   : > { %6492 = vmatprep.subr.bf16.mxu1 %v15134_v40  ;;  %v15154_v40 = vld [vmem:[#allocation2 + $0x10a4] ss:$56 sps:$4 sm:$0xff]  }
 0x567   : > { %6493 = vmatpush1.bf16.msra.mxu1 %v15135_v41  ;;  %v15155_v41 = vld [vmem:[#allocation2 + $0x10a0] ss:$56 sps:$4 sm:$0xff]  }
 0x568   : > { %6494 = vmatprep.subr.bf16.mxu1 %v15136_v42  ;;  %v15156_v42 = vld [vmem:[#allocation2 + $0x1114] ss:$56 sps:$4 sm:$0xff]  }
 0x56b   : > { %6495 = vmatpush1.bf16.msra.mxu1 %v15137_v43  ;;  %v15157_v43 = vld [vmem:[#allocation2 + $0x1110] ss:$56 sps:$4 sm:$0xff]  }
 0x56c   : > { %6496 = vmatprep.subr.bf16.mxu1 %v15138_v48  ;;  %v15158_v48 = vld [vmem:[#allocation2 + $0xe0c] ss:$56 sps:$4 sm:$0xff]  }
 0x56f   : > { %6497 = vmatpush1.bf16.msra.mxu1 %v15139_v52  ;;  %v15159_v52 = vld [vmem:[#allocation2 + $0xe08] ss:$56 sps:$4 sm:$0xff]  }
 0x570   : > { %6498 = vmatprep.subr.bf16.mxu1 %v15140_v60  ;;  %v15160_v60 = vld [vmem:[#allocation2 + $0xe7c] ss:$56 sps:$4 sm:$0xff]  }
 0x573   : > { %6499 = vmatpush1.bf16.msra.mxu1 %v15141_v1  ;;  %v15161_v1 = vld [vmem:[#allocation2 + $0xe78] ss:$56 sps:$4 sm:$0xff]  }
 0x574   : > { %6561 = vmatprep.subr.bf16.mxu1 %v15142_v3  ;;  %v15162_v3 = vld [vmem:[#allocation2 + $0xeec] ss:$56 sps:$4 sm:$0xff]  }
 0x576   : > { %6517 = vmatmul.mubr.bf16.vlgmr.msra.gmra.mrb[36].mxu1 %v15631_v62  ;;  %v15152_v62 = vld [vmem:[#allocation2 + $0x1034] ss:$56 sps:$4 sm:$0xff]  }
 0x577   : > { %6562 = vmatpush1.bf16.msra.mxu1 %v15143_v5  ;;  %6593 = vmatprep.mubr.bf16.mxu1 %v16089_v0  ;;  %v15163_v5 = vld [vmem:[#allocation2 + $0xee8] ss:$56 sps:$4 sm:$0xff]  }
 0x578   : > { %6563 = vmatprep.subr.bf16.mxu1 %v15144_v9  ;;  %v15164_v9 = vld [vmem:[#allocation2 + $0xf5c] ss:$56 sps:$4 sm:$0xff]  }
 0x57b   : > { %6564 = vmatpush1.bf16.msra.mxu1 %v15145_v8  ;;  %v15165_v8 = vld [vmem:[#allocation2 + $0xf58] ss:$56 sps:$4 sm:$0xff]  }
 0x57c   : > { %6565 = vmatprep.subr.bf16.mxu1 %v15146_v23  ;;  %v15166_v23 = vld [vmem:[#allocation2 + $0xfcc] ss:$56 sps:$4 sm:$0xff]  }
 0x57f   : > { %6566 = vmatpush1.bf16.msra.mxu1 %v15147_v29  ;;  %v15167_v29 = vld [vmem:[#allocation2 + $0xfc8] ss:$56 sps:$4 sm:$0xff]  }
 0x580   : > { %6567 = vmatprep.subr.bf16.mxu1 %v15148_v32  ;;  %v15168_v32 = vld [vmem:[#allocation2 + $0x103c] ss:$56 sps:$4 sm:$0xff]  }
 0x583   : > { %6568 = vmatpush1.bf16.msra.mxu1 %v15149_v37  ;;  %v15169_v37 = vld [vmem:[#allocation2 + $0x1038] ss:$56 sps:$4 sm:$0xff]  }
 0x584   : > { %6569 = vmatprep.subr.bf16.mxu1 %v15150_v14  ;;  %v15170_v14 = vld [vmem:[#allocation2 + $0x10ac] ss:$56 sps:$4 sm:$0xff]  }
 0x587   : > { %6570 = vmatpush1.bf16.msra.mxu1 %v15151_v34  ;;  %v15171_v34 = vld [vmem:[#allocation2 + $0x10a8] ss:$56 sps:$4 sm:$0xff]  }
 0x588   : > { %6571 = vmatprep.subr.bf16.mxu1 %v15152_v62  ;;  %v15172_v62 = vld [vmem:[#allocation2 + $0x111c] ss:$56 sps:$4 sm:$0xff]  }
 0x58b   : > { %6572 = vmatpush1.bf16.msra.mxu1 %v15153_v17  ;;  %v15173_v17 = vld [vmem:[#allocation2 + $0x1118] ss:$56 sps:$4 sm:$0xff]  }
 0x58c   : > { %6573 = vmatprep.subr.bf16.mxu1 %v15154_v40  ;;  %v15174_v40 = vld [vmem:[#allocation2 + $0xe14] ss:$56 sps:$4 sm:$0xff]  }
 0x58f   : > { %6574 = vmatpush1.bf16.msra.mxu1 %v15155_v41  ;;  %v15175_v41 = vld [vmem:[#allocation2 + $0xe10] ss:$56 sps:$4 sm:$0xff]  }
 0x590   : > { %6575 = vmatprep.subr.bf16.mxu1 %v15156_v42  ;;  %v15176_v42 = vld [vmem:[#allocation2 + $0xe84] ss:$56 sps:$4 sm:$0xff]  }
 0x593   : > { %6576 = vmatpush1.bf16.msra.mxu1 %v15157_v43  ;;  %v15177_v43 = vld [vmem:[#allocation2 + $0xe80] ss:$56 sps:$4 sm:$0xff]  }
 0x594   : > { %6604 = vmatprep.subr.bf16.mxu1 %v15158_v48  ;;  %v15178_v48 = vld [vmem:[#allocation2 + $0xef4] ss:$56 sps:$4 sm:$0xff]  }
 0x596   : > { %6594 = vmatmul.mubr.bf16.vlgmr.msra.gmra.mrb[16].mxu1 %v15789_v39 }
 0x597   : > { %6605 = vmatpush1.bf16.msra.mxu1 %v15159_v52  ;;  %6636 = vmatprep.mubr.bf16.mxu1 %v16089_v0  ;;  %v15179_v52 = vld [vmem:[#allocation2 + $0xef0] ss:$56 sps:$4 sm:$0xff]  }
 0x598   : > { %6606 = vmatprep.subr.bf16.mxu1 %v15160_v60  ;;  %v15180_v60 = vld [vmem:[#allocation2 + $0xf64] ss:$56 sps:$4 sm:$0xff]  }
 0x59b   : > { %6607 = vmatpush1.bf16.msra.mxu1 %v15161_v1  ;;  %v15181_v1 = vld [vmem:[#allocation2 + $0xf60] ss:$56 sps:$4 sm:$0xff]  }
 0x59c   : > { %6608 = vmatprep.subr.bf16.mxu1 %v15162_v3  ;;  %v15182_v3 = vld [vmem:[#allocation2 + $0xfd4] ss:$56 sps:$4 sm:$0xff]  }
 0x59f   : > { %6609 = vmatpush1.bf16.msra.mxu1 %v15163_v5  ;;  %v15183_v5 = vld [vmem:[#allocation2 + $0xfd0] ss:$56 sps:$4 sm:$0xff]  }
 0x5a0   : > { %6610 = vmatprep.subr.bf16.mxu1 %v15164_v9  ;;  %v15184_v9 = vld [vmem:[#allocation2 + $0x1044] ss:$56 sps:$4 sm:$0xff]  }
 0x5a3   : > { %6611 = vmatpush1.bf16.msra.mxu1 %v15165_v8  ;;  %v15185_v8 = vld [vmem:[#allocation2 + $0x1040] ss:$56 sps:$4 sm:$0xff]  }
 0x5a4   : > { %6612 = vmatprep.subr.bf16.mxu1 %v15166_v23  ;;  %v15186_v23 = vld [vmem:[#allocation2 + $0x10b4] ss:$56 sps:$4 sm:$0xff]  }
 0x5a7   : > { %6613 = vmatpush1.bf16.msra.mxu1 %v15167_v29  ;;  %v15187_v29 = vld [vmem:[#allocation2 + $0x10b0] ss:$56 sps:$4 sm:$0xff]  }
 0x5a8   : > { %6614 = vmatprep.subr.bf16.mxu1 %v15168_v32  ;;  %v15188_v32 = vld [vmem:[#allocation2 + $0x1124] ss:$56 sps:$4 sm:$0xff]  }
 0x5ab   : > { %6615 = vmatpush1.bf16.msra.mxu1 %v15169_v37  ;;  %v15189_v37 = vld [vmem:[#allocation2 + $0x1120] ss:$56 sps:$4 sm:$0xff]  }
 0x5ac   : > { %6616 = vmatprep.subr.bf16.mxu1 %v15170_v14  ;;  %v15190_v14 = vld [vmem:[#allocation2 + $0xe1c] ss:$56 sps:$4 sm:$0xff]  }
 0x5af   : > { %6617 = vmatpush1.bf16.msra.mxu1 %v15171_v34  ;;  %v15191_v34 = vld [vmem:[#allocation2 + $0xe18] ss:$56 sps:$4 sm:$0xff]  }
 0x5b0   : > { %6618 = vmatprep.subr.bf16.mxu1 %v15172_v62  ;;  %v15192_v62 = vld [vmem:[#allocation2 + $0xe8c] ss:$56 sps:$4 sm:$0xff]  }
 0x5b3   : > { %6619 = vmatpush1.bf16.msra.mxu1 %v15173_v17  ;;  %v15193_v17 = vld [vmem:[#allocation2 + $0xe88] ss:$56 sps:$4 sm:$0xff]  }
 0x5b4   : > { %6647 = vmatprep.subr.bf16.mxu1 %v15174_v40  ;;  %v15194_v40 = vld [vmem:[#allocation2 + $0xefc] ss:$56 sps:$4 sm:$0xff]  }
 0x5b6   : > { %6637 = vmatmul.mubr.bf16.vlgmr.msra.gmra.mrb[20].mxu1 %v15789_v39 }
 0x5b7   : > { %6648 = vmatpush1.bf16.msra.mxu1 %v15175_v41  ;;  %6679 = vmatprep.mubr.bf16.mxu1 %v16089_v0  ;;  %v15195_v41 = vld [vmem:[#allocation2 + $0xef8] ss:$56 sps:$4 sm:$0xff]  }
 0x5b8   : > { %6649 = vmatprep.subr.bf16.mxu1 %v15176_v42  ;;  %v15196_v42 = vld [vmem:[#allocation2 + $0xf6c] ss:$56 sps:$4 sm:$0xff]  }
 0x5bb   : > { %6650 = vmatpush1.bf16.msra.mxu1 %v15177_v43  ;;  %v15197_v43 = vld [vmem:[#allocation2 + $0xf68] ss:$56 sps:$4 sm:$0xff]  }
 0x5bc   : > { %6651 = vmatprep.subr.bf16.mxu1 %v15178_v48  ;;  %v15198_v48 = vld [vmem:[#allocation2 + $0xfdc] ss:$56 sps:$4 sm:$0xff]  }
 0x5bf   : > { %6652 = vmatpush1.bf16.msra.mxu1 %v15179_v52  ;;  %v15199_v52 = vld [vmem:[#allocation2 + $0xfd8] ss:$56 sps:$4 sm:$0xff]  }
 0x5c0   : > { %6653 = vmatprep.subr.bf16.mxu1 %v15180_v60  ;;  %v15200_v60 = vld [vmem:[#allocation2 + $0x104c] ss:$56 sps:$4 sm:$0xff]  }
 0x5c3   : > { %6654 = vmatpush1.bf16.msra.mxu1 %v15181_v1  ;;  %v15201_v1 = vld [vmem:[#allocation2 + $0x1048] ss:$56 sps:$4 sm:$0xff]  }
 0x5c4   : > { %6655 = vmatprep.subr.bf16.mxu1 %v15182_v3  ;;  %v15202_v3 = vld [vmem:[#allocation2 + $0x10bc] ss:$56 sps:$4 sm:$0xff]  }
 0x5c7   : > { %6656 = vmatpush1.bf16.msra.mxu1 %v15183_v5  ;;  %v15203_v5 = vld [vmem:[#allocation2 + $0x10b8] ss:$56 sps:$4 sm:$0xff]  }
 0x5c8   : > { %6657 = vmatprep.subr.bf16.mxu1 %v15184_v9  ;;  %v15204_v9 = vld [vmem:[#allocation2 + $0x112c] ss:$56 sps:$4 sm:$0xff]  }
 0x5cb   : > { %6658 = vmatpush1.bf16.msra.mxu1 %v15185_v8  ;;  %v15205_v8 = vld [vmem:[#allocation2 + $0x1128] ss:$56 sps:$4 sm:$0xff]  }
 0x5cc   : > { %6659 = vmatprep.subr.bf16.mxu1 %v15186_v23  ;;  %v15206_v23 = vld [vmem:[#allocation2 + $0xe24] ss:$56 sps:$4 sm:$0xff]  }
 0x5cf   : > { %6660 = vmatpush1.bf16.msra.mxu1 %v15187_v29  ;;  %v15207_v29 = vld [vmem:[#allocation2 + $0xe20] ss:$56 sps:$4 sm:$0xff]  }
 0x5d0   : > { %6661 = vmatprep.subr.bf16.mxu1 %v15188_v32  ;;  %v15208_v32 = vld [vmem:[#allocation2 + $0xe94] ss:$56 sps:$4 sm:$0xff]  }
 0x5d3   : > { %6662 = vmatpush1.bf16.msra.mxu1 %v15189_v37  ;;  %v15209_v37 = vld [vmem:[#allocation2 + $0xe90] ss:$56 sps:$4 sm:$0xff]  }
 0x5d4   : > { %6690 = vmatprep.subr.bf16.mxu1 %v15190_v14  ;;  %v15210_v14 = vld [vmem:[#allocation2 + $0xf04] ss:$56 sps:$4 sm:$0xff]  }
 0x5d6   : > { %6680 = vmatmul.mubr.bf16.vlgmr.msra.gmra.mrb[24].mxu1 %v15789_v39 }
 0x5d7   : > { %6691 = vmatpush1.bf16.msra.mxu1 %v15191_v34  ;;  %6722 = vmatprep.mubr.bf16.mxu1 %v16089_v0  ;;  %v15211_v34 = vld [vmem:[#allocation2 + $0xf00] ss:$56 sps:$4 sm:$0xff]  }
 0x5d8   : > { %6692 = vmatprep.subr.bf16.mxu1 %v15192_v62  ;;  %v15212_v62 = vld [vmem:[#allocation2 + $0xf74] ss:$56 sps:$4 sm:$0xff]  }
 0x5db   : > { %6693 = vmatpush1.bf16.msra.mxu1 %v15193_v17  ;;  %v15213_v17 = vld [vmem:[#allocation2 + $0xf70] ss:$56 sps:$4 sm:$0xff]  }
 0x5dc   : > { %6694 = vmatprep.subr.bf16.mxu1 %v15194_v40  ;;  %v15214_v40 = vld [vmem:[#allocation2 + $0xfe4] ss:$56 sps:$4 sm:$0xff]  }
 0x5df   : > { %6695 = vmatpush1.bf16.msra.mxu1 %v15195_v41  ;;  %v15215_v41 = vld [vmem:[#allocation2 + $0xfe0] ss:$56 sps:$4 sm:$0xff]  }
 0x5e0   : > { %6696 = vmatprep.subr.bf16.mxu1 %v15196_v42  ;;  %v15216_v42 = vld [vmem:[#allocation2 + $0x1054] ss:$56 sps:$4 sm:$0xff]  }
 0x5e3   : > { %6697 = vmatpush1.bf16.msra.mxu1 %v15197_v43  ;;  %v15809_v43 = vpop.f32.mrb[16].mxu0 }
 0x5e4   : > { %6698 = vmatprep.subr.bf16.mxu1 %v15198_v48  ;;  %v15217_v48 = vld [vmem:[#allocation2 + $0x1050] ss:$56 sps:$4 sm:$0xff]  }
 0x5e7   : > { %6699 = vmatpush1.bf16.msra.mxu1 %v15199_v52  ;;  %v15811_v52 = vpop.f32.mrb[17].mxu0 }
 0x5e8   : > { %6700 = vmatprep.subr.bf16.mxu1 %v15200_v60  ;;  %v15218_v60 = vld [vmem:[#allocation2 + $0x10c4] ss:$56 sps:$4 sm:$0xff]  }
 0x5eb   : > { %6701 = vmatpush1.bf16.msra.mxu1 %v15201_v1  ;;  %v15813_v1 = vpop.f32.mrb[18].mxu0 }
 0x5ec   : > { %6702 = vmatprep.subr.bf16.mxu1 %v15202_v3  ;;  %v15219_v3 = vld [vmem:[#allocation2 + $0x10c0] ss:$56 sps:$4 sm:$0xff]  }
 0x5ef   : > { %6703 = vmatpush1.bf16.msra.mxu1 %v15203_v5  ;;  %v15220_v5 = vld [vmem:[#allocation2 + $0x1134] ss:$56 sps:$4 sm:$0xff]  }
 0x5f0   : > { %6704 = vmatprep.subr.bf16.mxu1 %v15204_v9  ;;  %v15221_v9 = vld [vmem:[#allocation2 + $0x1130] ss:$56 sps:$4 sm:$0xff]  }
 0x5f3   : > { %6705 = vmatpush1.bf16.msra.mxu1 %v15205_v8  ;;  %v15222_v8 = vld [vmem:[#allocation2 + $0xe34] ss:$56 sps:$4 sm:$0xff]  }
 0x5f4   : > { %6733 = vmatprep.subr.bf16.mxu1 %v15206_v23  ;;  %v15223_v23 = vld [vmem:[#allocation2 + $0xe30] ss:$56 sps:$4 sm:$0xff]  }
 0x5f6   : > { %6723 = vmatmul.mubr.bf16.vlgmr.msra.gmra.mrb[28].mxu1 %v15789_v39 }
 0x5f7   : > { %6734 = vmatpush1.bf16.msra.mxu1 %v15207_v29  ;;  %6765 = vmatprep.mubr.bf16.mxu1 %v16089_v0  ;;  %v15224_v29 = vld [vmem:[#allocation2 + $0xea4] ss:$56 sps:$4 sm:$0xff]  }
 0x5f8   : > { %6735 = vmatprep.subr.bf16.mxu1 %v15208_v32  ;;  %v15225_v32 = vld [vmem:[#allocation2 + $0xea0] ss:$56 sps:$4 sm:$0xff]  }
 0x5fb   : > { %6736 = vmatpush1.bf16.msra.mxu1 %v15209_v37  ;;  %v15226_v37 = vld [vmem:[#allocation2 + $0xf14] ss:$56 sps:$4 sm:$0xff]  }
 0x5fc   : > { %6737 = vmatprep.subr.bf16.mxu1 %v15210_v14  ;;  %v15227_v14 = vld [vmem:[#allocation2 + $0xf10] ss:$56 sps:$4 sm:$0xff]  }
 0x5ff   : > { %6738 = vmatpush1.bf16.msra.mxu1 %v15211_v34  ;;  %v15228_v34 = vld [vmem:[#allocation2 + $0xf84] ss:$56 sps:$4 sm:$0xff]  }
 0x600   : > { %6739 = vmatprep.subr.bf16.mxu1 %v15212_v62  ;;  %v15229_v62 = vld [vmem:[#allocation2 + $0xf80] ss:$56 sps:$4 sm:$0xff]  }
 0x603   : > { %6740 = vmatpush1.bf16.msra.mxu1 %v15213_v17  ;;  %v15230_v17 = vld [vmem:[#allocation2 + $0xff4] ss:$56 sps:$4 sm:$0xff]  }
 0x604   : > { %6741 = vmatprep.subr.bf16.mxu1 %v15214_v40  ;;  %v15231_v40 = vld [vmem:[#allocation2 + $0xff0] ss:$56 sps:$4 sm:$0xff]  }
 0x607   : > { %6742 = vmatpush1.bf16.msra.mxu1 %v15215_v41  ;;  %v15232_v41 = vld [vmem:[#allocation2 + $0x1064] ss:$56 sps:$4 sm:$0xff]  }
 0x608   : > { %6743 = vmatprep.subr.bf16.mxu1 %v15216_v42  ;;  %v15233_v42 = vld [vmem:[#allocation2 + $0x1060] ss:$56 sps:$4 sm:$0xff]  }
 0x60b   : > { %6744 = vmatpush1.bf16.msra.mxu1 %v15217_v48  ;;  %v15817_v48 = vpop.f32.mrb[19].mxu0 }
 0x60c   : > { %6745 = vmatprep.subr.bf16.mxu1 %v15218_v60  ;;  %v15234_v60 = vld [vmem:[#allocation2 + $0x10d4] ss:$56 sps:$4 sm:$0xff]  }
 0x60f   : > { %6746 = vmatpush1.bf16.msra.mxu1 %v15219_v3  ;;  %v15235_v3 = vld [vmem:[#allocation2 + $0x10d0] ss:$56 sps:$4 sm:$0xff]  }
 0x610   : > { %6747 = vmatprep.subr.bf16.mxu1 %v15220_v5  ;;  %v15236_v5 = vld [vmem:[#allocation2 + $0x1144] ss:$56 sps:$4 sm:$0xff]  }
 0x613   : > { %6748 = vmatpush1.bf16.msra.mxu1 %v15221_v9  ;;  %v15237_v9 = vld [vmem:[#allocation2 + $0x1140] ss:$56 sps:$4 sm:$0xff]  }
 0x614   : > { %6819 = vmatprep.subr.bf16.mxu1 %v15222_v8  ;;  %v13835_v8 = vld [vmem:[#allocation6 + $0x380] ss:$8 sps:$4 sm:$0xff]  }
 0x616   : > { %6766 = vmatmul.mubr.bf16.vlgmr.msra.gmra.mrb[32].mxu1 %v15789_v39 }
 0x617   : > { %6820 = vmatpush1.bf16.msra.mxu1 %v15223_v23  ;;  %6851 = vmatprep.mubr.bf16.mxu1 %v16089_v0  ;;  %v13837_v23 = vld [vmem:[#allocation6 + $0x384] ss:$8 sps:$4 sm:$0xff]  }
 0x618   : > { %6821 = vmatprep.subr.bf16.mxu1 %v15224_v29  ;;  %v13840_v29 = vld [vmem:[#allocation6 + $0x394] ss:$8 sps:$4 sm:$0xff]  }
 0x61b   : > { %6822 = vmatpush1.bf16.msra.mxu1 %v15225_v32  ;;  %v13838_v32 = vld [vmem:[#allocation6 + $0x390] ss:$8 sps:$4 sm:$0xff]  }
 0x61c   : > { %6823 = vmatprep.subr.bf16.mxu1 %v15226_v37  ;;  %v13843_v37 = vld [vmem:[#allocation6 + $0x3a4] ss:$8 sps:$4 sm:$0xff]  }
 0x61f   : > { %6824 = vmatpush1.bf16.msra.mxu1 %v15227_v14  ;;  %v13841_v14 = vld [vmem:[#allocation6 + $0x3a0] ss:$8 sps:$4 sm:$0xff]  }
 0x620   : > { %6825 = vmatprep.subr.bf16.mxu1 %v15228_v34  ;;  %v13846_v34 = vld [vmem:[#allocation6 + $0x3b4] ss:$8 sps:$4 sm:$0xff]  }
 0x623   : > { %6826 = vmatpush1.bf16.msra.mxu1 %v15229_v62  ;;  %v13844_v62 = vld [vmem:[#allocation6 + $0x3b0] ss:$8 sps:$4 sm:$0xff]  }
 0x624   : > { %6827 = vmatprep.subr.bf16.mxu1 %v15230_v17  ;;  %v13849_v17 = vld [vmem:[#allocation6 + $0x3c4] ss:$8 sps:$4 sm:$0xff]  }
 0x627   : > { %6828 = vmatpush1.bf16.msra.mxu1 %v15231_v40  ;;  %v13847_v40 = vld [vmem:[#allocation6 + $0x3c0] ss:$8 sps:$4 sm:$0xff]  }
 0x628   : > { %6829 = vmatprep.subr.bf16.mxu1 %v15232_v41  ;;  %v13852_v41 = vld [vmem:[#allocation6 + $0x3d4] ss:$8 sps:$4 sm:$0xff]  }
 0x62b   : > { %6830 = vmatpush1.bf16.msra.mxu1 %v15233_v42  ;;  %v13850_v42 = vld [vmem:[#allocation6 + $0x3d0] ss:$8 sps:$4 sm:$0xff]  }
 0x62c   : > { %6831 = vmatprep.subr.bf16.mxu1 %v15234_v60  ;;  %v13853_v60 = vld [vmem:[#allocation6 + $0x3e0] ss:$8 sps:$4 sm:$0xff]  }
 0x62f   : > { %6832 = vmatpush1.bf16.msra.mxu1 %v15235_v3  ;;  %v13856_v3 = vld [vmem:[#allocation6 + $0x3f0] ss:$8 sps:$4 sm:$0xff]  }
 0x630   : > { %6833 = vmatprep.subr.bf16.mxu1 %v15236_v5  ;;  %v13858_v5 = vld [vmem:[#allocation6 + $0x3f4] ss:$8 sps:$4 sm:$0xff]  }
 0x633   : > { %6834 = vmatpush1.bf16.msra.mxu1 %v15237_v9  ;;  %v13861_v9 = vld [vmem:[#allocation6 + $0x404] ss:$8 sps:$4 sm:$0xff]  }
 0x634   : > { %7831 = vmatprep.subr.bf16.mxu1 %v13837_v23  ;;  %v13864_v23 = vld [vmem:[#allocation6 + $0x414] ss:$8 sps:$4 sm:$0xff]  }
 0x636   : > { %6852 = vmatmul.mubr.bf16.vlgmr.msra.gmra.mrb[36].mxu1 %v15789_v39  ;;  %v13855_v39 = vld [vmem:[#allocation6 + $0x3e4] ss:$8 sps:$4 sm:$0xff]  }
 0x637   : > { %7832 = vmatpush1.bf16.msra.mxu1 %v13835_v8  ;;  %v13859_v8 = vld [vmem:[#allocation6 + $0x400] ss:$8 sps:$4 sm:$0xff]  }
 0x638   : > { %7833 = vmatprep.subr.bf16.mxu1 %v13840_v29  ;;  %v13862_v29 = vld [vmem:[#allocation6 + $0x410] ss:$8 sps:$4 sm:$0xff]  }
 0x63b   : > { %7834 = vmatpush1.bf16.msra.mxu1 %v13838_v32  ;;  %v13867_v32 = vld [vmem:[#allocation6 + $0x424] ss:$8 sps:$4 sm:$0xff]  }
 0x63c   : > { %7835 = vmatprep.subr.bf16.mxu1 %v13843_v37  ;;  %v13865_v37 = vld [vmem:[#allocation6 + $0x420] ss:$8 sps:$4 sm:$0xff]  }
 0x63f   : > { %7836 = vmatpush1.bf16.msra.mxu1 %v13841_v14  ;;  %v13870_v14 = vld [vmem:[#allocation6 + $0x434] ss:$8 sps:$4 sm:$0xff]  }
 0x640   : > { %7837 = vmatprep.subr.bf16.mxu1 %v13846_v34  ;;  %v13868_v34 = vld [vmem:[#allocation6 + $0x430] ss:$8 sps:$4 sm:$0xff]  }
 0x643   : > { %7838 = vmatpush1.bf16.msra.mxu1 %v13844_v62 }
 0x644   : > { %7839 = vmatprep.subr.bf16.mxu1 %v13849_v17 }
 0x647   : > { %7840 = vmatpush1.bf16.msra.mxu1 %v13847_v40  ;;  %v13873_v40 = vld [vmem:[#allocation6 + $0x444] ss:$8 sps:$4 sm:$0xff]  }
 0x648   : > { %7841 = vmatprep.subr.bf16.mxu1 %v13852_v41 }
 0x64b   : > { %7842 = vmatpush1.bf16.msra.mxu1 %v13850_v42  ;;  %v13871_v42 = vld [vmem:[#allocation6 + $0x440] ss:$8 sps:$4 sm:$0xff]  }
 0x64c   : > { %7843 = vmatprep.subr.bf16.mxu1 %v13855_v39 }
 0x64f   : > { %7844 = vmatpush1.bf16.msra.mxu1 %v13853_v60  ;;  %v13876_v60 = vld [vmem:[#allocation6 + $0x454] ss:$8 sps:$4 sm:$0xff]  }
 0x650   : > { %7845 = vmatprep.subr.bf16.mxu1 %v13858_v5  ;;  %v13879_v5 = vld [vmem:[#allocation6 + $0x464] ss:$8 sps:$4 sm:$0xff]  }
 0x653   : > { %7846 = vmatpush1.bf16.msra.mxu1 %v13856_v3  ;;  %v13874_v3 = vld [vmem:[#allocation6 + $0x450] ss:$8 sps:$4 sm:$0xff]  }
 0x654   : > { %7847 = vmatprep.subr.bf16.mxu1 %v13861_v9  ;;  %v13877_v9 = vld [vmem:[#allocation6 + $0x460] ss:$8 sps:$4 sm:$0xff]  }
 0x657   : > { %7848 = vmatpush1.bf16.msra.mxu1 %v13859_v8  ;;  %v13880_v8 = vld [vmem:[#allocation6 + $0x470] ss:$8 sps:$4 sm:$0xff]  }
 0x658   : > { %7849 = vmatprep.subr.bf16.mxu1 %v13864_v23  ;;  %v13882_v23 = vld [vmem:[#allocation6 + $0x474] ss:$8 sps:$4 sm:$0xff]  }
 0x65b   : > { %7850 = vmatpush1.bf16.msra.mxu1 %v13862_v29  ;;  %v13885_v29 = vld [vmem:[#allocation6 + $0x484] ss:$8 sps:$4 sm:$0xff]  }
 0x65c   : > { %7851 = vmatprep.subr.bf16.mxu1 %v13867_v32  ;;  %v13888_v32 = vld [vmem:[#allocation6 + $0x684] ss:$8 sps:$4 sm:$0xff]  }
 0x65d   : > { %7960 = vmatprep.subr.bf16.mxu0 %v13888_v32 }
 0x65f   : > { %7852 = vmatpush1.bf16.msra.mxu1 %v13865_v37  ;;  %v13886_v37 = vld [vmem:[#allocation6 + $0x680] ss:$8 sps:$4 sm:$0xff]  }
 0x660   : > { %7853 = vmatprep.subr.bf16.mxu1 %v13870_v14  ;;  %7961 = vmatpush1.bf16.msra.mxu0 %v13886_v37  ;;  %v6920_v14 = vlaneseq }
 0x663   : > { %7854 = vmatpush1.bf16.msra.mxu1 %v13868_v34  ;;  %v13892_v34 = vld [vmem:[#allocation6 + $0x690] ss:$8 sps:$4 sm:$0xff]  }
 0x664   : > { %7855 = vmatprep.subr.bf16.mxu1 %v13873_v40  ;;  %v13894_v40 = vld [vmem:[#allocation6 + $0x694] ss:$8 sps:$4 sm:$0xff]  }
 0x665   : > { %7962 = vmatprep.subr.bf16.mxu0 %v13894_v40  ;;  %v13912_v40 = vld [vmem:[#allocation6 + $0x6c4] ss:$8 sps:$4 sm:$0xff]  }
 0x666   : > { %7963 = vmatpush1.bf16.msra.mxu0 %v13892_v34 }
 0x667   : > { %7856 = vmatpush1.bf16.msra.mxu1 %v13871_v42  ;;  %v15828_v42 = vshrl.u32 %v6920_v14, 7 }
 0x668   : > { %7857 = vmatprep.subr.bf16.mxu1 %v13876_v60  ;;  %v13898_v60 = vld [vmem:[#allocation6 + $0x6a0] ss:$8 sps:$4 sm:$0xff]  }
 0x669   : > { %v15820_v62 = vpop.f32.mrb[16].mxu1  ;;  %v6930_v38 = vsub.s32 2, %v15828_v42 }
 0x66a   : > { %v15822_v17 = vpop.f32.mrb[17].mxu1 }
 0x66b   : > { %v15824_v41 = vpop.f32.mrb[18].mxu1  ;;  %7858 = vmatpush1.bf16.msra.mxu1 %v13874_v3  ;;  %v13900_v3 = vld [vmem:[#allocation6 + $0x6a4] ss:$8 sps:$4 sm:$0xff]  }
 0x66c   : > { %v15826_v39 = vpop.f32.mrb[19].mxu1  ;;  %7859 = vmatprep.subr.bf16.mxu1 %v13879_v5  ;;  %7964 = vmatprep.subr.bf16.mxu0 %v13900_v3  ;;  %v6934_v5 = vsub.s32 3, %v15828_v42 }
 0x66d   : > { %7965 = vmatpush1.bf16.msra.mxu0 %v13898_v60  ;;  %v13910_v60 = vld [vmem:[#allocation6 + $0x6c0] ss:$8 sps:$4 sm:$0xff]  }
 0x66f   : > { %7860 = vmatpush1.bf16.msra.mxu1 %v13877_v9  ;;  %v13904_v9 = vld [vmem:[#allocation6 + $0x6b0] ss:$8 sps:$4 sm:$0xff]  }
 0x670   : > { %7861 = vmatprep.subr.bf16.mxu1 %v13882_v23  ;;  %v15831_v23 = vld [vmem:[#allocation4] sm:$0xff] }
 0x671   : > { %v6935_v14 = vrot.slane %v15831_v23, %v6934_v5  ;;  %v13916_v5 = vld [vmem:[#allocation6 + $0x6d0] ss:$8 sps:$4 sm:$0xff]  }
 0x673   : > { %7862 = vmatpush1.bf16.msra.mxu1 %v13880_v8  ;;  %v13906_v8 = vld [vmem:[#allocation6 + $0x6b4] ss:$8 sps:$4 sm:$0xff]  }
 0x674   : > { %7874 = vmatprep.subr.bf16.mxu1 %v13885_v29  ;;  %7966 = vmatprep.subr.bf16.mxu0 %v13906_v8 }
 0x675   : > { %7967 = vmatpush1.bf16.msra.mxu0 %v13904_v9  ;;  %v13918_v9 = vld [vmem:[#allocation6 + $0x6d4] ss:$8 sps:$4 sm:$0xff]  }
 0x676   : > { %7968 = vmatprep.subr.bf16.mxu0 %v13912_v40 }
 0x679   : > { %7969 = vmatpush1.bf16.msra.mxu0 %v13910_v60 }
 0x67a   : > { %7970 = vmatprep.subr.bf16.mxu0 %v13918_v9 }
 0x67d   : > { %7971 = vmatpush1.bf16.msra.mxu0 %v13916_v5 }
 0x67e   : > { %7972 = vmatprep.subr.bf16.mxu0 %v13924_v19  ;;  %v6938_v19 = vsub.s32 4, %v15828_v42 }
 0x681   : > { %7973 = vmatpush1.bf16.msra.mxu0 %v13922_v2 }
 0x682   : > { %7974 = vmatprep.subr.bf16.mxu0 %v13930_v57 }
 0x689   : > { %v15833_v29 = vpop.f32.mrb[20].mxu1 }
 0x68a   : > { %v6640_v32 = vpop.f32.mrb[21].mxu1 }
 0x68b   : > { %v6893_v37 = vmax.f32 %v6640_v32, %v15809_v43  ;;  %v15837_v34 = vpop.f32.mrb[22].mxu1 }
 0x68c   : > { %v6644_v3 = vpop.f32.mrb[23].mxu1 }
 0x68d   : > { %v6907_v0 = vmax.f32 %v5284_v18, %v6893_v37  ;;  %v6900_v54 = vmax.f32 %v6644_v3, %v15813_v1  ;;  %v13928_v18 = vld [vmem:[#allocation6 + $0x6f0] ss:$8 sps:$4 sm:$0xff]   ;;  %v6939_v1 = vrot.slane %v15831_v23, %v6938_v19 }
 0x68e   : > { %7975 = vmatpush1.bf16.msra.mxu0 %v13928_v18 }
 0x68f   : > { %v6958_v8 = vadd.f32 %v6935_v14, %v6907_v0  ;;  %v6914_v43 = vmax.f32 %v5291_v28, %v6900_v54 }
 0x691   : > { %v6965_v32 = vadd.f32 %v6935_v14, %v6914_v43  ;;  %v6972_v49 = vmax.f32 %v6958_v8, 0.0 }
 0x693   : > { %v6979_v46 = vmax.f32 %v6965_v32, 0.0 }
 0x695   : > { %v15846_v53 = vpack.c.bf16 %v6979_v46, %v6972_v49  ;;  %v13936_v46 = vld [vmem:[#allocation6 + $0x4] ss:$8 sps:$4 sm:$0xff]  }
 0x696   : > { %8563 = vmatprep.subr.bf16.mxu0 %v13936_v46 }
 0x697   : > { %v7237_v10 = vshrl.u32 %v15846_v53, 16  ;;  %v7239_v0 = vshll.u32 %v15846_v53, 16 }
 0x699   : > { %v15852_v24 = vrot.slane %v7237_v10, 1  ;;  %v15856_v28 = vrot.slane %v7239_v0, 2 }
 0x69b   : > { %v9729_v2 = vor.u32 %v15856_v28, %v15852_v24  ;;  %v14407_v24 = vld [vmem:[#allocation6 + $0xbe4] ss:$8 sps:$4 sm:$0xff]   ;;  %v14405_v28 = vld [vmem:[#allocation6 + $0xbe0] ss:$8 sps:$4 sm:$0xff]  }
 0x6a9   : > { %v6681_v49 = vpop.f32.mrb[24].mxu1 }
 0x6aa   : > { %v6894_v54 = vmax.f32 %v6681_v49, %v15811_v52  ;;  %v15863_v37 = vpop.f32.mrb[25].mxu1 }
 0x6ab   : > { %v6685_v14 = vpop.f32.mrb[26].mxu1 }
 0x6ac   : > { %v6908_v40 = vmax.f32 %v5285_v6, %v6894_v54  ;;  %v6901_v3 = vmax.f32 %v6685_v14, %v15817_v48  ;;  %v15869_v60 = vpop.f32.mrb[27].mxu1  ;;  %v6922_v6 = vsub.s32 0, %v15828_v42 }
 0x6ae   : > { %v6959_v8 = vadd.f32 %v6939_v1, %v6908_v40  ;;  %v6915_v43 = vmax.f32 %v5292_v21, %v6901_v3  ;;  %v6923_v46 = vrot.slane %v15831_v23, %v6922_v6 }
 0x6b0   : > { %v6966_v9 = vadd.f32 %v6939_v1, %v6915_v43  ;;  %v6973_v52 = vmax.f32 %v6959_v8, 0.0 }
 0x6b2   : > { %v6980_v5 = vmax.f32 %v6966_v9, 0.0 }
 0x6b4   : > { %v15874_v32 = vpack.c.bf16 %v6980_v5, %v6973_v52 }
 0x6b6   : > { %v7244_v18 = vshrl.u32 %v15874_v32, 16  ;;  %v7246_v57 = vshll.u32 %v15874_v32, 16 }
 0x6b8   : > { %v15880_v20 = vrot.slane %v7244_v18, 1  ;;  %v15884_v4 = vrot.slane %v7246_v57, 2 }
 0x6ba   : > { %v9732_v30 = vor.u32 %v15884_v4, %v15880_v20  ;;  %v14498_v20 = vld [vmem:[#allocation6 + $0xdd0] ss:$8 sps:$4 sm:$0xff]   ;;  %v14503_v4 = vld [vmem:[#allocation6 + $0xde4] ss:$8 sps:$4 sm:$0xff]  }
 0x6c9   : > { %v15889_v11 = vpop.f32.mrb[28].mxu1 }
 0x6ca   : > { %v6726_v21 = vpop.f32.mrb[29].mxu1 }
 0x6cb   : > { %v6890_v48 = vmax.f32 %v15820_v62, %v6726_v21  ;;  %v15893_v19 = vpop.f32.mrb[30].mxu1 }
 0x6cc   : > { %v6730_v49 = vpop.f32.mrb[31].mxu1 }
 0x6cd   : > { %v6904_v54 = vmax.f32 %v5281_v13, %v6890_v48  ;;  %v6897_v1 = vmax.f32 %v15824_v41, %v6730_v49  ;;  %v6926_v13 = vsub.s32 1, %v15828_v42  ;;  %v6931_v48 = vrot.slane %v15831_v23, %v6930_v38 }
 0x6cf   : > { %v6955_v14 = vadd.f32 %v6923_v46, %v6904_v54  ;;  %v6911_v40 = vmax.f32 %v5288_v36, %v6897_v1  ;;  %v6927_v41 = vrot.slane %v15831_v23, %v6926_v13 }
 0x6d1   : > { %v6962_v3 = vadd.f32 %v6923_v46, %v6911_v40  ;;  %v6969_v8 = vmax.f32 %v6955_v14, 0.0 }
 0x6d3   : > { %v6976_v43 = vmax.f32 %v6962_v3, 0.0 }
 0x6d5   : > { %v15902_v62 = vpack.c.bf16 %v6976_v43, %v6969_v8  ;;  %v16101_v8 = vmax.f32 %v15665_v55, %v15743_v63 }
 0x6d7   : > { %v7216_v9 = vshrl.u32 %v15902_v62, 16  ;;  %v7218_v52 = vshll.u32 %v15902_v62, 16 }
 0x6d9   : > { %v15906_v5 = vrot.slane %v7216_v9, 1  ;;  %v15908_v33 = vrot.slane %v7218_v52, 2  ;;  %v7220_v12 = vrot.slane %v7218_v52, 1 }
 0x6db   : > { %v9720_v16 = vor.u32 %v15908_v33, %v15906_v5  ;;  %v14404_v5 = vld [vmem:[#allocation6 + $0xbd4] ss:$8 sps:$4 sm:$0xff]   ;;  %v14402_v33 = vld [vmem:[#allocation6 + $0xbd0] ss:$8 sps:$4 sm:$0xff]  }
 0x6e9   : > { %v6767_v26 = vpop.f32.mrb[32].mxu1 }
 0x6ea   : > { %v6891_v36 = vmax.f32 %v15822_v17, %v6767_v26  ;;  %v6769_v6 = vpop.f32.mrb[33].mxu1 }
 0x6eb   : > { %v6892_v21 = vmax.f32 %v15833_v29, %v6769_v6  ;;  %v6771_v46 = vpop.f32.mrb[34].mxu1 }
 0x6ec   : > { %v6905_v49 = vmax.f32 %v5282_v58, %v6891_v36  ;;  %v6898_v54 = vmax.f32 %v15826_v39, %v6771_v46  ;;  %v6773_v1 = vpop.f32.mrb[35].mxu1  ;;  %v13891_v46 = vld [vmem:[#allocation6 + $0x494] ss:$8 sps:$4 sm:$0xff]  }
 0x6ed   : > { %v6906_v14 = vmax.f32 %v5283_v27, %v6892_v21  ;;  %v6899_v17 = vmax.f32 %v15837_v34, %v6773_v1  ;;  %v7241_v34 = vrot.slane %v7239_v0, 1  ;;  %v13883_v21 = vld [vmem:[#allocation6 + $0x480] ss:$8 sps:$4 sm:$0xff]   ;;  %v13889_v1 = vld [vmem:[#allocation6 + $0x490] ss:$8 sps:$4 sm:$0xff]  }
 0x6ee   : > { %v6956_v40 = vadd.f32 %v6927_v41, %v6905_v49  ;;  %v6912_v29 = vmax.f32 %v5289_v61, %v6898_v54 }
 0x6ef   : > { %v6957_v3 = vadd.f32 %v6931_v48, %v6906_v14  ;;  %v6913_v22 = vmax.f32 %v16101_v8, %v6899_v17  ;;  %v7242_v0 = vor.u32 %v7241_v34, %v7237_v10  ;;  %v13897_v14 = vld [vmem:[#allocation6 + $0x4a4] ss:$8 sps:$4 sm:$0xff]   ;;  %v13895_v17 = vld [vmem:[#allocation6 + $0x4a0] ss:$8 sps:$4 sm:$0xff]   ;;  %v6946_v10 = vsub.s32 6, %v15828_v42 }
 0x6f0   : > { %v6963_v56 = vadd.f32 %v6927_v41, %v6912_v29  ;;  %v6970_v39 = vmax.f32 %v6956_v40, 0.0  ;;  %v13901_v40 = vld [vmem:[#allocation6 + $0x4b0] ss:$8 sps:$4 sm:$0xff]   ;;  %v6942_v29 = vsub.s32 5, %v15828_v42 }
 0x6f1   : > { %v6964_v58 = vadd.f32 %v6931_v48, %v6913_v22  ;;  %v6971_v13 = vmax.f32 %v6957_v3, 0.0  ;;  %v7221_v48 = vor.u32 %v7220_v12, %v7216_v9  ;;  %v13903_v9 = vld [vmem:[#allocation6 + $0x4b4] ss:$8 sps:$4 sm:$0xff]   ;;  %v13909_v3 = vld [vmem:[#allocation6 + $0x4c4] ss:$8 sps:$4 sm:$0xff]  }
 0x6f2   : > { %v6977_v43 = vmax.f32 %v6963_v56, 0.0  ;;  %v6943_v56 = vrot.slane %v15831_v23, %v6942_v29  ;;  %v13933_v29 = vld [vmem:[#allocation6 + $0x504] ss:$8 sps:$4 sm:$0xff]  }
 0x6f3   : > { %v6978_v38 = vmax.f32 %v6964_v58, 0.0 }
 0x6f4   : > { %v15932_v51 = vpack.c.bf16 %v6977_v43, %v6970_v39  ;;  %v13907_v39 = vld [vmem:[#allocation6 + $0x4c0] ss:$8 sps:$4 sm:$0xff]  }
 0x6f5   : > { %v15934_v59 = vpack.c.bf16 %v6978_v38, %v6971_v13  ;;  %v6947_v13 = vrot.slane %v15831_v23, %v6946_v10  ;;  %v16104_v23 = vmax.f32 %v15727_v25, %v15757_v47  ;;  %v13927_v25 = vld [vmem:[#allocation6 + $0x4f4] ss:$8 sps:$4 sm:$0xff]  }
 0x6f6   : > { %v7223_v27 = vshrl.u32 %v15932_v51, 16  ;;  %v7225_v15 = vshll.u32 %v15932_v51, 16 }
 0x6f7   : > { %v7230_v61 = vshrl.u32 %v15934_v59, 16  ;;  %v7232_v55 = vshll.u32 %v15934_v59, 16 }
 0x6f8   : > { %v7227_v63 = vrot.slane %v7225_v15, 1  ;;  %v15942_v26 = vrot.slane %v7223_v27, 1  ;;  %v15944_v36 = vrot.slane %v7225_v15, 2  ;;  %v16102_v15 = vmax.f32 %v15721_v7, %v15749_v44 }
 0x6f9   : > { %v15948_v41 = vrot.slane %v7230_v61, 1  ;;  %v15952_v52 = vrot.slane %v7232_v55, 2  ;;  %v16105_v7 = vmax.f32 %v15677_v35, %v15761_v50 }
 0x6fa   : > { %v7228_v6 = vor.u32 %v7227_v63, %v7223_v27  ;;  %v9723_v49 = vor.u32 %v15944_v36, %v15942_v26  ;;  %v13915_v27 = vld [vmem:[#allocation6 + $0x4d4] ss:$8 sps:$4 sm:$0xff]   ;;  %v14359_v26 = vld [vmem:[#allocation6 + $0xae4] ss:$8 sps:$4 sm:$0xff]   ;;  %v14357_v36 = vld [vmem:[#allocation6 + $0xae0] ss:$8 sps:$4 sm:$0xff]  }
 0x6fb   : > { %v9726_v54 = vor.u32 %v15952_v52, %v15948_v41  ;;  %v14452_v41 = vld [vmem:[#allocation6 + $0xcd4] ss:$8 sps:$4 sm:$0xff]   ;;  %v14450_v52 = vld [vmem:[#allocation6 + $0xcd0] ss:$8 sps:$4 sm:$0xff]  }
 0x6fc   : > { %7863 = vmatprep.mubr.bf16.mxu1 %v7228_v6 }
 0x6fd   : > { %7864 = vmatmul.mubr.bf16.vlgmr.msra.gmra.mrb[40].mxu1 %v7221_v48  ;;  %v13913_v48 = vld [vmem:[#allocation6 + $0x4d0] ss:$8 sps:$4 sm:$0xff]  }
 0x6fe   : > { %7875 = vmatpush1.bf16.msra.mxu1 %v13883_v21  ;;  %7906 = vmatprep.mubr.bf16.mxu1 %v7242_v0 }
 0x6ff   : > { %7876 = vmatprep.subr.bf16.mxu1 %v13891_v46 }
 0x702   : > { %7877 = vmatpush1.bf16.msra.mxu1 %v13889_v1 }
 0x703   : > { %7878 = vmatprep.subr.bf16.mxu1 %v13897_v14 }
 0x706   : > { %7879 = vmatpush1.bf16.msra.mxu1 %v13895_v17 }
 0x707   : > { %7880 = vmatprep.subr.bf16.mxu1 %v13903_v9 }
 0x709   : > { %v6853_v8 = vpop.f32.mrb[36].mxu1 }
 0x70a   : > { %v6895_v22 = vmax.f32 %v15863_v37, %v6853_v8  ;;  %7881 = vmatpush1.bf16.msra.mxu1 %v13901_v40  ;;  %v6855_v58 = vpop.f32.mrb[37].mxu1  ;;  %v16103_v37 = vmax.f32 %v15673_v31, %v15753_v45  ;;  %v13925_v40 = vld [vmem:[#allocation6 + $0x4f0] ss:$8 sps:$4 sm:$0xff]  }
 0x70b   : > { %v6896_v43 = vmax.f32 %v15889_v11, %v6855_v58  ;;  %v6857_v38 = vpop.f32.mrb[38].mxu1  ;;  %7882 = vmatprep.subr.bf16.mxu1 %v13909_v3 }
 0x70c   : > { %v6909_v42 = vmax.f32 %v16102_v15, %v6895_v22  ;;  %v6902_v12 = vmax.f32 %v15869_v60, %v6857_v38  ;;  %v6859_v63 = vpop.f32.mrb[39].mxu1  ;;  %v13921_v60 = vld [vmem:[#allocation6 + $0x4e4] ss:$8 sps:$4 sm:$0xff]   ;;  %v13939_v15 = vld [vmem:[#allocation6 + $0x514] ss:$8 sps:$4 sm:$0xff]  }
 0x70d   : > { %v6910_v34 = vmax.f32 %v16103_v37, %v6896_v43  ;;  %v6903_v6 = vmax.f32 %v15893_v19, %v6859_v63  ;;  %v13919_v19 = vld [vmem:[#allocation6 + $0x4e0] ss:$8 sps:$4 sm:$0xff]   ;;  %v13937_v63 = vld [vmem:[#allocation6 + $0x510] ss:$8 sps:$4 sm:$0xff]  }
 0x70e   : > { %v6960_v21 = vadd.f32 %v6943_v56, %v6909_v42  ;;  %v6916_v11 = vmax.f32 %v16104_v23, %v6902_v12  ;;  %7883 = vmatpush1.bf16.msra.mxu1 %v13907_v39  ;;  %v13931_v43 = vld [vmem:[#allocation6 + $0x500] ss:$8 sps:$4 sm:$0xff]   ;;  %v13942_v12 = vld [vmem:[#allocation6 + $0x14] ss:$8 sps:$4 sm:$0xff]   ;;  %v13940_v37 = vld [vmem:[#allocation6 + $0x10] ss:$8 sps:$4 sm:$0xff]  }
 0x70f   : > { %v6961_v46 = vadd.f32 %v6947_v13, %v6910_v34  ;;  %v6917_v44 = vmax.f32 %v16105_v7, %v6903_v6  ;;  %7884 = vmatprep.subr.bf16.mxu1 %v13915_v27  ;;  %v13945_v34 = vld [vmem:[#allocation6 + $0x524] ss:$8 sps:$4 sm:$0xff]   ;;  %v13946_v23 = vld [vmem:[#allocation6 + $0x20] ss:$8 sps:$4 sm:$0xff]   ;;  %v13952_v7 = vld [vmem:[#allocation6 + $0x30] ss:$8 sps:$4 sm:$0xff]  }
 0x710   : > { %v6967_v0 = vadd.f32 %v6943_v56, %v6916_v11  ;;  %v6974_v31 = vmax.f32 %v6960_v21, 0.0  ;;  %v13948_v6 = vld [vmem:[#allocation6 + $0x24] ss:$8 sps:$4 sm:$0xff]   ;;  %v13943_v21 = vld [vmem:[#allocation6 + $0x520] ss:$8 sps:$4 sm:$0xff]  }
 0x711   : > { %v6968_v1 = vadd.f32 %v6947_v13, %v6917_v44  ;;  %v6975_v14 = vmax.f32 %v6961_v46, 0.0  ;;  %v13934_v13 = vld [vmem:[#allocation6] ss:$8 sps:$4 sm:$0xff]   ;;  %v13951_v11 = vld [vmem:[#allocation6 + $0x534] ss:$8 sps:$4 sm:$0xff]  }
 0x712   : > { %v6981_v45 = vmax.f32 %v6967_v0, 0.0  ;;  %7885 = vmatpush1.bf16.msra.mxu1 %v13913_v48  ;;  %v13954_v48 = vld [vmem:[#allocation6 + $0x34] ss:$8 sps:$4 sm:$0xff]   ;;  %v13949_v46 = vld [vmem:[#allocation6 + $0x530] ss:$8 sps:$4 sm:$0xff]  }
 0x713   : > { %v6982_v17 = vmax.f32 %v6968_v1, 0.0  ;;  %7886 = vmatprep.subr.bf16.mxu1 %v13921_v60  ;;  %v13957_v44 = vld [vmem:[#allocation6 + $0x544] ss:$8 sps:$4 sm:$0xff]   ;;  %v13955_v0 = vld [vmem:[#allocation6 + $0x540] ss:$8 sps:$4 sm:$0xff]  }
 0x714   : > { %v15980_v47 = vpack.c.bf16 %v6981_v45, %v6974_v31  ;;  %v13960_v60 = vld [vmem:[#allocation6 + $0x44] ss:$8 sps:$4 sm:$0xff]   ;;  %v13958_v1 = vld [vmem:[#allocation6 + $0x40] ss:$8 sps:$4 sm:$0xff]   ;;  %v13963_v31 = vld [vmem:[#allocation6 + $0x554] ss:$8 sps:$4 sm:$0xff]  }
 0x715   : > { %v15982_v9 = vpack.c.bf16 %v6982_v17, %v6975_v14  ;;  %v13966_v45 = vld [vmem:[#allocation6 + $0x54] ss:$8 sps:$4 sm:$0xff]   ;;  %v13964_v14 = vld [vmem:[#allocation6 + $0x50] ss:$8 sps:$4 sm:$0xff]   ;;  %v13969_v17 = vld [vmem:[#allocation6 + $0x564] ss:$8 sps:$4 sm:$0xff]  }
 0x716   : > { %7887 = vmatpush1.bf16.msra.mxu1 %v13919_v19  ;;  %v7251_v35 = vshrl.u32 %v15980_v47, 16  ;;  %v7253_v50 = vshll.u32 %v15980_v47, 16  ;;  %v13961_v19 = vld [vmem:[#allocation6 + $0x550] ss:$8 sps:$4 sm:$0xff]  }
 0x717   : > { %7888 = vmatprep.subr.bf16.mxu1 %v13927_v25  ;;  %v7258_v10 = vshrl.u32 %v15982_v9, 16  ;;  %v7260_v3 = vshll.u32 %v15982_v9, 16  ;;  %v13972_v25 = vld [vmem:[#allocation6 + $0x64] ss:$8 sps:$4 sm:$0xff]  }
 0x718   : > { %v15990_v8 = vrot.slane %v7251_v35, 1  ;;  %v15994_v22 = vrot.slane %v7253_v50, 2 }
 0x719   : > { %v7262_v56 = vrot.slane %v7260_v3, 1  ;;  %v15996_v58 = vrot.slane %v7258_v10, 1  ;;  %v15998_v39 = vrot.slane %v7260_v3, 2  ;;  %v13978_v3 = vld [vmem:[#allocation6 + $0x74] ss:$8 sps:$4 sm:$0xff]  }
 0x71a   : > { %7889 = vmatpush1.bf16.msra.mxu1 %v13925_v40  ;;  %v9735_v38 = vor.u32 %v15994_v22, %v15990_v8  ;;  %v13967_v40 = vld [vmem:[#allocation6 + $0x560] ss:$8 sps:$4 sm:$0xff]   ;;  %v14458_v22 = vld [vmem:[#allocation6 + $0xcf4] ss:$8 sps:$4 sm:$0xff]  }
 0x71b   : > { %7890 = vmatprep.subr.bf16.mxu1 %v13933_v29  ;;  %v7263_v27 = vor.u32 %v7262_v56, %v7258_v10  ;;  %v9738_v42 = vor.u32 %v15998_v39, %v15996_v58  ;;  %v13970_v29 = vld [vmem:[#allocation6 + $0x60] ss:$8 sps:$4 sm:$0xff]   ;;  %v13975_v10 = vld [vmem:[#allocation6 + $0x574] ss:$8 sps:$4 sm:$0xff]   ;;  %v13973_v56 = vld [vmem:[#allocation6 + $0x570] ss:$8 sps:$4 sm:$0xff]  }
 0x71c   : > { %v14453_v8 = vld [vmem:[#allocation6 + $0xce0] ss:$8 sps:$4 sm:$0xff]   ;;  %v14522_v58 = vld [vmem:[#allocation6 + $0xe50] ss:$8 sps:$4 sm:$0xff]   ;;  %v14527_v39 = vld [vmem:[#allocation6 + $0xe64] ss:$8 sps:$4 sm:$0xff]  }
 0x71d   : > { %7993 = vmatmul.mubr.bf16.vlgmr.msra.gmra.mrb[20].mxu0 %v7263_v27  ;;  %v13981_v27 = vld [vmem:[#allocation6 + $0x584] ss:$8 sps:$4 sm:$0xff]  }
 0x71e   : > { %7891 = vmatpush1.bf16.msra.mxu1 %v13931_v43  ;;  %8564 = vmatpush1.bf16.msra.mxu0 %v13934_v13  ;;  %v13976_v43 = vld [vmem:[#allocation6 + $0x70] ss:$8 sps:$4 sm:$0xff]   ;;  %v7234_v13 = vrot.slane %v7232_v55, 1 }
 0x71f   : > { %8595 = vmatprep.mubr.bf16.mxu0 %v15932_v51  ;;  %7892 = vmatprep.subr.bf16.mxu1 %v13939_v15  ;;  %v13984_v15 = vld [vmem:[#allocation6 + $0x84] ss:$8 sps:$4 sm:$0xff]   ;;  %v13985_v55 = vld [vmem:[#allocation6 + $0x590] ss:$8 sps:$4 sm:$0xff]  }
 0x720   : > { %8565 = vmatprep.subr.bf16.mxu0 %v13942_v12  ;;  %v7255_v12 = vrot.slane %v7253_v50, 1  ;;  %v13988_v50 = vld [vmem:[#allocation6 + $0x90] ss:$8 sps:$4 sm:$0xff]  }
 0x722   : > { %7893 = vmatpush1.bf16.msra.mxu1 %v13937_v63  ;;  %8566 = vmatpush1.bf16.msra.mxu0 %v13940_v37  ;;  %v13979_v63 = vld [vmem:[#allocation6 + $0x580] ss:$8 sps:$4 sm:$0xff]   ;;  %v7235_v37 = vor.u32 %v7234_v13, %v7230_v61  ;;  %v14021_v13 = vld [vmem:[#allocation6 + $0x5f0] ss:$8 sps:$4 sm:$0xff]  }
 0x723   : > { %7894 = vmatprep.subr.bf16.mxu1 %v13945_v34  ;;  %8567 = vmatprep.subr.bf16.mxu0 %v13948_v6  ;;  %v13982_v34 = vld [vmem:[#allocation6 + $0x80] ss:$8 sps:$4 sm:$0xff]   ;;  %v13987_v6 = vld [vmem:[#allocation6 + $0x594] ss:$8 sps:$4 sm:$0xff]  }
 0x724   : > { %v13991_v61 = vld [vmem:[#allocation6 + $0x5a0] ss:$8 sps:$4 sm:$0xff]  }
 0x726   : > { %7895 = vmatpush1.bf16.msra.mxu1 %v13943_v21  ;;  %8568 = vmatpush1.bf16.msra.mxu0 %v13946_v23  ;;  %v7256_v21 = vor.u32 %v7255_v12, %v7251_v35  ;;  %v13990_v23 = vld [vmem:[#allocation6 + $0x94] ss:$8 sps:$4 sm:$0xff]   ;;  %v13997_v35 = vld [vmem:[#allocation6 + $0x5b0] ss:$8 sps:$4 sm:$0xff]   ;;  %v14032_v12 = vld [vmem:[#allocation6 + $0x104] ss:$8 sps:$4 sm:$0xff]  }
 0x727   : > { %7896 = vmatprep.subr.bf16.mxu1 %v13951_v11  ;;  %8569 = vmatprep.subr.bf16.mxu0 %v13954_v48  ;;  %v13993_v11 = vld [vmem:[#allocation6 + $0x5a4] ss:$8 sps:$4 sm:$0xff]  }
 0x728   : > { %v13996_v48 = vld [vmem:[#allocation6 + $0xa4] ss:$8 sps:$4 sm:$0xff]  }
 0x72a   : > { %7897 = vmatpush1.bf16.msra.mxu1 %v13949_v46  ;;  %8570 = vmatpush1.bf16.msra.mxu0 %v13952_v7  ;;  %v13994_v46 = vld [vmem:[#allocation6 + $0xa0] ss:$8 sps:$4 sm:$0xff]   ;;  %v13999_v7 = vld [vmem:[#allocation6 + $0x5b4] ss:$8 sps:$4 sm:$0xff]  }
 0x72b   : > { %7898 = vmatprep.subr.bf16.mxu1 %v13957_v44  ;;  %8571 = vmatprep.subr.bf16.mxu0 %v13960_v60  ;;  %v14002_v44 = vld [vmem:[#allocation6 + $0xb4] ss:$8 sps:$4 sm:$0xff]   ;;  %v14000_v60 = vld [vmem:[#allocation6 + $0xb0] ss:$8 sps:$4 sm:$0xff]  }
 0x72e   : > { %7899 = vmatpush1.bf16.msra.mxu1 %v13955_v0  ;;  %8572 = vmatpush1.bf16.msra.mxu0 %v13958_v1  ;;  %v14005_v0 = vld [vmem:[#allocation6 + $0x5c4] ss:$8 sps:$4 sm:$0xff]  }
 0x72f   : > { %7900 = vmatprep.subr.bf16.mxu1 %v13963_v31  ;;  %8573 = vmatprep.subr.bf16.mxu0 %v13966_v45  ;;  %v14008_v1 = vld [vmem:[#allocation6 + $0xc4] ss:$8 sps:$4 sm:$0xff]   ;;  %v14003_v31 = vld [vmem:[#allocation6 + $0x5c0] ss:$8 sps:$4 sm:$0xff]  }
 0x730   : > { %v14006_v45 = vld [vmem:[#allocation6 + $0xc0] ss:$8 sps:$4 sm:$0xff]  }
 0x732   : > { %7901 = vmatpush1.bf16.msra.mxu1 %v13961_v19  ;;  %8574 = vmatpush1.bf16.msra.mxu0 %v13964_v14  ;;  %v14011_v19 = vld [vmem:[#allocation6 + $0x5d4] ss:$8 sps:$4 sm:$0xff]  }
 0x733   : > { %7902 = vmatprep.subr.bf16.mxu1 %v13969_v17  ;;  %8575 = vmatprep.subr.bf16.mxu0 %v13972_v25  ;;  %v14014_v14 = vld [vmem:[#allocation6 + $0xd4] ss:$8 sps:$4 sm:$0xff]   ;;  %v14009_v17 = vld [vmem:[#allocation6 + $0x5d0] ss:$8 sps:$4 sm:$0xff]  }
 0x734   : > { %v14012_v25 = vld [vmem:[#allocation6 + $0xd0] ss:$8 sps:$4 sm:$0xff]  }
 0x736   : > { %7903 = vmatpush1.bf16.msra.mxu1 %v13967_v40  ;;  %8576 = vmatpush1.bf16.msra.mxu0 %v13970_v29  ;;  %v14017_v40 = vld [vmem:[#allocation6 + $0x5e4] ss:$8 sps:$4 sm:$0xff]  }
 0x737   : > { %7904 = vmatprep.subr.bf16.mxu1 %v13975_v10  ;;  %8577 = vmatprep.subr.bf16.mxu0 %v13978_v3  ;;  %v14020_v29 = vld [vmem:[#allocation6 + $0xe4] ss:$8 sps:$4 sm:$0xff]   ;;  %v14015_v10 = vld [vmem:[#allocation6 + $0x5e0] ss:$8 sps:$4 sm:$0xff]  }
 0x738   : > { %v14018_v3 = vld [vmem:[#allocation6 + $0xe0] ss:$8 sps:$4 sm:$0xff]  }
 0x73a   : > { %7905 = vmatpush1.bf16.msra.mxu1 %v13973_v56  ;;  %8578 = vmatpush1.bf16.msra.mxu0 %v13976_v43  ;;  %v14023_v56 = vld [vmem:[#allocation6 + $0x5f4] ss:$8 sps:$4 sm:$0xff]  }
 0x73b   : > { %7917 = vmatprep.subr.bf16.mxu1 %v13981_v27  ;;  %8579 = vmatprep.subr.bf16.mxu0 %v13984_v15  ;;  %v14026_v43 = vld [vmem:[#allocation6 + $0xf4] ss:$8 sps:$4 sm:$0xff]   ;;  %v14024_v27 = vld [vmem:[#allocation6 + $0xf0] ss:$8 sps:$4 sm:$0xff]   ;;  %v14029_v15 = vld [vmem:[#allocation6 + $0x604] ss:$8 sps:$4 sm:$0xff]  }
 0x73d   : > { %7907 = vmatmul.mubr.bf16.vlgmr.msra.gmra.mrb[40].mxu1 %v7235_v37  ;;  %v14030_v37 = vld [vmem:[#allocation6 + $0x100] ss:$8 sps:$4 sm:$0xff]  }
 0x73e   : > { %7918 = vmatpush1.bf16.msra.mxu1 %v13979_v63  ;;  %7949 = vmatprep.mubr.bf16.mxu1 %v7256_v21  ;;  %v14027_v63 = vld [vmem:[#allocation6 + $0x600] ss:$8 sps:$4 sm:$0xff]   ;;  %v14033_v21 = vld [vmem:[#allocation6 + $0x610] ss:$8 sps:$4 sm:$0xff]  }
 0x73f   : > { %8580 = vmatpush1.bf16.msra.mxu0 %v13982_v34  ;;  %7919 = vmatprep.subr.bf16.mxu1 %v13987_v6  ;;  %v14035_v34 = vld [vmem:[#allocation6 + $0x614] ss:$8 sps:$4 sm:$0xff]  }
 0x740   : > { %8581 = vmatprep.subr.bf16.mxu0 %v13990_v23  ;;  %v14038_v6 = vld [vmem:[#allocation6 + $0x114] ss:$8 sps:$4 sm:$0xff]   ;;  %v14036_v23 = vld [vmem:[#allocation6 + $0x110] ss:$8 sps:$4 sm:$0xff]  }
 0x742   : > { %7920 = vmatpush1.bf16.msra.mxu1 %v13985_v55  ;;  %v14041_v55 = vld [vmem:[#allocation6 + $0x624] ss:$8 sps:$4 sm:$0xff]  }
 0x743   : > { %8582 = vmatpush1.bf16.msra.mxu0 %v13988_v50  ;;  %7921 = vmatprep.subr.bf16.mxu1 %v13993_v11  ;;  %v14044_v50 = vld [vmem:[#allocation6 + $0x124] ss:$8 sps:$4 sm:$0xff]   ;;  %v14039_v11 = vld [vmem:[#allocation6 + $0x620] ss:$8 sps:$4 sm:$0xff]  }
 0x744   : > { %8583 = vmatprep.subr.bf16.mxu0 %v13996_v48  ;;  %v14042_v48 = vld [vmem:[#allocation6 + $0x120] ss:$8 sps:$4 sm:$0xff]  }
 0x746   : > { %7922 = vmatpush1.bf16.msra.mxu1 %v13991_v61  ;;  %v14047_v61 = vld [vmem:[#allocation6 + $0x634] ss:$8 sps:$4 sm:$0xff]  }
 0x747   : > { %8584 = vmatpush1.bf16.msra.mxu0 %v13994_v46  ;;  %7923 = vmatprep.subr.bf16.mxu1 %v13999_v7  ;;  %v14050_v46 = vld [vmem:[#allocation6 + $0x134] ss:$8 sps:$4 sm:$0xff]   ;;  %v14045_v7 = vld [vmem:[#allocation6 + $0x630] ss:$8 sps:$4 sm:$0xff]  }
 0x748   : > { %8585 = vmatprep.subr.bf16.mxu0 %v14002_v44  ;;  %v14048_v44 = vld [vmem:[#allocation6 + $0x130] ss:$8 sps:$4 sm:$0xff]  }
 0x74a   : > { %7924 = vmatpush1.bf16.msra.mxu1 %v13997_v35  ;;  %v14053_v35 = vld [vmem:[#allocation6 + $0x644] ss:$8 sps:$4 sm:$0xff]  }
 0x74b   : > { %8586 = vmatpush1.bf16.msra.mxu0 %v14000_v60  ;;  %7925 = vmatprep.subr.bf16.mxu1 %v14005_v0  ;;  %v14056_v60 = vld [vmem:[#allocation6 + $0x144] ss:$8 sps:$4 sm:$0xff]   ;;  %v14051_v0 = vld [vmem:[#allocation6 + $0x640] ss:$8 sps:$4 sm:$0xff]  }
 0x74c   : > { %8587 = vmatprep.subr.bf16.mxu0 %v14008_v1  ;;  %v14054_v1 = vld [vmem:[#allocation6 + $0x140] ss:$8 sps:$4 sm:$0xff]  }
 0x74e   : > { %7926 = vmatpush1.bf16.msra.mxu1 %v14003_v31  ;;  %v14059_v31 = vld [vmem:[#allocation6 + $0x654] ss:$8 sps:$4 sm:$0xff]  }
 0x74f   : > { %8588 = vmatpush1.bf16.msra.mxu0 %v14006_v45  ;;  %7927 = vmatprep.subr.bf16.mxu1 %v14011_v19  ;;  %v14062_v45 = vld [vmem:[#allocation6 + $0x154] ss:$8 sps:$4 sm:$0xff]   ;;  %v14057_v19 = vld [vmem:[#allocation6 + $0x650] ss:$8 sps:$4 sm:$0xff]  }
 0x750   : > { %8589 = vmatprep.subr.bf16.mxu0 %v14014_v14  ;;  %v14060_v14 = vld [vmem:[#allocation6 + $0x150] ss:$8 sps:$4 sm:$0xff]  }
 0x752   : > { %7928 = vmatpush1.bf16.msra.mxu1 %v14009_v17  ;;  %v14065_v17 = vld [vmem:[#allocation6 + $0x664] ss:$8 sps:$4 sm:$0xff]  }
 0x753   : > { %8590 = vmatpush1.bf16.msra.mxu0 %v14012_v25  ;;  %7929 = vmatprep.subr.bf16.mxu1 %v14017_v40  ;;  %v14068_v25 = vld [vmem:[#allocation6 + $0x164] ss:$8 sps:$4 sm:$0xff]   ;;  %v14063_v40 = vld [vmem:[#allocation6 + $0x660] ss:$8 sps:$4 sm:$0xff]  }
 0x754   : > { %8591 = vmatprep.subr.bf16.mxu0 %v14020_v29  ;;  %v14066_v29 = vld [vmem:[#allocation6 + $0x160] ss:$8 sps:$4 sm:$0xff]  }
 0x756   : > { %7930 = vmatpush1.bf16.msra.mxu1 %v14015_v10  ;;  %v14071_v10 = vld [vmem:[#allocation6 + $0x674] ss:$8 sps:$4 sm:$0xff]  }
 0x757   : > { %8592 = vmatpush1.bf16.msra.mxu0 %v14018_v3  ;;  %7931 = vmatprep.subr.bf16.mxu1 %v14023_v56  ;;  %v14074_v3 = vld [vmem:[#allocation6 + $0x174] ss:$8 sps:$4 sm:$0xff]   ;;  %v14069_v56 = vld [vmem:[#allocation6 + $0x670] ss:$8 sps:$4 sm:$0xff]  }
 0x758   : > { %8593 = vmatprep.subr.bf16.mxu0 %v14026_v43  ;;  %v14072_v43 = vld [vmem:[#allocation6 + $0x170] ss:$8 sps:$4 sm:$0xff]  }
 0x75a   : > { %7932 = vmatpush1.bf16.msra.mxu1 %v14021_v13  ;;  %v7248_v13 = vrot.slane %v7246_v57, 1  ;;  %v14084_v57 = vld [vmem:[#allocation6 + $0x1b0] ss:$8 sps:$4 sm:$0xff]  }
 0x75b   : > { %8594 = vmatpush1.bf16.msra.mxu0 %v14024_v27  ;;  %7933 = vmatprep.subr.bf16.mxu1 %v14029_v15  ;;  %v14077_v27 = vld [vmem:[#allocation6 + $0x184] ss:$8 sps:$4 sm:$0xff]  }
 0x75c   : > { %8606 = vmatprep.subr.bf16.mxu0 %v14032_v12  ;;  %v7249_v15 = vor.u32 %v7248_v13, %v7244_v18  ;;  %v14075_v12 = vld [vmem:[#allocation6 + $0x180] ss:$8 sps:$4 sm:$0xff]   ;;  %v14092_v18 = vld [vmem:[#allocation6 + $0x1d4] ss:$8 sps:$4 sm:$0xff]  }
 0x75d   : > { %v14128_v13 = vld [vmem:[#allocation6 + $0x294] ss:$8 sps:$4 sm:$0xff]  }
 0x75e   : > { %8596 = vmatmul.mubr.bf16.vlgmr.msra.gmra.mrb[20].mxu0 %v15902_v62  ;;  %7934 = vmatpush1.bf16.msra.mxu1 %v14027_v63  ;;  %v14080_v63 = vld [vmem:[#allocation6 + $0x194] ss:$8 sps:$4 sm:$0xff]  }
 0x75f   : > { %8607 = vmatpush1.bf16.msra.mxu0 %v14030_v37  ;;  %8638 = vmatprep.mubr.bf16.mxu0 %v15846_v53  ;;  %v14078_v37 = vld [vmem:[#allocation6 + $0x190] ss:$8 sps:$4 sm:$0xff]  }
 0x760   : > { %7935 = vmatprep.subr.bf16.mxu1 %v14035_v34  ;;  %8608 = vmatprep.subr.bf16.mxu0 %v14038_v6  ;;  %v14083_v34 = vld [vmem:[#allocation6 + $0x1a4] ss:$8 sps:$4 sm:$0xff]   ;;  %v14081_v6 = vld [vmem:[#allocation6 + $0x1a0] ss:$8 sps:$4 sm:$0xff]  }
 0x762   : > { %7936 = vmatpush1.bf16.msra.mxu1 %v14033_v21  ;;  %v14086_v21 = vld [vmem:[#allocation6 + $0x1b4] ss:$8 sps:$4 sm:$0xff]  }
 0x763   : > { %8609 = vmatpush1.bf16.msra.mxu0 %v14036_v23  ;;  %7937 = vmatprep.subr.bf16.mxu1 %v14041_v55  ;;  %v14089_v23 = vld [vmem:[#allocation6 + $0x1c4] ss:$8 sps:$4 sm:$0xff]   ;;  %v14087_v55 = vld [vmem:[#allocation6 + $0x1c0] ss:$8 sps:$4 sm:$0xff]  }
 0x764   : > { %8610 = vmatprep.subr.bf16.mxu0 %v14044_v50  ;;  %v14090_v50 = vld [vmem:[#allocation6 + $0x1d0] ss:$8 sps:$4 sm:$0xff]  }
 0x766   : > { %7938 = vmatpush1.bf16.msra.mxu1 %v14039_v11  ;;  %v14095_v11 = vld [vmem:[#allocation6 + $0x1e4] ss:$8 sps:$4 sm:$0xff]  }
 0x767   : > { %8611 = vmatpush1.bf16.msra.mxu0 %v14042_v48  ;;  %7939 = vmatprep.subr.bf16.mxu1 %v14047_v61  ;;  %v14093_v48 = vld [vmem:[#allocation6 + $0x1e0] ss:$8 sps:$4 sm:$0xff]   ;;  %v14098_v61 = vld [vmem:[#allocation6 + $0x1f4] ss:$8 sps:$4 sm:$0xff]  }
 0x768   : > { %8612 = vmatprep.subr.bf16.mxu0 %v14050_v46  ;;  %v14096_v46 = vld [vmem:[#allocation6 + $0x1f0] ss:$8 sps:$4 sm:$0xff]  }
 0x76a   : > { %7940 = vmatpush1.bf16.msra.mxu1 %v14045_v7  ;;  %v14101_v7 = vld [vmem:[#allocation6 + $0x204] ss:$8 sps:$4 sm:$0xff]  }
 0x76b   : > { %8613 = vmatpush1.bf16.msra.mxu0 %v14048_v44  ;;  %7941 = vmatprep.subr.bf16.mxu1 %v14053_v35  ;;  %v14099_v44 = vld [vmem:[#allocation6 + $0x200] ss:$8 sps:$4 sm:$0xff]   ;;  %v14104_v35 = vld [vmem:[#allocation6 + $0x214] ss:$8 sps:$4 sm:$0xff]  }
 0x76c   : > { %8614 = vmatprep.subr.bf16.mxu0 %v14056_v60  ;;  %v14102_v60 = vld [vmem:[#allocation6 + $0x210] ss:$8 sps:$4 sm:$0xff]  }
 0x76e   : > { %7942 = vmatpush1.bf16.msra.mxu1 %v14051_v0  ;;  %v14107_v0 = vld [vmem:[#allocation6 + $0x224] ss:$8 sps:$4 sm:$0xff]  }
 0x76f   : > { %8615 = vmatpush1.bf16.msra.mxu0 %v14054_v1  ;;  %7943 = vmatprep.subr.bf16.mxu1 %v14059_v31  ;;  %v14105_v1 = vld [vmem:[#allocation6 + $0x220] ss:$8 sps:$4 sm:$0xff]   ;;  %v14110_v31 = vld [vmem:[#allocation6 + $0x234] ss:$8 sps:$4 sm:$0xff]  }
 0x770   : > { %8616 = vmatprep.subr.bf16.mxu0 %v14062_v45  ;;  %v14108_v45 = vld [vmem:[#allocation6 + $0x230] ss:$8 sps:$4 sm:$0xff]  }
 0x772   : > { %7944 = vmatpush1.bf16.msra.mxu1 %v14057_v19  ;;  %v14113_v19 = vld [vmem:[#allocation6 + $0x244] ss:$8 sps:$4 sm:$0xff]  }
 0x773   : > { %8617 = vmatpush1.bf16.msra.mxu0 %v14060_v14  ;;  %7945 = vmatprep.subr.bf16.mxu1 %v14065_v17  ;;  %v14111_v14 = vld [vmem:[#allocation6 + $0x240] ss:$8 sps:$4 sm:$0xff]   ;;  %v14116_v17 = vld [vmem:[#allocation6 + $0x254] ss:$8 sps:$4 sm:$0xff]  }
 0x774   : > { %8618 = vmatprep.subr.bf16.mxu0 %v14068_v25  ;;  %v14114_v25 = vld [vmem:[#allocation6 + $0x250] ss:$8 sps:$4 sm:$0xff]  }
 0x776   : > { %7946 = vmatpush1.bf16.msra.mxu1 %v14063_v40  ;;  %v14119_v40 = vld [vmem:[#allocation6 + $0x264] ss:$8 sps:$4 sm:$0xff]  }
 0x777   : > { %8619 = vmatpush1.bf16.msra.mxu0 %v14066_v29  ;;  %7947 = vmatprep.subr.bf16.mxu1 %v14071_v10  ;;  %v14117_v29 = vld [vmem:[#allocation6 + $0x260] ss:$8 sps:$4 sm:$0xff]   ;;  %v14122_v10 = vld [vmem:[#allocation6 + $0x274] ss:$8 sps:$4 sm:$0xff]  }
 0x778   : > { %8620 = vmatprep.subr.bf16.mxu0 %v14074_v3  ;;  %v14120_v3 = vld [vmem:[#allocation6 + $0x270] ss:$8 sps:$4 sm:$0xff]  }
 0x77a   : > { %7948 = vmatpush1.bf16.msra.mxu1 %v14069_v56  ;;  %v14125_v56 = vld [vmem:[#allocation6 + $0x284] ss:$8 sps:$4 sm:$0xff]  }
 0x77b   : > { %8621 = vmatpush1.bf16.msra.mxu0 %v14072_v43  ;;  %v14123_v43 = vld [vmem:[#allocation6 + $0x280] ss:$8 sps:$4 sm:$0xff]  }
 0x77c   : > { %8622 = vmatprep.subr.bf16.mxu0 %v14077_v27  ;;  %v14126_v27 = vld [vmem:[#allocation6 + $0x290] ss:$8 sps:$4 sm:$0xff]  }
 0x77d   : > { %7950 = vmatmul.mubr.bf16.vlgmr.msra.gmra.mrb[40].mxu1 %v7249_v15  ;;  %v14131_v15 = vld [vmem:[#allocation6 + $0x2a4] ss:$8 sps:$4 sm:$0xff]  }
 0x77f   : > { %8623 = vmatpush1.bf16.msra.mxu0 %v14075_v12  ;;  %v14129_v12 = vld [vmem:[#allocation6 + $0x2a0] ss:$8 sps:$4 sm:$0xff]  }
 0x780   : > { %8624 = vmatprep.subr.bf16.mxu0 %v14080_v63  ;;  %v14134_v63 = vld [vmem:[#allocation6 + $0x2b4] ss:$8 sps:$4 sm:$0xff]  }
 0x783   : > { %8625 = vmatpush1.bf16.msra.mxu0 %v14078_v37  ;;  %v14132_v37 = vld [vmem:[#allocation6 + $0x2b0] ss:$8 sps:$4 sm:$0xff]  }
 0x784   : > { %8626 = vmatprep.subr.bf16.mxu0 %v14083_v34  ;;  %v14137_v34 = vld [vmem:[#allocation6 + $0x2c4] ss:$8 sps:$4 sm:$0xff]  }
 0x787   : > { %8627 = vmatpush1.bf16.msra.mxu0 %v14081_v6  ;;  %v14135_v6 = vld [vmem:[#allocation6 + $0x2c0] ss:$8 sps:$4 sm:$0xff]  }
 0x788   : > { %8628 = vmatprep.subr.bf16.mxu0 %v14086_v21  ;;  %v14140_v21 = vld [vmem:[#allocation6 + $0x2d4] ss:$8 sps:$4 sm:$0xff]  }
 0x78b   : > { %8629 = vmatpush1.bf16.msra.mxu0 %v14084_v57  ;;  %v14138_v57 = vld [vmem:[#allocation6 + $0x2d0] ss:$8 sps:$4 sm:$0xff]  }
 0x78c   : > { %8630 = vmatprep.subr.bf16.mxu0 %v14089_v23  ;;  %v14143_v23 = vld [vmem:[#allocation6 + $0x2e4] ss:$8 sps:$4 sm:$0xff]  }
 0x78f   : > { %8631 = vmatpush1.bf16.msra.mxu0 %v14087_v55  ;;  %v14141_v55 = vld [vmem:[#allocation6 + $0x2e0] ss:$8 sps:$4 sm:$0xff]  }
 0x790   : > { %8632 = vmatprep.subr.bf16.mxu0 %v14092_v18  ;;  %v14146_v18 = vld [vmem:[#allocation6 + $0x2f4] ss:$8 sps:$4 sm:$0xff]  }
 0x793   : > { %8633 = vmatpush1.bf16.msra.mxu0 %v14090_v50  ;;  %v14144_v50 = vld [vmem:[#allocation6 + $0x2f0] ss:$8 sps:$4 sm:$0xff]  }
 0x794   : > { %8634 = vmatprep.subr.bf16.mxu0 %v14095_v11  ;;  %v14149_v11 = vld [vmem:[#allocation6 + $0x304] ss:$8 sps:$4 sm:$0xff]  }
 0x797   : > { %8635 = vmatpush1.bf16.msra.mxu0 %v14093_v48  ;;  %v14147_v48 = vld [vmem:[#allocation6 + $0x300] ss:$8 sps:$4 sm:$0xff]  }
 0x798   : > { %8636 = vmatprep.subr.bf16.mxu0 %v14098_v61  ;;  %v14152_v61 = vld [vmem:[#allocation6 + $0x314] ss:$8 sps:$4 sm:$0xff]  }
 0x79b   : > { %8637 = vmatpush1.bf16.msra.mxu0 %v14096_v46  ;;  %v14150_v46 = vld [vmem:[#allocation6 + $0x310] ss:$8 sps:$4 sm:$0xff]  }
 0x79c   : > { %8649 = vmatprep.subr.bf16.mxu0 %v14101_v7  ;;  %v16106_v7 = vmov 0  }
 0x79e   : > { %8639 = vmatmul.mubr.bf16.vlgmr.msra.gmra.mrb[20].mxu0 %v15934_v59 }
 0x79f   : > { %8650 = vmatpush1.bf16.msra.mxu0 %v14099_v44  ;;  %8681 = vmatprep.mubr.bf16.mxu0 %v15980_v47  ;;  %v14155_v44 = vld [vmem:[#allocation6 + $0x324] ss:$8 sps:$4 sm:$0xff]  }
 0x7a0   : > { %8651 = vmatprep.subr.bf16.mxu0 %v14104_v35  ;;  %v14153_v35 = vld [vmem:[#allocation6 + $0x320] ss:$8 sps:$4 sm:$0xff]  }
 0x7a3   : > { %8652 = vmatpush1.bf16.msra.mxu0 %v14102_v60  ;;  %v14158_v60 = vld [vmem:[#allocation6 + $0x334] ss:$8 sps:$4 sm:$0xff]  }
 0x7a4   : > { %8653 = vmatprep.subr.bf16.mxu0 %v14107_v0  ;;  %v14156_v0 = vld [vmem:[#allocation6 + $0x330] ss:$8 sps:$4 sm:$0xff]  }
 0x7a7   : > { %8654 = vmatpush1.bf16.msra.mxu0 %v14105_v1  ;;  %v14161_v1 = vld [vmem:[#allocation6 + $0x344] ss:$8 sps:$4 sm:$0xff]  }
 0x7a8   : > { %8655 = vmatprep.subr.bf16.mxu0 %v14110_v31  ;;  %v14159_v31 = vld [vmem:[#allocation6 + $0x340] ss:$8 sps:$4 sm:$0xff]  }
 0x7ab   : > { %8656 = vmatpush1.bf16.msra.mxu0 %v14108_v45  ;;  %v14164_v45 = vld [vmem:[#allocation6 + $0x354] ss:$8 sps:$4 sm:$0xff]  }
 0x7ac   : > { %8657 = vmatprep.subr.bf16.mxu0 %v14113_v19  ;;  %v14162_v19 = vld [vmem:[#allocation6 + $0x350] ss:$8 sps:$4 sm:$0xff]  }
 0x7af   : > { %8658 = vmatpush1.bf16.msra.mxu0 %v14111_v14  ;;  %v14167_v14 = vld [vmem:[#allocation6 + $0x364] ss:$8 sps:$4 sm:$0xff]  }
 0x7b0   : > { %8659 = vmatprep.subr.bf16.mxu0 %v14116_v17  ;;  %v14165_v17 = vld [vmem:[#allocation6 + $0x360] ss:$8 sps:$4 sm:$0xff]  }
 0x7b3   : > { %8660 = vmatpush1.bf16.msra.mxu0 %v14114_v25  ;;  %v14170_v25 = vld [vmem:[#allocation6 + $0x374] ss:$8 sps:$4 sm:$0xff]  }
 0x7b4   : > { %8661 = vmatprep.subr.bf16.mxu0 %v14119_v40  ;;  %v14168_v40 = vld [vmem:[#allocation6 + $0x370] ss:$8 sps:$4 sm:$0xff]  }
 0x7b7   : > { %8662 = vmatpush1.bf16.msra.mxu0 %v14117_v29  ;;  %v14173_v29 = vld [vmem:[#allocation6 + $0x704] ss:$8 sps:$4 sm:$0xff]  }
 0x7b8   : > { %8663 = vmatprep.subr.bf16.mxu0 %v14122_v10  ;;  %v14171_v10 = vld [vmem:[#allocation6 + $0x700] ss:$8 sps:$4 sm:$0xff]  }
 0x7bb   : > { %8664 = vmatpush1.bf16.msra.mxu0 %v14120_v3  ;;  %v14176_v3 = vld [vmem:[#allocation6 + $0x714] ss:$8 sps:$4 sm:$0xff]  }
 0x7bc   : > { %8665 = vmatprep.subr.bf16.mxu0 %v14125_v56  ;;  %v8856_v56 = vrot.slane %v15932_v51, 1 }
 0x7bf   : > { %8666 = vmatpush1.bf16.msra.mxu0 %v14123_v43  ;;  %v14174_v43 = vld [vmem:[#allocation6 + $0x710] ss:$8 sps:$4 sm:$0xff]  }
 0x7c0   : > { %8667 = vmatprep.subr.bf16.mxu0 %v14128_v13  ;;  %v14179_v13 = vld [vmem:[#allocation6 + $0x724] ss:$8 sps:$4 sm:$0xff]  }
 0x7c3   : > { %8668 = vmatpush1.bf16.msra.mxu0 %v14126_v27  ;;  %v14177_v27 = vld [vmem:[#allocation6 + $0x720] ss:$8 sps:$4 sm:$0xff]  }
 0x7c4   : > { %8669 = vmatprep.subr.bf16.mxu0 %v14131_v15  ;;  %v14182_v15 = vld [vmem:[#allocation6 + $0x734] ss:$8 sps:$4 sm:$0xff]  }
 0x7c7   : > { %8670 = vmatpush1.bf16.msra.mxu0 %v14129_v12  ;;  %v14180_v12 = vld [vmem:[#allocation6 + $0x730] ss:$8 sps:$4 sm:$0xff]  }
 0x7c8   : > { %8671 = vmatprep.subr.bf16.mxu0 %v14134_v63  ;;  %v14185_v63 = vld [vmem:[#allocation6 + $0x744] ss:$8 sps:$4 sm:$0xff]  }
 0x7cb   : > { %8672 = vmatpush1.bf16.msra.mxu0 %v14132_v37  ;;  %v14183_v37 = vld [vmem:[#allocation6 + $0x740] ss:$8 sps:$4 sm:$0xff]  }
 0x7cc   : > { %8673 = vmatprep.subr.bf16.mxu0 %v14137_v34  ;;  %v14188_v34 = vld [vmem:[#allocation6 + $0x754] ss:$8 sps:$4 sm:$0xff]  }
 0x7cf   : > { %8674 = vmatpush1.bf16.msra.mxu0 %v14135_v6  ;;  %v14186_v6 = vld [vmem:[#allocation6 + $0x750] ss:$8 sps:$4 sm:$0xff]  }
 0x7d0   : > { %8675 = vmatprep.subr.bf16.mxu0 %v14140_v21  ;;  %v14191_v21 = vld [vmem:[#allocation6 + $0x764] ss:$8 sps:$4 sm:$0xff]  }
 0x7d3   : > { %8676 = vmatpush1.bf16.msra.mxu0 %v14138_v57  ;;  %v14189_v57 = vld [vmem:[#allocation6 + $0x760] ss:$8 sps:$4 sm:$0xff]  }
 0x7d4   : > { %8677 = vmatprep.subr.bf16.mxu0 %v14143_v23  ;;  %v14194_v23 = vld [vmem:[#allocation6 + $0x774] ss:$8 sps:$4 sm:$0xff]  }
 0x7d7   : > { %8678 = vmatpush1.bf16.msra.mxu0 %v14141_v55  ;;  %v14192_v55 = vld [vmem:[#allocation6 + $0x770] ss:$8 sps:$4 sm:$0xff]  }
 0x7d8   : > { %8679 = vmatprep.subr.bf16.mxu0 %v14146_v18  ;;  %v14197_v18 = vld [vmem:[#allocation6 + $0x784] ss:$8 sps:$4 sm:$0xff]  }
 0x7db   : > { %8680 = vmatpush1.bf16.msra.mxu0 %v14144_v50  ;;  %v14195_v50 = vld [vmem:[#allocation6 + $0x780] ss:$8 sps:$4 sm:$0xff]  }
 0x7dc   : > { %8692 = vmatprep.subr.bf16.mxu0 %v14149_v11  ;;  %v14200_v11 = vld [vmem:[#allocation6 + $0x794] ss:$8 sps:$4 sm:$0xff]  }
 0x7de   : > { %8682 = vmatmul.mubr.bf16.vlgmr.msra.gmra.mrb[20].mxu0 %v15874_v32 }
 0x7df   : > { %8693 = vmatpush1.bf16.msra.mxu0 %v14147_v48  ;;  %8724 = vmatprep.mubr.bf16.mxu0 %v16106_v7  ;;  %v14198_v48 = vld [vmem:[#allocation6 + $0x790] ss:$8 sps:$4 sm:$0xff]  }
 0x7e0   : > { %8694 = vmatprep.subr.bf16.mxu0 %v14152_v61  ;;  %v14203_v61 = vld [vmem:[#allocation6 + $0x7a4] ss:$8 sps:$4 sm:$0xff]  }
 0x7e3   : > { %8695 = vmatpush1.bf16.msra.mxu0 %v14150_v46  ;;  %v14201_v46 = vld [vmem:[#allocation6 + $0x7a0] ss:$8 sps:$4 sm:$0xff]  }
 0x7e4   : > { %8696 = vmatprep.subr.bf16.mxu0 %v14155_v44  ;;  %v14206_v44 = vld [vmem:[#allocation6 + $0x7b4] ss:$8 sps:$4 sm:$0xff]  }
 0x7e7   : > { %8697 = vmatpush1.bf16.msra.mxu0 %v14153_v35  ;;  %v14204_v35 = vld [vmem:[#allocation6 + $0x7b0] ss:$8 sps:$4 sm:$0xff]  }
 0x7e8   : > { %8698 = vmatprep.subr.bf16.mxu0 %v14158_v60  ;;  %v14209_v60 = vld [vmem:[#allocation6 + $0x7c4] ss:$8 sps:$4 sm:$0xff]  }
 0x7eb   : > { %8699 = vmatpush1.bf16.msra.mxu0 %v14156_v0  ;;  %v14207_v0 = vld [vmem:[#allocation6 + $0x7c0] ss:$8 sps:$4 sm:$0xff]  }
 0x7ec   : > { %8700 = vmatprep.subr.bf16.mxu0 %v14161_v1  ;;  %v14212_v1 = vld [vmem:[#allocation6 + $0x7d4] ss:$8 sps:$4 sm:$0xff]  }
 0x7ef   : > { %8701 = vmatpush1.bf16.msra.mxu0 %v14159_v31  ;;  %v14210_v31 = vld [vmem:[#allocation6 + $0x7d0] ss:$8 sps:$4 sm:$0xff]  }
 0x7f0   : > { %8702 = vmatprep.subr.bf16.mxu0 %v14164_v45  ;;  %v14215_v45 = vld [vmem:[#allocation6 + $0x7e4] ss:$8 sps:$4 sm:$0xff]  }
 0x7f3   : > { %8703 = vmatpush1.bf16.msra.mxu0 %v14162_v19  ;;  %v14213_v19 = vld [vmem:[#allocation6 + $0x7e0] ss:$8 sps:$4 sm:$0xff]  }
 0x7f4   : > { %8704 = vmatprep.subr.bf16.mxu0 %v14167_v14  ;;  %v14218_v14 = vld [vmem:[#allocation6 + $0x7f4] ss:$8 sps:$4 sm:$0xff]  }
 0x7f7   : > { %8705 = vmatpush1.bf16.msra.mxu0 %v14165_v17  ;;  %v14216_v17 = vld [vmem:[#allocation6 + $0x7f0] ss:$8 sps:$4 sm:$0xff]  }
 0x7f8   : > { %8706 = vmatprep.subr.bf16.mxu0 %v14170_v25  ;;  %v14221_v25 = vld [vmem:[#allocation6 + $0x804] ss:$8 sps:$4 sm:$0xff]  }
 0x7fb   : > { %8707 = vmatpush1.bf16.msra.mxu0 %v14168_v40  ;;  %v14219_v40 = vld [vmem:[#allocation6 + $0x800] ss:$8 sps:$4 sm:$0xff]  }
 0x7fc   : > { %9429 = vmatprep.subr.bf16.mxu0 %v14173_v29  ;;  %v8855_v29 = vrot.slane %v15902_v62, 1 }
 0x7fe   : > { %8725 = vmatmul.mubr.bf16.vlgmr.msra.gmra.mrb[20].mxu0 %v15982_v9 }
 0x7ff   : > { %9430 = vmatpush1.bf16.msra.mxu0 %v14171_v10  ;;  %9461 = vmatprep.mubr.bf16.mxu0 %v8856_v56  ;;  %v14224_v10 = vld [vmem:[#allocation6 + $0x814] ss:$8 sps:$4 sm:$0xff]   ;;  %v14222_v56 = vld [vmem:[#allocation6 + $0x810] ss:$8 sps:$4 sm:$0xff]  }
 0x800   : > { %9431 = vmatprep.subr.bf16.mxu0 %v14176_v3  ;;  %v8858_v3 = vrot.slane %v15846_v53, 1 }
 0x803   : > { %9432 = vmatpush1.bf16.msra.mxu0 %v14174_v43  ;;  %v14227_v43 = vld [vmem:[#allocation6 + $0x824] ss:$8 sps:$4 sm:$0xff]  }
 0x804   : > { %9433 = vmatprep.subr.bf16.mxu0 %v14179_v13  ;;  %v14225_v13 = vld [vmem:[#allocation6 + $0x820] ss:$8 sps:$4 sm:$0xff]  }
 0x807   : > { %9434 = vmatpush1.bf16.msra.mxu0 %v14177_v27  ;;  %v14230_v27 = vld [vmem:[#allocation6 + $0x834] ss:$8 sps:$4 sm:$0xff]  }
 0x808   : > { %9435 = vmatprep.subr.bf16.mxu0 %v14182_v15  ;;  %v14228_v15 = vld [vmem:[#allocation6 + $0x830] ss:$8 sps:$4 sm:$0xff]  }
 0x80b   : > { %9436 = vmatpush1.bf16.msra.mxu0 %v14180_v12  ;;  %v14233_v12 = vld [vmem:[#allocation6 + $0x844] ss:$8 sps:$4 sm:$0xff]  }
 0x80c   : > { %9437 = vmatprep.subr.bf16.mxu0 %v14185_v63  ;;  %v14231_v63 = vld [vmem:[#allocation6 + $0x840] ss:$8 sps:$4 sm:$0xff]  }
 0x80f   : > { %9438 = vmatpush1.bf16.msra.mxu0 %v14183_v37  ;;  %v14236_v37 = vld [vmem:[#allocation6 + $0x854] ss:$8 sps:$4 sm:$0xff]  }
 0x810   : > { %9439 = vmatprep.subr.bf16.mxu0 %v14188_v34  ;;  %v14234_v34 = vld [vmem:[#allocation6 + $0x850] ss:$8 sps:$4 sm:$0xff]  }
 0x813   : > { %9440 = vmatpush1.bf16.msra.mxu0 %v14186_v6 }
 0x814   : > { %9441 = vmatprep.subr.bf16.mxu0 %v14191_v21  ;;  %v14239_v21 = vld [vmem:[#allocation6 + $0x864] ss:$8 sps:$4 sm:$0xff]  }
 0x817   : > { %9442 = vmatpush1.bf16.msra.mxu0 %v14189_v57 }
 0x818   : > { %9443 = vmatprep.subr.bf16.mxu0 %v14194_v23 }
 0x81b   : > { %9444 = vmatpush1.bf16.msra.mxu0 %v14192_v55 }
 0x81c   : > { %9445 = vmatprep.subr.bf16.mxu0 %v14197_v18  ;;  %v14237_v18 = vld [vmem:[#allocation6 + $0x860] ss:$8 sps:$4 sm:$0xff]  }
 0x81f   : > { %9446 = vmatpush1.bf16.msra.mxu0 %v14195_v50  ;;  %v14242_v50 = vld [vmem:[#allocation6 + $0x874] ss:$8 sps:$4 sm:$0xff]  }
 0x820   : > { %9447 = vmatprep.subr.bf16.mxu0 %v14200_v11  ;;  %v14240_v11 = vld [vmem:[#allocation6 + $0x870] ss:$8 sps:$4 sm:$0xff]  }
 0x823   : > { %9448 = vmatpush1.bf16.msra.mxu0 %v14198_v48  ;;  %v14245_v48 = vld [vmem:[#allocation6 + $0x884] ss:$8 sps:$4 sm:$0xff]  }
 0x824   : > { %9449 = vmatprep.subr.bf16.mxu0 %v14203_v61  ;;  %v14243_v61 = vld [vmem:[#allocation6 + $0x880] ss:$8 sps:$4 sm:$0xff]  }
 0x827   : > { %9450 = vmatpush1.bf16.msra.mxu0 %v14201_v46  ;;  %v14248_v46 = vld [vmem:[#allocation6 + $0x894] ss:$8 sps:$4 sm:$0xff]  }
 0x828   : > { %9451 = vmatprep.subr.bf16.mxu0 %v14206_v44  ;;  %v14246_v44 = vld [vmem:[#allocation6 + $0x890] ss:$8 sps:$4 sm:$0xff]  }
 0x82b   : > { %9452 = vmatpush1.bf16.msra.mxu0 %v14204_v35  ;;  %v14251_v35 = vld [vmem:[#allocation6 + $0x8a4] ss:$8 sps:$4 sm:$0xff]  }
 0x82c   : > { %9453 = vmatprep.subr.bf16.mxu0 %v14209_v60  ;;  %v14249_v60 = vld [vmem:[#allocation6 + $0x8a0] ss:$8 sps:$4 sm:$0xff]  }
 0x82f   : > { %9454 = vmatpush1.bf16.msra.mxu0 %v14207_v0  ;;  %v14254_v0 = vld [vmem:[#allocation6 + $0x8b4] ss:$8 sps:$4 sm:$0xff]  }
 0x830   : > { %9455 = vmatprep.subr.bf16.mxu0 %v14212_v1  ;;  %v14252_v1 = vld [vmem:[#allocation6 + $0x8b0] ss:$8 sps:$4 sm:$0xff]  }
 0x833   : > { %9456 = vmatpush1.bf16.msra.mxu0 %v14210_v31  ;;  %v14257_v31 = vld [vmem:[#allocation6 + $0x8c4] ss:$8 sps:$4 sm:$0xff]  }
 0x834   : > { %9457 = vmatprep.subr.bf16.mxu0 %v14215_v45  ;;  %v14255_v45 = vld [vmem:[#allocation6 + $0x8c0] ss:$8 sps:$4 sm:$0xff]  }
 0x837   : > { %9458 = vmatpush1.bf16.msra.mxu0 %v14213_v19  ;;  %v14260_v19 = vld [vmem:[#allocation6 + $0x8d4] ss:$8 sps:$4 sm:$0xff]  }
 0x838   : > { %9459 = vmatprep.subr.bf16.mxu0 %v14218_v14  ;;  %v14258_v14 = vld [vmem:[#allocation6 + $0x8d0] ss:$8 sps:$4 sm:$0xff]  }
 0x83b   : > { %9460 = vmatpush1.bf16.msra.mxu0 %v14216_v17  ;;  %v14263_v17 = vld [vmem:[#allocation6 + $0x8e4] ss:$8 sps:$4 sm:$0xff]  }
 0x83c   : > { %9472 = vmatprep.subr.bf16.mxu0 %v14221_v25  ;;  %v14261_v25 = vld [vmem:[#allocation6 + $0x8e0] ss:$8 sps:$4 sm:$0xff]  }
 0x83e   : > { %9462 = vmatmul.mubr.bf16.vlgmr.msra.gmra.mrb[20].mxu0 %v8855_v29  ;;  %v14264_v29 = vld [vmem:[#allocation6 + $0x8f0] ss:$8 sps:$4 sm:$0xff]  }
 0x83f   : > { %9473 = vmatpush1.bf16.msra.mxu0 %v14219_v40  ;;  %9504 = vmatprep.mubr.bf16.mxu0 %v8858_v3  ;;  %v14266_v40 = vld [vmem:[#allocation6 + $0x8f4] ss:$8 sps:$4 sm:$0xff]   ;;  %v14267_v3 = vld [vmem:[#allocation6 + $0x900] ss:$8 sps:$4 sm:$0xff]  }
 0x840   : > { %9474 = vmatprep.subr.bf16.mxu0 %v14224_v10  ;;  %v14269_v10 = vld [vmem:[#allocation6 + $0x904] ss:$8 sps:$4 sm:$0xff]  }
 0x843   : > { %9475 = vmatpush1.bf16.msra.mxu0 %v14222_v56  ;;  %v8857_v56 = vrot.slane %v15934_v59, 1 }
 0x844   : > { %9476 = vmatprep.subr.bf16.mxu0 %v14227_v43  ;;  %v14272_v43 = vld [vmem:[#allocation6 + $0x914] ss:$8 sps:$4 sm:$0xff]  }
 0x847   : > { %9477 = vmatpush1.bf16.msra.mxu0 %v14225_v13  ;;  %v8860_v13 = vrot.slane %v15980_v47, 1 }
 0x848   : > { %9478 = vmatprep.subr.bf16.mxu0 %v14230_v27  ;;  %v14270_v27 = vld [vmem:[#allocation6 + $0x910] ss:$8 sps:$4 sm:$0xff]  }
 0x84b   : > { %9479 = vmatpush1.bf16.msra.mxu0 %v14228_v15  ;;  %v14275_v15 = vld [vmem:[#allocation6 + $0x924] ss:$8 sps:$4 sm:$0xff]  }
 0x84c   : > { %9480 = vmatprep.subr.bf16.mxu0 %v14233_v12  ;;  %v14273_v12 = vld [vmem:[#allocation6 + $0x920] ss:$8 sps:$4 sm:$0xff]  }
 0x84f   : > { %9481 = vmatpush1.bf16.msra.mxu0 %v14231_v63  ;;  %v14278_v63 = vld [vmem:[#allocation6 + $0x934] ss:$8 sps:$4 sm:$0xff]  }
 0x850   : > { %v16027_v6 = vpop.f32.mrb[40].mxu1  ;;  %9482 = vmatprep.subr.bf16.mxu0 %v14236_v37  ;;  %v14276_v37 = vld [vmem:[#allocation6 + $0x930] ss:$8 sps:$4 sm:$0xff]  }
 0x851   : > { %v16029_v57 = vpop.f32.mrb[41].mxu1 }
 0x852   : > { %v16031_v23 = vpop.f32.mrb[42].mxu1 }
 0x853   : > { %9483 = vmatpush1.bf16.msra.mxu0 %v14234_v34  ;;  %v16033_v55 = vpop.f32.mrb[43].mxu1  ;;  %v14281_v34 = vld [vmem:[#allocation6 + $0x944] ss:$8 sps:$4 sm:$0xff]  }
 0x854   : > { %9484 = vmatprep.subr.bf16.mxu0 %v14239_v21  ;;  %v14279_v21 = vld [vmem:[#allocation6 + $0x940] ss:$8 sps:$4 sm:$0xff]  }
 0x857   : > { %9485 = vmatpush1.bf16.msra.mxu0 %v14237_v18  ;;  %v14284_v18 = vld [vmem:[#allocation6 + $0x954] ss:$8 sps:$4 sm:$0xff]  }
 0x858   : > { %9486 = vmatprep.subr.bf16.mxu0 %v14242_v50  ;;  %v14282_v50 = vld [vmem:[#allocation6 + $0x950] ss:$8 sps:$4 sm:$0xff]  }
 0x85b   : > { %9487 = vmatpush1.bf16.msra.mxu0 %v14240_v11  ;;  %v14287_v11 = vld [vmem:[#allocation6 + $0x964] ss:$8 sps:$4 sm:$0xff]  }
 0x85c   : > { %9488 = vmatprep.subr.bf16.mxu0 %v14245_v48  ;;  %v14285_v48 = vld [vmem:[#allocation6 + $0x960] ss:$8 sps:$4 sm:$0xff]  }
 0x85f   : > { %9489 = vmatpush1.bf16.msra.mxu0 %v14243_v61  ;;  %v14290_v61 = vld [vmem:[#allocation6 + $0x974] ss:$8 sps:$4 sm:$0xff]  }
 0x860   : > { %9490 = vmatprep.subr.bf16.mxu0 %v14248_v46  ;;  %v14288_v46 = vld [vmem:[#allocation6 + $0x970] ss:$8 sps:$4 sm:$0xff]  }
 0x863   : > { %9491 = vmatpush1.bf16.msra.mxu0 %v14246_v44  ;;  %v14293_v44 = vld [vmem:[#allocation6 + $0x984] ss:$8 sps:$4 sm:$0xff]  }
 0x864   : > { %9492 = vmatprep.subr.bf16.mxu0 %v14251_v35  ;;  %v14291_v35 = vld [vmem:[#allocation6 + $0x980] ss:$8 sps:$4 sm:$0xff]  }
 0x867   : > { %9493 = vmatpush1.bf16.msra.mxu0 %v14249_v60  ;;  %v14296_v60 = vld [vmem:[#allocation6 + $0x994] ss:$8 sps:$4 sm:$0xff]  }
 0x868   : > { %9494 = vmatprep.subr.bf16.mxu0 %v14254_v0  ;;  %v14294_v0 = vld [vmem:[#allocation6 + $0x990] ss:$8 sps:$4 sm:$0xff]  }
 0x86b   : > { %9495 = vmatpush1.bf16.msra.mxu0 %v14252_v1  ;;  %v14299_v1 = vld [vmem:[#allocation6 + $0x9a4] ss:$8 sps:$4 sm:$0xff]  }
 0x86c   : > { %9496 = vmatprep.subr.bf16.mxu0 %v14257_v31  ;;  %v14297_v31 = vld [vmem:[#allocation6 + $0x9a0] ss:$8 sps:$4 sm:$0xff]  }
 0x86f   : > { %9497 = vmatpush1.bf16.msra.mxu0 %v14255_v45  ;;  %v14302_v45 = vld [vmem:[#allocation6 + $0x9b4] ss:$8 sps:$4 sm:$0xff]  }
 0x870   : > { %9498 = vmatprep.subr.bf16.mxu0 %v14260_v19  ;;  %v14300_v19 = vld [vmem:[#allocation6 + $0x9b0] ss:$8 sps:$4 sm:$0xff]  }
 0x873   : > { %9499 = vmatpush1.bf16.msra.mxu0 %v14258_v14  ;;  %v14305_v14 = vld [vmem:[#allocation6 + $0x9c4] ss:$8 sps:$4 sm:$0xff]  }
 0x874   : > { %9500 = vmatprep.subr.bf16.mxu0 %v14263_v17  ;;  %v14303_v17 = vld [vmem:[#allocation6 + $0x9c0] ss:$8 sps:$4 sm:$0xff]  }
 0x877   : > { %9501 = vmatpush1.bf16.msra.mxu0 %v14261_v25  ;;  %v14308_v25 = vld [vmem:[#allocation6 + $0x9d4] ss:$8 sps:$4 sm:$0xff]  }
 0x878   : > { %9502 = vmatprep.subr.bf16.mxu0 %v14266_v40  ;;  %v14306_v40 = vld [vmem:[#allocation6 + $0x9d0] ss:$8 sps:$4 sm:$0xff]  }
 0x87b   : > { %9503 = vmatpush1.bf16.msra.mxu0 %v14264_v29  ;;  %v14311_v29 = vld [vmem:[#allocation6 + $0x9e4] ss:$8 sps:$4 sm:$0xff]  }
 0x87c   : > { %9515 = vmatprep.subr.bf16.mxu0 %v14269_v10  ;;  %v14309_v10 = vld [vmem:[#allocation6 + $0x9e0] ss:$8 sps:$4 sm:$0xff]  }
 0x87e   : > { %9505 = vmatmul.mubr.bf16.vlgmr.msra.gmra.mrb[20].mxu0 %v8857_v56  ;;  %v14312_v56 = vld [vmem:[#allocation6 + $0x9f0] ss:$8 sps:$4 sm:$0xff]  }
 0x87f   : > { %9516 = vmatpush1.bf16.msra.mxu0 %v14267_v3  ;;  %9547 = vmatprep.mubr.bf16.mxu0 %v8860_v13  ;;  %v14314_v3 = vld [vmem:[#allocation6 + $0x9f4] ss:$8 sps:$4 sm:$0xff]   ;;  %v14315_v13 = vld [vmem:[#allocation6 + $0xa00] ss:$8 sps:$4 sm:$0xff]  }
 0x880   : > { %9517 = vmatprep.subr.bf16.mxu0 %v14272_v43  ;;  %v14317_v43 = vld [vmem:[#allocation6 + $0xa04] ss:$8 sps:$4 sm:$0xff]  }
 0x883   : > { %9518 = vmatpush1.bf16.msra.mxu0 %v14270_v27  ;;  %v8859_v27 = vrot.slane %v15874_v32, 1 }
 0x884   : > { %9519 = vmatprep.subr.bf16.mxu0 %v14275_v15  ;;  %v14320_v15 = vld [vmem:[#allocation6 + $0xa14] ss:$8 sps:$4 sm:$0xff]  }
 0x887   : > { %9520 = vmatpush1.bf16.msra.mxu0 %v14273_v12  ;;  %v14318_v12 = vld [vmem:[#allocation6 + $0xa10] ss:$8 sps:$4 sm:$0xff]  }
 0x888   : > { %9521 = vmatprep.subr.bf16.mxu0 %v14278_v63  ;;  %v14323_v63 = vld [vmem:[#allocation6 + $0xa24] ss:$8 sps:$4 sm:$0xff]  }
 0x88b   : > { %9522 = vmatpush1.bf16.msra.mxu0 %v14276_v37  ;;  %v14321_v37 = vld [vmem:[#allocation6 + $0xa20] ss:$8 sps:$4 sm:$0xff]  }
 0x88c   : > { %9523 = vmatprep.subr.bf16.mxu0 %v14281_v34  ;;  %v14326_v34 = vld [vmem:[#allocation6 + $0xa34] ss:$8 sps:$4 sm:$0xff]  }
 0x88f   : > { %9524 = vmatpush1.bf16.msra.mxu0 %v14279_v21  ;;  %v14324_v21 = vld [vmem:[#allocation6 + $0xa30] ss:$8 sps:$4 sm:$0xff]  }
 0x890   : > { %9525 = vmatprep.subr.bf16.mxu0 %v14284_v18  ;;  %v14329_v18 = vld [vmem:[#allocation6 + $0xa44] ss:$8 sps:$4 sm:$0xff]  }
 0x893   : > { %9526 = vmatpush1.bf16.msra.mxu0 %v14282_v50  ;;  %v14327_v50 = vld [vmem:[#allocation6 + $0xa40] ss:$8 sps:$4 sm:$0xff]  }
 0x894   : > { %9527 = vmatprep.subr.bf16.mxu0 %v14287_v11  ;;  %v14332_v11 = vld [vmem:[#allocation6 + $0xa54] ss:$8 sps:$4 sm:$0xff]  }
 0x897   : > { %9528 = vmatpush1.bf16.msra.mxu0 %v14285_v48  ;;  %v14330_v48 = vld [vmem:[#allocation6 + $0xa50] ss:$8 sps:$4 sm:$0xff]  }
 0x898   : > { %9529 = vmatprep.subr.bf16.mxu0 %v14290_v61  ;;  %v14335_v61 = vld [vmem:[#allocation6 + $0xa64] ss:$8 sps:$4 sm:$0xff]  }
 0x89b   : > { %9530 = vmatpush1.bf16.msra.mxu0 %v14288_v46  ;;  %v14333_v46 = vld [vmem:[#allocation6 + $0xa60] ss:$8 sps:$4 sm:$0xff]  }
 0x89c   : > { %9531 = vmatprep.subr.bf16.mxu0 %v14293_v44  ;;  %v14338_v44 = vld [vmem:[#allocation6 + $0xa74] ss:$8 sps:$4 sm:$0xff]  }
 0x89f   : > { %9532 = vmatpush1.bf16.msra.mxu0 %v14291_v35  ;;  %v14336_v35 = vld [vmem:[#allocation6 + $0xa70] ss:$8 sps:$4 sm:$0xff]  }
 0x8a0   : > { %9533 = vmatprep.subr.bf16.mxu0 %v14296_v60  ;;  %v14341_v60 = vld [vmem:[#allocation6 + $0xa84] ss:$8 sps:$4 sm:$0xff]  }
 0x8a3   : > { %9534 = vmatpush1.bf16.msra.mxu0 %v14294_v0  ;;  %v14339_v0 = vld [vmem:[#allocation6 + $0xa80] ss:$8 sps:$4 sm:$0xff]  }
 0x8a4   : > { %9535 = vmatprep.subr.bf16.mxu0 %v14299_v1  ;;  %v8861_v1 = vrot.slane %v15982_v9, 1 }
 0x8a7   : > { %9536 = vmatpush1.bf16.msra.mxu0 %v14297_v31  ;;  %v14344_v31 = vld [vmem:[#allocation6 + $0xa94] ss:$8 sps:$4 sm:$0xff]  }
 0x8a8   : > { %9537 = vmatprep.subr.bf16.mxu0 %v14302_v45  ;;  %v14342_v45 = vld [vmem:[#allocation6 + $0xa90] ss:$8 sps:$4 sm:$0xff]  }
 0x8ab   : > { %9538 = vmatpush1.bf16.msra.mxu0 %v14300_v19  ;;  %v14347_v19 = vld [vmem:[#allocation6 + $0xaa4] ss:$8 sps:$4 sm:$0xff]  }
 0x8ac   : > { %9539 = vmatprep.subr.bf16.mxu0 %v14305_v14  ;;  %v14345_v14 = vld [vmem:[#allocation6 + $0xaa0] ss:$8 sps:$4 sm:$0xff]  }
 0x8af   : > { %9540 = vmatpush1.bf16.msra.mxu0 %v14303_v17  ;;  %v14350_v17 = vld [vmem:[#allocation6 + $0xab4] ss:$8 sps:$4 sm:$0xff]  }
 0x8b0   : > { %9541 = vmatprep.subr.bf16.mxu0 %v14308_v25  ;;  %v14348_v25 = vld [vmem:[#allocation6 + $0xab0] ss:$8 sps:$4 sm:$0xff]  }
 0x8b3   : > { %9542 = vmatpush1.bf16.msra.mxu0 %v14306_v40  ;;  %v14353_v40 = vld [vmem:[#allocation6 + $0xac4] ss:$8 sps:$4 sm:$0xff]  }
 0x8b4   : > { %9543 = vmatprep.subr.bf16.mxu0 %v14311_v29  ;;  %v14351_v29 = vld [vmem:[#allocation6 + $0xac0] ss:$8 sps:$4 sm:$0xff]  }
 0x8b7   : > { %9544 = vmatpush1.bf16.msra.mxu0 %v14309_v10  ;;  %v14356_v10 = vld [vmem:[#allocation6 + $0xad4] ss:$8 sps:$4 sm:$0xff]  }
 0x8b8   : > { %9545 = vmatprep.subr.bf16.mxu0 %v14314_v3  ;;  %v14354_v3 = vld [vmem:[#allocation6 + $0xad0] ss:$8 sps:$4 sm:$0xff]  }
 0x8bb   : > { %9546 = vmatpush1.bf16.msra.mxu0 %v14312_v56  ;;  %v14360_v56 = vld [vmem:[#allocation6 + $0xaf0] ss:$8 sps:$4 sm:$0xff]  }
 0x8bc   : > { %9558 = vmatprep.subr.bf16.mxu0 %v14317_v43  ;;  %v14365_v43 = vld [vmem:[#allocation6 + $0xb04] ss:$8 sps:$4 sm:$0xff]  }
 0x8be   : > { %9548 = vmatmul.mubr.bf16.vlgmr.msra.gmra.mrb[20].mxu0 %v8859_v27  ;;  %v14368_v27 = vld [vmem:[#allocation6 + $0xb14] ss:$8 sps:$4 sm:$0xff]  }
 0x8bf   : > { %9559 = vmatpush1.bf16.msra.mxu0 %v14315_v13  ;;  %9590 = vmatprep.mubr.bf16.mxu0 %v16106_v7  ;;  %v14363_v13 = vld [vmem:[#allocation6 + $0xb00] ss:$8 sps:$4 sm:$0xff]  }
 0x8c0   : > { %9560 = vmatprep.subr.bf16.mxu0 %v14320_v15  ;;  %v14366_v15 = vld [vmem:[#allocation6 + $0xb10] ss:$8 sps:$4 sm:$0xff]  }
 0x8c3   : > { %9561 = vmatpush1.bf16.msra.mxu0 %v14318_v12  ;;  %v14371_v12 = vld [vmem:[#allocation6 + $0xb24] ss:$8 sps:$4 sm:$0xff]  }
 0x8c4   : > { %9562 = vmatprep.subr.bf16.mxu0 %v14323_v63  ;;  %v14369_v63 = vld [vmem:[#allocation6 + $0xb20] ss:$8 sps:$4 sm:$0xff]  }
 0x8c7   : > { %9563 = vmatpush1.bf16.msra.mxu0 %v14321_v37  ;;  %v14374_v37 = vld [vmem:[#allocation6 + $0xb34] ss:$8 sps:$4 sm:$0xff]  }
 0x8c8   : > { %9564 = vmatprep.subr.bf16.mxu0 %v14326_v34  ;;  %v14372_v34 = vld [vmem:[#allocation6 + $0xb30] ss:$8 sps:$4 sm:$0xff]  }
 0x8cb   : > { %9565 = vmatpush1.bf16.msra.mxu0 %v14324_v21  ;;  %v14377_v21 = vld [vmem:[#allocation6 + $0xb44] ss:$8 sps:$4 sm:$0xff]  }
 0x8cc   : > { %9566 = vmatprep.subr.bf16.mxu0 %v14329_v18  ;;  %v14375_v18 = vld [vmem:[#allocation6 + $0xb40] ss:$8 sps:$4 sm:$0xff]  }
 0x8cf   : > { %9567 = vmatpush1.bf16.msra.mxu0 %v14327_v50  ;;  %v14380_v50 = vld [vmem:[#allocation6 + $0xb54] ss:$8 sps:$4 sm:$0xff]  }
 0x8d0   : > { %9568 = vmatprep.subr.bf16.mxu0 %v14332_v11  ;;  %v14378_v11 = vld [vmem:[#allocation6 + $0xb50] ss:$8 sps:$4 sm:$0xff]  }
 0x8d3   : > { %9569 = vmatpush1.bf16.msra.mxu0 %v14330_v48  ;;  %v14383_v48 = vld [vmem:[#allocation6 + $0xb64] ss:$8 sps:$4 sm:$0xff]  }
 0x8d4   : > { %9570 = vmatprep.subr.bf16.mxu0 %v14335_v61  ;;  %v14381_v61 = vld [vmem:[#allocation6 + $0xb60] ss:$8 sps:$4 sm:$0xff]  }
 0x8d7   : > { %9571 = vmatpush1.bf16.msra.mxu0 %v14333_v46  ;;  %v14386_v46 = vld [vmem:[#allocation6 + $0xb74] ss:$8 sps:$4 sm:$0xff]  }
 0x8d8   : > { %9572 = vmatprep.subr.bf16.mxu0 %v14338_v44  ;;  %v14384_v44 = vld [vmem:[#allocation6 + $0xb70] ss:$8 sps:$4 sm:$0xff]  }
 0x8db   : > { %9573 = vmatpush1.bf16.msra.mxu0 %v14336_v35  ;;  %v14389_v35 = vld [vmem:[#allocation6 + $0xb84] ss:$8 sps:$4 sm:$0xff]  }
 0x8dc   : > { %10306 = vmatprep.subr.bf16.mxu0 %v14341_v60  ;;  %v14387_v60 = vld [vmem:[#allocation6 + $0xb80] ss:$8 sps:$4 sm:$0xff]  }
 0x8de   : > { %9591 = vmatmul.mubr.bf16.vlgmr.msra.gmra.mrb[20].mxu0 %v8861_v1  ;;  %v14390_v1 = vld [vmem:[#allocation6 + $0xb90] ss:$8 sps:$4 sm:$0xff]  }
 0x8df   : > { %10307 = vmatpush1.bf16.msra.mxu0 %v14339_v0  ;;  %10338 = vmatprep.mubr.bf16.mxu0 %v9723_v49  ;;  %v14362_v49 = vld [vmem:[#allocation6 + $0xaf4] ss:$8 sps:$4 sm:$0xff]  }
 0x8e0   : > { %10308 = vmatprep.subr.bf16.mxu0 %v14344_v31  ;;  %v14392_v0 = vld [vmem:[#allocation6 + $0xb94] ss:$8 sps:$4 sm:$0xff]   ;;  %v14395_v31 = vld [vmem:[#allocation6 + $0xba4] ss:$8 sps:$4 sm:$0xff]  }
 0x8e3   : > { %10309 = vmatpush1.bf16.msra.mxu0 %v14342_v45  ;;  %v14393_v45 = vld [vmem:[#allocation6 + $0xba0] ss:$8 sps:$4 sm:$0xff]  }
 0x8e4   : > { %10310 = vmatprep.subr.bf16.mxu0 %v14347_v19  ;;  %v14398_v19 = vld [vmem:[#allocation6 + $0xbb4] ss:$8 sps:$4 sm:$0xff]  }
 0x8e7   : > { %10311 = vmatpush1.bf16.msra.mxu0 %v14345_v14  ;;  %v14396_v14 = vld [vmem:[#allocation6 + $0xbb0] ss:$8 sps:$4 sm:$0xff]  }
 0x8e8   : > { %10312 = vmatprep.subr.bf16.mxu0 %v14350_v17  ;;  %v14401_v17 = vld [vmem:[#allocation6 + $0xbc4] ss:$8 sps:$4 sm:$0xff]  }
 0x8eb   : > { %10313 = vmatpush1.bf16.msra.mxu0 %v14348_v25  ;;  %v14399_v25 = vld [vmem:[#allocation6 + $0xbc0] ss:$8 sps:$4 sm:$0xff]  }
 0x8ec   : > { %10314 = vmatprep.subr.bf16.mxu0 %v14353_v40  ;;  %v14413_v40 = vld [vmem:[#allocation6 + $0xc04] ss:$8 sps:$4 sm:$0xff]  }
 0x8ef   : > { %10315 = vmatpush1.bf16.msra.mxu0 %v14351_v29  ;;  %v14411_v29 = vld [vmem:[#allocation6 + $0xc00] ss:$8 sps:$4 sm:$0xff]  }
 0x8f0   : > { %10316 = vmatprep.subr.bf16.mxu0 %v14356_v10  ;;  %v14416_v10 = vld [vmem:[#allocation6 + $0xc14] ss:$8 sps:$4 sm:$0xff]  }
 0x8f3   : > { %10317 = vmatpush1.bf16.msra.mxu0 %v14354_v3  ;;  %v14414_v3 = vld [vmem:[#allocation6 + $0xc10] ss:$8 sps:$4 sm:$0xff]  }
 0x8f4   : > { %10318 = vmatprep.subr.bf16.mxu0 %v14359_v26  ;;  %v14419_v26 = vld [vmem:[#allocation6 + $0xc24] ss:$8 sps:$4 sm:$0xff]  }
 0x8f7   : > { %10319 = vmatpush1.bf16.msra.mxu0 %v14357_v36  ;;  %v14417_v36 = vld [vmem:[#allocation6 + $0xc20] ss:$8 sps:$4 sm:$0xff]  }
 0x8f8   : > { %10320 = vmatprep.subr.bf16.mxu0 %v14362_v49  ;;  %v14422_v49 = vld [vmem:[#allocation6 + $0xc34] ss:$8 sps:$4 sm:$0xff]  }
 0x8fb   : > { %10321 = vmatpush1.bf16.msra.mxu0 %v14360_v56  ;;  %v14420_v56 = vld [vmem:[#allocation6 + $0xc30] ss:$8 sps:$4 sm:$0xff]  }
 0x8fc   : > { %10322 = vmatprep.subr.bf16.mxu0 %v14365_v43  ;;  %v14425_v43 = vld [vmem:[#allocation6 + $0xc44] ss:$8 sps:$4 sm:$0xff]  }
 0x8ff   : > { %10323 = vmatpush1.bf16.msra.mxu0 %v14363_v13  ;;  %v14423_v13 = vld [vmem:[#allocation6 + $0xc40] ss:$8 sps:$4 sm:$0xff]  }
 0x900   : > { %10324 = vmatprep.subr.bf16.mxu0 %v14368_v27  ;;  %v14428_v27 = vld [vmem:[#allocation6 + $0xc54] ss:$8 sps:$4 sm:$0xff]  }
 0x903   : > { %10325 = vmatpush1.bf16.msra.mxu0 %v14366_v15  ;;  %v14426_v15 = vld [vmem:[#allocation6 + $0xc50] ss:$8 sps:$4 sm:$0xff]  }
 0x904   : > { %10326 = vmatprep.subr.bf16.mxu0 %v14371_v12  ;;  %v14431_v12 = vld [vmem:[#allocation6 + $0xc64] ss:$8 sps:$4 sm:$0xff]  }
 0x907   : > { %10327 = vmatpush1.bf16.msra.mxu0 %v14369_v63  ;;  %v14429_v63 = vld [vmem:[#allocation6 + $0xc60] ss:$8 sps:$4 sm:$0xff]  }
 0x908   : > { %10328 = vmatprep.subr.bf16.mxu0 %v14374_v37  ;;  %v14434_v37 = vld [vmem:[#allocation6 + $0xc74] ss:$8 sps:$4 sm:$0xff]  }
 0x90b   : > { %10329 = vmatpush1.bf16.msra.mxu0 %v14372_v34  ;;  %v14432_v34 = vld [vmem:[#allocation6 + $0xc70] ss:$8 sps:$4 sm:$0xff]  }
 0x90c   : > { %10330 = vmatprep.subr.bf16.mxu0 %v14377_v21  ;;  %v14437_v21 = vld [vmem:[#allocation6 + $0xc84] ss:$8 sps:$4 sm:$0xff]  }
 0x90f   : > { %10331 = vmatpush1.bf16.msra.mxu0 %v14375_v18  ;;  %v14435_v18 = vld [vmem:[#allocation6 + $0xc80] ss:$8 sps:$4 sm:$0xff]  }
 0x910   : > { %10332 = vmatprep.subr.bf16.mxu0 %v14380_v50  ;;  %v14440_v50 = vld [vmem:[#allocation6 + $0xc94] ss:$8 sps:$4 sm:$0xff]  }
 0x913   : > { %10333 = vmatpush1.bf16.msra.mxu0 %v14378_v11  ;;  %v14438_v11 = vld [vmem:[#allocation6 + $0xc90] ss:$8 sps:$4 sm:$0xff]  }
 0x914   : > { %10334 = vmatprep.subr.bf16.mxu0 %v14383_v48  ;;  %v14443_v48 = vld [vmem:[#allocation6 + $0xca4] ss:$8 sps:$4 sm:$0xff]  }
 0x917   : > { %10335 = vmatpush1.bf16.msra.mxu0 %v14381_v61  ;;  %v14441_v61 = vld [vmem:[#allocation6 + $0xca0] ss:$8 sps:$4 sm:$0xff]  }
 0x918   : > { %10336 = vmatprep.subr.bf16.mxu0 %v14386_v46  ;;  %v14446_v46 = vld [vmem:[#allocation6 + $0xcb4] ss:$8 sps:$4 sm:$0xff]  }
 0x91b   : > { %10337 = vmatpush1.bf16.msra.mxu0 %v14384_v44  ;;  %v14444_v44 = vld [vmem:[#allocation6 + $0xcb0] ss:$8 sps:$4 sm:$0xff]  }
 0x91c   : > { %10349 = vmatprep.subr.bf16.mxu0 %v14389_v35  ;;  %v14449_v35 = vld [vmem:[#allocation6 + $0xcc4] ss:$8 sps:$4 sm:$0xff]  }
 0x91e   : > { %10339 = vmatmul.mubr.bf16.vlgmr.msra.gmra.mrb[20].mxu0 %v9720_v16  ;;  %v14408_v16 = vld [vmem:[#allocation6 + $0xbf0] ss:$8 sps:$4 sm:$0xff]  }
 0x91f   : > { %10350 = vmatpush1.bf16.msra.mxu0 %v14387_v60  ;;  %10381 = vmatprep.mubr.bf16.mxu0 %v9729_v2  ;;  %v14410_v2 = vld [vmem:[#allocation6 + $0xbf4] ss:$8 sps:$4 sm:$0xff]   ;;  %v14447_v60 = vld [vmem:[#allocation6 + $0xcc0] ss:$8 sps:$4 sm:$0xff]  }
 0x920   : > { %10351 = vmatprep.subr.bf16.mxu0 %v14392_v0  ;;  %v14461_v0 = vld [vmem:[#allocation6 + $0xd04] ss:$8 sps:$4 sm:$0xff]  }
 0x923   : > { %10352 = vmatpush1.bf16.msra.mxu0 %v14390_v1  ;;  %v14459_v1 = vld [vmem:[#allocation6 + $0xd00] ss:$8 sps:$4 sm:$0xff]  }
 0x924   : > { %10353 = vmatprep.subr.bf16.mxu0 %v14395_v31  ;;  %v14464_v31 = vld [vmem:[#allocation6 + $0xd14] ss:$8 sps:$4 sm:$0xff]  }
 0x927   : > { %10354 = vmatpush1.bf16.msra.mxu0 %v14393_v45  ;;  %v14462_v45 = vld [vmem:[#allocation6 + $0xd10] ss:$8 sps:$4 sm:$0xff]  }
 0x928   : > { %10355 = vmatprep.subr.bf16.mxu0 %v14398_v19  ;;  %v14467_v19 = vld [vmem:[#allocation6 + $0xd24] ss:$8 sps:$4 sm:$0xff]  }
 0x92b   : > { %10356 = vmatpush1.bf16.msra.mxu0 %v14396_v14  ;;  %v14465_v14 = vld [vmem:[#allocation6 + $0xd20] ss:$8 sps:$4 sm:$0xff]  }
 0x92c   : > { %10357 = vmatprep.subr.bf16.mxu0 %v14401_v17  ;;  %v14470_v17 = vld [vmem:[#allocation6 + $0xd34] ss:$8 sps:$4 sm:$0xff]  }
 0x92f   : > { %10358 = vmatpush1.bf16.msra.mxu0 %v14399_v25  ;;  %v14468_v25 = vld [vmem:[#allocation6 + $0xd30] ss:$8 sps:$4 sm:$0xff]  }
 0x930   : > { %10359 = vmatprep.subr.bf16.mxu0 %v14404_v5  ;;  %v14473_v5 = vld [vmem:[#allocation6 + $0xd44] ss:$8 sps:$4 sm:$0xff]  }
 0x933   : > { %10360 = vmatpush1.bf16.msra.mxu0 %v14402_v33  ;;  %v14471_v33 = vld [vmem:[#allocation6 + $0xd40] ss:$8 sps:$4 sm:$0xff]  }
 0x934   : > { %10361 = vmatprep.subr.bf16.mxu0 %v14407_v24  ;;  %v14476_v24 = vld [vmem:[#allocation6 + $0xd54] ss:$8 sps:$4 sm:$0xff]  }
 0x937   : > { %10362 = vmatpush1.bf16.msra.mxu0 %v14405_v28  ;;  %v14474_v28 = vld [vmem:[#allocation6 + $0xd50] ss:$8 sps:$4 sm:$0xff]  }
 0x938   : > { %10363 = vmatprep.subr.bf16.mxu0 %v14410_v2  ;;  %v14479_v2 = vld [vmem:[#allocation6 + $0xd64] ss:$8 sps:$4 sm:$0xff]  }
 0x93b   : > { %10364 = vmatpush1.bf16.msra.mxu0 %v14408_v16  ;;  %v14477_v16 = vld [vmem:[#allocation6 + $0xd60] ss:$8 sps:$4 sm:$0xff]  }
 0x93c   : > { %10365 = vmatprep.subr.bf16.mxu0 %v14413_v40  ;;  %v14482_v40 = vld [vmem:[#allocation6 + $0xd74] ss:$8 sps:$4 sm:$0xff]  }
 0x93f   : > { %10366 = vmatpush1.bf16.msra.mxu0 %v14411_v29  ;;  %v14480_v29 = vld [vmem:[#allocation6 + $0xd70] ss:$8 sps:$4 sm:$0xff]  }
 0x940   : > { %10367 = vmatprep.subr.bf16.mxu0 %v14416_v10  ;;  %v14485_v10 = vld [vmem:[#allocation6 + $0xd84] ss:$8 sps:$4 sm:$0xff]  }
 0x943   : > { %10368 = vmatpush1.bf16.msra.mxu0 %v14414_v3  ;;  %v14483_v3 = vld [vmem:[#allocation6 + $0xd80] ss:$8 sps:$4 sm:$0xff]  }
 0x944   : > { %10369 = vmatprep.subr.bf16.mxu0 %v14419_v26  ;;  %v14488_v26 = vld [vmem:[#allocation6 + $0xd94] ss:$8 sps:$4 sm:$0xff]  }
 0x947   : > { %10370 = vmatpush1.bf16.msra.mxu0 %v14417_v36  ;;  %v14486_v36 = vld [vmem:[#allocation6 + $0xd90] ss:$8 sps:$4 sm:$0xff]  }
 0x948   : > { %10371 = vmatprep.subr.bf16.mxu0 %v14422_v49  ;;  %v14491_v49 = vld [vmem:[#allocation6 + $0xda4] ss:$8 sps:$4 sm:$0xff]  }
 0x94b   : > { %10372 = vmatpush1.bf16.msra.mxu0 %v14420_v56  ;;  %v14489_v56 = vld [vmem:[#allocation6 + $0xda0] ss:$8 sps:$4 sm:$0xff]  }
 0x94c   : > { %10373 = vmatprep.subr.bf16.mxu0 %v14425_v43  ;;  %v14494_v43 = vld [vmem:[#allocation6 + $0xdb4] ss:$8 sps:$4 sm:$0xff]  }
 0x94f   : > { %10374 = vmatpush1.bf16.msra.mxu0 %v14423_v13  ;;  %v14492_v13 = vld [vmem:[#allocation6 + $0xdb0] ss:$8 sps:$4 sm:$0xff]  }
 0x950   : > { %10375 = vmatprep.subr.bf16.mxu0 %v14428_v27  ;;  %v14497_v27 = vld [vmem:[#allocation6 + $0xdc4] ss:$8 sps:$4 sm:$0xff]  }
 0x953   : > { %10376 = vmatpush1.bf16.msra.mxu0 %v14426_v15  ;;  %v14495_v15 = vld [vmem:[#allocation6 + $0xdc0] ss:$8 sps:$4 sm:$0xff]  }
 0x954   : > { %10377 = vmatprep.subr.bf16.mxu0 %v14431_v12  ;;  %v14500_v12 = vld [vmem:[#allocation6 + $0xdd4] ss:$8 sps:$4 sm:$0xff]  }
 0x957   : > { %10378 = vmatpush1.bf16.msra.mxu0 %v14429_v63  ;;  %v14506_v63 = vld [vmem:[#allocation6 + $0xdf4] ss:$8 sps:$4 sm:$0xff]  }
 0x958   : > { %10379 = vmatprep.subr.bf16.mxu0 %v14434_v37  ;;  %v14504_v37 = vld [vmem:[#allocation6 + $0xdf0] ss:$8 sps:$4 sm:$0xff]  }
 0x95b   : > { %10380 = vmatpush1.bf16.msra.mxu0 %v14432_v34  ;;  %v14509_v34 = vld [vmem:[#allocation6 + $0xe04] ss:$8 sps:$4 sm:$0xff]  }
 0x95c   : > { %10392 = vmatprep.subr.bf16.mxu0 %v14437_v21  ;;  %v14507_v21 = vld [vmem:[#allocation6 + $0xe00] ss:$8 sps:$4 sm:$0xff]  }
 0x95e   : > { %10382 = vmatmul.mubr.bf16.vlgmr.msra.gmra.mrb[20].mxu0 %v9726_v54  ;;  %v14455_v54 = vld [vmem:[#allocation6 + $0xce4] ss:$8 sps:$4 sm:$0xff]  }
 0x95f   : > { %10393 = vmatpush1.bf16.msra.mxu0 %v14435_v18  ;;  %10424 = vmatprep.mubr.bf16.mxu0 %v9735_v38  ;;  %v14456_v38 = vld [vmem:[#allocation6 + $0xcf0] ss:$8 sps:$4 sm:$0xff]   ;;  %v14512_v18 = vld [vmem:[#allocation6 + $0xe14] ss:$8 sps:$4 sm:$0xff]  }
 0x960   : > { %10394 = vmatprep.subr.bf16.mxu0 %v14440_v50  ;;  %v10596_v50 = vrot.slane %v15932_v51, 2  ;;  %v14524_v51 = vld [vmem:[#allocation6 + $0xe54] ss:$8 sps:$4 sm:$0xff]  }
 0x963   : > { %10395 = vmatpush1.bf16.msra.mxu0 %v14438_v11  ;;  %v14510_v11 = vld [vmem:[#allocation6 + $0xe10] ss:$8 sps:$4 sm:$0xff]  }
 0x964   : > { %10396 = vmatprep.subr.bf16.mxu0 %v14443_v48  ;;  %v14515_v48 = vld [vmem:[#allocation6 + $0xe24] ss:$8 sps:$4 sm:$0xff]  }
 0x967   : > { %10397 = vmatpush1.bf16.msra.mxu0 %v14441_v61  ;;  %v14513_v61 = vld [vmem:[#allocation6 + $0xe20] ss:$8 sps:$4 sm:$0xff]  }
 0x968   : > { %10398 = vmatprep.subr.bf16.mxu0 %v14446_v46  ;;  %v14518_v46 = vld [vmem:[#allocation6 + $0xe34] ss:$8 sps:$4 sm:$0xff]  }
 0x96b   : > { %10399 = vmatpush1.bf16.msra.mxu0 %v14444_v44  ;;  %v14516_v44 = vld [vmem:[#allocation6 + $0xe30] ss:$8 sps:$4 sm:$0xff]  }
 0x96c   : > { %10400 = vmatprep.subr.bf16.mxu0 %v14449_v35  ;;  %v14521_v35 = vld [vmem:[#allocation6 + $0xe44] ss:$8 sps:$4 sm:$0xff]  }
 0x96f   : > { %10401 = vmatpush1.bf16.msra.mxu0 %v14447_v60  ;;  %v14519_v60 = vld [vmem:[#allocation6 + $0xe40] ss:$8 sps:$4 sm:$0xff]  }
 0x970   : > { %10402 = vmatprep.subr.bf16.mxu0 %v14452_v41  ;;  %v14530_v41 = vld [vmem:[#allocation6 + $0xe74] ss:$8 sps:$4 sm:$0xff]  }
 0x973   : > { %10403 = vmatpush1.bf16.msra.mxu0 %v14450_v52  ;;  %v14528_v52 = vld [vmem:[#allocation6 + $0xe70] ss:$8 sps:$4 sm:$0xff]  }
 0x974   : > { %10404 = vmatprep.subr.bf16.mxu0 %v14455_v54  ;;  %v14533_v54 = vld [vmem:[#allocation6 + $0xe84] ss:$8 sps:$4 sm:$0xff]  }
 0x977   : > { %10405 = vmatpush1.bf16.msra.mxu0 %v14453_v8  ;;  %v14531_v8 = vld [vmem:[#allocation6 + $0xe80] ss:$8 sps:$4 sm:$0xff]  }
 0x978   : > { %10406 = vmatprep.subr.bf16.mxu0 %v14458_v22  ;;  %v14536_v22 = vld [vmem:[#allocation6 + $0xe94] ss:$8 sps:$4 sm:$0xff]  }
 0x97b   : > { %10407 = vmatpush1.bf16.msra.mxu0 %v14456_v38  ;;  %v14534_v38 = vld [vmem:[#allocation6 + $0xe90] ss:$8 sps:$4 sm:$0xff]  }
 0x97c   : > { %10408 = vmatprep.subr.bf16.mxu0 %v14461_v0  ;;  %v14539_v0 = vld [vmem:[#allocation6 + $0xea4] ss:$8 sps:$4 sm:$0xff]  }
 0x97f   : > { %10409 = vmatpush1.bf16.msra.mxu0 %v14459_v1  ;;  %v14537_v1 = vld [vmem:[#allocation6 + $0xea0] ss:$8 sps:$4 sm:$0xff]  }
 0x980   : > { %10410 = vmatprep.subr.bf16.mxu0 %v14464_v31  ;;  %v14542_v31 = vld [vmem:[#allocation6 + $0xeb4] ss:$8 sps:$4 sm:$0xff]  }
 0x983   : > { %10411 = vmatpush1.bf16.msra.mxu0 %v14462_v45  ;;  %v14540_v45 = vld [vmem:[#allocation6 + $0xeb0] ss:$8 sps:$4 sm:$0xff]  }
 0x984   : > { %10412 = vmatprep.subr.bf16.mxu0 %v14467_v19  ;;  %v14545_v19 = vld [vmem:[#allocation6 + $0xec4] ss:$8 sps:$4 sm:$0xff]  }
 0x987   : > { %10413 = vmatpush1.bf16.msra.mxu0 %v14465_v14  ;;  %v14543_v14 = vld [vmem:[#allocation6 + $0xec0] ss:$8 sps:$4 sm:$0xff]  }
 0x988   : > { %10414 = vmatprep.subr.bf16.mxu0 %v14470_v17  ;;  %v14548_v17 = vld [vmem:[#allocation6 + $0xed4] ss:$8 sps:$4 sm:$0xff]  }
 0x98b   : > { %10415 = vmatpush1.bf16.msra.mxu0 %v14468_v25  ;;  %v14546_v25 = vld [vmem:[#allocation6 + $0xed0] ss:$8 sps:$4 sm:$0xff]  }
 0x98c   : > { %10416 = vmatprep.subr.bf16.mxu0 %v14473_v5  ;;  %v14551_v5 = vld [vmem:[#allocation6 + $0xee4] ss:$8 sps:$4 sm:$0xff]  }
 0x98f   : > { %10417 = vmatpush1.bf16.msra.mxu0 %v14471_v33  ;;  %v14549_v33 = vld [vmem:[#allocation6 + $0xee0] ss:$8 sps:$4 sm:$0xff]  }
 0x990   : > { %10418 = vmatprep.subr.bf16.mxu0 %v14476_v24  ;;  %v14554_v24 = vld [vmem:[#allocation6 + $0xef4] ss:$8 sps:$4 sm:$0xff]  }
 0x993   : > { %10419 = vmatpush1.bf16.msra.mxu0 %v14474_v28  ;;  %v14552_v28 = vld [vmem:[#allocation6 + $0xef0] ss:$8 sps:$4 sm:$0xff]  }
 0x994   : > { %10420 = vmatprep.subr.bf16.mxu0 %v14479_v2  ;;  %v14557_v2 = vld [vmem:[#allocation6 + $0xf04] ss:$8 sps:$4 sm:$0xff]  }
 0x997   : > { %10421 = vmatpush1.bf16.msra.mxu0 %v14477_v16  ;;  %v14555_v16 = vld [vmem:[#allocation6 + $0xf00] ss:$8 sps:$4 sm:$0xff]  }
 0x998   : > { %10422 = vmatprep.subr.bf16.mxu0 %v14482_v40  ;;  %v10595_v40 = vrot.slane %v15902_v62, 2  ;;  %v14567_v62 = vld [vmem:[#allocation6 + $0xf40] ss:$8 sps:$4 sm:$0xff]  }
 0x99b   : > { %10423 = vmatpush1.bf16.msra.mxu0 %v14480_v29  ;;  %v14560_v29 = vld [vmem:[#allocation6 + $0xf14] ss:$8 sps:$4 sm:$0xff]  }
 0x99c   : > { %10435 = vmatprep.subr.bf16.mxu0 %v14485_v10  ;;  %v10598_v10 = vrot.slane %v15846_v53, 2  ;;  %v14570_v53 = vld [vmem:[#allocation6 + $0xf50] ss:$8 sps:$4 sm:$0xff]  }
 0x99e   : > { %10425 = vmatmul.mubr.bf16.vlgmr.msra.gmra.mrb[20].mxu0 %v9732_v30  ;;  %v14501_v30 = vld [vmem:[#allocation6 + $0xde0] ss:$8 sps:$4 sm:$0xff]  }
 0x99f   : > { %10436 = vmatpush1.bf16.msra.mxu0 %v14483_v3  ;;  %10467 = vmatprep.mubr.bf16.mxu0 %v16106_v7  ;;  %v14558_v3 = vld [vmem:[#allocation6 + $0xf10] ss:$8 sps:$4 sm:$0xff]  }
 0x9a0   : > { %10437 = vmatprep.subr.bf16.mxu0 %v14488_v26  ;;  %v14563_v26 = vld [vmem:[#allocation6 + $0xf24] ss:$8 sps:$4 sm:$0xff]  }
 0x9a3   : > { %10438 = vmatpush1.bf16.msra.mxu0 %v14486_v36  ;;  %v14561_v36 = vld [vmem:[#allocation6 + $0xf20] ss:$8 sps:$4 sm:$0xff]  }
 0x9a4   : > { %10439 = vmatprep.subr.bf16.mxu0 %v14491_v49  ;;  %v14566_v49 = vld [vmem:[#allocation6 + $0xf34] ss:$8 sps:$4 sm:$0xff]  }
 0x9a7   : > { %10440 = vmatpush1.bf16.msra.mxu0 %v14489_v56  ;;  %v14564_v56 = vld [vmem:[#allocation6 + $0xf30] ss:$8 sps:$4 sm:$0xff]  }
 0x9a8   : > { %10441 = vmatprep.subr.bf16.mxu0 %v14494_v43  ;;  %v14569_v43 = vld [vmem:[#allocation6 + $0xf44] ss:$8 sps:$4 sm:$0xff]  }
 0x9ab   : > { %10442 = vmatpush1.bf16.msra.mxu0 %v14492_v13  ;;  %v14572_v13 = vld [vmem:[#allocation6 + $0xf54] ss:$8 sps:$4 sm:$0xff]  }
 0x9ac   : > { %10443 = vmatprep.subr.bf16.mxu0 %v14497_v27  ;;  %v14575_v27 = vld [vmem:[#allocation6 + $0xf64] ss:$8 sps:$4 sm:$0xff]  }
 0x9af   : > { %10444 = vmatpush1.bf16.msra.mxu0 %v14495_v15  ;;  %v14573_v15 = vld [vmem:[#allocation6 + $0xf60] ss:$8 sps:$4 sm:$0xff]  }
 0x9b0   : > { %10445 = vmatprep.subr.bf16.mxu0 %v14500_v12  ;;  %v14578_v12 = vld [vmem:[#allocation6 + $0xf74] ss:$8 sps:$4 sm:$0xff]  }
 0x9b3   : > { %10446 = vmatpush1.bf16.msra.mxu0 %v14498_v20  ;;  %v14576_v20 = vld [vmem:[#allocation6 + $0xf70] ss:$8 sps:$4 sm:$0xff]  }
 0x9b4   : > { %10447 = vmatprep.subr.bf16.mxu0 %v14503_v4  ;;  %v14581_v4 = vld [vmem:[#allocation6 + $0xf84] ss:$8 sps:$4 sm:$0xff]  }
 0x9b7   : > { %10448 = vmatpush1.bf16.msra.mxu0 %v14501_v30  ;;  %v14579_v30 = vld [vmem:[#allocation6 + $0xf80] ss:$8 sps:$4 sm:$0xff]  }
 0x9b8   : > { %10449 = vmatprep.subr.bf16.mxu0 %v14506_v63  ;;  %v14584_v63 = vld [vmem:[#allocation6 + $0xf94] ss:$8 sps:$4 sm:$0xff]  }
 0x9bb   : > { %10450 = vmatpush1.bf16.msra.mxu0 %v14504_v37  ;;  %v14582_v37 = vld [vmem:[#allocation6 + $0xf90] ss:$8 sps:$4 sm:$0xff]  }
 0x9bc   : > { %11169 = vmatprep.subr.bf16.mxu0 %v14509_v34  ;;  %v14587_v34 = vld [vmem:[#allocation6 + $0xfa4] ss:$8 sps:$4 sm:$0xff]  }
 0x9be   : > { %10468 = vmatmul.mubr.bf16.vlgmr.msra.gmra.mrb[20].mxu0 %v9738_v42  ;;  %v14525_v42 = vld [vmem:[#allocation6 + $0xe60] ss:$8 sps:$4 sm:$0xff]  }
 0x9bf   : > { %11170 = vmatpush1.bf16.msra.mxu0 %v14507_v21  ;;  %11201 = vmatprep.mubr.bf16.mxu0 %v10596_v50  ;;  %v14585_v21 = vld [vmem:[#allocation6 + $0xfa0] ss:$8 sps:$4 sm:$0xff]   ;;  %v14588_v50 = vld [vmem:[#allocation6 + $0xfb0] ss:$8 sps:$4 sm:$0xff]  }
 0x9c0   : > { %11171 = vmatprep.subr.bf16.mxu0 %v14512_v18  ;;  %v14590_v18 = vld [vmem:[#allocation6 + $0xfb4] ss:$8 sps:$4 sm:$0xff]  }
 0x9c3   : > { %11172 = vmatpush1.bf16.msra.mxu0 %v14510_v11  ;;  %v14593_v11 = vld [vmem:[#allocation6 + $0xfc4] ss:$8 sps:$4 sm:$0xff]  }
 0x9c4   : > { %11173 = vmatprep.subr.bf16.mxu0 %v14515_v48  ;;  %v14591_v48 = vld [vmem:[#allocation6 + $0xfc0] ss:$8 sps:$4 sm:$0xff]  }
 0x9c7   : > { %11174 = vmatpush1.bf16.msra.mxu0 %v14513_v61  ;;  %v14596_v61 = vld [vmem:[#allocation6 + $0xfd4] ss:$8 sps:$4 sm:$0xff]  }
 0x9c8   : > { %11175 = vmatprep.subr.bf16.mxu0 %v14518_v46  ;;  %v14594_v46 = vld [vmem:[#allocation6 + $0xfd0] ss:$8 sps:$4 sm:$0xff]  }
 0x9cb   : > { %11176 = vmatpush1.bf16.msra.mxu0 %v14516_v44  ;;  %v14599_v44 = vld [vmem:[#allocation6 + $0xfe4] ss:$8 sps:$4 sm:$0xff]  }
 0x9cc   : > { %11177 = vmatprep.subr.bf16.mxu0 %v14521_v35  ;;  %v14597_v35 = vld [vmem:[#allocation6 + $0xfe0] ss:$8 sps:$4 sm:$0xff]  }
 0x9cf   : > { %11178 = vmatpush1.bf16.msra.mxu0 %v14519_v60  ;;  %v14602_v60 = vld [vmem:[#allocation6 + $0xff4] ss:$8 sps:$4 sm:$0xff]  }
 0x9d0   : > { %11179 = vmatprep.subr.bf16.mxu0 %v14524_v51  ;;  %v14600_v51 = vld [vmem:[#allocation6 + $0xff0] ss:$8 sps:$4 sm:$0xff]  }
 0x9d3   : > { %11180 = vmatpush1.bf16.msra.mxu0 %v14522_v58  ;;  %v14605_v58 = vld [vmem:[#allocation6 + $0x1004] ss:$8 sps:$4 sm:$0xff]  }
 0x9d4   : > { %11181 = vmatprep.subr.bf16.mxu0 %v14527_v39  ;;  %v14603_v39 = vld [vmem:[#allocation6 + $0x1000] ss:$8 sps:$4 sm:$0xff]  }
 0x9d7   : > { %11182 = vmatpush1.bf16.msra.mxu0 %v14525_v42  ;;  %v10597_v42 = vrot.slane %v15934_v59, 2  ;;  %v14615_v59 = vld [vmem:[#allocation6 + $0x1040] ss:$8 sps:$4 sm:$0xff]  }
 0x9d8   : > { %11183 = vmatprep.subr.bf16.mxu0 %v14530_v41  ;;  %v14608_v41 = vld [vmem:[#allocation6 + $0x1014] ss:$8 sps:$4 sm:$0xff]  }
 0x9db   : > { %11184 = vmatpush1.bf16.msra.mxu0 %v14528_v52  ;;  %v10600_v52 = vrot.slane %v15980_v47, 2  ;;  %v14618_v47 = vld [vmem:[#allocation6 + $0x1050] ss:$8 sps:$4 sm:$0xff]  }
 0x9dc   : > { %11185 = vmatprep.subr.bf16.mxu0 %v14533_v54  ;;  %v14606_v54 = vld [vmem:[#allocation6 + $0x1010] ss:$8 sps:$4 sm:$0xff]  }
 0x9df   : > { %11186 = vmatpush1.bf16.msra.mxu0 %v14531_v8  ;;  %v14611_v8 = vld [vmem:[#allocation6 + $0x1024] ss:$8 sps:$4 sm:$0xff]  }
 0x9e0   : > { %11187 = vmatprep.subr.bf16.mxu0 %v14536_v22  ;;  %v14609_v22 = vld [vmem:[#allocation6 + $0x1020] ss:$8 sps:$4 sm:$0xff]  }
 0x9e3   : > { %11188 = vmatpush1.bf16.msra.mxu0 %v14534_v38  ;;  %v14614_v38 = vld [vmem:[#allocation6 + $0x1034] ss:$8 sps:$4 sm:$0xff]  }
 0x9e4   : > { %11189 = vmatprep.subr.bf16.mxu0 %v14539_v0  ;;  %v14612_v0 = vld [vmem:[#allocation6 + $0x1030] ss:$8 sps:$4 sm:$0xff]  }
 0x9e7   : > { %11190 = vmatpush1.bf16.msra.mxu0 %v14537_v1  ;;  %v14617_v1 = vld [vmem:[#allocation6 + $0x1044] ss:$8 sps:$4 sm:$0xff]  }
 0x9e8   : > { %11191 = vmatprep.subr.bf16.mxu0 %v14542_v31  ;;  %v14620_v31 = vld [vmem:[#allocation6 + $0x1054] ss:$8 sps:$4 sm:$0xff]  }
 0x9eb   : > { %11192 = vmatpush1.bf16.msra.mxu0 %v14540_v45  ;;  %v14623_v45 = vld [vmem:[#allocation6 + $0x1064] ss:$8 sps:$4 sm:$0xff]  }
 0x9ec   : > { %11193 = vmatprep.subr.bf16.mxu0 %v14545_v19  ;;  %v14621_v19 = vld [vmem:[#allocation6 + $0x1060] ss:$8 sps:$4 sm:$0xff]  }
 0x9ef   : > { %11194 = vmatpush1.bf16.msra.mxu0 %v14543_v14  ;;  %v14626_v14 = vld [vmem:[#allocation6 + $0x1074] ss:$8 sps:$4 sm:$0xff]  }
 0x9f0   : > { %11195 = vmatprep.subr.bf16.mxu0 %v14548_v17  ;;  %v14624_v17 = vld [vmem:[#allocation6 + $0x1070] ss:$8 sps:$4 sm:$0xff]  }
 0x9f3   : > { %11196 = vmatpush1.bf16.msra.mxu0 %v14546_v25  ;;  %v14629_v25 = vld [vmem:[#allocation6 + $0x1084] ss:$8 sps:$4 sm:$0xff]  }
 0x9f4   : > { %11197 = vmatprep.subr.bf16.mxu0 %v14551_v5  ;;  %v14627_v5 = vld [vmem:[#allocation6 + $0x1080] ss:$8 sps:$4 sm:$0xff]  }
 0x9f7   : > { %11198 = vmatpush1.bf16.msra.mxu0 %v14549_v33  ;;  %v14632_v33 = vld [vmem:[#allocation6 + $0x1094] ss:$8 sps:$4 sm:$0xff]  }
 0x9f8   : > { %11199 = vmatprep.subr.bf16.mxu0 %v14554_v24  ;;  %v14630_v24 = vld [vmem:[#allocation6 + $0x1090] ss:$8 sps:$4 sm:$0xff]  }
 0x9fb   : > { %11200 = vmatpush1.bf16.msra.mxu0 %v14552_v28  ;;  %v14635_v28 = vld [vmem:[#allocation6 + $0x10a4] ss:$8 sps:$4 sm:$0xff]  }
 0x9fc   : > { %11212 = vmatprep.subr.bf16.mxu0 %v14557_v2  ;;  %v14633_v2 = vld [vmem:[#allocation6 + $0x10a0] ss:$8 sps:$4 sm:$0xff]  }
 0x9fe   : > { %11202 = vmatmul.mubr.bf16.vlgmr.msra.gmra.mrb[20].mxu0 %v10595_v40  ;;  %v14636_v40 = vld [vmem:[#allocation6 + $0x10b0] ss:$8 sps:$4 sm:$0xff]  }
 0x9ff   : > { %11213 = vmatpush1.bf16.msra.mxu0 %v14555_v16  ;;  %11244 = vmatprep.mubr.bf16.mxu0 %v10598_v10  ;;  %v14638_v16 = vld [vmem:[#allocation6 + $0x10b4] ss:$8 sps:$4 sm:$0xff]   ;;  %v14639_v10 = vld [vmem:[#allocation6 + $0x10c0] ss:$8 sps:$4 sm:$0xff]  }
 0xa00   : > { %11214 = vmatprep.subr.bf16.mxu0 %v14560_v29  ;;  %v14641_v29 = vld [vmem:[#allocation6 + $0x10c4] ss:$8 sps:$4 sm:$0xff]  }
 0xa03   : > { %11215 = vmatpush1.bf16.msra.mxu0 %v14558_v3  ;;  %v14644_v3 = vld [vmem:[#allocation6 + $0x10d4] ss:$8 sps:$4 sm:$0xff]  }
 0xa04   : > { %11216 = vmatprep.subr.bf16.mxu0 %v14563_v26  ;;  %v14642_v26 = vld [vmem:[#allocation6 + $0x10d0] ss:$8 sps:$4 sm:$0xff]  }
 0xa07   : > { %11217 = vmatpush1.bf16.msra.mxu0 %v14561_v36  ;;  %v14647_v36 = vld [vmem:[#allocation6 + $0x10e4] ss:$8 sps:$4 sm:$0xff]  }
 0xa08   : > { %11218 = vmatprep.subr.bf16.mxu0 %v14566_v49  ;;  %v14645_v49 = vld [vmem:[#allocation6 + $0x10e0] ss:$8 sps:$4 sm:$0xff]  }
 0xa0b   : > { %11219 = vmatpush1.bf16.msra.mxu0 %v14564_v56  ;;  %v14650_v56 = vld [vmem:[#allocation6 + $0x10f4] ss:$8 sps:$4 sm:$0xff]  }
 0xa0c   : > { %11220 = vmatprep.subr.bf16.mxu0 %v14569_v43  ;;  %v14648_v43 = vld [vmem:[#allocation6 + $0x10f0] ss:$8 sps:$4 sm:$0xff]  }
 0xa0f   : > { %11221 = vmatpush1.bf16.msra.mxu0 %v14567_v62  ;;  %v14653_v62 = vld [vmem:[#allocation6 + $0x1104] ss:$8 sps:$4 sm:$0xff]  }
 0xa10   : > { %11222 = vmatprep.subr.bf16.mxu0 %v14572_v13  ;;  %v14651_v13 = vld [vmem:[#allocation6 + $0x1100] ss:$8 sps:$4 sm:$0xff]  }
 0xa13   : > { %11223 = vmatpush1.bf16.msra.mxu0 %v14570_v53  ;;  %v10599_v53 = vrot.slane %v15874_v32, 2  ;;  %v14668_v32 = vld [vmem:[#allocation6 + $0x1154] ss:$8 sps:$4 sm:$0xff]  }
 0xa14   : > { %11224 = vmatprep.subr.bf16.mxu0 %v14575_v27  ;;  %v14656_v27 = vld [vmem:[#allocation6 + $0x1114] ss:$8 sps:$4 sm:$0xff]  }
 0xa17   : > { %11225 = vmatpush1.bf16.msra.mxu0 %v14573_v15  ;;  %v14654_v15 = vld [vmem:[#allocation6 + $0x1110] ss:$8 sps:$4 sm:$0xff]  }
 0xa18   : > { %11226 = vmatprep.subr.bf16.mxu0 %v14578_v12  ;;  %v14659_v12 = vld [vmem:[#allocation6 + $0x1124] ss:$8 sps:$4 sm:$0xff]  }
 0xa1b   : > { %11227 = vmatpush1.bf16.msra.mxu0 %v14576_v20  ;;  %v14657_v20 = vld [vmem:[#allocation6 + $0x1120] ss:$8 sps:$4 sm:$0xff]  }
 0xa1c   : > { %11228 = vmatprep.subr.bf16.mxu0 %v14581_v4  ;;  %v14662_v4 = vld [vmem:[#allocation6 + $0x1134] ss:$8 sps:$4 sm:$0xff]  }
 0xa1f   : > { %11229 = vmatpush1.bf16.msra.mxu0 %v14579_v30  ;;  %v14660_v30 = vld [vmem:[#allocation6 + $0x1130] ss:$8 sps:$4 sm:$0xff]  }
 0xa20   : > { %11230 = vmatprep.subr.bf16.mxu0 %v14584_v63  ;;  %v14665_v63 = vld [vmem:[#allocation6 + $0x1144] ss:$8 sps:$4 sm:$0xff]  }
 0xa23   : > { %11231 = vmatpush1.bf16.msra.mxu0 %v14582_v37  ;;  %v14663_v37 = vld [vmem:[#allocation6 + $0x1140] ss:$8 sps:$4 sm:$0xff]  }
 0xa24   : > { %11232 = vmatprep.subr.bf16.mxu0 %v14587_v34  ;;  %v14666_v34 = vld [vmem:[#allocation6 + $0x1150] ss:$8 sps:$4 sm:$0xff]  }
 0xa27   : > { %11233 = vmatpush1.bf16.msra.mxu0 %v14585_v21  ;;  %v14671_v21 = vld [vmem:[#allocation6 + $0x1164] ss:$8 sps:$4 sm:$0xff]  }
 0xa28   : > { %11234 = vmatprep.subr.bf16.mxu0 %v14590_v18  ;;  %v14674_v18 = vld [vmem:[#allocation6 + $0x1174] ss:$8 sps:$4 sm:$0xff]  }
 0xa2b   : > { %11235 = vmatpush1.bf16.msra.mxu0 %v14588_v50  ;;  %v14672_v50 = vld [vmem:[#allocation6 + $0x1170] ss:$8 sps:$4 sm:$0xff]  }
 0xa2c   : > { %11236 = vmatprep.subr.bf16.mxu0 %v14593_v11  ;;  %v10601_v11 = vrot.slane %v15982_v9, 2  ;;  %v12626_v9 = vld [vmem:[#allocation7] ss:$0 sm:$0xff] }
 0xa2f   : > { %11237 = vmatpush1.bf16.msra.mxu0 %v14591_v48 }
 0xa30   : > { %11238 = vmatprep.subr.bf16.mxu0 %v14596_v61 }
 0xa33   : > { %11239 = vmatpush1.bf16.msra.mxu0 %v14594_v46 }
 0xa34   : > { %11240 = vmatprep.subr.bf16.mxu0 %v14599_v44 }
 0xa37   : > { %11241 = vmatpush1.bf16.msra.mxu0 %v14597_v35 }
 0xa38   : > { %11242 = vmatprep.subr.bf16.mxu0 %v14602_v60 }
 0xa3b   : > { %11243 = vmatpush1.bf16.msra.mxu0 %v14600_v51 }
 0xa3c   : > { %11255 = vmatprep.subr.bf16.mxu0 %v14605_v58 }
 0xa3e   : > { %11245 = vmatmul.mubr.bf16.vlgmr.msra.gmra.mrb[20].mxu0 %v10597_v42 }
 0xa3f   : > { %11256 = vmatpush1.bf16.msra.mxu0 %v14603_v39  ;;  %11287 = vmatprep.mubr.bf16.mxu0 %v10600_v52 }
 0xa40   : > { %11257 = vmatprep.subr.bf16.mxu0 %v14608_v41 }
 0xa43   : > { %11258 = vmatpush1.bf16.msra.mxu0 %v14606_v54 }
 0xa44   : > { %11259 = vmatprep.subr.bf16.mxu0 %v14611_v8 }
 0xa47   : > { %11260 = vmatpush1.bf16.msra.mxu0 %v14609_v22 }
 0xa48   : > { %11261 = vmatprep.subr.bf16.mxu0 %v14614_v38 }
 0xa4b   : > { %11262 = vmatpush1.bf16.msra.mxu0 %v14612_v0 }
 0xa4c   : > { %11263 = vmatprep.subr.bf16.mxu0 %v14617_v1 }
 0xa4f   : > { %11264 = vmatpush1.bf16.msra.mxu0 %v14615_v59 }
 0xa50   : > { %11265 = vmatprep.subr.bf16.mxu0 %v14620_v31 }
 0xa53   : > { %11266 = vmatpush1.bf16.msra.mxu0 %v14618_v47 }
 0xa54   : > { %11267 = vmatprep.subr.bf16.mxu0 %v14623_v45 }
 0xa57   : > { %11268 = vmatpush1.bf16.msra.mxu0 %v14621_v19 }
 0xa58   : > { %11269 = vmatprep.subr.bf16.mxu0 %v14626_v14 }
 0xa5b   : > { %11270 = vmatpush1.bf16.msra.mxu0 %v14624_v17 }
 0xa5c   : > { %11271 = vmatprep.subr.bf16.mxu0 %v14629_v25 }
 0xa5f   : > { %11272 = vmatpush1.bf16.msra.mxu0 %v14627_v5 }
 0xa60   : > { %11273 = vmatprep.subr.bf16.mxu0 %v14632_v33 }
 0xa63   : > { %11274 = vmatpush1.bf16.msra.mxu0 %v14630_v24 }
 0xa64   : > { %11275 = vmatprep.subr.bf16.mxu0 %v14635_v28 }
 0xa67   : > { %11276 = vmatpush1.bf16.msra.mxu0 %v14633_v2 }
 0xa68   : > { %11277 = vmatprep.subr.bf16.mxu0 %v14638_v16 }
 0xa6b   : > { %11278 = vmatpush1.bf16.msra.mxu0 %v14636_v40 }
 0xa6c   : > { %11279 = vmatprep.subr.bf16.mxu0 %v14641_v29 }
 0xa6f   : > { %11280 = vmatpush1.bf16.msra.mxu0 %v14639_v10 }
 0xa70   : > { %11281 = vmatprep.subr.bf16.mxu0 %v14644_v3 }
 0xa73   : > { %11282 = vmatpush1.bf16.msra.mxu0 %v14642_v26 }
 0xa74   : > { %11283 = vmatprep.subr.bf16.mxu0 %v14647_v36 }
 0xa77   : > { %11284 = vmatpush1.bf16.msra.mxu0 %v14645_v49 }
 0xa78   : > { %11285 = vmatprep.subr.bf16.mxu0 %v14650_v56 }
 0xa7b   : > { %11286 = vmatpush1.bf16.msra.mxu0 %v14648_v43 }
 0xa7c   : > { %11298 = vmatprep.subr.bf16.mxu0 %v14653_v62 }
 0xa7e   : > { %11288 = vmatmul.mubr.bf16.vlgmr.msra.gmra.mrb[20].mxu0 %v10599_v53 }
 0xa7f   : > { %11299 = vmatpush1.bf16.msra.mxu0 %v14651_v13  ;;  %11330 = vmatprep.mubr.bf16.mxu0 %v16106_v7  ;;  %v14669_v7 = vld [vmem:[#allocation6 + $0x1160] ss:$8 sps:$4 sm:$0xff]  }
 0xa80   : > { %11300 = vmatprep.subr.bf16.mxu0 %v14656_v27 }
 0xa83   : > { %11301 = vmatpush1.bf16.msra.mxu0 %v14654_v15 }
 0xa84   : > { %11302 = vmatprep.subr.bf16.mxu0 %v14659_v12 }
 0xa87   : > { %11303 = vmatpush1.bf16.msra.mxu0 %v14657_v20 }
 0xa88   : > { %11304 = vmatprep.subr.bf16.mxu0 %v14662_v4 }
 0xa8b   : > { %11305 = vmatpush1.bf16.msra.mxu0 %v14660_v30 }
 0xa8c   : > { %11306 = vmatprep.subr.bf16.mxu0 %v14665_v63 }
 0xa8f   : > { %11307 = vmatpush1.bf16.msra.mxu0 %v14663_v37 }
 0xa90   : > { %11308 = vmatprep.subr.bf16.mxu0 %v14668_v32 }
 0xa93   : > { %11309 = vmatpush1.bf16.msra.mxu0 %v14666_v34 }
 0xa94   : > { %11310 = vmatprep.subr.bf16.mxu0 %v14671_v21 }
 0xa97   : > { %11311 = vmatpush1.bf16.msra.mxu0 %v14669_v7 }
 0xa98   : > { %11312 = vmatprep.subr.bf16.mxu0 %v14674_v18 }
 0xa9b   : > { %11313 = vmatpush1.bf16.msra.mxu0 %v14672_v50 }
 0xa9e   : > { %11331 = vmatmul.mubr.bf16.vlgmr.msra.gmra.mrb[20].mxu0 %v10601_v11 }
 0xb71   : > { %v11332_v48 = vpop.f32.mrb[20].mxu0 }
 0xb72   : > { %v12639_v61 = vadd.f32 %v11332_v48, %v16027_v6  ;;  %v11334_v46 = vpop.f32.mrb[21].mxu0 }
 0xb73   : > { %v12640_v44 = vadd.f32 %v11334_v46, %v16029_v57  ;;  %v11336_v35 = vpop.f32.mrb[22].mxu0 }
 0xb74   : > { %v12641_v60 = vadd.f32 %v11336_v35, %v16031_v23  ;;  %v11338_v51 = vpop.f32.mrb[23].mxu0 }
 0xb75   : > { %v11345_v58 = vmax.f32 %v12639_v61, %v12640_v44  ;;  %v12642_v39 = vadd.f32 %v11338_v51, %v16033_v55  ;;  %v11380_v55 = vld [vmem:[%s279_s17 + $0x4] sm:$0x1] }
 0xb77   : > { %v11346_v42 = vmax.f32 %v12641_v60, %v12642_v39  ;;  %v11350_v41 = vrot.slane %v11345_v58, 1 }
 0xb79   : > { %v11351_v52 = vrot.slane %v11346_v42, 1 }
 0xb7b   : > { %v11352_v54 = vsel %vm11349_vm0, %v11350_v41, %v11351_v52  ;;  %v11356_v8 = vmax.f32 %v11346_v42, %v11351_v52 }
 0xb7c   : > { %v11355_v22 = vmax.f32 %v11345_v58, %v11352_v54 }
 0xb7d   : > { %v11365_v6 = vadd.f32 %v12626_v9, %v11356_v8 }
 0xb7e   : > { %v11364_v57 = vadd.f32 %v12626_v9, %v11355_v22 }
 0xb7f   : > { %v11367_v23 = vmax.f32 %v11365_v6, 0.0 }
 0xb80   : > { %v11366_v38 = vmax.f32 %v11364_v57, 0.0 }
 0xb81   : > { %v12634_v0 = vpack.c.bf16 %v11367_v23, %v11367_v23 }
 0xb82   : > { %v12633_v1 = vpack.c.bf16 %v11366_v38, %v11366_v38 }
 0xb83   : > { %v11381_v59 = vsel %vm11379_vm3, %v12634_v0, %v11380_v55 }
 0xb84   : > { %11376 = vst [vmem:[%s279_s17] sm:$0xf] %v12633_v1  ;;  %11382 = vst [vmem:[%s279_s17 + $0x4] sm:$0x1] %v11381_v59 }
 0xb85 PF: > { %s18_s18 = sadd.s32 1, %s15368_s18  }
 0xb86   : > { %p15_p11 = scmp.ge.s32.totalorder %s18_s18, 4  }
 0xb88   :  { %17 = sbr.rel (!%p15_p11) target bundleno = 3 (0x3), region = 96 }
 0xb8f   :  { %11404 = vsyncpa [#allocation3], 1 }
 0xb90   :  { %11406 = vsyncpa [#allocation3 + $0x1], 1 }
 0xb91   :  { %11407 = vsyncpa [#allocation5], 1 }
 0xb92   :  { %11408 = vsyncpa [#allocation8], 1 }

</bundles_post_ra>
